<compile_context>
chip_gen: v7x
topology: tpu7x:2x2x1
jax: 0.10.0
libtpu: 0.0.40
codegen_flags: <defaults>
</compile_context>

<pallas_src>
import jax
import jax.numpy as jnp
from jax import lax
from jax.experimental import pallas as pl
from jax.experimental.pallas import tpu as pltpu

# ---- module constants (from the PyTorch __init__) --------------------------------
INPUT = 64       # LSTM input_size / conv1 in-channels
HID = 32         # LSTM hidden_size
LAYERS = 3       # LSTM num_layers
KSZ = 8          # Conv1d kernel size
C_MID = 8        # Conv1d(64 -> 8) mid channels
EPS = 1e-5       # BatchNorm eps
GB = 2 * HID     # 64: width of one packed gate block  [fwd(32) | bwd(32)]
HH = 2 * HID     # 64: width of the packed hidden state [h_f | h_b]

# Layers > 0 consume concat(fwd, bwd) = 2*HID features; the packed weights below rely
# on this equalling the model input width.
assert INPUT == 2 * HID


# ================================ fused kernel ====================================
def _fused_kernel(xaug_ref, xfcn_ref, w_ih_ref, w_hh_ref, b_ref,
                  w1_ref, b1_ref, g1_ref, be1_ref,
                  w2_ref, b2_ref, g2_ref, be2_ref,
                  out_ref,
                  xproj_buf, hcat_buf):
    # xaug_ref : (T*BP, 128) row t*BP+b = [x(t,b) | x(T-1-t,b)]  (batch zero-padded to BP)
    # xfcn_ref : (T*B, 64)   un-padded time-major input (row = t*B + b) for the FCN
    # w_ih_ref : (LAYERS, 128, 256) packed input->gate weights (x @ W convention)
    # w_hh_ref : (LAYERS, 64, 256)  packed block-diagonal recurrent weights
    # b_ref    : (LAYERS, 1, 256)   packed b_ih + b_hh, both directions
    # w1_ref   : (KSZ, 64, 8), w2_ref: (KSZ, 8, 64) per-tap conv weights (x @ W layout)
    # out_ref  : (B, 128)   cols 0:64 = LSTM last timestep, cols 64:128 = FCN branch
    # Gate column blocks (64 lanes = [fwd|bwd] each): [ f | i | o | g ].
    B = out_ref.shape[0]
    T = xfcn_ref.shape[0] // B
    BP = xaug_ref.shape[0] // T

    # ----------------- 3-layer bidirectional LSTM (fused fwd/bwd chain) -----------------
    # NOTE: the v7x-only alternative of running one direction per TensorCore (core_map +
    # per-layer barrier) is mutually exclusive with fusing both directions into one
    # per-step matmul/sigmoid; the fusion is the lower-risk, all-generation win chosen here.
    for layer in range(LAYERS):
        src = xaug_ref[...] if layer == 0 else hcat_buf[...]
        # Hoisted input projection for every timestep, both directions, all gates:
        # one (T*BP, 128) @ (128, 256) matmul; the bwd half of each row is already the
        # time-reversed projection, so the per-step add is a single aligned (BP,256) load.
        xproj_buf[...] = (jnp.dot(src, w_ih_ref[layer],
                                  preferred_element_type=jnp.float32)
                          + b_ref[layer])
        w_hh = w_hh_ref[layer]                              # (64, 256) block-diagonal

        def step(t, carry, w_hh=w_hh):
            h, c = carry                                    # (BP, 64) packed [fwd | bwd]
            rt = pl.multiple_of(t * BP, BP)
            rr = pl.multiple_of((T - 1 - t) * BP, BP)
            # ONE MXU push produces both directions' gate pre-activations.
            gates = xproj_buf[pl.ds(rt, BP), :] + jnp.dot(
                h, w_hh, preferred_element_type=jnp.float32)          # (BP, 256)
            s = jax.nn.sigmoid(gates[:, :3 * GB])           # f,i,o blocks in one push
            g = jnp.tanh(gates[:, 3 * GB:])                 # g block (both directions)
            c = s[:, :GB] * c + s[:, GB:2 * GB] * g         # 64-wide cell update
            h = s[:, 2 * GB:3 * GB] * jnp.tanh(c)           # 64-wide hidden update
            # Row t holds [h_f(t) | h_b(T-1-t)]; the mirrored store at row T-1-t builds
            # the next layer's augmented input in place (no concat / reversal later).
            hcat_buf[pl.ds(rt, BP), :HH] = h
            hcat_buf[pl.ds(rr, BP), HH:] = h
            return h, c

        z = jnp.zeros((BP, HH), jnp.float32)
        lax.fori_loop(0, T, step, (z, z), unroll=True)

    # x1 = lstm_output[:, -1, :] = [h_fwd(T-1) | h_bwd(T-1)]
    last = (T - 1) * BP
    out_ref[:, :HID] = hcat_buf[last:last + B, :HID]
    out_ref[:, HID:2 * HID] = hcat_buf[last:last + B, 3 * HID:]

    # ----------------- FCN branch: Conv1d+BN+ReLU x2, adaptive avg pool -----------------
    L1 = T - KSZ + 1
    L2 = L1 - KSZ + 1
    xf = xfcn_ref[...]                                      # (T*B, 64), real batch only

    # Conv1d(64 -> 8, k=8): 8 shifted-slice matmuls accumulated in registers.
    y1 = jnp.zeros((L1 * B, C_MID), jnp.float32) + b1_ref[...]
    for k in range(KSZ):
        y1 = y1 + jnp.dot(xf[k * B:(k + L1) * B, :], w1_ref[k],
                          preferred_element_type=jnp.float32)
    # BatchNorm1d(8): batch statistics over (batch, length), biased variance.
    m1 = jnp.mean(y1, axis=0, keepdims=True)
    v1 = jnp.mean((y1 - m1) ** 2, axis=0, keepdims=True)
    y1 = jnp.maximum((y1 - m1) * lax.rsqrt(v1 + EPS) * g1_ref[...] + be1_ref[...], 0.0)

    # Conv1d(8 -> 64, k=8)
    y2 = jnp.zeros((L2 * B, INPUT), jnp.float32) + b2_ref[...]
    for k in range(KSZ):
        y2 = y2 + jnp.dot(y1[k * B:(k + L2) * B, :], w2_ref[k],
                          preferred_element_type=jnp.float32)
    m2 = jnp.mean(y2, axis=0, keepdims=True)
    v2 = jnp.mean((y2 - m2) ** 2, axis=0, keepdims=True)
    y2 = jnp.maximum((y2 - m2) * lax.rsqrt(v2 + EPS) * g2_ref[...] + be2_ref[...], 0.0)

    # AdaptiveAvgPool1d(1): mean over the L2 length positions per (batch, channel).
    pooled = jnp.zeros((B, INPUT), jnp.float32)
    for l in range(L2):
        pooled = pooled + y2[l * B:(l + 1) * B, :]
    out_ref[:, 2 * HID:] = pooled * (1.0 / L2)


# ================================ parameters ======================================
def _gate_cols(w_t, d):
    """Pack a torch-layout gate weight into the kernel's 256-wide column layout.

    w_t: (K, 4*HID) -- transposed torch weight (input-dim rows; gate cols i,f,g,o).
    d:   direction slot (0 = forward -> lanes [0:32) of each block, 1 = backward).
    Returns (K, 256) with 64-wide column blocks [f | i | o | g], each block holding
    [fwd(32) | bwd(32)]; the other direction's slot is zero.
    """
    z = jnp.zeros((w_t.shape[0], HID), jnp.float32)
    i_ = w_t[:, 0 * HID:1 * HID]
    f_ = w_t[:, 1 * HID:2 * HID]
    g_ = w_t[:, 2 * HID:3 * HID]
    o_ = w_t[:, 3 * HID:4 * HID]
    blocks = []
    for blk in (f_, i_, o_, g_):
        blocks.extend((blk, z) if d == 0 else (z, blk))
    return jnp.concatenate(blocks, axis=1)


def init_params(key):
    ks = jax.random.split(key, 8)

    def u(k, shape, bound):
        return jax.random.uniform(k, shape, jnp.float32, -bound, bound)

    kb = 1.0 / float(HID ** 0.5)
    # PyTorch LSTM layouts: weight_ih (4H, in), weight_hh (4H, H), biases (4H,), gates i,f,g,o.
    w_ih = u(ks[0], (LAYERS, 2, 4 * HID, INPUT), kb)
    w_hh = u(ks[1], (LAYERS, 2, 4 * HID, HID), kb)
    b_ih = u(ks[2], (LAYERS, 2, 4 * HID), kb)
    b_hh = u(ks[3], (LAYERS, 2, 4 * HID), kb)

    # Block-diagonal recurrent weights: rows 0:32 (h_fwd) feed only fwd gate columns,
    # rows 32:64 (h_bwd) feed only bwd gate columns.     (L, 64, 256)
    w_hh_p = jnp.stack([
        jnp.concatenate([_gate_cols(w_hh[l, 0].T, 0),
                         _gate_cols(w_hh[l, 1].T, 1)], axis=0)
        for l in range(LAYERS)])

    # Input weights against the augmented 128-wide per-row kernel input:
    #   layer 0  row t : [x(t) | x(T-1-t)]
    #   layer >0 row t : [h_f(t) | h_b(T-1-t) | h_f(T-1-t) | h_b(t)]   (== hcat_buf row t)
    def _w_ih_layer(l):
        if l == 0:
            return jnp.concatenate([_gate_cols(w_ih[0, 0].T, 0),   # x(t)      -> fwd gates
                                    _gate_cols(w_ih[0, 1].T, 1)],  # x(T-1-t)  -> bwd gates
                                   axis=0)
        wf, wb = w_ih[l, 0], w_ih[l, 1]        # (128, 64): in-cols 0:32 = h_f, 32:64 = h_b
        return jnp.concatenate([
            _gate_cols(wf[:, :HID].T, 0),      # h_f(t)       -> fwd gates
            _gate_cols(wb[:, HID:].T, 1),      # h_b(T-1-t)   -> bwd gates
            _gate_cols(wb[:, :HID].T, 1),      # h_f(T-1-t)   -> bwd gates
            _gate_cols(wf[:, HID:].T, 0),      # h_b(t)       -> fwd gates
        ], axis=0)

    w_ih_p = jnp.stack([_w_ih_layer(l) for l in range(LAYERS)])     # (L, 128, 256)

    b_sum = b_ih + b_hh                                             # (L, 2, 128)
    b_p = jnp.stack([_gate_cols(b_sum[l, 0][None, :], 0)
                     + _gate_cols(b_sum[l, 1][None, :], 1)
                     for l in range(LAYERS)])                       # (L, 1, 256)

    lstm = dict(w_ih=w_ih_p, w_hh=w_hh_p, b=b_p)

    cb1 = 1.0 / float((INPUT * KSZ) ** 0.5)
    cb2 = 1.0 / float((C_MID * KSZ) ** 0.5)
    w1 = u(ks[4], (C_MID, INPUT, KSZ), cb1)                         # PyTorch (out, in, K)
    b1 = u(ks[5], (C_MID,), cb1)
    w2 = u(ks[6], (INPUT, C_MID, KSZ), cb2)
    b2 = u(ks[7], (INPUT,), cb2)
    fcn = dict(
        w1=jnp.transpose(w1, (2, 1, 0)),                # (K, 64, 8) per-tap x@W weights
        b1=b1.reshape(1, C_MID),
        g1=jnp.ones((1, C_MID), jnp.float32),
        be1=jnp.zeros((1, C_MID), jnp.float32),
        w2=jnp.transpose(w2, (2, 1, 0)),                # (K, 8, 64)
        b2=b2.reshape(1, INPUT),
        g2=jnp.ones((1, INPUT), jnp.float32),
        be2=jnp.zeros((1, INPUT), jnp.float32),
    )
    return lstm, fcn


# ================================ wrapper =========================================
@jax.jit
def fcn_model_forward(x, lstm, fcn):
    B, T, _ = x.shape
    BP = ((B + 7) // 8) * 8            # pad LSTM batch to full f32 sublanes (8)
    xt = jnp.transpose(x, (1, 0, 2))                                   # (T, B, 64)
    xfcn = xt.reshape(T * B, INPUT)                                    # FCN input (real batch)
    xp = jnp.zeros((T, BP, INPUT), jnp.float32).at[:, :B].set(xt)      # sublane-padded
    # row t*BP+b = [x(t,b) | x(T-1-t,b)]: one matmul then yields the fwd projection in
    # time order and the bwd projection already time-reversed per row.
    xaug = jnp.concatenate([xp, xp[::-1]], axis=-1).reshape(T * BP, 2 * INPUT)

    # Single invocation (no grid): the whole problem is ~1 MiB of VMEM, and a 2-step
    # grid only added per-step overhead on single-TensorCore chips.
    out = pl.pallas_call(
        _fused_kernel,
        out_shape=jax.ShapeDtypeStruct((B, 2 * HID + INPUT), jnp.float32),
        scratch_shapes=[
            pltpu.VMEM((T * BP, 8 * HID), jnp.float32),   # hoisted gate projections (T*BP, 256)
            pltpu.VMEM((T * BP, 4 * HID), jnp.float32),   # packed fwd/bwd hidden states (T*BP, 128)
        ],
    )(xaug, xfcn, lstm["w_ih"], lstm["w_hh"], lstm["b"],
      fcn["w1"], fcn["b1"], fcn["g1"], fcn["be1"],
      fcn["w2"], fcn["b2"], fcn["g2"], fcn["be2"])
    return out                                            # (B, 128) = cat([x1, x2], dim=1)


if __name__ == "__main__":
    key = jax.random.PRNGKey(0)
    kx, kp = jax.random.split(key)
    B, T = 2, 16                                          # T >= 15 for the two k=8 convs
    x = jax.random.normal(kx, (B, T, INPUT), jnp.float32)
    lstm_params, fcn_params = init_params(kp)

    out = jax.block_until_ready(fcn_model_forward(x, lstm_params, fcn_params))

    assert out.shape == (B, 2 * HID + INPUT), out.shape
    assert bool(jnp.all(jnp.isfinite(out)))
    # TODO(synk): BatchNorm running-mean/var buffer updates (stateful training side
    # effect) are not modeled; the forward uses batch statistics exactly as train-mode does.
    print("KERNEL_OK")
</pallas_src>

<mosaic_0001>
module attributes {stable_mosaic.version = 11 : i64} {
  func.func @_fused_kernel(%arg0: memref<128x128xf32, #tpu.memory_space<vmem>>, %arg1: memref<32x64xf32, #tpu.memory_space<vmem>>, %arg2: memref<3x128x256xf32, #tpu.memory_space<vmem>>, %arg3: memref<3x64x256xf32, #tpu.memory_space<vmem>>, %arg4: memref<3x1x256xf32, #tpu.memory_space<vmem>>, %arg5: memref<8x64x8xf32, #tpu.memory_space<vmem>>, %arg6: memref<1x8xf32, #tpu.memory_space<vmem>>, %arg7: memref<1x8xf32, #tpu.memory_space<vmem>>, %arg8: memref<1x8xf32, #tpu.memory_space<vmem>>, %arg9: memref<8x8x64xf32, #tpu.memory_space<vmem>>, %arg10: memref<1x64xf32, #tpu.memory_space<vmem>>, %arg11: memref<1x64xf32, #tpu.memory_space<vmem>>, %arg12: memref<1x64xf32, #tpu.memory_space<vmem>>, %arg13: memref<2x128xf32, #tpu.memory_space<vmem>>, %arg14: memref<128x256xf32, #tpu.memory_space<vmem>>, %arg15: memref<128x128xf32, #tpu.memory_space<vmem>>) attributes {dimension_semantics = [], scalar_prefetch = 0 : i64, scratch_operands = 2 : i64, tpu.core_type = #tpu.core_type<tc>} {
    %c0 = arith.constant 0 : index
    %c0_0 = arith.constant 0 : index
    %0 = vector.load %arg0[%c0, %c0_0] : memref<128x128xf32, #tpu.memory_space<vmem>>, vector<128x128xf32>
    %c0_1 = arith.constant 0 : index
    %c0_2 = arith.constant 0 : index
    %c0_3 = arith.constant 0 : index
    %1 = vector.load %arg2[%c0_1, %c0_2, %c0_3] : memref<3x128x256xf32, #tpu.memory_space<vmem>>, vector<1x128x256xf32>
    %2 = vector.shape_cast %1 : vector<1x128x256xf32> to vector<128x256xf32>
    %cst = arith.constant dense<0.000000e+00> : vector<128x256xf32>
    %3 = tpu.matmul %0, %2, %cst {dimension_numbers = #tpu.dot_dimension_numbers<[1], [0], [0], [1], [0, 0, 1, 1], [], []>} : vector<128x128xf32>, vector<128x256xf32>, vector<128x256xf32> -> vector<128x256xf32>
    %c0_4 = arith.constant 0 : index
    %c0_5 = arith.constant 0 : index
    %c0_6 = arith.constant 0 : index
    %4 = vector.load %arg4[%c0_4, %c0_5, %c0_6] : memref<3x1x256xf32, #tpu.memory_space<vmem>>, vector<1x1x256xf32>
    %5 = vector.shape_cast %4 : vector<1x1x256xf32> to vector<1x256xf32>
    %6 = vector.broadcast %5 : vector<1x256xf32> to vector<128x256xf32>
    %7 = arith.addf %3, %6 : vector<128x256xf32>
    %c0_7 = arith.constant 0 : index
    %c0_8 = arith.constant 0 : index
    %8 = vector.load %arg14[%c0_7, %c0_8] : memref<128x256xf32, #tpu.memory_space<vmem>>, vector<128x256xf32>
    tpu.vector_store %arg14[%c0_7, %c0_8], %7 {strides = array<i32>} : memref<128x256xf32, #tpu.memory_space<vmem>>, vector<128x256xf32>,
    %c0_9 = arith.constant 0 : index
    %c0_10 = arith.constant 0 : index
    %c0_11 = arith.constant 0 : index
    %9 = vector.load %arg3[%c0_9, %c0_10, %c0_11] : memref<3x64x256xf32, #tpu.memory_space<vmem>>, vector<1x64x256xf32>
    %10 = vector.shape_cast %9 : vector<1x64x256xf32> to vector<64x256xf32>
    %cst_12 = arith.constant 0.000000e+00 : f32
    %11 = vector.broadcast %cst_12 : f32 to vector<8x64xf32>
    %c0_i32 = arith.constant 0 : i32
    %c8_i32 = arith.constant 8 : i32
    %12 = arith.muli %c0_i32, %c8_i32 : i32
    %13 = tpu.assume_multiple %12, 8 : i32
    %c15_i32 = arith.constant 15 : i32
    %14 = arith.subi %c15_i32, %c0_i32 : i32
    %c8_i32_13 = arith.constant 8 : i32
    %15 = arith.muli %14, %c8_i32_13 : i32
    %16 = tpu.assume_multiple %15, 8 : i32
    %17 = arith.index_cast %13 : i32 to index
    %c0_14 = arith.constant 0 : index
    %18 = vector.load %arg14[%17, %c0_14] : memref<128x256xf32, #tpu.memory_space<vmem>>, vector<8x256xf32>
    %cst_15 = arith.constant dense<0.000000e+00> : vector<8x256xf32>
    %19 = tpu.matmul %11, %10, %cst_15 {dimension_numbers = #tpu.dot_dimension_numbers<[1], [0], [0], [1], [0, 0, 1, 1], [], []>} : vector<8x64xf32>, vector<64x256xf32>, vector<8x256xf32> -> vector<8x256xf32>
    %20 = arith.addf %18, %19 : vector<8x256xf32>
    %21 = vector.extract_strided_slice %20 {offsets = [0, 0], sizes = [8, 192], strides = [1, 1]} : vector<8x256xf32> to vector<8x192xf32>
    %22 = arith.negf %21 : vector<8x192xf32>
    %23 = math.exp %22 : vector<8x192xf32>
    %cst_16 = arith.constant 1.000000e+00 : f32
    %24 = vector.broadcast %cst_16 : f32 to vector<8x192xf32>
    %25 = arith.addf %24, %23 : vector<8x192xf32>
    %26 = arith.divf %24, %25 : vector<8x192xf32>
    %27 = vector.extract_strided_slice %20 {offsets = [0, 192], sizes = [8, 64], strides = [1, 1]} : vector<8x256xf32> to vector<8x64xf32>
    %28 = math.tanh %27 : vector<8x64xf32>
    %29 = vector.extract_strided_slice %26 {offsets = [0, 0], sizes = [8, 64], strides = [1, 1]} : vector<8x192xf32> to vector<8x64xf32>
    %30 = arith.mulf %29, %11 : vector<8x64xf32>
    %31 = vector.extract_strided_slice %26 {offsets = [0, 64], sizes = [8, 64], strides = [1, 1]} : vector<8x192xf32> to vector<8x64xf32>
    %32 = arith.mulf %31, %28 : vector<8x64xf32>
    %33 = arith.addf %30, %32 : vector<8x64xf32>
    %34 = vector.extract_strided_slice %26 {offsets = [0, 128], sizes = [8, 64], strides = [1, 1]} : vector<8x192xf32> to vector<8x64xf32>
    %35 = math.tanh %33 : vector<8x64xf32>
    %36 = arith.mulf %34, %35 : vector<8x64xf32>
    %37 = arith.index_cast %13 : i32 to index
    %c0_17 = arith.constant 0 : index
    %38 = vector.load %arg15[%37, %c0_17] : memref<128x128xf32, #tpu.memory_space<vmem>>, vector<8x64xf32>
    tpu.vector_store %arg15[%37, %c0_17], %36 {strides = array<i32>} : memref<128x128xf32, #tpu.memory_space<vmem>>, vector<8x64xf32>,
    %39 = arith.index_cast %16 : i32 to index
    %c64 = arith.constant 64 : index
    %40 = vector.load %arg15[%39, %c64] : memref<128x128xf32, #tpu.memory_space<vmem>>, vector<8x64xf32>
    tpu.vector_store %arg15[%39, %c64], %36 {strides = array<i32>} : memref<128x128xf32, #tpu.memory_space<vmem>>, vector<8x64xf32>,
    %c1_i32 = arith.constant 1 : i32
    %c8_i32_18 = arith.constant 8 : i32
    %41 = arith.muli %c1_i32, %c8_i32_18 : i32
    %42 = tpu.assume_multiple %41, 8 : i32
    %c15_i32_19 = arith.constant 15 : i32
    %43 = arith.subi %c15_i32_19, %c1_i32 : i32
    %c8_i32_20 = arith.constant 8 : i32
    %44 = arith.muli %43, %c8_i32_20 : i32
    %45 = tpu.assume_multiple %44, 8 : i32
    %46 = arith.index_cast %42 : i32 to index
    %c0_21 = arith.constant 0 : index
    %47 = vector.load %arg14[%46, %c0_21] : memref<128x256xf32, #tpu.memory_space<vmem>>, vector<8x256xf32>
    %cst_22 = arith.constant dense<0.000000e+00> : vector<8x256xf32>
    %48 = tpu.matmul %36, %10, %cst_22 {dimension_numbers = #tpu.dot_dimension_numbers<[1], [0], [0], [1], [0, 0, 1, 1], [], []>} : vector<8x64xf32>, vector<64x256xf32>, vector<8x256xf32> -> vector<8x256xf32>
    %49 = arith.addf %47, %48 : vector<8x256xf32>
    %50 = vector.extract_strided_slice %49 {offsets = [0, 0], sizes = [8, 192], strides = [1, 1]} : vector<8x256xf32> to vector<8x192xf32>
    %51 = arith.negf %50 : vector<8x192xf32>
    %52 = math.exp %51 : vector<8x192xf32>
    %cst_23 = arith.constant 1.000000e+00 : f32
    %53 = vector.broadcast %cst_23 : f32 to vector<8x192xf32>
    %54 = arith.addf %53, %52 : vector<8x192xf32>
    %55 = arith.divf %53, %54 : vector<8x192xf32>
    %56 = vector.extract_strided_slice %49 {offsets = [0, 192], sizes = [8, 64], strides = [1, 1]} : vector<8x256xf32> to vector<8x64xf32>
    %57 = math.tanh %56 : vector<8x64xf32>
    %58 = vector.extract_strided_slice %55 {offsets = [0, 0], sizes = [8, 64], strides = [1, 1]} : vector<8x192xf32> to vector<8x64xf32>
    %59 = arith.mulf %58, %33 : vector<8x64xf32>
    %60 = vector.extract_strided_slice %55 {offsets = [0, 64], sizes = [8, 64], strides = [1, 1]} : vector<8x192xf32> to vector<8x64xf32>
    %61 = arith.mulf %60, %57 : vector<8x64xf32>
    %62 = arith.addf %59, %61 : vector<8x64xf32>
    %63 = vector.extract_strided_slice %55 {offsets = [0, 128], sizes = [8, 64], strides = [1, 1]} : vector<8x192xf32> to vector<8x64xf32>
    %64 = math.tanh %62 : vector<8x64xf32>
    %65 = arith.mulf %63, %64 : vector<8x64xf32>
    %66 = arith.index_cast %42 : i32 to index
    %c0_24 = arith.constant 0 : index
    %67 = vector.load %arg15[%66, %c0_24] : memref<128x128xf32, #tpu.memory_space<vmem>>, vector<8x64xf32>
    tpu.vector_store %arg15[%66, %c0_24], %65 {strides = array<i32>} : memref<128x128xf32, #tpu.memory_space<vmem>>, vector<8x64xf32>,
    %68 = arith.index_cast %45 : i32 to index
    %c64_25 = arith.constant 64 : index
    %69 = vector.load %arg15[%68, %c64_25] : memref<128x128xf32, #tpu.memory_space<vmem>>, vector<8x64xf32>
    tpu.vector_store %arg15[%68, %c64_25], %65 {strides = array<i32>} : memref<128x128xf32, #tpu.memory_space<vmem>>, vector<8x64xf32>,
    %c2_i32 = arith.constant 2 : i32
    %c8_i32_26 = arith.constant 8 : i32
    %70 = arith.muli %c2_i32, %c8_i32_26 : i32
    %71 = tpu.assume_multiple %70, 8 : i32
    %c15_i32_27 = arith.constant 15 : i32
    %72 = arith.subi %c15_i32_27, %c2_i32 : i32
    %c8_i32_28 = arith.constant 8 : i32
    %73 = arith.muli %72, %c8_i32_28 : i32
    %74 = tpu.assume_multiple %73, 8 : i32
    %75 = arith.index_cast %71 : i32 to index
    %c0_29 = arith.constant 0 : index
    %76 = vector.load %arg14[%75, %c0_29] : memref<128x256xf32, #tpu.memory_space<vmem>>, vector<8x256xf32>
    %cst_30 = arith.constant dense<0.000000e+00> : vector<8x256xf32>
    %77 = tpu.matmul %65, %10, %cst_30 {dimension_numbers = #tpu.dot_dimension_numbers<[1], [0], [0], [1], [0, 0, 1, 1], [], []>} : vector<8x64xf32>, vector<64x256xf32>, vector<8x256xf32> -> vector<8x256xf32>
    %78 = arith.addf %76, %77 : vector<8x256xf32>
    %79 = vector.extract_strided_slice %78 {offsets = [0, 0], sizes = [8, 192], strides = [1, 1]} : vector<8x256xf32> to vector<8x192xf32>
    %80 = arith.negf %79 : vector<8x192xf32>
    %81 = math.exp %80 : vector<8x192xf32>
    %cst_31 = arith.constant 1.000000e+00 : f32
    %82 = vector.broadcast %cst_31 : f32 to vector<8x192xf32>
    %83 = arith.addf %82, %81 : vector<8x192xf32>
    %84 = arith.divf %82, %83 : vector<8x192xf32>
    %85 = vector.extract_strided_slice %78 {offsets = [0, 192], sizes = [8, 64], strides = [1, 1]} : vector<8x256xf32> to vector<8x64xf32>
    %86 = math.tanh %85 : vector<8x64xf32>
    %87 = vector.extract_strided_slice %84 {offsets = [0, 0], sizes = [8, 64], strides = [1, 1]} : vector<8x192xf32> to vector<8x64xf32>
    %88 = arith.mulf %87, %62 : vector<8x64xf32>
    %89 = vector.extract_strided_slice %84 {offsets = [0, 64], sizes = [8, 64], strides = [1, 1]} : vector<8x192xf32> to vector<8x64xf32>
    %90 = arith.mulf %89, %86 : vector<8x64xf32>
    %91 = arith.addf %88, %90 : vector<8x64xf32>
    %92 = vector.extract_strided_slice %84 {offsets = [0, 128], sizes = [8, 64], strides = [1, 1]} : vector<8x192xf32> to vector<8x64xf32>
    %93 = math.tanh %91 : vector<8x64xf32>
    %94 = arith.mulf %92, %93 : vector<8x64xf32>
    %95 = arith.index_cast %71 : i32 to index
    %c0_32 = arith.constant 0 : index
    %96 = vector.load %arg15[%95, %c0_32] : memref<128x128xf32, #tpu.memory_space<vmem>>, vector<8x64xf32>
    tpu.vector_store %arg15[%95, %c0_32], %94 {strides = array<i32>} : memref<128x128xf32, #tpu.memory_space<vmem>>, vector<8x64xf32>,
    %97 = arith.index_cast %74 : i32 to index
    %c64_33 = arith.constant 64 : index
    %98 = vector.load %arg15[%97, %c64_33] : memref<128x128xf32, #tpu.memory_space<vmem>>, vector<8x64xf32>
    tpu.vector_store %arg15[%97, %c64_33], %94 {strides = array<i32>} : memref<128x128xf32, #tpu.memory_space<vmem>>, vector<8x64xf32>,
    %c3_i32 = arith.constant 3 : i32
    %c8_i32_34 = arith.constant 8 : i32
    %99 = arith.muli %c3_i32, %c8_i32_34 : i32
    %100 = tpu.assume_multiple %99, 8 : i32
    %c15_i32_35 = arith.constant 15 : i32
    %101 = arith.subi %c15_i32_35, %c3_i32 : i32
    %c8_i32_36 = arith.constant 8 : i32
    %102 = arith.muli %101, %c8_i32_36 : i32
    %103 = tpu.assume_multiple %102, 8 : i32
    %104 = arith.index_cast %100 : i32 to index
    %c0_37 = arith.constant 0 : index
    %105 = vector.load %arg14[%104, %c0_37] : memref<128x256xf32, #tpu.memory_space<vmem>>, vector<8x256xf32>
    %cst_38 = arith.constant dense<0.000000e+00> : vector<8x256xf32>
    %106 = tpu.matmul %94, %10, %cst_38 {dimension_numbers = #tpu.dot_dimension_numbers<[1], [0], [0], [1], [0, 0, 1, 1], [], []>} : vector<8x64xf32>, vector<64x256xf32>, vector<8x256xf32> -> vector<8x256xf32>
    %107 = arith.addf %105, %106 : vector<8x256xf32>
    %108 = vector.extract_strided_slice %107 {offsets = [0, 0], sizes = [8, 192], strides = [1, 1]} : vector<8x256xf32> to vector<8x192xf32>
    %109 = arith.negf %108 : vector<8x192xf32>
    %110 = math.exp %109 : vector<8x192xf32>
    %cst_39 = arith.constant 1.000000e+00 : f32
    %111 = vector.broadcast %cst_39 : f32 to vector<8x192xf32>
    %112 = arith.addf %111, %110 : vector<8x192xf32>
    %113 = arith.divf %111, %112 : vector<8x192xf32>
    %114 = vector.extract_strided_slice %107 {offsets = [0, 192], sizes = [8, 64], strides = [1, 1]} : vector<8x256xf32> to vector<8x64xf32>
    %115 = math.tanh %114 : vector<8x64xf32>
    %116 = vector.extract_strided_slice %113 {offsets = [0, 0], sizes = [8, 64], strides = [1, 1]} : vector<8x192xf32> to vector<8x64xf32>
    %117 = arith.mulf %116, %91 : vector<8x64xf32>
    %118 = vector.extract_strided_slice %113 {offsets = [0, 64], sizes = [8, 64], strides = [1, 1]} : vector<8x192xf32> to vector<8x64xf32>
    %119 = arith.mulf %118, %115 : vector<8x64xf32>
    %120 = arith.addf %117, %119 : vector<8x64xf32>
    %121 = vector.extract_strided_slice %113 {offsets = [0, 128], sizes = [8, 64], strides = [1, 1]} : vector<8x192xf32> to vector<8x64xf32>
    %122 = math.tanh %120 : vector<8x64xf32>
    %123 = arith.mulf %121, %122 : vector<8x64xf32>
    %124 = arith.index_cast %100 : i32 to index
    %c0_40 = arith.constant 0 : index
    %125 = vector.load %arg15[%124, %c0_40] : memref<128x128xf32, #tpu.memory_space<vmem>>, vector<8x64xf32>
    tpu.vector_store %arg15[%124, %c0_40], %123 {strides = array<i32>} : memref<128x128xf32, #tpu.memory_space<vmem>>, vector<8x64xf32>,
    %126 = arith.index_cast %103 : i32 to index
    %c64_41 = arith.constant 64 : index
    %127 = vector.load %arg15[%126, %c64_41] : memref<128x128xf32, #tpu.memory_space<vmem>>, vector<8x64xf32>
    tpu.vector_store %arg15[%126, %c64_41], %123 {strides = array<i32>} : memref<128x128xf32, #tpu.memory_space<vmem>>, vector<8x64xf32>,
    %c4_i32 = arith.constant 4 : i32
    %c8_i32_42 = arith.constant 8 : i32
    %128 = arith.muli %c4_i32, %c8_i32_42 : i32
    %129 = tpu.assume_multiple %128, 8 : i32
    %c15_i32_43 = arith.constant 15 : i32
    %130 = arith.subi %c15_i32_43, %c4_i32 : i32
    %c8_i32_44 = arith.constant 8 : i32
    %131 = arith.muli %130, %c8_i32_44 : i32
    %132 = tpu.assume_multiple %131, 8 : i32
    %133 = arith.index_cast %129 : i32 to index
    %c0_45 = arith.constant 0 : index
    %134 = vector.load %arg14[%133, %c0_45] : memref<128x256xf32, #tpu.memory_space<vmem>>, vector<8x256xf32>
    %cst_46 = arith.constant dense<0.000000e+00> : vector<8x256xf32>
    %135 = tpu.matmul %123, %10, %cst_46 {dimension_numbers = #tpu.dot_dimension_numbers<[1], [0], [0], [1], [0, 0, 1, 1], [], []>} : vector<8x64xf32>, vector<64x256xf32>, vector<8x256xf32> -> vector<8x256xf32>
    %136 = arith.addf %134, %135 : vector<8x256xf32>
    %137 = vector.extract_strided_slice %136 {offsets = [0, 0], sizes = [8, 192], strides = [1, 1]} : vector<8x256xf32> to vector<8x192xf32>
    %138 = arith.negf %137 : vector<8x192xf32>
    %139 = math.exp %138 : vector<8x192xf32>
    %cst_47 = arith.constant 1.000000e+00 : f32
    %140 = vector.broadcast %cst_47 : f32 to vector<8x192xf32>
    %141 = arith.addf %140, %139 : vector<8x192xf32>
    %142 = arith.divf %140, %141 : vector<8x192xf32>
    %143 = vector.extract_strided_slice %136 {offsets = [0, 192], sizes = [8, 64], strides = [1, 1]} : vector<8x256xf32> to vector<8x64xf32>
    %144 = math.tanh %143 : vector<8x64xf32>
    %145 = vector.extract_strided_slice %142 {offsets = [0, 0], sizes = [8, 64], strides = [1, 1]} : vector<8x192xf32> to vector<8x64xf32>
    %146 = arith.mulf %145, %120 : vector<8x64xf32>
    %147 = vector.extract_strided_slice %142 {offsets = [0, 64], sizes = [8, 64], strides = [1, 1]} : vector<8x192xf32> to vector<8x64xf32>
    %148 = arith.mulf %147, %144 : vector<8x64xf32>
    %149 = arith.addf %146, %148 : vector<8x64xf32>
    %150 = vector.extract_strided_slice %142 {offsets = [0, 128], sizes = [8, 64], strides = [1, 1]} : vector<8x192xf32> to vector<8x64xf32>
    %151 = math.tanh %149 : vector<8x64xf32>
    %152 = arith.mulf %150, %151 : vector<8x64xf32>
    %153 = arith.index_cast %129 : i32 to index
    %c0_48 = arith.constant 0 : index
    %154 = vector.load %arg15[%153, %c0_48] : memref<128x128xf32, #tpu.memory_space<vmem>>, vector<8x64xf32>
    tpu.vector_store %arg15[%153, %c0_48], %152 {strides = array<i32>} : memref<128x128xf32, #tpu.memory_space<vmem>>, vector<8x64xf32>,
    %155 = arith.index_cast %132 : i32 to index
    %c64_49 = arith.constant 64 : index
    %156 = vector.load %arg15[%155, %c64_49] : memref<128x128xf32, #tpu.memory_space<vmem>>, vector<8x64xf32>
    tpu.vector_store %arg15[%155, %c64_49], %152 {strides = array<i32>} : memref<128x128xf32, #tpu.memory_space<vmem>>, vector<8x64xf32>,
    %c5_i32 = arith.constant 5 : i32
    %c8_i32_50 = arith.constant 8 : i32
    %157 = arith.muli %c5_i32, %c8_i32_50 : i32
    %158 = tpu.assume_multiple %157, 8 : i32
    %c15_i32_51 = arith.constant 15 : i32
    %159 = arith.subi %c15_i32_51, %c5_i32 : i32
    %c8_i32_52 = arith.constant 8 : i32
    %160 = arith.muli %159, %c8_i32_52 : i32
    %161 = tpu.assume_multiple %160, 8 : i32
    %162 = arith.index_cast %158 : i32 to index
    %c0_53 = arith.constant 0 : index
    %163 = vector.load %arg14[%162, %c0_53] : memref<128x256xf32, #tpu.memory_space<vmem>>, vector<8x256xf32>
    %cst_54 = arith.constant dense<0.000000e+00> : vector<8x256xf32>
    %164 = tpu.matmul %152, %10, %cst_54 {dimension_numbers = #tpu.dot_dimension_numbers<[1], [0], [0], [1], [0, 0, 1, 1], [], []>} : vector<8x64xf32>, vector<64x256xf32>, vector<8x256xf32> -> vector<8x256xf32>
    %165 = arith.addf %163, %164 : vector<8x256xf32>
    %166 = vector.extract_strided_slice %165 {offsets = [0, 0], sizes = [8, 192], strides = [1, 1]} : vector<8x256xf32> to vector<8x192xf32>
    %167 = arith.negf %166 : vector<8x192xf32>
    %168 = math.exp %167 : vector<8x192xf32>
    %cst_55 = arith.constant 1.000000e+00 : f32
    %169 = vector.broadcast %cst_55 : f32 to vector<8x192xf32>
    %170 = arith.addf %169, %168 : vector<8x192xf32>
    %171 = arith.divf %169, %170 : vector<8x192xf32>
    %172 = vector.extract_strided_slice %165 {offsets = [0, 192], sizes = [8, 64], strides = [1, 1]} : vector<8x256xf32> to vector<8x64xf32>
    %173 = math.tanh %172 : vector<8x64xf32>
    %174 = vector.extract_strided_slice %171 {offsets = [0, 0], sizes = [8, 64], strides = [1, 1]} : vector<8x192xf32> to vector<8x64xf32>
    %175 = arith.mulf %174, %149 : vector<8x64xf32>
    %176 = vector.extract_strided_slice %171 {offsets = [0, 64], sizes = [8, 64], strides = [1, 1]} : vector<8x192xf32> to vector<8x64xf32>
    %177 = arith.mulf %176, %173 : vector<8x64xf32>
    %178 = arith.addf %175, %177 : vector<8x64xf32>
    %179 = vector.extract_strided_slice %171 {offsets = [0, 128], sizes = [8, 64], strides = [1, 1]} : vector<8x192xf32> to vector<8x64xf32>
    %180 = math.tanh %178 : vector<8x64xf32>
    %181 = arith.mulf %179, %180 : vector<8x64xf32>
    %182 = arith.index_cast %158 : i32 to index
    %c0_56 = arith.constant 0 : index
    %183 = vector.load %arg15[%182, %c0_56] : memref<128x128xf32, #tpu.memory_space<vmem>>, vector<8x64xf32>
    tpu.vector_store %arg15[%182, %c0_56], %181 {strides = array<i32>} : memref<128x128xf32, #tpu.memory_space<vmem>>, vector<8x64xf32>,
    %184 = arith.index_cast %161 : i32 to index
    %c64_57 = arith.constant 64 : index
    %185 = vector.load %arg15[%184, %c64_57] : memref<128x128xf32, #tpu.memory_space<vmem>>, vector<8x64xf32>
    tpu.vector_store %arg15[%184, %c64_57], %181 {strides = array<i32>} : memref<128x128xf32, #tpu.memory_space<vmem>>, vector<8x64xf32>,
    %c6_i32 = arith.constant 6 : i32
    %c8_i32_58 = arith.constant 8 : i32
    %186 = arith.muli %c6_i32, %c8_i32_58 : i32
    %187 = tpu.assume_multiple %186, 8 : i32
    %c15_i32_59 = arith.constant 15 : i32
    %188 = arith.subi %c15_i32_59, %c6_i32 : i32
    %c8_i32_60 = arith.constant 8 : i32
    %189 = arith.muli %188, %c8_i32_60 : i32
    %190 = tpu.assume_multiple %189, 8 : i32
    %191 = arith.index_cast %187 : i32 to index
    %c0_61 = arith.constant 0 : index
    %192 = vector.load %arg14[%191, %c0_61] : memref<128x256xf32, #tpu.memory_space<vmem>>, vector<8x256xf32>
    %cst_62 = arith.constant dense<0.000000e+00> : vector<8x256xf32>
    %193 = tpu.matmul %181, %10, %cst_62 {dimension_numbers = #tpu.dot_dimension_numbers<[1], [0], [0], [1], [0, 0, 1, 1], [], []>} : vector<8x64xf32>, vector<64x256xf32>, vector<8x256xf32> -> vector<8x256xf32>
    %194 = arith.addf %192, %193 : vector<8x256xf32>
    %195 = vector.extract_strided_slice %194 {offsets = [0, 0], sizes = [8, 192], strides = [1, 1]} : vector<8x256xf32> to vector<8x192xf32>
    %196 = arith.negf %195 : vector<8x192xf32>
    %197 = math.exp %196 : vector<8x192xf32>
    %cst_63 = arith.constant 1.000000e+00 : f32
    %198 = vector.broadcast %cst_63 : f32 to vector<8x192xf32>
    %199 = arith.addf %198, %197 : vector<8x192xf32>
    %200 = arith.divf %198, %199 : vector<8x192xf32>
    %201 = vector.extract_strided_slice %194 {offsets = [0, 192], sizes = [8, 64], strides = [1, 1]} : vector<8x256xf32> to vector<8x64xf32>
    %202 = math.tanh %201 : vector<8x64xf32>
    %203 = vector.extract_strided_slice %200 {offsets = [0, 0], sizes = [8, 64], strides = [1, 1]} : vector<8x192xf32> to vector<8x64xf32>
    %204 = arith.mulf %203, %178 : vector<8x64xf32>
    %205 = vector.extract_strided_slice %200 {offsets = [0, 64], sizes = [8, 64], strides = [1, 1]} : vector<8x192xf32> to vector<8x64xf32>
    %206 = arith.mulf %205, %202 : vector<8x64xf32>
    %207 = arith.addf %204, %206 : vector<8x64xf32>
    %208 = vector.extract_strided_slice %200 {offsets = [0, 128], sizes = [8, 64], strides = [1, 1]} : vector<8x192xf32> to vector<8x64xf32>
    %209 = math.tanh %207 : vector<8x64xf32>
    %210 = arith.mulf %208, %209 : vector<8x64xf32>
    %211 = arith.index_cast %187 : i32 to index
    %c0_64 = arith.constant 0 : index
    %212 = vector.load %arg15[%211, %c0_64] : memref<128x128xf32, #tpu.memory_space<vmem>>, vector<8x64xf32>
    tpu.vector_store %arg15[%211, %c0_64], %210 {strides = array<i32>} : memref<128x128xf32, #tpu.memory_space<vmem>>, vector<8x64xf32>,
    %213 = arith.index_cast %190 : i32 to index
    %c64_65 = arith.constant 64 : index
    %214 = vector.load %arg15[%213, %c64_65] : memref<128x128xf32, #tpu.memory_space<vmem>>, vector<8x64xf32>
    tpu.vector_store %arg15[%213, %c64_65], %210 {strides = array<i32>} : memref<128x128xf32, #tpu.memory_space<vmem>>, vector<8x64xf32>,
    %c7_i32 = arith.constant 7 : i32
    %c8_i32_66 = arith.constant 8 : i32
    %215 = arith.muli %c7_i32, %c8_i32_66 : i32
    %216 = tpu.assume_multiple %215, 8 : i32
    %c15_i32_67 = arith.constant 15 : i32
    %217 = arith.subi %c15_i32_67, %c7_i32 : i32
    %c8_i32_68 = arith.constant 8 : i32
    %218 = arith.muli %217, %c8_i32_68 : i32
    %219 = tpu.assume_multiple %218, 8 : i32
    %220 = arith.index_cast %216 : i32 to index
    %c0_69 = arith.constant 0 : index
    %221 = vector.load %arg14[%220, %c0_69] : memref<128x256xf32, #tpu.memory_space<vmem>>, vector<8x256xf32>
    %cst_70 = arith.constant dense<0.000000e+00> : vector<8x256xf32>
    %222 = tpu.matmul %210, %10, %cst_70 {dimension_numbers = #tpu.dot_dimension_numbers<[1], [0], [0], [1], [0, 0, 1, 1], [], []>} : vector<8x64xf32>, vector<64x256xf32>, vector<8x256xf32> -> vector<8x256xf32>
    %223 = arith.addf %221, %222 : vector<8x256xf32>
    %224 = vector.extract_strided_slice %223 {offsets = [0, 0], sizes = [8, 192], strides = [1, 1]} : vector<8x256xf32> to vector<8x192xf32>
    %225 = arith.negf %224 : vector<8x192xf32>
    %226 = math.exp %225 : vector<8x192xf32>
    %cst_71 = arith.constant 1.000000e+00 : f32
    %227 = vector.broadcast %cst_71 : f32 to vector<8x192xf32>
    %228 = arith.addf %227, %226 : vector<8x192xf32>
    %229 = arith.divf %227, %228 : vector<8x192xf32>
    %230 = vector.extract_strided_slice %223 {offsets = [0, 192], sizes = [8, 64], strides = [1, 1]} : vector<8x256xf32> to vector<8x64xf32>
    %231 = math.tanh %230 : vector<8x64xf32>
    %232 = vector.extract_strided_slice %229 {offsets = [0, 0], sizes = [8, 64], strides = [1, 1]} : vector<8x192xf32> to vector<8x64xf32>
    %233 = arith.mulf %232, %207 : vector<8x64xf32>
    %234 = vector.extract_strided_slice %229 {offsets = [0, 64], sizes = [8, 64], strides = [1, 1]} : vector<8x192xf32> to vector<8x64xf32>
    %235 = arith.mulf %234, %231 : vector<8x64xf32>
    %236 = arith.addf %233, %235 : vector<8x64xf32>
    %237 = vector.extract_strided_slice %229 {offsets = [0, 128], sizes = [8, 64], strides = [1, 1]} : vector<8x192xf32> to vector<8x64xf32>
    %238 = math.tanh %236 : vector<8x64xf32>
    %239 = arith.mulf %237, %238 : vector<8x64xf32>
    %240 = arith.index_cast %216 : i32 to index
    %c0_72 = arith.constant 0 : index
    %241 = vector.load %arg15[%240, %c0_72] : memref<128x128xf32, #tpu.memory_space<vmem>>, vector<8x64xf32>
    tpu.vector_store %arg15[%240, %c0_72], %239 {strides = array<i32>} : memref<128x128xf32, #tpu.memory_space<vmem>>, vector<8x64xf32>,
    %242 = arith.index_cast %219 : i32 to index
    %c64_73 = arith.constant 64 : index
    %243 = vector.load %arg15[%242, %c64_73] : memref<128x128xf32, #tpu.memory_space<vmem>>, vector<8x64xf32>
    tpu.vector_store %arg15[%242, %c64_73], %239 {strides = array<i32>} : memref<128x128xf32, #tpu.memory_space<vmem>>, vector<8x64xf32>,
    %c8_i32_74 = arith.constant 8 : i32
    %c8_i32_75 = arith.constant 8 : i32
    %244 = arith.muli %c8_i32_74, %c8_i32_75 : i32
    %245 = tpu.assume_multiple %244, 8 : i32
    %c15_i32_76 = arith.constant 15 : i32
    %246 = arith.subi %c15_i32_76, %c8_i32_74 : i32
    %c8_i32_77 = arith.constant 8 : i32
    %247 = arith.muli %246, %c8_i32_77 : i32
    %248 = tpu.assume_multiple %247, 8 : i32
    %249 = arith.index_cast %245 : i32 to index
    %c0_78 = arith.constant 0 : index
    %250 = vector.load %arg14[%249, %c0_78] : memref<128x256xf32, #tpu.memory_space<vmem>>, vector<8x256xf32>
    %cst_79 = arith.constant dense<0.000000e+00> : vector<8x256xf32>
    %251 = tpu.matmul %239, %10, %cst_79 {dimension_numbers = #tpu.dot_dimension_numbers<[1], [0], [0], [1], [0, 0, 1, 1], [], []>} : vector<8x64xf32>, vector<64x256xf32>, vector<8x256xf32> -> vector<8x256xf32>
    %252 = arith.addf %250, %251 : vector<8x256xf32>
    %253 = vector.extract_strided_slice %252 {offsets = [0, 0], sizes = [8, 192], strides = [1, 1]} : vector<8x256xf32> to vector<8x192xf32>
    %254 = arith.negf %253 : vector<8x192xf32>
    %255 = math.exp %254 : vector<8x192xf32>
    %cst_80 = arith.constant 1.000000e+00 : f32
    %256 = vector.broadcast %cst_80 : f32 to vector<8x192xf32>
    %257 = arith.addf %256, %255 : vector<8x192xf32>
    %258 = arith.divf %256, %257 : vector<8x192xf32>
    %259 = vector.extract_strided_slice %252 {offsets = [0, 192], sizes = [8, 64], strides = [1, 1]} : vector<8x256xf32> to vector<8x64xf32>
    %260 = math.tanh %259 : vector<8x64xf32>
    %261 = vector.extract_strided_slice %258 {offsets = [0, 0], sizes = [8, 64], strides = [1, 1]} : vector<8x192xf32> to vector<8x64xf32>
    %262 = arith.mulf %261, %236 : vector<8x64xf32>
    %263 = vector.extract_strided_slice %258 {offsets = [0, 64], sizes = [8, 64], strides = [1, 1]} : vector<8x192xf32> to vector<8x64xf32>
    %264 = arith.mulf %263, %260 : vector<8x64xf32>
    %265 = arith.addf %262, %264 : vector<8x64xf32>
    %266 = vector.extract_strided_slice %258 {offsets = [0, 128], sizes = [8, 64], strides = [1, 1]} : vector<8x192xf32> to vector<8x64xf32>
    %267 = math.tanh %265 : vector<8x64xf32>
    %268 = arith.mulf %266, %267 : vector<8x64xf32>
    %269 = arith.index_cast %245 : i32 to index
    %c0_81 = arith.constant 0 : index
    %270 = vector.load %arg15[%269, %c0_81] : memref<128x128xf32, #tpu.memory_space<vmem>>, vector<8x64xf32>
    tpu.vector_store %arg15[%269, %c0_81], %268 {strides = array<i32>} : memref<128x128xf32, #tpu.memory_space<vmem>>, vector<8x64xf32>,
    %271 = arith.index_cast %248 : i32 to index
    %c64_82 = arith.constant 64 : index
    %272 = vector.load %arg15[%271, %c64_82] : memref<128x128xf32, #tpu.memory_space<vmem>>, vector<8x64xf32>
    tpu.vector_store %arg15[%271, %c64_82], %268 {strides = array<i32>} : memref<128x128xf32, #tpu.memory_space<vmem>>, vector<8x64xf32>,
    %c9_i32 = arith.constant 9 : i32
    %c8_i32_83 = arith.constant 8 : i32
    %273 = arith.muli %c9_i32, %c8_i32_83 : i32
    %274 = tpu.assume_multiple %273, 8 : i32
    %c15_i32_84 = arith.constant 15 : i32
    %275 = arith.subi %c15_i32_84, %c9_i32 : i32
    %c8_i32_85 = arith.constant 8 : i32
    %276 = arith.muli %275, %c8_i32_85 : i32
    %277 = tpu.assume_multiple %276, 8 : i32
    %278 = arith.index_cast %274 : i32 to index
    %c0_86 = arith.constant 0 : index
    %279 = vector.load %arg14[%278, %c0_86] : memref<128x256xf32, #tpu.memory_space<vmem>>, vector<8x256xf32>
    %cst_87 = arith.constant dense<0.000000e+00> : vector<8x256xf32>
    %280 = tpu.matmul %268, %10, %cst_87 {dimension_numbers = #tpu.dot_dimension_numbers<[1], [0], [0], [1], [0, 0, 1, 1], [], []>} : vector<8x64xf32>, vector<64x256xf32>, vector<8x256xf32> -> vector<8x256xf32>
    %281 = arith.addf %279, %280 : vector<8x256xf32>
    %282 = vector.extract_strided_slice %281 {offsets = [0, 0], sizes = [8, 192], strides = [1, 1]} : vector<8x256xf32> to vector<8x192xf32>
    %283 = arith.negf %282 : vector<8x192xf32>
    %284 = math.exp %283 : vector<8x192xf32>
    %cst_88 = arith.constant 1.000000e+00 : f32
    %285 = vector.broadcast %cst_88 : f32 to vector<8x192xf32>
    %286 = arith.addf %285, %284 : vector<8x192xf32>
    %287 = arith.divf %285, %286 : vector<8x192xf32>
    %288 = vector.extract_strided_slice %281 {offsets = [0, 192], sizes = [8, 64], strides = [1, 1]} : vector<8x256xf32> to vector<8x64xf32>
    %289 = math.tanh %288 : vector<8x64xf32>
    %290 = vector.extract_strided_slice %287 {offsets = [0, 0], sizes = [8, 64], strides = [1, 1]} : vector<8x192xf32> to vector<8x64xf32>
    %291 = arith.mulf %290, %265 : vector<8x64xf32>
    %292 = vector.extract_strided_slice %287 {offsets = [0, 64], sizes = [8, 64], strides = [1, 1]} : vector<8x192xf32> to vector<8x64xf32>
    %293 = arith.mulf %292, %289 : vector<8x64xf32>
    %294 = arith.addf %291, %293 : vector<8x64xf32>
    %295 = vector.extract_strided_slice %287 {offsets = [0, 128], sizes = [8, 64], strides = [1, 1]} : vector<8x192xf32> to vector<8x64xf32>
    %296 = math.tanh %294 : vector<8x64xf32>
    %297 = arith.mulf %295, %296 : vector<8x64xf32>
    %298 = arith.index_cast %274 : i32 to index
    %c0_89 = arith.constant 0 : index
    %299 = vector.load %arg15[%298, %c0_89] : memref<128x128xf32, #tpu.memory_space<vmem>>, vector<8x64xf32>
    tpu.vector_store %arg15[%298, %c0_89], %297 {strides = array<i32>} : memref<128x128xf32, #tpu.memory_space<vmem>>, vector<8x64xf32>,
    %300 = arith.index_cast %277 : i32 to index
    %c64_90 = arith.constant 64 : index
    %301 = vector.load %arg15[%300, %c64_90] : memref<128x128xf32, #tpu.memory_space<vmem>>, vector<8x64xf32>
    tpu.vector_store %arg15[%300, %c64_90], %297 {strides = array<i32>} : memref<128x128xf32, #tpu.memory_space<vmem>>, vector<8x64xf32>,
    %c10_i32 = arith.constant 10 : i32
    %c8_i32_91 = arith.constant 8 : i32
    %302 = arith.muli %c10_i32, %c8_i32_91 : i32
    %303 = tpu.assume_multiple %302, 8 : i32
    %c15_i32_92 = arith.constant 15 : i32
    %304 = arith.subi %c15_i32_92, %c10_i32 : i32
    %c8_i32_93 = arith.constant 8 : i32
    %305 = arith.muli %304, %c8_i32_93 : i32
    %306 = tpu.assume_multiple %305, 8 : i32
    %307 = arith.index_cast %303 : i32 to index
    %c0_94 = arith.constant 0 : index
    %308 = vector.load %arg14[%307, %c0_94] : memref<128x256xf32, #tpu.memory_space<vmem>>, vector<8x256xf32>
    %cst_95 = arith.constant dense<0.000000e+00> : vector<8x256xf32>
    %309 = tpu.matmul %297, %10, %cst_95 {dimension_numbers = #tpu.dot_dimension_numbers<[1], [0], [0], [1], [0, 0, 1, 1], [], []>} : vector<8x64xf32>, vector<64x256xf32>, vector<8x256xf32> -> vector<8x256xf32>
    %310 = arith.addf %308, %309 : vector<8x256xf32>
    %311 = vector.extract_strided_slice %310 {offsets = [0, 0], sizes = [8, 192], strides = [1, 1]} : vector<8x256xf32> to vector<8x192xf32>
    %312 = arith.negf %311 : vector<8x192xf32>
    %313 = math.exp %312 : vector<8x192xf32>
    %cst_96 = arith.constant 1.000000e+00 : f32
    %314 = vector.broadcast %cst_96 : f32 to vector<8x192xf32>
    %315 = arith.addf %314, %313 : vector<8x192xf32>
    %316 = arith.divf %314, %315 : vector<8x192xf32>
    %317 = vector.extract_strided_slice %310 {offsets = [0, 192], sizes = [8, 64], strides = [1, 1]} : vector<8x256xf32> to vector<8x64xf32>
    %318 = math.tanh %317 : vector<8x64xf32>
    %319 = vector.extract_strided_slice %316 {offsets = [0, 0], sizes = [8, 64], strides = [1, 1]} : vector<8x192xf32> to vector<8x64xf32>
    %320 = arith.mulf %319, %294 : vector<8x64xf32>
    %321 = vector.extract_strided_slice %316 {offsets = [0, 64], sizes = [8, 64], strides = [1, 1]} : vector<8x192xf32> to vector<8x64xf32>
    %322 = arith.mulf %321, %318 : vector<8x64xf32>
    %323 = arith.addf %320, %322 : vector<8x64xf32>
    %324 = vector.extract_strided_slice %316 {offsets = [0, 128], sizes = [8, 64], strides = [1, 1]} : vector<8x192xf32> to vector<8x64xf32>
    %325 = math.tanh %323 : vector<8x64xf32>
    %326 = arith.mulf %324, %325 : vector<8x64xf32>
    %327 = arith.index_cast %303 : i32 to index
    %c0_97 = arith.constant 0 : index
    %328 = vector.load %arg15[%327, %c0_97] : memref<128x128xf32, #tpu.memory_space<vmem>>, vector<8x64xf32>
    tpu.vector_store %arg15[%327, %c0_97], %326 {strides = array<i32>} : memref<128x128xf32, #tpu.memory_space<vmem>>, vector<8x64xf32>,
    %329 = arith.index_cast %306 : i32 to index
    %c64_98 = arith.constant 64 : index
    %330 = vector.load %arg15[%329, %c64_98] : memref<128x128xf32, #tpu.memory_space<vmem>>, vector<8x64xf32>
    tpu.vector_store %arg15[%329, %c64_98], %326 {strides = array<i32>} : memref<128x128xf32, #tpu.memory_space<vmem>>, vector<8x64xf32>,
    %c11_i32 = arith.constant 11 : i32
    %c8_i32_99 = arith.constant 8 : i32
    %331 = arith.muli %c11_i32, %c8_i32_99 : i32
    %332 = tpu.assume_multiple %331, 8 : i32
    %c15_i32_100 = arith.constant 15 : i32
    %333 = arith.subi %c15_i32_100, %c11_i32 : i32
    %c8_i32_101 = arith.constant 8 : i32
    %334 = arith.muli %333, %c8_i32_101 : i32
    %335 = tpu.assume_multiple %334, 8 : i32
    %336 = arith.index_cast %332 : i32 to index
    %c0_102 = arith.constant 0 : index
    %337 = vector.load %arg14[%336, %c0_102] : memref<128x256xf32, #tpu.memory_space<vmem>>, vector<8x256xf32>
    %cst_103 = arith.constant dense<0.000000e+00> : vector<8x256xf32>
    %338 = tpu.matmul %326, %10, %cst_103 {dimension_numbers = #tpu.dot_dimension_numbers<[1], [0], [0], [1], [0, 0, 1, 1], [], []>} : vector<8x64xf32>, vector<64x256xf32>, vector<8x256xf32> -> vector<8x256xf32>
    %339 = arith.addf %337, %338 : vector<8x256xf32>
    %340 = vector.extract_strided_slice %339 {offsets = [0, 0], sizes = [8, 192], strides = [1, 1]} : vector<8x256xf32> to vector<8x192xf32>
    %341 = arith.negf %340 : vector<8x192xf32>
    %342 = math.exp %341 : vector<8x192xf32>
    %cst_104 = arith.constant 1.000000e+00 : f32
    %343 = vector.broadcast %cst_104 : f32 to vector<8x192xf32>
    %344 = arith.addf %343, %342 : vector<8x192xf32>
    %345 = arith.divf %343, %344 : vector<8x192xf32>
    %346 = vector.extract_strided_slice %339 {offsets = [0, 192], sizes = [8, 64], strides = [1, 1]} : vector<8x256xf32> to vector<8x64xf32>
    %347 = math.tanh %346 : vector<8x64xf32>
    %348 = vector.extract_strided_slice %345 {offsets = [0, 0], sizes = [8, 64], strides = [1, 1]} : vector<8x192xf32> to vector<8x64xf32>
    %349 = arith.mulf %348, %323 : vector<8x64xf32>
    %350 = vector.extract_strided_slice %345 {offsets = [0, 64], sizes = [8, 64], strides = [1, 1]} : vector<8x192xf32> to vector<8x64xf32>
    %351 = arith.mulf %350, %347 : vector<8x64xf32>
    %352 = arith.addf %349, %351 : vector<8x64xf32>
    %353 = vector.extract_strided_slice %345 {offsets = [0, 128], sizes = [8, 64], strides = [1, 1]} : vector<8x192xf32> to vector<8x64xf32>
    %354 = math.tanh %352 : vector<8x64xf32>
    %355 = arith.mulf %353, %354 : vector<8x64xf32>
    %356 = arith.index_cast %332 : i32 to index
    %c0_105 = arith.constant 0 : index
    %357 = vector.load %arg15[%356, %c0_105] : memref<128x128xf32, #tpu.memory_space<vmem>>, vector<8x64xf32>
    tpu.vector_store %arg15[%356, %c0_105], %355 {strides = array<i32>} : memref<128x128xf32, #tpu.memory_space<vmem>>, vector<8x64xf32>,
    %358 = arith.index_cast %335 : i32 to index
    %c64_106 = arith.constant 64 : index
    %359 = vector.load %arg15[%358, %c64_106] : memref<128x128xf32, #tpu.memory_space<vmem>>, vector<8x64xf32>
    tpu.vector_store %arg15[%358, %c64_106], %355 {strides = array<i32>} : memref<128x128xf32, #tpu.memory_space<vmem>>, vector<8x64xf32>,
    %c12_i32 = arith.constant 12 : i32
    %c8_i32_107 = arith.constant 8 : i32
    %360 = arith.muli %c12_i32, %c8_i32_107 : i32
    %361 = tpu.assume_multiple %360, 8 : i32
    %c15_i32_108 = arith.constant 15 : i32
    %362 = arith.subi %c15_i32_108, %c12_i32 : i32
    %c8_i32_109 = arith.constant 8 : i32
    %363 = arith.muli %362, %c8_i32_109 : i32
    %364 = tpu.assume_multiple %363, 8 : i32
    %365 = arith.index_cast %361 : i32 to index
    %c0_110 = arith.constant 0 : index
    %366 = vector.load %arg14[%365, %c0_110] : memref<128x256xf32, #tpu.memory_space<vmem>>, vector<8x256xf32>
    %cst_111 = arith.constant dense<0.000000e+00> : vector<8x256xf32>
    %367 = tpu.matmul %355, %10, %cst_111 {dimension_numbers = #tpu.dot_dimension_numbers<[1], [0], [0], [1], [0, 0, 1, 1], [], []>} : vector<8x64xf32>, vector<64x256xf32>, vector<8x256xf32> -> vector<8x256xf32>
    %368 = arith.addf %366, %367 : vector<8x256xf32>
    %369 = vector.extract_strided_slice %368 {offsets = [0, 0], sizes = [8, 192], strides = [1, 1]} : vector<8x256xf32> to vector<8x192xf32>
    %370 = arith.negf %369 : vector<8x192xf32>
    %371 = math.exp %370 : vector<8x192xf32>
    %cst_112 = arith.constant 1.000000e+00 : f32
    %372 = vector.broadcast %cst_112 : f32 to vector<8x192xf32>
    %373 = arith.addf %372, %371 : vector<8x192xf32>
    %374 = arith.divf %372, %373 : vector<8x192xf32>
    %375 = vector.extract_strided_slice %368 {offsets = [0, 192], sizes = [8, 64], strides = [1, 1]} : vector<8x256xf32> to vector<8x64xf32>
    %376 = math.tanh %375 : vector<8x64xf32>
    %377 = vector.extract_strided_slice %374 {offsets = [0, 0], sizes = [8, 64], strides = [1, 1]} : vector<8x192xf32> to vector<8x64xf32>
    %378 = arith.mulf %377, %352 : vector<8x64xf32>
    %379 = vector.extract_strided_slice %374 {offsets = [0, 64], sizes = [8, 64], strides = [1, 1]} : vector<8x192xf32> to vector<8x64xf32>
    %380 = arith.mulf %379, %376 : vector<8x64xf32>
    %381 = arith.addf %378, %380 : vector<8x64xf32>
    %382 = vector.extract_strided_slice %374 {offsets = [0, 128], sizes = [8, 64], strides = [1, 1]} : vector<8x192xf32> to vector<8x64xf32>
    %383 = math.tanh %381 : vector<8x64xf32>
    %384 = arith.mulf %382, %383 : vector<8x64xf32>
    %385 = arith.index_cast %361 : i32 to index
    %c0_113 = arith.constant 0 : index
    %386 = vector.load %arg15[%385, %c0_113] : memref<128x128xf32, #tpu.memory_space<vmem>>, vector<8x64xf32>
    tpu.vector_store %arg15[%385, %c0_113], %384 {strides = array<i32>} : memref<128x128xf32, #tpu.memory_space<vmem>>, vector<8x64xf32>,
    %387 = arith.index_cast %364 : i32 to index
    %c64_114 = arith.constant 64 : index
    %388 = vector.load %arg15[%387, %c64_114] : memref<128x128xf32, #tpu.memory_space<vmem>>, vector<8x64xf32>
    tpu.vector_store %arg15[%387, %c64_114], %384 {strides = array<i32>} : memref<128x128xf32, #tpu.memory_space<vmem>>, vector<8x64xf32>,
    %c13_i32 = arith.constant 13 : i32
    %c8_i32_115 = arith.constant 8 : i32
    %389 = arith.muli %c13_i32, %c8_i32_115 : i32
    %390 = tpu.assume_multiple %389, 8 : i32
    %c15_i32_116 = arith.constant 15 : i32
    %391 = arith.subi %c15_i32_116, %c13_i32 : i32
    %c8_i32_117 = arith.constant 8 : i32
    %392 = arith.muli %391, %c8_i32_117 : i32
    %393 = tpu.assume_multiple %392, 8 : i32
    %394 = arith.index_cast %390 : i32 to index
    %c0_118 = arith.constant 0 : index
    %395 = vector.load %arg14[%394, %c0_118] : memref<128x256xf32, #tpu.memory_space<vmem>>, vector<8x256xf32>
    %cst_119 = arith.constant dense<0.000000e+00> : vector<8x256xf32>
    %396 = tpu.matmul %384, %10, %cst_119 {dimension_numbers = #tpu.dot_dimension_numbers<[1], [0], [0], [1], [0, 0, 1, 1], [], []>} : vector<8x64xf32>, vector<64x256xf32>, vector<8x256xf32> -> vector<8x256xf32>
    %397 = arith.addf %395, %396 : vector<8x256xf32>
    %398 = vector.extract_strided_slice %397 {offsets = [0, 0], sizes = [8, 192], strides = [1, 1]} : vector<8x256xf32> to vector<8x192xf32>
    %399 = arith.negf %398 : vector<8x192xf32>
    %400 = math.exp %399 : vector<8x192xf32>
    %cst_120 = arith.constant 1.000000e+00 : f32
    %401 = vector.broadcast %cst_120 : f32 to vector<8x192xf32>
    %402 = arith.addf %401, %400 : vector<8x192xf32>
    %403 = arith.divf %401, %402 : vector<8x192xf32>
    %404 = vector.extract_strided_slice %397 {offsets = [0, 192], sizes = [8, 64], strides = [1, 1]} : vector<8x256xf32> to vector<8x64xf32>
    %405 = math.tanh %404 : vector<8x64xf32>
    %406 = vector.extract_strided_slice %403 {offsets = [0, 0], sizes = [8, 64], strides = [1, 1]} : vector<8x192xf32> to vector<8x64xf32>
    %407 = arith.mulf %406, %381 : vector<8x64xf32>
    %408 = vector.extract_strided_slice %403 {offsets = [0, 64], sizes = [8, 64], strides = [1, 1]} : vector<8x192xf32> to vector<8x64xf32>
    %409 = arith.mulf %408, %405 : vector<8x64xf32>
    %410 = arith.addf %407, %409 : vector<8x64xf32>
    %411 = vector.extract_strided_slice %403 {offsets = [0, 128], sizes = [8, 64], strides = [1, 1]} : vector<8x192xf32> to vector<8x64xf32>
    %412 = math.tanh %410 : vector<8x64xf32>
    %413 = arith.mulf %411, %412 : vector<8x64xf32>
    %414 = arith.index_cast %390 : i32 to index
    %c0_121 = arith.constant 0 : index
    %415 = vector.load %arg15[%414, %c0_121] : memref<128x128xf32, #tpu.memory_space<vmem>>, vector<8x64xf32>
    tpu.vector_store %arg15[%414, %c0_121], %413 {strides = array<i32>} : memref<128x128xf32, #tpu.memory_space<vmem>>, vector<8x64xf32>,
    %416 = arith.index_cast %393 : i32 to index
    %c64_122 = arith.constant 64 : index
    %417 = vector.load %arg15[%416, %c64_122] : memref<128x128xf32, #tpu.memory_space<vmem>>, vector<8x64xf32>
    tpu.vector_store %arg15[%416, %c64_122], %413 {strides = array<i32>} : memref<128x128xf32, #tpu.memory_space<vmem>>, vector<8x64xf32>,
    %c14_i32 = arith.constant 14 : i32
    %c8_i32_123 = arith.constant 8 : i32
    %418 = arith.muli %c14_i32, %c8_i32_123 : i32
    %419 = tpu.assume_multiple %418, 8 : i32
    %c15_i32_124 = arith.constant 15 : i32
    %420 = arith.subi %c15_i32_124, %c14_i32 : i32
    %c8_i32_125 = arith.constant 8 : i32
    %421 = arith.muli %420, %c8_i32_125 : i32
    %422 = tpu.assume_multiple %421, 8 : i32
    %423 = arith.index_cast %419 : i32 to index
    %c0_126 = arith.constant 0 : index
    %424 = vector.load %arg14[%423, %c0_126] : memref<128x256xf32, #tpu.memory_space<vmem>>, vector<8x256xf32>
    %cst_127 = arith.constant dense<0.000000e+00> : vector<8x256xf32>
    %425 = tpu.matmul %413, %10, %cst_127 {dimension_numbers = #tpu.dot_dimension_numbers<[1], [0], [0], [1], [0, 0, 1, 1], [], []>} : vector<8x64xf32>, vector<64x256xf32>, vector<8x256xf32> -> vector<8x256xf32>
    %426 = arith.addf %424, %425 : vector<8x256xf32>
    %427 = vector.extract_strided_slice %426 {offsets = [0, 0], sizes = [8, 192], strides = [1, 1]} : vector<8x256xf32> to vector<8x192xf32>
    %428 = arith.negf %427 : vector<8x192xf32>
    %429 = math.exp %428 : vector<8x192xf32>
    %cst_128 = arith.constant 1.000000e+00 : f32
    %430 = vector.broadcast %cst_128 : f32 to vector<8x192xf32>
    %431 = arith.addf %430, %429 : vector<8x192xf32>
    %432 = arith.divf %430, %431 : vector<8x192xf32>
    %433 = vector.extract_strided_slice %426 {offsets = [0, 192], sizes = [8, 64], strides = [1, 1]} : vector<8x256xf32> to vector<8x64xf32>
    %434 = math.tanh %433 : vector<8x64xf32>
    %435 = vector.extract_strided_slice %432 {offsets = [0, 0], sizes = [8, 64], strides = [1, 1]} : vector<8x192xf32> to vector<8x64xf32>
    %436 = arith.mulf %435, %410 : vector<8x64xf32>
    %437 = vector.extract_strided_slice %432 {offsets = [0, 64], sizes = [8, 64], strides = [1, 1]} : vector<8x192xf32> to vector<8x64xf32>
    %438 = arith.mulf %437, %434 : vector<8x64xf32>
    %439 = arith.addf %436, %438 : vector<8x64xf32>
    %440 = vector.extract_strided_slice %432 {offsets = [0, 128], sizes = [8, 64], strides = [1, 1]} : vector<8x192xf32> to vector<8x64xf32>
    %441 = math.tanh %439 : vector<8x64xf32>
    %442 = arith.mulf %440, %441 : vector<8x64xf32>
    %443 = arith.index_cast %419 : i32 to index
    %c0_129 = arith.constant 0 : index
    %444 = vector.load %arg15[%443, %c0_129] : memref<128x128xf32, #tpu.memory_space<vmem>>, vector<8x64xf32>
    tpu.vector_store %arg15[%443, %c0_129], %442 {strides = array<i32>} : memref<128x128xf32, #tpu.memory_space<vmem>>, vector<8x64xf32>,
    %445 = arith.index_cast %422 : i32 to index
    %c64_130 = arith.constant 64 : index
    %446 = vector.load %arg15[%445, %c64_130] : memref<128x128xf32, #tpu.memory_space<vmem>>, vector<8x64xf32>
    tpu.vector_store %arg15[%445, %c64_130], %442 {strides = array<i32>} : memref<128x128xf32, #tpu.memory_space<vmem>>, vector<8x64xf32>,
    %c15_i32_131 = arith.constant 15 : i32
    %c8_i32_132 = arith.constant 8 : i32
    %447 = arith.muli %c15_i32_131, %c8_i32_132 : i32
    %448 = tpu.assume_multiple %447, 8 : i32
    %c15_i32_133 = arith.constant 15 : i32
    %449 = arith.subi %c15_i32_133, %c15_i32_131 : i32
    %c8_i32_134 = arith.constant 8 : i32
    %450 = arith.muli %449, %c8_i32_134 : i32
    %451 = tpu.assume_multiple %450, 8 : i32
    %452 = arith.index_cast %448 : i32 to index
    %c0_135 = arith.constant 0 : index
    %453 = vector.load %arg14[%452, %c0_135] : memref<128x256xf32, #tpu.memory_space<vmem>>, vector<8x256xf32>
    %cst_136 = arith.constant dense<0.000000e+00> : vector<8x256xf32>
    %454 = tpu.matmul %442, %10, %cst_136 {dimension_numbers = #tpu.dot_dimension_numbers<[1], [0], [0], [1], [0, 0, 1, 1], [], []>} : vector<8x64xf32>, vector<64x256xf32>, vector<8x256xf32> -> vector<8x256xf32>
    %455 = arith.addf %453, %454 : vector<8x256xf32>
    %456 = vector.extract_strided_slice %455 {offsets = [0, 0], sizes = [8, 192], strides = [1, 1]} : vector<8x256xf32> to vector<8x192xf32>
    %457 = arith.negf %456 : vector<8x192xf32>
    %458 = math.exp %457 : vector<8x192xf32>
    %cst_137 = arith.constant 1.000000e+00 : f32
    %459 = vector.broadcast %cst_137 : f32 to vector<8x192xf32>
    %460 = arith.addf %459, %458 : vector<8x192xf32>
    %461 = arith.divf %459, %460 : vector<8x192xf32>
    %462 = vector.extract_strided_slice %455 {offsets = [0, 192], sizes = [8, 64], strides = [1, 1]} : vector<8x256xf32> to vector<8x64xf32>
    %463 = math.tanh %462 : vector<8x64xf32>
    %464 = vector.extract_strided_slice %461 {offsets = [0, 0], sizes = [8, 64], strides = [1, 1]} : vector<8x192xf32> to vector<8x64xf32>
    %465 = arith.mulf %464, %439 : vector<8x64xf32>
    %466 = vector.extract_strided_slice %461 {offsets = [0, 64], sizes = [8, 64], strides = [1, 1]} : vector<8x192xf32> to vector<8x64xf32>
    %467 = arith.mulf %466, %463 : vector<8x64xf32>
    %468 = arith.addf %465, %467 : vector<8x64xf32>
    %469 = vector.extract_strided_slice %461 {offsets = [0, 128], sizes = [8, 64], strides = [1, 1]} : vector<8x192xf32> to vector<8x64xf32>
    %470 = math.tanh %468 : vector<8x64xf32>
    %471 = arith.mulf %469, %470 : vector<8x64xf32>
    %472 = arith.index_cast %448 : i32 to index
    %c0_138 = arith.constant 0 : index
    %473 = vector.load %arg15[%472, %c0_138] : memref<128x128xf32, #tpu.memory_space<vmem>>, vector<8x64xf32>
    tpu.vector_store %arg15[%472, %c0_138], %471 {strides = array<i32>} : memref<128x128xf32, #tpu.memory_space<vmem>>, vector<8x64xf32>,
    %474 = arith.index_cast %451 : i32 to index
    %c64_139 = arith.constant 64 : index
    %475 = vector.load %arg15[%474, %c64_139] : memref<128x128xf32, #tpu.memory_space<vmem>>, vector<8x64xf32>
    tpu.vector_store %arg15[%474, %c64_139], %471 {strides = array<i32>} : memref<128x128xf32, #tpu.memory_space<vmem>>, vector<8x64xf32>,
    %c16_i32 = arith.constant 16 : i32
    %c0_140 = arith.constant 0 : index
    %c0_141 = arith.constant 0 : index
    %476 = vector.load %arg15[%c0_140, %c0_141] : memref<128x128xf32, #tpu.memory_space<vmem>>, vector<128x128xf32>
    %c1 = arith.constant 1 : index
    %c0_142 = arith.constant 0 : index
    %c0_143 = arith.constant 0 : index
    %477 = vector.load %arg2[%c1, %c0_142, %c0_143] : memref<3x128x256xf32, #tpu.memory_space<vmem>>, vector<1x128x256xf32>
    %478 = vector.shape_cast %477 : vector<1x128x256xf32> to vector<128x256xf32>
    %cst_144 = arith.constant dense<0.000000e+00> : vector<128x256xf32>
    %479 = tpu.matmul %476, %478, %cst_144 {dimension_numbers = #tpu.dot_dimension_numbers<[1], [0], [0], [1], [0, 0, 1, 1], [], []>} : vector<128x128xf32>, vector<128x256xf32>, vector<128x256xf32> -> vector<128x256xf32>
    %c1_145 = arith.constant 1 : index
    %c0_146 = arith.constant 0 : index
    %c0_147 = arith.constant 0 : index
    %480 = vector.load %arg4[%c1_145, %c0_146, %c0_147] : memref<3x1x256xf32, #tpu.memory_space<vmem>>, vector<1x1x256xf32>
    %481 = vector.shape_cast %480 : vector<1x1x256xf32> to vector<1x256xf32>
    %482 = vector.broadcast %481 : vector<1x256xf32> to vector<128x256xf32>
    %483 = arith.addf %479, %482 : vector<128x256xf32>
    %c0_148 = arith.constant 0 : index
    %c0_149 = arith.constant 0 : index
    %484 = vector.load %arg14[%c0_148, %c0_149] : memref<128x256xf32, #tpu.memory_space<vmem>>, vector<128x256xf32>
    tpu.vector_store %arg14[%c0_148, %c0_149], %483 {strides = array<i32>} : memref<128x256xf32, #tpu.memory_space<vmem>>, vector<128x256xf32>,
    %c1_150 = arith.constant 1 : index
    %c0_151 = arith.constant 0 : index
    %c0_152 = arith.constant 0 : index
    %485 = vector.load %arg3[%c1_150, %c0_151, %c0_152] : memref<3x64x256xf32, #tpu.memory_space<vmem>>, vector<1x64x256xf32>
    %486 = vector.shape_cast %485 : vector<1x64x256xf32> to vector<64x256xf32>
    %cst_153 = arith.constant 0.000000e+00 : f32
    %487 = vector.broadcast %cst_153 : f32 to vector<8x64xf32>
    %c0_i32_154 = arith.constant 0 : i32
    %c8_i32_155 = arith.constant 8 : i32
    %488 = arith.muli %c0_i32_154, %c8_i32_155 : i32
    %489 = tpu.assume_multiple %488, 8 : i32
    %c15_i32_156 = arith.constant 15 : i32
    %490 = arith.subi %c15_i32_156, %c0_i32_154 : i32
    %c8_i32_157 = arith.constant 8 : i32
    %491 = arith.muli %490, %c8_i32_157 : i32
    %492 = tpu.assume_multiple %491, 8 : i32
    %493 = arith.index_cast %489 : i32 to index
    %c0_158 = arith.constant 0 : index
    %494 = vector.load %arg14[%493, %c0_158] : memref<128x256xf32, #tpu.memory_space<vmem>>, vector<8x256xf32>
    %cst_159 = arith.constant dense<0.000000e+00> : vector<8x256xf32>
    %495 = tpu.matmul %487, %486, %cst_159 {dimension_numbers = #tpu.dot_dimension_numbers<[1], [0], [0], [1], [0, 0, 1, 1], [], []>} : vector<8x64xf32>, vector<64x256xf32>, vector<8x256xf32> -> vector<8x256xf32>
    %496 = arith.addf %494, %495 : vector<8x256xf32>
    %497 = vector.extract_strided_slice %496 {offsets = [0, 0], sizes = [8, 192], strides = [1, 1]} : vector<8x256xf32> to vector<8x192xf32>
    %498 = arith.negf %497 : vector<8x192xf32>
    %499 = math.exp %498 : vector<8x192xf32>
    %cst_160 = arith.constant 1.000000e+00 : f32
    %500 = vector.broadcast %cst_160 : f32 to vector<8x192xf32>
    %501 = arith.addf %500, %499 : vector<8x192xf32>
    %502 = arith.divf %500, %501 : vector<8x192xf32>
    %503 = vector.extract_strided_slice %496 {offsets = [0, 192], sizes = [8, 64], strides = [1, 1]} : vector<8x256xf32> to vector<8x64xf32>
    %504 = math.tanh %503 : vector<8x64xf32>
    %505 = vector.extract_strided_slice %502 {offsets = [0, 0], sizes = [8, 64], strides = [1, 1]} : vector<8x192xf32> to vector<8x64xf32>
    %506 = arith.mulf %505, %487 : vector<8x64xf32>
    %507 = vector.extract_strided_slice %502 {offsets = [0, 64], sizes = [8, 64], strides = [1, 1]} : vector<8x192xf32> to vector<8x64xf32>
    %508 = arith.mulf %507, %504 : vector<8x64xf32>
    %509 = arith.addf %506, %508 : vector<8x64xf32>
    %510 = vector.extract_strided_slice %502 {offsets = [0, 128], sizes = [8, 64], strides = [1, 1]} : vector<8x192xf32> to vector<8x64xf32>
    %511 = math.tanh %509 : vector<8x64xf32>
    %512 = arith.mulf %510, %511 : vector<8x64xf32>
    %513 = arith.index_cast %489 : i32 to index
    %c0_161 = arith.constant 0 : index
    %514 = vector.load %arg15[%513, %c0_161] : memref<128x128xf32, #tpu.memory_space<vmem>>, vector<8x64xf32>
    tpu.vector_store %arg15[%513, %c0_161], %512 {strides = array<i32>} : memref<128x128xf32, #tpu.memory_space<vmem>>, vector<8x64xf32>,
    %515 = arith.index_cast %492 : i32 to index
    %c64_162 = arith.constant 64 : index
    %516 = vector.load %arg15[%515, %c64_162] : memref<128x128xf32, #tpu.memory_space<vmem>>, vector<8x64xf32>
    tpu.vector_store %arg15[%515, %c64_162], %512 {strides = array<i32>} : memref<128x128xf32, #tpu.memory_space<vmem>>, vector<8x64xf32>,
    %c1_i32_163 = arith.constant 1 : i32
    %c8_i32_164 = arith.constant 8 : i32
    %517 = arith.muli %c1_i32_163, %c8_i32_164 : i32
    %518 = tpu.assume_multiple %517, 8 : i32
    %c15_i32_165 = arith.constant 15 : i32
    %519 = arith.subi %c15_i32_165, %c1_i32_163 : i32
    %c8_i32_166 = arith.constant 8 : i32
    %520 = arith.muli %519, %c8_i32_166 : i32
    %521 = tpu.assume_multiple %520, 8 : i32
    %522 = arith.index_cast %518 : i32 to index
    %c0_167 = arith.constant 0 : index
    %523 = vector.load %arg14[%522, %c0_167] : memref<128x256xf32, #tpu.memory_space<vmem>>, vector<8x256xf32>
    %cst_168 = arith.constant dense<0.000000e+00> : vector<8x256xf32>
    %524 = tpu.matmul %512, %486, %cst_168 {dimension_numbers = #tpu.dot_dimension_numbers<[1], [0], [0], [1], [0, 0, 1, 1], [], []>} : vector<8x64xf32>, vector<64x256xf32>, vector<8x256xf32> -> vector<8x256xf32>
    %525 = arith.addf %523, %524 : vector<8x256xf32>
    %526 = vector.extract_strided_slice %525 {offsets = [0, 0], sizes = [8, 192], strides = [1, 1]} : vector<8x256xf32> to vector<8x192xf32>
    %527 = arith.negf %526 : vector<8x192xf32>
    %528 = math.exp %527 : vector<8x192xf32>
    %cst_169 = arith.constant 1.000000e+00 : f32
    %529 = vector.broadcast %cst_169 : f32 to vector<8x192xf32>
    %530 = arith.addf %529, %528 : vector<8x192xf32>
    %531 = arith.divf %529, %530 : vector<8x192xf32>
    %532 = vector.extract_strided_slice %525 {offsets = [0, 192], sizes = [8, 64], strides = [1, 1]} : vector<8x256xf32> to vector<8x64xf32>
    %533 = math.tanh %532 : vector<8x64xf32>
    %534 = vector.extract_strided_slice %531 {offsets = [0, 0], sizes = [8, 64], strides = [1, 1]} : vector<8x192xf32> to vector<8x64xf32>
    %535 = arith.mulf %534, %509 : vector<8x64xf32>
    %536 = vector.extract_strided_slice %531 {offsets = [0, 64], sizes = [8, 64], strides = [1, 1]} : vector<8x192xf32> to vector<8x64xf32>
    %537 = arith.mulf %536, %533 : vector<8x64xf32>
    %538 = arith.addf %535, %537 : vector<8x64xf32>
    %539 = vector.extract_strided_slice %531 {offsets = [0, 128], sizes = [8, 64], strides = [1, 1]} : vector<8x192xf32> to vector<8x64xf32>
    %540 = math.tanh %538 : vector<8x64xf32>
    %541 = arith.mulf %539, %540 : vector<8x64xf32>
    %542 = arith.index_cast %518 : i32 to index
    %c0_170 = arith.constant 0 : index
    %543 = vector.load %arg15[%542, %c0_170] : memref<128x128xf32, #tpu.memory_space<vmem>>, vector<8x64xf32>
    tpu.vector_store %arg15[%542, %c0_170], %541 {strides = array<i32>} : memref<128x128xf32, #tpu.memory_space<vmem>>, vector<8x64xf32>,
    %544 = arith.index_cast %521 : i32 to index
    %c64_171 = arith.constant 64 : index
    %545 = vector.load %arg15[%544, %c64_171] : memref<128x128xf32, #tpu.memory_space<vmem>>, vector<8x64xf32>
    tpu.vector_store %arg15[%544, %c64_171], %541 {strides = array<i32>} : memref<128x128xf32, #tpu.memory_space<vmem>>, vector<8x64xf32>,
    %c2_i32_172 = arith.constant 2 : i32
    %c8_i32_173 = arith.constant 8 : i32
    %546 = arith.muli %c2_i32_172, %c8_i32_173 : i32
    %547 = tpu.assume_multiple %546, 8 : i32
    %c15_i32_174 = arith.constant 15 : i32
    %548 = arith.subi %c15_i32_174, %c2_i32_172 : i32
    %c8_i32_175 = arith.constant 8 : i32
    %549 = arith.muli %548, %c8_i32_175 : i32
    %550 = tpu.assume_multiple %549, 8 : i32
    %551 = arith.index_cast %547 : i32 to index
    %c0_176 = arith.constant 0 : index
    %552 = vector.load %arg14[%551, %c0_176] : memref<128x256xf32, #tpu.memory_space<vmem>>, vector<8x256xf32>
    %cst_177 = arith.constant dense<0.000000e+00> : vector<8x256xf32>
    %553 = tpu.matmul %541, %486, %cst_177 {dimension_numbers = #tpu.dot_dimension_numbers<[1], [0], [0], [1], [0, 0, 1, 1], [], []>} : vector<8x64xf32>, vector<64x256xf32>, vector<8x256xf32> -> vector<8x256xf32>
    %554 = arith.addf %552, %553 : vector<8x256xf32>
    %555 = vector.extract_strided_slice %554 {offsets = [0, 0], sizes = [8, 192], strides = [1, 1]} : vector<8x256xf32> to vector<8x192xf32>
    %556 = arith.negf %555 : vector<8x192xf32>
    %557 = math.exp %556 : vector<8x192xf32>
    %cst_178 = arith.constant 1.000000e+00 : f32
    %558 = vector.broadcast %cst_178 : f32 to vector<8x192xf32>
    %559 = arith.addf %558, %557 : vector<8x192xf32>
    %560 = arith.divf %558, %559 : vector<8x192xf32>
    %561 = vector.extract_strided_slice %554 {offsets = [0, 192], sizes = [8, 64], strides = [1, 1]} : vector<8x256xf32> to vector<8x64xf32>
    %562 = math.tanh %561 : vector<8x64xf32>
    %563 = vector.extract_strided_slice %560 {offsets = [0, 0], sizes = [8, 64], strides = [1, 1]} : vector<8x192xf32> to vector<8x64xf32>
    %564 = arith.mulf %563, %538 : vector<8x64xf32>
    %565 = vector.extract_strided_slice %560 {offsets = [0, 64], sizes = [8, 64], strides = [1, 1]} : vector<8x192xf32> to vector<8x64xf32>
    %566 = arith.mulf %565, %562 : vector<8x64xf32>
    %567 = arith.addf %564, %566 : vector<8x64xf32>
    %568 = vector.extract_strided_slice %560 {offsets = [0, 128], sizes = [8, 64], strides = [1, 1]} : vector<8x192xf32> to vector<8x64xf32>
    %569 = math.tanh %567 : vector<8x64xf32>
    %570 = arith.mulf %568, %569 : vector<8x64xf32>
    %571 = arith.index_cast %547 : i32 to index
    %c0_179 = arith.constant 0 : index
    %572 = vector.load %arg15[%571, %c0_179] : memref<128x128xf32, #tpu.memory_space<vmem>>, vector<8x64xf32>
    tpu.vector_store %arg15[%571, %c0_179], %570 {strides = array<i32>} : memref<128x128xf32, #tpu.memory_space<vmem>>, vector<8x64xf32>,
    %573 = arith.index_cast %550 : i32 to index
    %c64_180 = arith.constant 64 : index
    %574 = vector.load %arg15[%573, %c64_180] : memref<128x128xf32, #tpu.memory_space<vmem>>, vector<8x64xf32>
    tpu.vector_store %arg15[%573, %c64_180], %570 {strides = array<i32>} : memref<128x128xf32, #tpu.memory_space<vmem>>, vector<8x64xf32>,
    %c3_i32_181 = arith.constant 3 : i32
    %c8_i32_182 = arith.constant 8 : i32
    %575 = arith.muli %c3_i32_181, %c8_i32_182 : i32
    %576 = tpu.assume_multiple %575, 8 : i32
    %c15_i32_183 = arith.constant 15 : i32
    %577 = arith.subi %c15_i32_183, %c3_i32_181 : i32
    %c8_i32_184 = arith.constant 8 : i32
    %578 = arith.muli %577, %c8_i32_184 : i32
    %579 = tpu.assume_multiple %578, 8 : i32
    %580 = arith.index_cast %576 : i32 to index
    %c0_185 = arith.constant 0 : index
    %581 = vector.load %arg14[%580, %c0_185] : memref<128x256xf32, #tpu.memory_space<vmem>>, vector<8x256xf32>
    %cst_186 = arith.constant dense<0.000000e+00> : vector<8x256xf32>
    %582 = tpu.matmul %570, %486, %cst_186 {dimension_numbers = #tpu.dot_dimension_numbers<[1], [0], [0], [1], [0, 0, 1, 1], [], []>} : vector<8x64xf32>, vector<64x256xf32>, vector<8x256xf32> -> vector<8x256xf32>
    %583 = arith.addf %581, %582 : vector<8x256xf32>
    %584 = vector.extract_strided_slice %583 {offsets = [0, 0], sizes = [8, 192], strides = [1, 1]} : vector<8x256xf32> to vector<8x192xf32>
    %585 = arith.negf %584 : vector<8x192xf32>
    %586 = math.exp %585 : vector<8x192xf32>
    %cst_187 = arith.constant 1.000000e+00 : f32
    %587 = vector.broadcast %cst_187 : f32 to vector<8x192xf32>
    %588 = arith.addf %587, %586 : vector<8x192xf32>
    %589 = arith.divf %587, %588 : vector<8x192xf32>
    %590 = vector.extract_strided_slice %583 {offsets = [0, 192], sizes = [8, 64], strides = [1, 1]} : vector<8x256xf32> to vector<8x64xf32>
    %591 = math.tanh %590 : vector<8x64xf32>
    %592 = vector.extract_strided_slice %589 {offsets = [0, 0], sizes = [8, 64], strides = [1, 1]} : vector<8x192xf32> to vector<8x64xf32>
    %593 = arith.mulf %592, %567 : vector<8x64xf32>
    %594 = vector.extract_strided_slice %589 {offsets = [0, 64], sizes = [8, 64], strides = [1, 1]} : vector<8x192xf32> to vector<8x64xf32>
    %595 = arith.mulf %594, %591 : vector<8x64xf32>
    %596 = arith.addf %593, %595 : vector<8x64xf32>
    %597 = vector.extract_strided_slice %589 {offsets = [0, 128], sizes = [8, 64], strides = [1, 1]} : vector<8x192xf32> to vector<8x64xf32>
    %598 = math.tanh %596 : vector<8x64xf32>
    %599 = arith.mulf %597, %598 : vector<8x64xf32>
    %600 = arith.index_cast %576 : i32 to index
    %c0_188 = arith.constant 0 : index
    %601 = vector.load %arg15[%600, %c0_188] : memref<128x128xf32, #tpu.memory_space<vmem>>, vector<8x64xf32>
    tpu.vector_store %arg15[%600, %c0_188], %599 {strides = array<i32>} : memref<128x128xf32, #tpu.memory_space<vmem>>, vector<8x64xf32>,
    %602 = arith.index_cast %579 : i32 to index
    %c64_189 = arith.constant 64 : index
    %603 = vector.load %arg15[%602, %c64_189] : memref<128x128xf32, #tpu.memory_space<vmem>>, vector<8x64xf32>
    tpu.vector_store %arg15[%602, %c64_189], %599 {strides = array<i32>} : memref<128x128xf32, #tpu.memory_space<vmem>>, vector<8x64xf32>,
    %c4_i32_190 = arith.constant 4 : i32
    %c8_i32_191 = arith.constant 8 : i32
    %604 = arith.muli %c4_i32_190, %c8_i32_191 : i32
    %605 = tpu.assume_multiple %604, 8 : i32
    %c15_i32_192 = arith.constant 15 : i32
    %606 = arith.subi %c15_i32_192, %c4_i32_190 : i32
    %c8_i32_193 = arith.constant 8 : i32
    %607 = arith.muli %606, %c8_i32_193 : i32
    %608 = tpu.assume_multiple %607, 8 : i32
    %609 = arith.index_cast %605 : i32 to index
    %c0_194 = arith.constant 0 : index
    %610 = vector.load %arg14[%609, %c0_194] : memref<128x256xf32, #tpu.memory_space<vmem>>, vector<8x256xf32>
    %cst_195 = arith.constant dense<0.000000e+00> : vector<8x256xf32>
    %611 = tpu.matmul %599, %486, %cst_195 {dimension_numbers = #tpu.dot_dimension_numbers<[1], [0], [0], [1], [0, 0, 1, 1], [], []>} : vector<8x64xf32>, vector<64x256xf32>, vector<8x256xf32> -> vector<8x256xf32>
    %612 = arith.addf %610, %611 : vector<8x256xf32>
    %613 = vector.extract_strided_slice %612 {offsets = [0, 0], sizes = [8, 192], strides = [1, 1]} : vector<8x256xf32> to vector<8x192xf32>
    %614 = arith.negf %613 : vector<8x192xf32>
    %615 = math.exp %614 : vector<8x192xf32>
    %cst_196 = arith.constant 1.000000e+00 : f32
    %616 = vector.broadcast %cst_196 : f32 to vector<8x192xf32>
    %617 = arith.addf %616, %615 : vector<8x192xf32>
    %618 = arith.divf %616, %617 : vector<8x192xf32>
    %619 = vector.extract_strided_slice %612 {offsets = [0, 192], sizes = [8, 64], strides = [1, 1]} : vector<8x256xf32> to vector<8x64xf32>
    %620 = math.tanh %619 : vector<8x64xf32>
    %621 = vector.extract_strided_slice %618 {offsets = [0, 0], sizes = [8, 64], strides = [1, 1]} : vector<8x192xf32> to vector<8x64xf32>
    %622 = arith.mulf %621, %596 : vector<8x64xf32>
    %623 = vector.extract_strided_slice %618 {offsets = [0, 64], sizes = [8, 64], strides = [1, 1]} : vector<8x192xf32> to vector<8x64xf32>
    %624 = arith.mulf %623, %620 : vector<8x64xf32>
    %625 = arith.addf %622, %624 : vector<8x64xf32>
    %626 = vector.extract_strided_slice %618 {offsets = [0, 128], sizes = [8, 64], strides = [1, 1]} : vector<8x192xf32> to vector<8x64xf32>
    %627 = math.tanh %625 : vector<8x64xf32>
    %628 = arith.mulf %626, %627 : vector<8x64xf32>
    %629 = arith.index_cast %605 : i32 to index
    %c0_197 = arith.constant 0 : index
    %630 = vector.load %arg15[%629, %c0_197] : memref<128x128xf32, #tpu.memory_space<vmem>>, vector<8x64xf32>
    tpu.vector_store %arg15[%629, %c0_197], %628 {strides = array<i32>} : memref<128x128xf32, #tpu.memory_space<vmem>>, vector<8x64xf32>,
    %631 = arith.index_cast %608 : i32 to index
    %c64_198 = arith.constant 64 : index
    %632 = vector.load %arg15[%631, %c64_198] : memref<128x128xf32, #tpu.memory_space<vmem>>, vector<8x64xf32>
    tpu.vector_store %arg15[%631, %c64_198], %628 {strides = array<i32>} : memref<128x128xf32, #tpu.memory_space<vmem>>, vector<8x64xf32>,
    %c5_i32_199 = arith.constant 5 : i32
    %c8_i32_200 = arith.constant 8 : i32
    %633 = arith.muli %c5_i32_199, %c8_i32_200 : i32
    %634 = tpu.assume_multiple %633, 8 : i32
    %c15_i32_201 = arith.constant 15 : i32
    %635 = arith.subi %c15_i32_201, %c5_i32_199 : i32
    %c8_i32_202 = arith.constant 8 : i32
    %636 = arith.muli %635, %c8_i32_202 : i32
    %637 = tpu.assume_multiple %636, 8 : i32
    %638 = arith.index_cast %634 : i32 to index
    %c0_203 = arith.constant 0 : index
    %639 = vector.load %arg14[%638, %c0_203] : memref<128x256xf32, #tpu.memory_space<vmem>>, vector<8x256xf32>
    %cst_204 = arith.constant dense<0.000000e+00> : vector<8x256xf32>
    %640 = tpu.matmul %628, %486, %cst_204 {dimension_numbers = #tpu.dot_dimension_numbers<[1], [0], [0], [1], [0, 0, 1, 1], [], []>} : vector<8x64xf32>, vector<64x256xf32>, vector<8x256xf32> -> vector<8x256xf32>
    %641 = arith.addf %639, %640 : vector<8x256xf32>
    %642 = vector.extract_strided_slice %641 {offsets = [0, 0], sizes = [8, 192], strides = [1, 1]} : vector<8x256xf32> to vector<8x192xf32>
    %643 = arith.negf %642 : vector<8x192xf32>
    %644 = math.exp %643 : vector<8x192xf32>
    %cst_205 = arith.constant 1.000000e+00 : f32
    %645 = vector.broadcast %cst_205 : f32 to vector<8x192xf32>
    %646 = arith.addf %645, %644 : vector<8x192xf32>
    %647 = arith.divf %645, %646 : vector<8x192xf32>
    %648 = vector.extract_strided_slice %641 {offsets = [0, 192], sizes = [8, 64], strides = [1, 1]} : vector<8x256xf32> to vector<8x64xf32>
    %649 = math.tanh %648 : vector<8x64xf32>
    %650 = vector.extract_strided_slice %647 {offsets = [0, 0], sizes = [8, 64], strides = [1, 1]} : vector<8x192xf32> to vector<8x64xf32>
    %651 = arith.mulf %650, %625 : vector<8x64xf32>
    %652 = vector.extract_strided_slice %647 {offsets = [0, 64], sizes = [8, 64], strides = [1, 1]} : vector<8x192xf32> to vector<8x64xf32>
    %653 = arith.mulf %652, %649 : vector<8x64xf32>
    %654 = arith.addf %651, %653 : vector<8x64xf32>
    %655 = vector.extract_strided_slice %647 {offsets = [0, 128], sizes = [8, 64], strides = [1, 1]} : vector<8x192xf32> to vector<8x64xf32>
    %656 = math.tanh %654 : vector<8x64xf32>
    %657 = arith.mulf %655, %656 : vector<8x64xf32>
    %658 = arith.index_cast %634 : i32 to index
    %c0_206 = arith.constant 0 : index
    %659 = vector.load %arg15[%658, %c0_206] : memref<128x128xf32, #tpu.memory_space<vmem>>, vector<8x64xf32>
    tpu.vector_store %arg15[%658, %c0_206], %657 {strides = array<i32>} : memref<128x128xf32, #tpu.memory_space<vmem>>, vector<8x64xf32>,
    %660 = arith.index_cast %637 : i32 to index
    %c64_207 = arith.constant 64 : index
    %661 = vector.load %arg15[%660, %c64_207] : memref<128x128xf32, #tpu.memory_space<vmem>>, vector<8x64xf32>
    tpu.vector_store %arg15[%660, %c64_207], %657 {strides = array<i32>} : memref<128x128xf32, #tpu.memory_space<vmem>>, vector<8x64xf32>,
    %c6_i32_208 = arith.constant 6 : i32
    %c8_i32_209 = arith.constant 8 : i32
    %662 = arith.muli %c6_i32_208, %c8_i32_209 : i32
    %663 = tpu.assume_multiple %662, 8 : i32
    %c15_i32_210 = arith.constant 15 : i32
    %664 = arith.subi %c15_i32_210, %c6_i32_208 : i32
    %c8_i32_211 = arith.constant 8 : i32
    %665 = arith.muli %664, %c8_i32_211 : i32
    %666 = tpu.assume_multiple %665, 8 : i32
    %667 = arith.index_cast %663 : i32 to index
    %c0_212 = arith.constant 0 : index
    %668 = vector.load %arg14[%667, %c0_212] : memref<128x256xf32, #tpu.memory_space<vmem>>, vector<8x256xf32>
    %cst_213 = arith.constant dense<0.000000e+00> : vector<8x256xf32>
    %669 = tpu.matmul %657, %486, %cst_213 {dimension_numbers = #tpu.dot_dimension_numbers<[1], [0], [0], [1], [0, 0, 1, 1], [], []>} : vector<8x64xf32>, vector<64x256xf32>, vector<8x256xf32> -> vector<8x256xf32>
    %670 = arith.addf %668, %669 : vector<8x256xf32>
    %671 = vector.extract_strided_slice %670 {offsets = [0, 0], sizes = [8, 192], strides = [1, 1]} : vector<8x256xf32> to vector<8x192xf32>
    %672 = arith.negf %671 : vector<8x192xf32>
    %673 = math.exp %672 : vector<8x192xf32>
    %cst_214 = arith.constant 1.000000e+00 : f32
    %674 = vector.broadcast %cst_214 : f32 to vector<8x192xf32>
    %675 = arith.addf %674, %673 : vector<8x192xf32>
    %676 = arith.divf %674, %675 : vector<8x192xf32>
    %677 = vector.extract_strided_slice %670 {offsets = [0, 192], sizes = [8, 64], strides = [1, 1]} : vector<8x256xf32> to vector<8x64xf32>
    %678 = math.tanh %677 : vector<8x64xf32>
    %679 = vector.extract_strided_slice %676 {offsets = [0, 0], sizes = [8, 64], strides = [1, 1]} : vector<8x192xf32> to vector<8x64xf32>
    %680 = arith.mulf %679, %654 : vector<8x64xf32>
    %681 = vector.extract_strided_slice %676 {offsets = [0, 64], sizes = [8, 64], strides = [1, 1]} : vector<8x192xf32> to vector<8x64xf32>
    %682 = arith.mulf %681, %678 : vector<8x64xf32>
    %683 = arith.addf %680, %682 : vector<8x64xf32>
    %684 = vector.extract_strided_slice %676 {offsets = [0, 128], sizes = [8, 64], strides = [1, 1]} : vector<8x192xf32> to vector<8x64xf32>
    %685 = math.tanh %683 : vector<8x64xf32>
    %686 = arith.mulf %684, %685 : vector<8x64xf32>
    %687 = arith.index_cast %663 : i32 to index
    %c0_215 = arith.constant 0 : index
    %688 = vector.load %arg15[%687, %c0_215] : memref<128x128xf32, #tpu.memory_space<vmem>>, vector<8x64xf32>
    tpu.vector_store %arg15[%687, %c0_215], %686 {strides = array<i32>} : memref<128x128xf32, #tpu.memory_space<vmem>>, vector<8x64xf32>,
    %689 = arith.index_cast %666 : i32 to index
    %c64_216 = arith.constant 64 : index
    %690 = vector.load %arg15[%689, %c64_216] : memref<128x128xf32, #tpu.memory_space<vmem>>, vector<8x64xf32>
    tpu.vector_store %arg15[%689, %c64_216], %686 {strides = array<i32>} : memref<128x128xf32, #tpu.memory_space<vmem>>, vector<8x64xf32>,
    %c7_i32_217 = arith.constant 7 : i32
    %c8_i32_218 = arith.constant 8 : i32
    %691 = arith.muli %c7_i32_217, %c8_i32_218 : i32
    %692 = tpu.assume_multiple %691, 8 : i32
    %c15_i32_219 = arith.constant 15 : i32
    %693 = arith.subi %c15_i32_219, %c7_i32_217 : i32
    %c8_i32_220 = arith.constant 8 : i32
    %694 = arith.muli %693, %c8_i32_220 : i32
    %695 = tpu.assume_multiple %694, 8 : i32
    %696 = arith.index_cast %692 : i32 to index
    %c0_221 = arith.constant 0 : index
    %697 = vector.load %arg14[%696, %c0_221] : memref<128x256xf32, #tpu.memory_space<vmem>>, vector<8x256xf32>
    %cst_222 = arith.constant dense<0.000000e+00> : vector<8x256xf32>
    %698 = tpu.matmul %686, %486, %cst_222 {dimension_numbers = #tpu.dot_dimension_numbers<[1], [0], [0], [1], [0, 0, 1, 1], [], []>} : vector<8x64xf32>, vector<64x256xf32>, vector<8x256xf32> -> vector<8x256xf32>
    %699 = arith.addf %697, %698 : vector<8x256xf32>
    %700 = vector.extract_strided_slice %699 {offsets = [0, 0], sizes = [8, 192], strides = [1, 1]} : vector<8x256xf32> to vector<8x192xf32>
    %701 = arith.negf %700 : vector<8x192xf32>
    %702 = math.exp %701 : vector<8x192xf32>
    %cst_223 = arith.constant 1.000000e+00 : f32
    %703 = vector.broadcast %cst_223 : f32 to vector<8x192xf32>
    %704 = arith.addf %703, %702 : vector<8x192xf32>
    %705 = arith.divf %703, %704 : vector<8x192xf32>
    %706 = vector.extract_strided_slice %699 {offsets = [0, 192], sizes = [8, 64], strides = [1, 1]} : vector<8x256xf32> to vector<8x64xf32>
    %707 = math.tanh %706 : vector<8x64xf32>
    %708 = vector.extract_strided_slice %705 {offsets = [0, 0], sizes = [8, 64], strides = [1, 1]} : vector<8x192xf32> to vector<8x64xf32>
    %709 = arith.mulf %708, %683 : vector<8x64xf32>
    %710 = vector.extract_strided_slice %705 {offsets = [0, 64], sizes = [8, 64], strides = [1, 1]} : vector<8x192xf32> to vector<8x64xf32>
    %711 = arith.mulf %710, %707 : vector<8x64xf32>
    %712 = arith.addf %709, %711 : vector<8x64xf32>
    %713 = vector.extract_strided_slice %705 {offsets = [0, 128], sizes = [8, 64], strides = [1, 1]} : vector<8x192xf32> to vector<8x64xf32>
    %714 = math.tanh %712 : vector<8x64xf32>
    %715 = arith.mulf %713, %714 : vector<8x64xf32>
    %716 = arith.index_cast %692 : i32 to index
    %c0_224 = arith.constant 0 : index
    %717 = vector.load %arg15[%716, %c0_224] : memref<128x128xf32, #tpu.memory_space<vmem>>, vector<8x64xf32>
    tpu.vector_store %arg15[%716, %c0_224], %715 {strides = array<i32>} : memref<128x128xf32, #tpu.memory_space<vmem>>, vector<8x64xf32>,
    %718 = arith.index_cast %695 : i32 to index
    %c64_225 = arith.constant 64 : index
    %719 = vector.load %arg15[%718, %c64_225] : memref<128x128xf32, #tpu.memory_space<vmem>>, vector<8x64xf32>
    tpu.vector_store %arg15[%718, %c64_225], %715 {strides = array<i32>} : memref<128x128xf32, #tpu.memory_space<vmem>>, vector<8x64xf32>,
    %c8_i32_226 = arith.constant 8 : i32
    %c8_i32_227 = arith.constant 8 : i32
    %720 = arith.muli %c8_i32_226, %c8_i32_227 : i32
    %721 = tpu.assume_multiple %720, 8 : i32
    %c15_i32_228 = arith.constant 15 : i32
    %722 = arith.subi %c15_i32_228, %c8_i32_226 : i32
    %c8_i32_229 = arith.constant 8 : i32
    %723 = arith.muli %722, %c8_i32_229 : i32
    %724 = tpu.assume_multiple %723, 8 : i32
    %725 = arith.index_cast %721 : i32 to index
    %c0_230 = arith.constant 0 : index
    %726 = vector.load %arg14[%725, %c0_230] : memref<128x256xf32, #tpu.memory_space<vmem>>, vector<8x256xf32>
    %cst_231 = arith.constant dense<0.000000e+00> : vector<8x256xf32>
    %727 = tpu.matmul %715, %486, %cst_231 {dimension_numbers = #tpu.dot_dimension_numbers<[1], [0], [0], [1], [0, 0, 1, 1], [], []>} : vector<8x64xf32>, vector<64x256xf32>, vector<8x256xf32> -> vector<8x256xf32>
    %728 = arith.addf %726, %727 : vector<8x256xf32>
    %729 = vector.extract_strided_slice %728 {offsets = [0, 0], sizes = [8, 192], strides = [1, 1]} : vector<8x256xf32> to vector<8x192xf32>
    %730 = arith.negf %729 : vector<8x192xf32>
    %731 = math.exp %730 : vector<8x192xf32>
    %cst_232 = arith.constant 1.000000e+00 : f32
    %732 = vector.broadcast %cst_232 : f32 to vector<8x192xf32>
    %733 = arith.addf %732, %731 : vector<8x192xf32>
    %734 = arith.divf %732, %733 : vector<8x192xf32>
    %735 = vector.extract_strided_slice %728 {offsets = [0, 192], sizes = [8, 64], strides = [1, 1]} : vector<8x256xf32> to vector<8x64xf32>
    %736 = math.tanh %735 : vector<8x64xf32>
    %737 = vector.extract_strided_slice %734 {offsets = [0, 0], sizes = [8, 64], strides = [1, 1]} : vector<8x192xf32> to vector<8x64xf32>
    %738 = arith.mulf %737, %712 : vector<8x64xf32>
    %739 = vector.extract_strided_slice %734 {offsets = [0, 64], sizes = [8, 64], strides = [1, 1]} : vector<8x192xf32> to vector<8x64xf32>
    %740 = arith.mulf %739, %736 : vector<8x64xf32>
    %741 = arith.addf %738, %740 : vector<8x64xf32>
    %742 = vector.extract_strided_slice %734 {offsets = [0, 128], sizes = [8, 64], strides = [1, 1]} : vector<8x192xf32> to vector<8x64xf32>
    %743 = math.tanh %741 : vector<8x64xf32>
    %744 = arith.mulf %742, %743 : vector<8x64xf32>
    %745 = arith.index_cast %721 : i32 to index
    %c0_233 = arith.constant 0 : index
    %746 = vector.load %arg15[%745, %c0_233] : memref<128x128xf32, #tpu.memory_space<vmem>>, vector<8x64xf32>
    tpu.vector_store %arg15[%745, %c0_233], %744 {strides = array<i32>} : memref<128x128xf32, #tpu.memory_space<vmem>>, vector<8x64xf32>,
    %747 = arith.index_cast %724 : i32 to index
    %c64_234 = arith.constant 64 : index
    %748 = vector.load %arg15[%747, %c64_234] : memref<128x128xf32, #tpu.memory_space<vmem>>, vector<8x64xf32>
    tpu.vector_store %arg15[%747, %c64_234], %744 {strides = array<i32>} : memref<128x128xf32, #tpu.memory_space<vmem>>, vector<8x64xf32>,
    %c9_i32_235 = arith.constant 9 : i32
    %c8_i32_236 = arith.constant 8 : i32
    %749 = arith.muli %c9_i32_235, %c8_i32_236 : i32
    %750 = tpu.assume_multiple %749, 8 : i32
    %c15_i32_237 = arith.constant 15 : i32
    %751 = arith.subi %c15_i32_237, %c9_i32_235 : i32
    %c8_i32_238 = arith.constant 8 : i32
    %752 = arith.muli %751, %c8_i32_238 : i32
    %753 = tpu.assume_multiple %752, 8 : i32
    %754 = arith.index_cast %750 : i32 to index
    %c0_239 = arith.constant 0 : index
    %755 = vector.load %arg14[%754, %c0_239] : memref<128x256xf32, #tpu.memory_space<vmem>>, vector<8x256xf32>
    %cst_240 = arith.constant dense<0.000000e+00> : vector<8x256xf32>
    %756 = tpu.matmul %744, %486, %cst_240 {dimension_numbers = #tpu.dot_dimension_numbers<[1], [0], [0], [1], [0, 0, 1, 1], [], []>} : vector<8x64xf32>, vector<64x256xf32>, vector<8x256xf32> -> vector<8x256xf32>
    %757 = arith.addf %755, %756 : vector<8x256xf32>
    %758 = vector.extract_strided_slice %757 {offsets = [0, 0], sizes = [8, 192], strides = [1, 1]} : vector<8x256xf32> to vector<8x192xf32>
    %759 = arith.negf %758 : vector<8x192xf32>
    %760 = math.exp %759 : vector<8x192xf32>
    %cst_241 = arith.constant 1.000000e+00 : f32
    %761 = vector.broadcast %cst_241 : f32 to vector<8x192xf32>
    %762 = arith.addf %761, %760 : vector<8x192xf32>
    %763 = arith.divf %761, %762 : vector<8x192xf32>
    %764 = vector.extract_strided_slice %757 {offsets = [0, 192], sizes = [8, 64], strides = [1, 1]} : vector<8x256xf32> to vector<8x64xf32>
    %765 = math.tanh %764 : vector<8x64xf32>
    %766 = vector.extract_strided_slice %763 {offsets = [0, 0], sizes = [8, 64], strides = [1, 1]} : vector<8x192xf32> to vector<8x64xf32>
    %767 = arith.mulf %766, %741 : vector<8x64xf32>
    %768 = vector.extract_strided_slice %763 {offsets = [0, 64], sizes = [8, 64], strides = [1, 1]} : vector<8x192xf32> to vector<8x64xf32>
    %769 = arith.mulf %768, %765 : vector<8x64xf32>
    %770 = arith.addf %767, %769 : vector<8x64xf32>
    %771 = vector.extract_strided_slice %763 {offsets = [0, 128], sizes = [8, 64], strides = [1, 1]} : vector<8x192xf32> to vector<8x64xf32>
    %772 = math.tanh %770 : vector<8x64xf32>
    %773 = arith.mulf %771, %772 : vector<8x64xf32>
    %774 = arith.index_cast %750 : i32 to index
    %c0_242 = arith.constant 0 : index
    %775 = vector.load %arg15[%774, %c0_242] : memref<128x128xf32, #tpu.memory_space<vmem>>, vector<8x64xf32>
    tpu.vector_store %arg15[%774, %c0_242], %773 {strides = array<i32>} : memref<128x128xf32, #tpu.memory_space<vmem>>, vector<8x64xf32>,
    %776 = arith.index_cast %753 : i32 to index
    %c64_243 = arith.constant 64 : index
    %777 = vector.load %arg15[%776, %c64_243] : memref<128x128xf32, #tpu.memory_space<vmem>>, vector<8x64xf32>
    tpu.vector_store %arg15[%776, %c64_243], %773 {strides = array<i32>} : memref<128x128xf32, #tpu.memory_space<vmem>>, vector<8x64xf32>,
    %c10_i32_244 = arith.constant 10 : i32
    %c8_i32_245 = arith.constant 8 : i32
    %778 = arith.muli %c10_i32_244, %c8_i32_245 : i32
    %779 = tpu.assume_multiple %778, 8 : i32
    %c15_i32_246 = arith.constant 15 : i32
    %780 = arith.subi %c15_i32_246, %c10_i32_244 : i32
    %c8_i32_247 = arith.constant 8 : i32
    %781 = arith.muli %780, %c8_i32_247 : i32
    %782 = tpu.assume_multiple %781, 8 : i32
    %783 = arith.index_cast %779 : i32 to index
    %c0_248 = arith.constant 0 : index
    %784 = vector.load %arg14[%783, %c0_248] : memref<128x256xf32, #tpu.memory_space<vmem>>, vector<8x256xf32>
    %cst_249 = arith.constant dense<0.000000e+00> : vector<8x256xf32>
    %785 = tpu.matmul %773, %486, %cst_249 {dimension_numbers = #tpu.dot_dimension_numbers<[1], [0], [0], [1], [0, 0, 1, 1], [], []>} : vector<8x64xf32>, vector<64x256xf32>, vector<8x256xf32> -> vector<8x256xf32>
    %786 = arith.addf %784, %785 : vector<8x256xf32>
    %787 = vector.extract_strided_slice %786 {offsets = [0, 0], sizes = [8, 192], strides = [1, 1]} : vector<8x256xf32> to vector<8x192xf32>
    %788 = arith.negf %787 : vector<8x192xf32>
    %789 = math.exp %788 : vector<8x192xf32>
    %cst_250 = arith.constant 1.000000e+00 : f32
    %790 = vector.broadcast %cst_250 : f32 to vector<8x192xf32>
    %791 = arith.addf %790, %789 : vector<8x192xf32>
    %792 = arith.divf %790, %791 : vector<8x192xf32>
    %793 = vector.extract_strided_slice %786 {offsets = [0, 192], sizes = [8, 64], strides = [1, 1]} : vector<8x256xf32> to vector<8x64xf32>
    %794 = math.tanh %793 : vector<8x64xf32>
    %795 = vector.extract_strided_slice %792 {offsets = [0, 0], sizes = [8, 64], strides = [1, 1]} : vector<8x192xf32> to vector<8x64xf32>
    %796 = arith.mulf %795, %770 : vector<8x64xf32>
    %797 = vector.extract_strided_slice %792 {offsets = [0, 64], sizes = [8, 64], strides = [1, 1]} : vector<8x192xf32> to vector<8x64xf32>
    %798 = arith.mulf %797, %794 : vector<8x64xf32>
    %799 = arith.addf %796, %798 : vector<8x64xf32>
    %800 = vector.extract_strided_slice %792 {offsets = [0, 128], sizes = [8, 64], strides = [1, 1]} : vector<8x192xf32> to vector<8x64xf32>
    %801 = math.tanh %799 : vector<8x64xf32>
    %802 = arith.mulf %800, %801 : vector<8x64xf32>
    %803 = arith.index_cast %779 : i32 to index
    %c0_251 = arith.constant 0 : index
    %804 = vector.load %arg15[%803, %c0_251] : memref<128x128xf32, #tpu.memory_space<vmem>>, vector<8x64xf32>
    tpu.vector_store %arg15[%803, %c0_251], %802 {strides = array<i32>} : memref<128x128xf32, #tpu.memory_space<vmem>>, vector<8x64xf32>,
    %805 = arith.index_cast %782 : i32 to index
    %c64_252 = arith.constant 64 : index
    %806 = vector.load %arg15[%805, %c64_252] : memref<128x128xf32, #tpu.memory_space<vmem>>, vector<8x64xf32>
    tpu.vector_store %arg15[%805, %c64_252], %802 {strides = array<i32>} : memref<128x128xf32, #tpu.memory_space<vmem>>, vector<8x64xf32>,
    %c11_i32_253 = arith.constant 11 : i32
    %c8_i32_254 = arith.constant 8 : i32
    %807 = arith.muli %c11_i32_253, %c8_i32_254 : i32
    %808 = tpu.assume_multiple %807, 8 : i32
    %c15_i32_255 = arith.constant 15 : i32
    %809 = arith.subi %c15_i32_255, %c11_i32_253 : i32
    %c8_i32_256 = arith.constant 8 : i32
    %810 = arith.muli %809, %c8_i32_256 : i32
    %811 = tpu.assume_multiple %810, 8 : i32
    %812 = arith.index_cast %808 : i32 to index
    %c0_257 = arith.constant 0 : index
    %813 = vector.load %arg14[%812, %c0_257] : memref<128x256xf32, #tpu.memory_space<vmem>>, vector<8x256xf32>
    %cst_258 = arith.constant dense<0.000000e+00> : vector<8x256xf32>
    %814 = tpu.matmul %802, %486, %cst_258 {dimension_numbers = #tpu.dot_dimension_numbers<[1], [0], [0], [1], [0, 0, 1, 1], [], []>} : vector<8x64xf32>, vector<64x256xf32>, vector<8x256xf32> -> vector<8x256xf32>
    %815 = arith.addf %813, %814 : vector<8x256xf32>
    %816 = vector.extract_strided_slice %815 {offsets = [0, 0], sizes = [8, 192], strides = [1, 1]} : vector<8x256xf32> to vector<8x192xf32>
    %817 = arith.negf %816 : vector<8x192xf32>
    %818 = math.exp %817 : vector<8x192xf32>
    %cst_259 = arith.constant 1.000000e+00 : f32
    %819 = vector.broadcast %cst_259 : f32 to vector<8x192xf32>
    %820 = arith.addf %819, %818 : vector<8x192xf32>
    %821 = arith.divf %819, %820 : vector<8x192xf32>
    %822 = vector.extract_strided_slice %815 {offsets = [0, 192], sizes = [8, 64], strides = [1, 1]} : vector<8x256xf32> to vector<8x64xf32>
    %823 = math.tanh %822 : vector<8x64xf32>
    %824 = vector.extract_strided_slice %821 {offsets = [0, 0], sizes = [8, 64], strides = [1, 1]} : vector<8x192xf32> to vector<8x64xf32>
    %825 = arith.mulf %824, %799 : vector<8x64xf32>
    %826 = vector.extract_strided_slice %821 {offsets = [0, 64], sizes = [8, 64], strides = [1, 1]} : vector<8x192xf32> to vector<8x64xf32>
    %827 = arith.mulf %826, %823 : vector<8x64xf32>
    %828 = arith.addf %825, %827 : vector<8x64xf32>
    %829 = vector.extract_strided_slice %821 {offsets = [0, 128], sizes = [8, 64], strides = [1, 1]} : vector<8x192xf32> to vector<8x64xf32>
    %830 = math.tanh %828 : vector<8x64xf32>
    %831 = arith.mulf %829, %830 : vector<8x64xf32>
    %832 = arith.index_cast %808 : i32 to index
    %c0_260 = arith.constant 0 : index
    %833 = vector.load %arg15[%832, %c0_260] : memref<128x128xf32, #tpu.memory_space<vmem>>, vector<8x64xf32>
    tpu.vector_store %arg15[%832, %c0_260], %831 {strides = array<i32>} : memref<128x128xf32, #tpu.memory_space<vmem>>, vector<8x64xf32>,
    %834 = arith.index_cast %811 : i32 to index
    %c64_261 = arith.constant 64 : index
    %835 = vector.load %arg15[%834, %c64_261] : memref<128x128xf32, #tpu.memory_space<vmem>>, vector<8x64xf32>
    tpu.vector_store %arg15[%834, %c64_261], %831 {strides = array<i32>} : memref<128x128xf32, #tpu.memory_space<vmem>>, vector<8x64xf32>,
    %c12_i32_262 = arith.constant 12 : i32
    %c8_i32_263 = arith.constant 8 : i32
    %836 = arith.muli %c12_i32_262, %c8_i32_263 : i32
    %837 = tpu.assume_multiple %836, 8 : i32
    %c15_i32_264 = arith.constant 15 : i32
    %838 = arith.subi %c15_i32_264, %c12_i32_262 : i32
    %c8_i32_265 = arith.constant 8 : i32
    %839 = arith.muli %838, %c8_i32_265 : i32
    %840 = tpu.assume_multiple %839, 8 : i32
    %841 = arith.index_cast %837 : i32 to index
    %c0_266 = arith.constant 0 : index
    %842 = vector.load %arg14[%841, %c0_266] : memref<128x256xf32, #tpu.memory_space<vmem>>, vector<8x256xf32>
    %cst_267 = arith.constant dense<0.000000e+00> : vector<8x256xf32>
    %843 = tpu.matmul %831, %486, %cst_267 {dimension_numbers = #tpu.dot_dimension_numbers<[1], [0], [0], [1], [0, 0, 1, 1], [], []>} : vector<8x64xf32>, vector<64x256xf32>, vector<8x256xf32> -> vector<8x256xf32>
    %844 = arith.addf %842, %843 : vector<8x256xf32>
    %845 = vector.extract_strided_slice %844 {offsets = [0, 0], sizes = [8, 192], strides = [1, 1]} : vector<8x256xf32> to vector<8x192xf32>
    %846 = arith.negf %845 : vector<8x192xf32>
    %847 = math.exp %846 : vector<8x192xf32>
    %cst_268 = arith.constant 1.000000e+00 : f32
    %848 = vector.broadcast %cst_268 : f32 to vector<8x192xf32>
    %849 = arith.addf %848, %847 : vector<8x192xf32>
    %850 = arith.divf %848, %849 : vector<8x192xf32>
    %851 = vector.extract_strided_slice %844 {offsets = [0, 192], sizes = [8, 64], strides = [1, 1]} : vector<8x256xf32> to vector<8x64xf32>
    %852 = math.tanh %851 : vector<8x64xf32>
    %853 = vector.extract_strided_slice %850 {offsets = [0, 0], sizes = [8, 64], strides = [1, 1]} : vector<8x192xf32> to vector<8x64xf32>
    %854 = arith.mulf %853, %828 : vector<8x64xf32>
    %855 = vector.extract_strided_slice %850 {offsets = [0, 64], sizes = [8, 64], strides = [1, 1]} : vector<8x192xf32> to vector<8x64xf32>
    %856 = arith.mulf %855, %852 : vector<8x64xf32>
    %857 = arith.addf %854, %856 : vector<8x64xf32>
    %858 = vector.extract_strided_slice %850 {offsets = [0, 128], sizes = [8, 64], strides = [1, 1]} : vector<8x192xf32> to vector<8x64xf32>
    %859 = math.tanh %857 : vector<8x64xf32>
    %860 = arith.mulf %858, %859 : vector<8x64xf32>
    %861 = arith.index_cast %837 : i32 to index
    %c0_269 = arith.constant 0 : index
    %862 = vector.load %arg15[%861, %c0_269] : memref<128x128xf32, #tpu.memory_space<vmem>>, vector<8x64xf32>
    tpu.vector_store %arg15[%861, %c0_269], %860 {strides = array<i32>} : memref<128x128xf32, #tpu.memory_space<vmem>>, vector<8x64xf32>,
    %863 = arith.index_cast %840 : i32 to index
    %c64_270 = arith.constant 64 : index
    %864 = vector.load %arg15[%863, %c64_270] : memref<128x128xf32, #tpu.memory_space<vmem>>, vector<8x64xf32>
    tpu.vector_store %arg15[%863, %c64_270], %860 {strides = array<i32>} : memref<128x128xf32, #tpu.memory_space<vmem>>, vector<8x64xf32>,
    %c13_i32_271 = arith.constant 13 : i32
    %c8_i32_272 = arith.constant 8 : i32
    %865 = arith.muli %c13_i32_271, %c8_i32_272 : i32
    %866 = tpu.assume_multiple %865, 8 : i32
    %c15_i32_273 = arith.constant 15 : i32
    %867 = arith.subi %c15_i32_273, %c13_i32_271 : i32
    %c8_i32_274 = arith.constant 8 : i32
    %868 = arith.muli %867, %c8_i32_274 : i32
    %869 = tpu.assume_multiple %868, 8 : i32
    %870 = arith.index_cast %866 : i32 to index
    %c0_275 = arith.constant 0 : index
    %871 = vector.load %arg14[%870, %c0_275] : memref<128x256xf32, #tpu.memory_space<vmem>>, vector<8x256xf32>
    %cst_276 = arith.constant dense<0.000000e+00> : vector<8x256xf32>
    %872 = tpu.matmul %860, %486, %cst_276 {dimension_numbers = #tpu.dot_dimension_numbers<[1], [0], [0], [1], [0, 0, 1, 1], [], []>} : vector<8x64xf32>, vector<64x256xf32>, vector<8x256xf32> -> vector<8x256xf32>
    %873 = arith.addf %871, %872 : vector<8x256xf32>
    %874 = vector.extract_strided_slice %873 {offsets = [0, 0], sizes = [8, 192], strides = [1, 1]} : vector<8x256xf32> to vector<8x192xf32>
    %875 = arith.negf %874 : vector<8x192xf32>
    %876 = math.exp %875 : vector<8x192xf32>
    %cst_277 = arith.constant 1.000000e+00 : f32
    %877 = vector.broadcast %cst_277 : f32 to vector<8x192xf32>
    %878 = arith.addf %877, %876 : vector<8x192xf32>
    %879 = arith.divf %877, %878 : vector<8x192xf32>
    %880 = vector.extract_strided_slice %873 {offsets = [0, 192], sizes = [8, 64], strides = [1, 1]} : vector<8x256xf32> to vector<8x64xf32>
    %881 = math.tanh %880 : vector<8x64xf32>
    %882 = vector.extract_strided_slice %879 {offsets = [0, 0], sizes = [8, 64], strides = [1, 1]} : vector<8x192xf32> to vector<8x64xf32>
    %883 = arith.mulf %882, %857 : vector<8x64xf32>
    %884 = vector.extract_strided_slice %879 {offsets = [0, 64], sizes = [8, 64], strides = [1, 1]} : vector<8x192xf32> to vector<8x64xf32>
    %885 = arith.mulf %884, %881 : vector<8x64xf32>
    %886 = arith.addf %883, %885 : vector<8x64xf32>
    %887 = vector.extract_strided_slice %879 {offsets = [0, 128], sizes = [8, 64], strides = [1, 1]} : vector<8x192xf32> to vector<8x64xf32>
    %888 = math.tanh %886 : vector<8x64xf32>
    %889 = arith.mulf %887, %888 : vector<8x64xf32>
    %890 = arith.index_cast %866 : i32 to index
    %c0_278 = arith.constant 0 : index
    %891 = vector.load %arg15[%890, %c0_278] : memref<128x128xf32, #tpu.memory_space<vmem>>, vector<8x64xf32>
    tpu.vector_store %arg15[%890, %c0_278], %889 {strides = array<i32>} : memref<128x128xf32, #tpu.memory_space<vmem>>, vector<8x64xf32>,
    %892 = arith.index_cast %869 : i32 to index
    %c64_279 = arith.constant 64 : index
    %893 = vector.load %arg15[%892, %c64_279] : memref<128x128xf32, #tpu.memory_space<vmem>>, vector<8x64xf32>
    tpu.vector_store %arg15[%892, %c64_279], %889 {strides = array<i32>} : memref<128x128xf32, #tpu.memory_space<vmem>>, vector<8x64xf32>,
    %c14_i32_280 = arith.constant 14 : i32
    %c8_i32_281 = arith.constant 8 : i32
    %894 = arith.muli %c14_i32_280, %c8_i32_281 : i32
    %895 = tpu.assume_multiple %894, 8 : i32
    %c15_i32_282 = arith.constant 15 : i32
    %896 = arith.subi %c15_i32_282, %c14_i32_280 : i32
    %c8_i32_283 = arith.constant 8 : i32
    %897 = arith.muli %896, %c8_i32_283 : i32
    %898 = tpu.assume_multiple %897, 8 : i32
    %899 = arith.index_cast %895 : i32 to index
    %c0_284 = arith.constant 0 : index
    %900 = vector.load %arg14[%899, %c0_284] : memref<128x256xf32, #tpu.memory_space<vmem>>, vector<8x256xf32>
    %cst_285 = arith.constant dense<0.000000e+00> : vector<8x256xf32>
    %901 = tpu.matmul %889, %486, %cst_285 {dimension_numbers = #tpu.dot_dimension_numbers<[1], [0], [0], [1], [0, 0, 1, 1], [], []>} : vector<8x64xf32>, vector<64x256xf32>, vector<8x256xf32> -> vector<8x256xf32>
    %902 = arith.addf %900, %901 : vector<8x256xf32>
    %903 = vector.extract_strided_slice %902 {offsets = [0, 0], sizes = [8, 192], strides = [1, 1]} : vector<8x256xf32> to vector<8x192xf32>
    %904 = arith.negf %903 : vector<8x192xf32>
    %905 = math.exp %904 : vector<8x192xf32>
    %cst_286 = arith.constant 1.000000e+00 : f32
    %906 = vector.broadcast %cst_286 : f32 to vector<8x192xf32>
    %907 = arith.addf %906, %905 : vector<8x192xf32>
    %908 = arith.divf %906, %907 : vector<8x192xf32>
    %909 = vector.extract_strided_slice %902 {offsets = [0, 192], sizes = [8, 64], strides = [1, 1]} : vector<8x256xf32> to vector<8x64xf32>
    %910 = math.tanh %909 : vector<8x64xf32>
    %911 = vector.extract_strided_slice %908 {offsets = [0, 0], sizes = [8, 64], strides = [1, 1]} : vector<8x192xf32> to vector<8x64xf32>
    %912 = arith.mulf %911, %886 : vector<8x64xf32>
    %913 = vector.extract_strided_slice %908 {offsets = [0, 64], sizes = [8, 64], strides = [1, 1]} : vector<8x192xf32> to vector<8x64xf32>
    %914 = arith.mulf %913, %910 : vector<8x64xf32>
    %915 = arith.addf %912, %914 : vector<8x64xf32>
    %916 = vector.extract_strided_slice %908 {offsets = [0, 128], sizes = [8, 64], strides = [1, 1]} : vector<8x192xf32> to vector<8x64xf32>
    %917 = math.tanh %915 : vector<8x64xf32>
    %918 = arith.mulf %916, %917 : vector<8x64xf32>
    %919 = arith.index_cast %895 : i32 to index
    %c0_287 = arith.constant 0 : index
    %920 = vector.load %arg15[%919, %c0_287] : memref<128x128xf32, #tpu.memory_space<vmem>>, vector<8x64xf32>
    tpu.vector_store %arg15[%919, %c0_287], %918 {strides = array<i32>} : memref<128x128xf32, #tpu.memory_space<vmem>>, vector<8x64xf32>,
    %921 = arith.index_cast %898 : i32 to index
    %c64_288 = arith.constant 64 : index
    %922 = vector.load %arg15[%921, %c64_288] : memref<128x128xf32, #tpu.memory_space<vmem>>, vector<8x64xf32>
    tpu.vector_store %arg15[%921, %c64_288], %918 {strides = array<i32>} : memref<128x128xf32, #tpu.memory_space<vmem>>, vector<8x64xf32>,
    %c15_i32_289 = arith.constant 15 : i32
    %c8_i32_290 = arith.constant 8 : i32
    %923 = arith.muli %c15_i32_289, %c8_i32_290 : i32
    %924 = tpu.assume_multiple %923, 8 : i32
    %c15_i32_291 = arith.constant 15 : i32
    %925 = arith.subi %c15_i32_291, %c15_i32_289 : i32
    %c8_i32_292 = arith.constant 8 : i32
    %926 = arith.muli %925, %c8_i32_292 : i32
    %927 = tpu.assume_multiple %926, 8 : i32
    %928 = arith.index_cast %924 : i32 to index
    %c0_293 = arith.constant 0 : index
    %929 = vector.load %arg14[%928, %c0_293] : memref<128x256xf32, #tpu.memory_space<vmem>>, vector<8x256xf32>
    %cst_294 = arith.constant dense<0.000000e+00> : vector<8x256xf32>
    %930 = tpu.matmul %918, %486, %cst_294 {dimension_numbers = #tpu.dot_dimension_numbers<[1], [0], [0], [1], [0, 0, 1, 1], [], []>} : vector<8x64xf32>, vector<64x256xf32>, vector<8x256xf32> -> vector<8x256xf32>
    %931 = arith.addf %929, %930 : vector<8x256xf32>
    %932 = vector.extract_strided_slice %931 {offsets = [0, 0], sizes = [8, 192], strides = [1, 1]} : vector<8x256xf32> to vector<8x192xf32>
    %933 = arith.negf %932 : vector<8x192xf32>
    %934 = math.exp %933 : vector<8x192xf32>
    %cst_295 = arith.constant 1.000000e+00 : f32
    %935 = vector.broadcast %cst_295 : f32 to vector<8x192xf32>
    %936 = arith.addf %935, %934 : vector<8x192xf32>
    %937 = arith.divf %935, %936 : vector<8x192xf32>
    %938 = vector.extract_strided_slice %931 {offsets = [0, 192], sizes = [8, 64], strides = [1, 1]} : vector<8x256xf32> to vector<8x64xf32>
    %939 = math.tanh %938 : vector<8x64xf32>
    %940 = vector.extract_strided_slice %937 {offsets = [0, 0], sizes = [8, 64], strides = [1, 1]} : vector<8x192xf32> to vector<8x64xf32>
    %941 = arith.mulf %940, %915 : vector<8x64xf32>
    %942 = vector.extract_strided_slice %937 {offsets = [0, 64], sizes = [8, 64], strides = [1, 1]} : vector<8x192xf32> to vector<8x64xf32>
    %943 = arith.mulf %942, %939 : vector<8x64xf32>
    %944 = arith.addf %941, %943 : vector<8x64xf32>
    %945 = vector.extract_strided_slice %937 {offsets = [0, 128], sizes = [8, 64], strides = [1, 1]} : vector<8x192xf32> to vector<8x64xf32>
    %946 = math.tanh %944 : vector<8x64xf32>
    %947 = arith.mulf %945, %946 : vector<8x64xf32>
    %948 = arith.index_cast %924 : i32 to index
    %c0_296 = arith.constant 0 : index
    %949 = vector.load %arg15[%948, %c0_296] : memref<128x128xf32, #tpu.memory_space<vmem>>, vector<8x64xf32>
    tpu.vector_store %arg15[%948, %c0_296], %947 {strides = array<i32>} : memref<128x128xf32, #tpu.memory_space<vmem>>, vector<8x64xf32>,
    %950 = arith.index_cast %927 : i32 to index
    %c64_297 = arith.constant 64 : index
    %951 = vector.load %arg15[%950, %c64_297] : memref<128x128xf32, #tpu.memory_space<vmem>>, vector<8x64xf32>
    tpu.vector_store %arg15[%950, %c64_297], %947 {strides = array<i32>} : memref<128x128xf32, #tpu.memory_space<vmem>>, vector<8x64xf32>,
    %c16_i32_298 = arith.constant 16 : i32
    %c0_299 = arith.constant 0 : index
    %c0_300 = arith.constant 0 : index
    %952 = vector.load %arg15[%c0_299, %c0_300] : memref<128x128xf32, #tpu.memory_space<vmem>>, vector<128x128xf32>
    %c2 = arith.constant 2 : index
    %c0_301 = arith.constant 0 : index
    %c0_302 = arith.constant 0 : index
    %953 = vector.load %arg2[%c2, %c0_301, %c0_302] : memref<3x128x256xf32, #tpu.memory_space<vmem>>, vector<1x128x256xf32>
    %954 = vector.shape_cast %953 : vector<1x128x256xf32> to vector<128x256xf32>
    %cst_303 = arith.constant dense<0.000000e+00> : vector<128x256xf32>
    %955 = tpu.matmul %952, %954, %cst_303 {dimension_numbers = #tpu.dot_dimension_numbers<[1], [0], [0], [1], [0, 0, 1, 1], [], []>} : vector<128x128xf32>, vector<128x256xf32>, vector<128x256xf32> -> vector<128x256xf32>
    %c2_304 = arith.constant 2 : index
    %c0_305 = arith.constant 0 : index
    %c0_306 = arith.constant 0 : index
    %956 = vector.load %arg4[%c2_304, %c0_305, %c0_306] : memref<3x1x256xf32, #tpu.memory_space<vmem>>, vector<1x1x256xf32>
    %957 = vector.shape_cast %956 : vector<1x1x256xf32> to vector<1x256xf32>
    %958 = vector.broadcast %957 : vector<1x256xf32> to vector<128x256xf32>
    %959 = arith.addf %955, %958 : vector<128x256xf32>
    %c0_307 = arith.constant 0 : index
    %c0_308 = arith.constant 0 : index
    %960 = vector.load %arg14[%c0_307, %c0_308] : memref<128x256xf32, #tpu.memory_space<vmem>>, vector<128x256xf32>
    tpu.vector_store %arg14[%c0_307, %c0_308], %959 {strides = array<i32>} : memref<128x256xf32, #tpu.memory_space<vmem>>, vector<128x256xf32>,
    %c2_309 = arith.constant 2 : index
    %c0_310 = arith.constant 0 : index
    %c0_311 = arith.constant 0 : index
    %961 = vector.load %arg3[%c2_309, %c0_310, %c0_311] : memref<3x64x256xf32, #tpu.memory_space<vmem>>, vector<1x64x256xf32>
    %962 = vector.shape_cast %961 : vector<1x64x256xf32> to vector<64x256xf32>
    %cst_312 = arith.constant 0.000000e+00 : f32
    %963 = vector.broadcast %cst_312 : f32 to vector<8x64xf32>
    %c0_i32_313 = arith.constant 0 : i32
    %c8_i32_314 = arith.constant 8 : i32
    %964 = arith.muli %c0_i32_313, %c8_i32_314 : i32
    %965 = tpu.assume_multiple %964, 8 : i32
    %c15_i32_315 = arith.constant 15 : i32
    %966 = arith.subi %c15_i32_315, %c0_i32_313 : i32
    %c8_i32_316 = arith.constant 8 : i32
    %967 = arith.muli %966, %c8_i32_316 : i32
    %968 = tpu.assume_multiple %967, 8 : i32
    %969 = arith.index_cast %965 : i32 to index
    %c0_317 = arith.constant 0 : index
    %970 = vector.load %arg14[%969, %c0_317] : memref<128x256xf32, #tpu.memory_space<vmem>>, vector<8x256xf32>
    %cst_318 = arith.constant dense<0.000000e+00> : vector<8x256xf32>
    %971 = tpu.matmul %963, %962, %cst_318 {dimension_numbers = #tpu.dot_dimension_numbers<[1], [0], [0], [1], [0, 0, 1, 1], [], []>} : vector<8x64xf32>, vector<64x256xf32>, vector<8x256xf32> -> vector<8x256xf32>
    %972 = arith.addf %970, %971 : vector<8x256xf32>
    %973 = vector.extract_strided_slice %972 {offsets = [0, 0], sizes = [8, 192], strides = [1, 1]} : vector<8x256xf32> to vector<8x192xf32>
    %974 = arith.negf %973 : vector<8x192xf32>
    %975 = math.exp %974 : vector<8x192xf32>
    %cst_319 = arith.constant 1.000000e+00 : f32
    %976 = vector.broadcast %cst_319 : f32 to vector<8x192xf32>
    %977 = arith.addf %976, %975 : vector<8x192xf32>
    %978 = arith.divf %976, %977 : vector<8x192xf32>
    %979 = vector.extract_strided_slice %972 {offsets = [0, 192], sizes = [8, 64], strides = [1, 1]} : vector<8x256xf32> to vector<8x64xf32>
    %980 = math.tanh %979 : vector<8x64xf32>
    %981 = vector.extract_strided_slice %978 {offsets = [0, 0], sizes = [8, 64], strides = [1, 1]} : vector<8x192xf32> to vector<8x64xf32>
    %982 = arith.mulf %981, %963 : vector<8x64xf32>
    %983 = vector.extract_strided_slice %978 {offsets = [0, 64], sizes = [8, 64], strides = [1, 1]} : vector<8x192xf32> to vector<8x64xf32>
    %984 = arith.mulf %983, %980 : vector<8x64xf32>
    %985 = arith.addf %982, %984 : vector<8x64xf32>
    %986 = vector.extract_strided_slice %978 {offsets = [0, 128], sizes = [8, 64], strides = [1, 1]} : vector<8x192xf32> to vector<8x64xf32>
    %987 = math.tanh %985 : vector<8x64xf32>
    %988 = arith.mulf %986, %987 : vector<8x64xf32>
    %989 = arith.index_cast %965 : i32 to index
    %c0_320 = arith.constant 0 : index
    %990 = vector.load %arg15[%989, %c0_320] : memref<128x128xf32, #tpu.memory_space<vmem>>, vector<8x64xf32>
    tpu.vector_store %arg15[%989, %c0_320], %988 {strides = array<i32>} : memref<128x128xf32, #tpu.memory_space<vmem>>, vector<8x64xf32>,
    %991 = arith.index_cast %968 : i32 to index
    %c64_321 = arith.constant 64 : index
    %992 = vector.load %arg15[%991, %c64_321] : memref<128x128xf32, #tpu.memory_space<vmem>>, vector<8x64xf32>
    tpu.vector_store %arg15[%991, %c64_321], %988 {strides = array<i32>} : memref<128x128xf32, #tpu.memory_space<vmem>>, vector<8x64xf32>,
    %c1_i32_322 = arith.constant 1 : i32
    %c8_i32_323 = arith.constant 8 : i32
    %993 = arith.muli %c1_i32_322, %c8_i32_323 : i32
    %994 = tpu.assume_multiple %993, 8 : i32
    %c15_i32_324 = arith.constant 15 : i32
    %995 = arith.subi %c15_i32_324, %c1_i32_322 : i32
    %c8_i32_325 = arith.constant 8 : i32
    %996 = arith.muli %995, %c8_i32_325 : i32
    %997 = tpu.assume_multiple %996, 8 : i32
    %998 = arith.index_cast %994 : i32 to index
    %c0_326 = arith.constant 0 : index
    %999 = vector.load %arg14[%998, %c0_326] : memref<128x256xf32, #tpu.memory_space<vmem>>, vector<8x256xf32>
    %cst_327 = arith.constant dense<0.000000e+00> : vector<8x256xf32>
    %1000 = tpu.matmul %988, %962, %cst_327 {dimension_numbers = #tpu.dot_dimension_numbers<[1], [0], [0], [1], [0, 0, 1, 1], [], []>} : vector<8x64xf32>, vector<64x256xf32>, vector<8x256xf32> -> vector<8x256xf32>
    %1001 = arith.addf %999, %1000 : vector<8x256xf32>
    %1002 = vector.extract_strided_slice %1001 {offsets = [0, 0], sizes = [8, 192], strides = [1, 1]} : vector<8x256xf32> to vector<8x192xf32>
    %1003 = arith.negf %1002 : vector<8x192xf32>
    %1004 = math.exp %1003 : vector<8x192xf32>
    %cst_328 = arith.constant 1.000000e+00 : f32
    %1005 = vector.broadcast %cst_328 : f32 to vector<8x192xf32>
    %1006 = arith.addf %1005, %1004 : vector<8x192xf32>
    %1007 = arith.divf %1005, %1006 : vector<8x192xf32>
    %1008 = vector.extract_strided_slice %1001 {offsets = [0, 192], sizes = [8, 64], strides = [1, 1]} : vector<8x256xf32> to vector<8x64xf32>
    %1009 = math.tanh %1008 : vector<8x64xf32>
    %1010 = vector.extract_strided_slice %1007 {offsets = [0, 0], sizes = [8, 64], strides = [1, 1]} : vector<8x192xf32> to vector<8x64xf32>
    %1011 = arith.mulf %1010, %985 : vector<8x64xf32>
    %1012 = vector.extract_strided_slice %1007 {offsets = [0, 64], sizes = [8, 64], strides = [1, 1]} : vector<8x192xf32> to vector<8x64xf32>
    %1013 = arith.mulf %1012, %1009 : vector<8x64xf32>
    %1014 = arith.addf %1011, %1013 : vector<8x64xf32>
    %1015 = vector.extract_strided_slice %1007 {offsets = [0, 128], sizes = [8, 64], strides = [1, 1]} : vector<8x192xf32> to vector<8x64xf32>
    %1016 = math.tanh %1014 : vector<8x64xf32>
    %1017 = arith.mulf %1015, %1016 : vector<8x64xf32>
    %1018 = arith.index_cast %994 : i32 to index
    %c0_329 = arith.constant 0 : index
    %1019 = vector.load %arg15[%1018, %c0_329] : memref<128x128xf32, #tpu.memory_space<vmem>>, vector<8x64xf32>
    tpu.vector_store %arg15[%1018, %c0_329], %1017 {strides = array<i32>} : memref<128x128xf32, #tpu.memory_space<vmem>>, vector<8x64xf32>,
    %1020 = arith.index_cast %997 : i32 to index
    %c64_330 = arith.constant 64 : index
    %1021 = vector.load %arg15[%1020, %c64_330] : memref<128x128xf32, #tpu.memory_space<vmem>>, vector<8x64xf32>
    tpu.vector_store %arg15[%1020, %c64_330], %1017 {strides = array<i32>} : memref<128x128xf32, #tpu.memory_space<vmem>>, vector<8x64xf32>,
    %c2_i32_331 = arith.constant 2 : i32
    %c8_i32_332 = arith.constant 8 : i32
    %1022 = arith.muli %c2_i32_331, %c8_i32_332 : i32
    %1023 = tpu.assume_multiple %1022, 8 : i32
    %c15_i32_333 = arith.constant 15 : i32
    %1024 = arith.subi %c15_i32_333, %c2_i32_331 : i32
    %c8_i32_334 = arith.constant 8 : i32
    %1025 = arith.muli %1024, %c8_i32_334 : i32
    %1026 = tpu.assume_multiple %1025, 8 : i32
    %1027 = arith.index_cast %1023 : i32 to index
    %c0_335 = arith.constant 0 : index
    %1028 = vector.load %arg14[%1027, %c0_335] : memref<128x256xf32, #tpu.memory_space<vmem>>, vector<8x256xf32>
    %cst_336 = arith.constant dense<0.000000e+00> : vector<8x256xf32>
    %1029 = tpu.matmul %1017, %962, %cst_336 {dimension_numbers = #tpu.dot_dimension_numbers<[1], [0], [0], [1], [0, 0, 1, 1], [], []>} : vector<8x64xf32>, vector<64x256xf32>, vector<8x256xf32> -> vector<8x256xf32>
    %1030 = arith.addf %1028, %1029 : vector<8x256xf32>
    %1031 = vector.extract_strided_slice %1030 {offsets = [0, 0], sizes = [8, 192], strides = [1, 1]} : vector<8x256xf32> to vector<8x192xf32>
    %1032 = arith.negf %1031 : vector<8x192xf32>
    %1033 = math.exp %1032 : vector<8x192xf32>
    %cst_337 = arith.constant 1.000000e+00 : f32
    %1034 = vector.broadcast %cst_337 : f32 to vector<8x192xf32>
    %1035 = arith.addf %1034, %1033 : vector<8x192xf32>
    %1036 = arith.divf %1034, %1035 : vector<8x192xf32>
    %1037 = vector.extract_strided_slice %1030 {offsets = [0, 192], sizes = [8, 64], strides = [1, 1]} : vector<8x256xf32> to vector<8x64xf32>
    %1038 = math.tanh %1037 : vector<8x64xf32>
    %1039 = vector.extract_strided_slice %1036 {offsets = [0, 0], sizes = [8, 64], strides = [1, 1]} : vector<8x192xf32> to vector<8x64xf32>
    %1040 = arith.mulf %1039, %1014 : vector<8x64xf32>
    %1041 = vector.extract_strided_slice %1036 {offsets = [0, 64], sizes = [8, 64], strides = [1, 1]} : vector<8x192xf32> to vector<8x64xf32>
    %1042 = arith.mulf %1041, %1038 : vector<8x64xf32>
    %1043 = arith.addf %1040, %1042 : vector<8x64xf32>
    %1044 = vector.extract_strided_slice %1036 {offsets = [0, 128], sizes = [8, 64], strides = [1, 1]} : vector<8x192xf32> to vector<8x64xf32>
    %1045 = math.tanh %1043 : vector<8x64xf32>
    %1046 = arith.mulf %1044, %1045 : vector<8x64xf32>
    %1047 = arith.index_cast %1023 : i32 to index
    %c0_338 = arith.constant 0 : index
    %1048 = vector.load %arg15[%1047, %c0_338] : memref<128x128xf32, #tpu.memory_space<vmem>>, vector<8x64xf32>
    tpu.vector_store %arg15[%1047, %c0_338], %1046 {strides = array<i32>} : memref<128x128xf32, #tpu.memory_space<vmem>>, vector<8x64xf32>,
    %1049 = arith.index_cast %1026 : i32 to index
    %c64_339 = arith.constant 64 : index
    %1050 = vector.load %arg15[%1049, %c64_339] : memref<128x128xf32, #tpu.memory_space<vmem>>, vector<8x64xf32>
    tpu.vector_store %arg15[%1049, %c64_339], %1046 {strides = array<i32>} : memref<128x128xf32, #tpu.memory_space<vmem>>, vector<8x64xf32>,
    %c3_i32_340 = arith.constant 3 : i32
    %c8_i32_341 = arith.constant 8 : i32
    %1051 = arith.muli %c3_i32_340, %c8_i32_341 : i32
    %1052 = tpu.assume_multiple %1051, 8 : i32
    %c15_i32_342 = arith.constant 15 : i32
    %1053 = arith.subi %c15_i32_342, %c3_i32_340 : i32
    %c8_i32_343 = arith.constant 8 : i32
    %1054 = arith.muli %1053, %c8_i32_343 : i32
    %1055 = tpu.assume_multiple %1054, 8 : i32
    %1056 = arith.index_cast %1052 : i32 to index
    %c0_344 = arith.constant 0 : index
    %1057 = vector.load %arg14[%1056, %c0_344] : memref<128x256xf32, #tpu.memory_space<vmem>>, vector<8x256xf32>
    %cst_345 = arith.constant dense<0.000000e+00> : vector<8x256xf32>
    %1058 = tpu.matmul %1046, %962, %cst_345 {dimension_numbers = #tpu.dot_dimension_numbers<[1], [0], [0], [1], [0, 0, 1, 1], [], []>} : vector<8x64xf32>, vector<64x256xf32>, vector<8x256xf32> -> vector<8x256xf32>
    %1059 = arith.addf %1057, %1058 : vector<8x256xf32>
    %1060 = vector.extract_strided_slice %1059 {offsets = [0, 0], sizes = [8, 192], strides = [1, 1]} : vector<8x256xf32> to vector<8x192xf32>
    %1061 = arith.negf %1060 : vector<8x192xf32>
    %1062 = math.exp %1061 : vector<8x192xf32>
    %cst_346 = arith.constant 1.000000e+00 : f32
    %1063 = vector.broadcast %cst_346 : f32 to vector<8x192xf32>
    %1064 = arith.addf %1063, %1062 : vector<8x192xf32>
    %1065 = arith.divf %1063, %1064 : vector<8x192xf32>
    %1066 = vector.extract_strided_slice %1059 {offsets = [0, 192], sizes = [8, 64], strides = [1, 1]} : vector<8x256xf32> to vector<8x64xf32>
    %1067 = math.tanh %1066 : vector<8x64xf32>
    %1068 = vector.extract_strided_slice %1065 {offsets = [0, 0], sizes = [8, 64], strides = [1, 1]} : vector<8x192xf32> to vector<8x64xf32>
    %1069 = arith.mulf %1068, %1043 : vector<8x64xf32>
    %1070 = vector.extract_strided_slice %1065 {offsets = [0, 64], sizes = [8, 64], strides = [1, 1]} : vector<8x192xf32> to vector<8x64xf32>
    %1071 = arith.mulf %1070, %1067 : vector<8x64xf32>
    %1072 = arith.addf %1069, %1071 : vector<8x64xf32>
    %1073 = vector.extract_strided_slice %1065 {offsets = [0, 128], sizes = [8, 64], strides = [1, 1]} : vector<8x192xf32> to vector<8x64xf32>
    %1074 = math.tanh %1072 : vector<8x64xf32>
    %1075 = arith.mulf %1073, %1074 : vector<8x64xf32>
    %1076 = arith.index_cast %1052 : i32 to index
    %c0_347 = arith.constant 0 : index
    %1077 = vector.load %arg15[%1076, %c0_347] : memref<128x128xf32, #tpu.memory_space<vmem>>, vector<8x64xf32>
    tpu.vector_store %arg15[%1076, %c0_347], %1075 {strides = array<i32>} : memref<128x128xf32, #tpu.memory_space<vmem>>, vector<8x64xf32>,
    %1078 = arith.index_cast %1055 : i32 to index
    %c64_348 = arith.constant 64 : index
    %1079 = vector.load %arg15[%1078, %c64_348] : memref<128x128xf32, #tpu.memory_space<vmem>>, vector<8x64xf32>
    tpu.vector_store %arg15[%1078, %c64_348], %1075 {strides = array<i32>} : memref<128x128xf32, #tpu.memory_space<vmem>>, vector<8x64xf32>,
    %c4_i32_349 = arith.constant 4 : i32
    %c8_i32_350 = arith.constant 8 : i32
    %1080 = arith.muli %c4_i32_349, %c8_i32_350 : i32
    %1081 = tpu.assume_multiple %1080, 8 : i32
    %c15_i32_351 = arith.constant 15 : i32
    %1082 = arith.subi %c15_i32_351, %c4_i32_349 : i32
    %c8_i32_352 = arith.constant 8 : i32
    %1083 = arith.muli %1082, %c8_i32_352 : i32
    %1084 = tpu.assume_multiple %1083, 8 : i32
    %1085 = arith.index_cast %1081 : i32 to index
    %c0_353 = arith.constant 0 : index
    %1086 = vector.load %arg14[%1085, %c0_353] : memref<128x256xf32, #tpu.memory_space<vmem>>, vector<8x256xf32>
    %cst_354 = arith.constant dense<0.000000e+00> : vector<8x256xf32>
    %1087 = tpu.matmul %1075, %962, %cst_354 {dimension_numbers = #tpu.dot_dimension_numbers<[1], [0], [0], [1], [0, 0, 1, 1], [], []>} : vector<8x64xf32>, vector<64x256xf32>, vector<8x256xf32> -> vector<8x256xf32>
    %1088 = arith.addf %1086, %1087 : vector<8x256xf32>
    %1089 = vector.extract_strided_slice %1088 {offsets = [0, 0], sizes = [8, 192], strides = [1, 1]} : vector<8x256xf32> to vector<8x192xf32>
    %1090 = arith.negf %1089 : vector<8x192xf32>
    %1091 = math.exp %1090 : vector<8x192xf32>
    %cst_355 = arith.constant 1.000000e+00 : f32
    %1092 = vector.broadcast %cst_355 : f32 to vector<8x192xf32>
    %1093 = arith.addf %1092, %1091 : vector<8x192xf32>
    %1094 = arith.divf %1092, %1093 : vector<8x192xf32>
    %1095 = vector.extract_strided_slice %1088 {offsets = [0, 192], sizes = [8, 64], strides = [1, 1]} : vector<8x256xf32> to vector<8x64xf32>
    %1096 = math.tanh %1095 : vector<8x64xf32>
    %1097 = vector.extract_strided_slice %1094 {offsets = [0, 0], sizes = [8, 64], strides = [1, 1]} : vector<8x192xf32> to vector<8x64xf32>
    %1098 = arith.mulf %1097, %1072 : vector<8x64xf32>
    %1099 = vector.extract_strided_slice %1094 {offsets = [0, 64], sizes = [8, 64], strides = [1, 1]} : vector<8x192xf32> to vector<8x64xf32>
    %1100 = arith.mulf %1099, %1096 : vector<8x64xf32>
    %1101 = arith.addf %1098, %1100 : vector<8x64xf32>
    %1102 = vector.extract_strided_slice %1094 {offsets = [0, 128], sizes = [8, 64], strides = [1, 1]} : vector<8x192xf32> to vector<8x64xf32>
    %1103 = math.tanh %1101 : vector<8x64xf32>
    %1104 = arith.mulf %1102, %1103 : vector<8x64xf32>
    %1105 = arith.index_cast %1081 : i32 to index
    %c0_356 = arith.constant 0 : index
    %1106 = vector.load %arg15[%1105, %c0_356] : memref<128x128xf32, #tpu.memory_space<vmem>>, vector<8x64xf32>
    tpu.vector_store %arg15[%1105, %c0_356], %1104 {strides = array<i32>} : memref<128x128xf32, #tpu.memory_space<vmem>>, vector<8x64xf32>,
    %1107 = arith.index_cast %1084 : i32 to index
    %c64_357 = arith.constant 64 : index
    %1108 = vector.load %arg15[%1107, %c64_357] : memref<128x128xf32, #tpu.memory_space<vmem>>, vector<8x64xf32>
    tpu.vector_store %arg15[%1107, %c64_357], %1104 {strides = array<i32>} : memref<128x128xf32, #tpu.memory_space<vmem>>, vector<8x64xf32>,
    %c5_i32_358 = arith.constant 5 : i32
    %c8_i32_359 = arith.constant 8 : i32
    %1109 = arith.muli %c5_i32_358, %c8_i32_359 : i32
    %1110 = tpu.assume_multiple %1109, 8 : i32
    %c15_i32_360 = arith.constant 15 : i32
    %1111 = arith.subi %c15_i32_360, %c5_i32_358 : i32
    %c8_i32_361 = arith.constant 8 : i32
    %1112 = arith.muli %1111, %c8_i32_361 : i32
    %1113 = tpu.assume_multiple %1112, 8 : i32
    %1114 = arith.index_cast %1110 : i32 to index
    %c0_362 = arith.constant 0 : index
    %1115 = vector.load %arg14[%1114, %c0_362] : memref<128x256xf32, #tpu.memory_space<vmem>>, vector<8x256xf32>
    %cst_363 = arith.constant dense<0.000000e+00> : vector<8x256xf32>
    %1116 = tpu.matmul %1104, %962, %cst_363 {dimension_numbers = #tpu.dot_dimension_numbers<[1], [0], [0], [1], [0, 0, 1, 1], [], []>} : vector<8x64xf32>, vector<64x256xf32>, vector<8x256xf32> -> vector<8x256xf32>
    %1117 = arith.addf %1115, %1116 : vector<8x256xf32>
    %1118 = vector.extract_strided_slice %1117 {offsets = [0, 0], sizes = [8, 192], strides = [1, 1]} : vector<8x256xf32> to vector<8x192xf32>
    %1119 = arith.negf %1118 : vector<8x192xf32>
    %1120 = math.exp %1119 : vector<8x192xf32>
    %cst_364 = arith.constant 1.000000e+00 : f32
    %1121 = vector.broadcast %cst_364 : f32 to vector<8x192xf32>
    %1122 = arith.addf %1121, %1120 : vector<8x192xf32>
    %1123 = arith.divf %1121, %1122 : vector<8x192xf32>
    %1124 = vector.extract_strided_slice %1117 {offsets = [0, 192], sizes = [8, 64], strides = [1, 1]} : vector<8x256xf32> to vector<8x64xf32>
    %1125 = math.tanh %1124 : vector<8x64xf32>
    %1126 = vector.extract_strided_slice %1123 {offsets = [0, 0], sizes = [8, 64], strides = [1, 1]} : vector<8x192xf32> to vector<8x64xf32>
    %1127 = arith.mulf %1126, %1101 : vector<8x64xf32>
    %1128 = vector.extract_strided_slice %1123 {offsets = [0, 64], sizes = [8, 64], strides = [1, 1]} : vector<8x192xf32> to vector<8x64xf32>
    %1129 = arith.mulf %1128, %1125 : vector<8x64xf32>
    %1130 = arith.addf %1127, %1129 : vector<8x64xf32>
    %1131 = vector.extract_strided_slice %1123 {offsets = [0, 128], sizes = [8, 64], strides = [1, 1]} : vector<8x192xf32> to vector<8x64xf32>
    %1132 = math.tanh %1130 : vector<8x64xf32>
    %1133 = arith.mulf %1131, %1132 : vector<8x64xf32>
    %1134 = arith.index_cast %1110 : i32 to index
    %c0_365 = arith.constant 0 : index
    %1135 = vector.load %arg15[%1134, %c0_365] : memref<128x128xf32, #tpu.memory_space<vmem>>, vector<8x64xf32>
    tpu.vector_store %arg15[%1134, %c0_365], %1133 {strides = array<i32>} : memref<128x128xf32, #tpu.memory_space<vmem>>, vector<8x64xf32>,
    %1136 = arith.index_cast %1113 : i32 to index
    %c64_366 = arith.constant 64 : index
    %1137 = vector.load %arg15[%1136, %c64_366] : memref<128x128xf32, #tpu.memory_space<vmem>>, vector<8x64xf32>
    tpu.vector_store %arg15[%1136, %c64_366], %1133 {strides = array<i32>} : memref<128x128xf32, #tpu.memory_space<vmem>>, vector<8x64xf32>,
    %c6_i32_367 = arith.constant 6 : i32
    %c8_i32_368 = arith.constant 8 : i32
    %1138 = arith.muli %c6_i32_367, %c8_i32_368 : i32
    %1139 = tpu.assume_multiple %1138, 8 : i32
    %c15_i32_369 = arith.constant 15 : i32
    %1140 = arith.subi %c15_i32_369, %c6_i32_367 : i32
    %c8_i32_370 = arith.constant 8 : i32
    %1141 = arith.muli %1140, %c8_i32_370 : i32
    %1142 = tpu.assume_multiple %1141, 8 : i32
    %1143 = arith.index_cast %1139 : i32 to index
    %c0_371 = arith.constant 0 : index
    %1144 = vector.load %arg14[%1143, %c0_371] : memref<128x256xf32, #tpu.memory_space<vmem>>, vector<8x256xf32>
    %cst_372 = arith.constant dense<0.000000e+00> : vector<8x256xf32>
    %1145 = tpu.matmul %1133, %962, %cst_372 {dimension_numbers = #tpu.dot_dimension_numbers<[1], [0], [0], [1], [0, 0, 1, 1], [], []>} : vector<8x64xf32>, vector<64x256xf32>, vector<8x256xf32> -> vector<8x256xf32>
    %1146 = arith.addf %1144, %1145 : vector<8x256xf32>
    %1147 = vector.extract_strided_slice %1146 {offsets = [0, 0], sizes = [8, 192], strides = [1, 1]} : vector<8x256xf32> to vector<8x192xf32>
    %1148 = arith.negf %1147 : vector<8x192xf32>
    %1149 = math.exp %1148 : vector<8x192xf32>
    %cst_373 = arith.constant 1.000000e+00 : f32
    %1150 = vector.broadcast %cst_373 : f32 to vector<8x192xf32>
    %1151 = arith.addf %1150, %1149 : vector<8x192xf32>
    %1152 = arith.divf %1150, %1151 : vector<8x192xf32>
    %1153 = vector.extract_strided_slice %1146 {offsets = [0, 192], sizes = [8, 64], strides = [1, 1]} : vector<8x256xf32> to vector<8x64xf32>
    %1154 = math.tanh %1153 : vector<8x64xf32>
    %1155 = vector.extract_strided_slice %1152 {offsets = [0, 0], sizes = [8, 64], strides = [1, 1]} : vector<8x192xf32> to vector<8x64xf32>
    %1156 = arith.mulf %1155, %1130 : vector<8x64xf32>
    %1157 = vector.extract_strided_slice %1152 {offsets = [0, 64], sizes = [8, 64], strides = [1, 1]} : vector<8x192xf32> to vector<8x64xf32>
    %1158 = arith.mulf %1157, %1154 : vector<8x64xf32>
    %1159 = arith.addf %1156, %1158 : vector<8x64xf32>
    %1160 = vector.extract_strided_slice %1152 {offsets = [0, 128], sizes = [8, 64], strides = [1, 1]} : vector<8x192xf32> to vector<8x64xf32>
    %1161 = math.tanh %1159 : vector<8x64xf32>
    %1162 = arith.mulf %1160, %1161 : vector<8x64xf32>
    %1163 = arith.index_cast %1139 : i32 to index
    %c0_374 = arith.constant 0 : index
    %1164 = vector.load %arg15[%1163, %c0_374] : memref<128x128xf32, #tpu.memory_space<vmem>>, vector<8x64xf32>
    tpu.vector_store %arg15[%1163, %c0_374], %1162 {strides = array<i32>} : memref<128x128xf32, #tpu.memory_space<vmem>>, vector<8x64xf32>,
    %1165 = arith.index_cast %1142 : i32 to index
    %c64_375 = arith.constant 64 : index
    %1166 = vector.load %arg15[%1165, %c64_375] : memref<128x128xf32, #tpu.memory_space<vmem>>, vector<8x64xf32>
    tpu.vector_store %arg15[%1165, %c64_375], %1162 {strides = array<i32>} : memref<128x128xf32, #tpu.memory_space<vmem>>, vector<8x64xf32>,
    %c7_i32_376 = arith.constant 7 : i32
    %c8_i32_377 = arith.constant 8 : i32
    %1167 = arith.muli %c7_i32_376, %c8_i32_377 : i32
    %1168 = tpu.assume_multiple %1167, 8 : i32
    %c15_i32_378 = arith.constant 15 : i32
    %1169 = arith.subi %c15_i32_378, %c7_i32_376 : i32
    %c8_i32_379 = arith.constant 8 : i32
    %1170 = arith.muli %1169, %c8_i32_379 : i32
    %1171 = tpu.assume_multiple %1170, 8 : i32
    %1172 = arith.index_cast %1168 : i32 to index
    %c0_380 = arith.constant 0 : index
    %1173 = vector.load %arg14[%1172, %c0_380] : memref<128x256xf32, #tpu.memory_space<vmem>>, vector<8x256xf32>
    %cst_381 = arith.constant dense<0.000000e+00> : vector<8x256xf32>
    %1174 = tpu.matmul %1162, %962, %cst_381 {dimension_numbers = #tpu.dot_dimension_numbers<[1], [0], [0], [1], [0, 0, 1, 1], [], []>} : vector<8x64xf32>, vector<64x256xf32>, vector<8x256xf32> -> vector<8x256xf32>
    %1175 = arith.addf %1173, %1174 : vector<8x256xf32>
    %1176 = vector.extract_strided_slice %1175 {offsets = [0, 0], sizes = [8, 192], strides = [1, 1]} : vector<8x256xf32> to vector<8x192xf32>
    %1177 = arith.negf %1176 : vector<8x192xf32>
    %1178 = math.exp %1177 : vector<8x192xf32>
    %cst_382 = arith.constant 1.000000e+00 : f32
    %1179 = vector.broadcast %cst_382 : f32 to vector<8x192xf32>
    %1180 = arith.addf %1179, %1178 : vector<8x192xf32>
    %1181 = arith.divf %1179, %1180 : vector<8x192xf32>
    %1182 = vector.extract_strided_slice %1175 {offsets = [0, 192], sizes = [8, 64], strides = [1, 1]} : vector<8x256xf32> to vector<8x64xf32>
    %1183 = math.tanh %1182 : vector<8x64xf32>
    %1184 = vector.extract_strided_slice %1181 {offsets = [0, 0], sizes = [8, 64], strides = [1, 1]} : vector<8x192xf32> to vector<8x64xf32>
    %1185 = arith.mulf %1184, %1159 : vector<8x64xf32>
    %1186 = vector.extract_strided_slice %1181 {offsets = [0, 64], sizes = [8, 64], strides = [1, 1]} : vector<8x192xf32> to vector<8x64xf32>
    %1187 = arith.mulf %1186, %1183 : vector<8x64xf32>
    %1188 = arith.addf %1185, %1187 : vector<8x64xf32>
    %1189 = vector.extract_strided_slice %1181 {offsets = [0, 128], sizes = [8, 64], strides = [1, 1]} : vector<8x192xf32> to vector<8x64xf32>
    %1190 = math.tanh %1188 : vector<8x64xf32>
    %1191 = arith.mulf %1189, %1190 : vector<8x64xf32>
    %1192 = arith.index_cast %1168 : i32 to index
    %c0_383 = arith.constant 0 : index
    %1193 = vector.load %arg15[%1192, %c0_383] : memref<128x128xf32, #tpu.memory_space<vmem>>, vector<8x64xf32>
    tpu.vector_store %arg15[%1192, %c0_383], %1191 {strides = array<i32>} : memref<128x128xf32, #tpu.memory_space<vmem>>, vector<8x64xf32>,
    %1194 = arith.index_cast %1171 : i32 to index
    %c64_384 = arith.constant 64 : index
    %1195 = vector.load %arg15[%1194, %c64_384] : memref<128x128xf32, #tpu.memory_space<vmem>>, vector<8x64xf32>
    tpu.vector_store %arg15[%1194, %c64_384], %1191 {strides = array<i32>} : memref<128x128xf32, #tpu.memory_space<vmem>>, vector<8x64xf32>,
    %c8_i32_385 = arith.constant 8 : i32
    %c8_i32_386 = arith.constant 8 : i32
    %1196 = arith.muli %c8_i32_385, %c8_i32_386 : i32
    %1197 = tpu.assume_multiple %1196, 8 : i32
    %c15_i32_387 = arith.constant 15 : i32
    %1198 = arith.subi %c15_i32_387, %c8_i32_385 : i32
    %c8_i32_388 = arith.constant 8 : i32
    %1199 = arith.muli %1198, %c8_i32_388 : i32
    %1200 = tpu.assume_multiple %1199, 8 : i32
    %1201 = arith.index_cast %1197 : i32 to index
    %c0_389 = arith.constant 0 : index
    %1202 = vector.load %arg14[%1201, %c0_389] : memref<128x256xf32, #tpu.memory_space<vmem>>, vector<8x256xf32>
    %cst_390 = arith.constant dense<0.000000e+00> : vector<8x256xf32>
    %1203 = tpu.matmul %1191, %962, %cst_390 {dimension_numbers = #tpu.dot_dimension_numbers<[1], [0], [0], [1], [0, 0, 1, 1], [], []>} : vector<8x64xf32>, vector<64x256xf32>, vector<8x256xf32> -> vector<8x256xf32>
    %1204 = arith.addf %1202, %1203 : vector<8x256xf32>
    %1205 = vector.extract_strided_slice %1204 {offsets = [0, 0], sizes = [8, 192], strides = [1, 1]} : vector<8x256xf32> to vector<8x192xf32>
    %1206 = arith.negf %1205 : vector<8x192xf32>
    %1207 = math.exp %1206 : vector<8x192xf32>
    %cst_391 = arith.constant 1.000000e+00 : f32
    %1208 = vector.broadcast %cst_391 : f32 to vector<8x192xf32>
    %1209 = arith.addf %1208, %1207 : vector<8x192xf32>
    %1210 = arith.divf %1208, %1209 : vector<8x192xf32>
    %1211 = vector.extract_strided_slice %1204 {offsets = [0, 192], sizes = [8, 64], strides = [1, 1]} : vector<8x256xf32> to vector<8x64xf32>
    %1212 = math.tanh %1211 : vector<8x64xf32>
    %1213 = vector.extract_strided_slice %1210 {offsets = [0, 0], sizes = [8, 64], strides = [1, 1]} : vector<8x192xf32> to vector<8x64xf32>
    %1214 = arith.mulf %1213, %1188 : vector<8x64xf32>
    %1215 = vector.extract_strided_slice %1210 {offsets = [0, 64], sizes = [8, 64], strides = [1, 1]} : vector<8x192xf32> to vector<8x64xf32>
    %1216 = arith.mulf %1215, %1212 : vector<8x64xf32>
    %1217 = arith.addf %1214, %1216 : vector<8x64xf32>
    %1218 = vector.extract_strided_slice %1210 {offsets = [0, 128], sizes = [8, 64], strides = [1, 1]} : vector<8x192xf32> to vector<8x64xf32>
    %1219 = math.tanh %1217 : vector<8x64xf32>
    %1220 = arith.mulf %1218, %1219 : vector<8x64xf32>
    %1221 = arith.index_cast %1197 : i32 to index
    %c0_392 = arith.constant 0 : index
    %1222 = vector.load %arg15[%1221, %c0_392] : memref<128x128xf32, #tpu.memory_space<vmem>>, vector<8x64xf32>
    tpu.vector_store %arg15[%1221, %c0_392], %1220 {strides = array<i32>} : memref<128x128xf32, #tpu.memory_space<vmem>>, vector<8x64xf32>,
    %1223 = arith.index_cast %1200 : i32 to index
    %c64_393 = arith.constant 64 : index
    %1224 = vector.load %arg15[%1223, %c64_393] : memref<128x128xf32, #tpu.memory_space<vmem>>, vector<8x64xf32>
    tpu.vector_store %arg15[%1223, %c64_393], %1220 {strides = array<i32>} : memref<128x128xf32, #tpu.memory_space<vmem>>, vector<8x64xf32>,
    %c9_i32_394 = arith.constant 9 : i32
    %c8_i32_395 = arith.constant 8 : i32
    %1225 = arith.muli %c9_i32_394, %c8_i32_395 : i32
    %1226 = tpu.assume_multiple %1225, 8 : i32
    %c15_i32_396 = arith.constant 15 : i32
    %1227 = arith.subi %c15_i32_396, %c9_i32_394 : i32
    %c8_i32_397 = arith.constant 8 : i32
    %1228 = arith.muli %1227, %c8_i32_397 : i32
    %1229 = tpu.assume_multiple %1228, 8 : i32
    %1230 = arith.index_cast %1226 : i32 to index
    %c0_398 = arith.constant 0 : index
    %1231 = vector.load %arg14[%1230, %c0_398] : memref<128x256xf32, #tpu.memory_space<vmem>>, vector<8x256xf32>
    %cst_399 = arith.constant dense<0.000000e+00> : vector<8x256xf32>
    %1232 = tpu.matmul %1220, %962, %cst_399 {dimension_numbers = #tpu.dot_dimension_numbers<[1], [0], [0], [1], [0, 0, 1, 1], [], []>} : vector<8x64xf32>, vector<64x256xf32>, vector<8x256xf32> -> vector<8x256xf32>
    %1233 = arith.addf %1231, %1232 : vector<8x256xf32>
    %1234 = vector.extract_strided_slice %1233 {offsets = [0, 0], sizes = [8, 192], strides = [1, 1]} : vector<8x256xf32> to vector<8x192xf32>
    %1235 = arith.negf %1234 : vector<8x192xf32>
    %1236 = math.exp %1235 : vector<8x192xf32>
    %cst_400 = arith.constant 1.000000e+00 : f32
    %1237 = vector.broadcast %cst_400 : f32 to vector<8x192xf32>
    %1238 = arith.addf %1237, %1236 : vector<8x192xf32>
    %1239 = arith.divf %1237, %1238 : vector<8x192xf32>
    %1240 = vector.extract_strided_slice %1233 {offsets = [0, 192], sizes = [8, 64], strides = [1, 1]} : vector<8x256xf32> to vector<8x64xf32>
    %1241 = math.tanh %1240 : vector<8x64xf32>
    %1242 = vector.extract_strided_slice %1239 {offsets = [0, 0], sizes = [8, 64], strides = [1, 1]} : vector<8x192xf32> to vector<8x64xf32>
    %1243 = arith.mulf %1242, %1217 : vector<8x64xf32>
    %1244 = vector.extract_strided_slice %1239 {offsets = [0, 64], sizes = [8, 64], strides = [1, 1]} : vector<8x192xf32> to vector<8x64xf32>
    %1245 = arith.mulf %1244, %1241 : vector<8x64xf32>
    %1246 = arith.addf %1243, %1245 : vector<8x64xf32>
    %1247 = vector.extract_strided_slice %1239 {offsets = [0, 128], sizes = [8, 64], strides = [1, 1]} : vector<8x192xf32> to vector<8x64xf32>
    %1248 = math.tanh %1246 : vector<8x64xf32>
    %1249 = arith.mulf %1247, %1248 : vector<8x64xf32>
    %1250 = arith.index_cast %1226 : i32 to index
    %c0_401 = arith.constant 0 : index
    %1251 = vector.load %arg15[%1250, %c0_401] : memref<128x128xf32, #tpu.memory_space<vmem>>, vector<8x64xf32>
    tpu.vector_store %arg15[%1250, %c0_401], %1249 {strides = array<i32>} : memref<128x128xf32, #tpu.memory_space<vmem>>, vector<8x64xf32>,
    %1252 = arith.index_cast %1229 : i32 to index
    %c64_402 = arith.constant 64 : index
    %1253 = vector.load %arg15[%1252, %c64_402] : memref<128x128xf32, #tpu.memory_space<vmem>>, vector<8x64xf32>
    tpu.vector_store %arg15[%1252, %c64_402], %1249 {strides = array<i32>} : memref<128x128xf32, #tpu.memory_space<vmem>>, vector<8x64xf32>,
    %c10_i32_403 = arith.constant 10 : i32
    %c8_i32_404 = arith.constant 8 : i32
    %1254 = arith.muli %c10_i32_403, %c8_i32_404 : i32
    %1255 = tpu.assume_multiple %1254, 8 : i32
    %c15_i32_405 = arith.constant 15 : i32
    %1256 = arith.subi %c15_i32_405, %c10_i32_403 : i32
    %c8_i32_406 = arith.constant 8 : i32
    %1257 = arith.muli %1256, %c8_i32_406 : i32
    %1258 = tpu.assume_multiple %1257, 8 : i32
    %1259 = arith.index_cast %1255 : i32 to index
    %c0_407 = arith.constant 0 : index
    %1260 = vector.load %arg14[%1259, %c0_407] : memref<128x256xf32, #tpu.memory_space<vmem>>, vector<8x256xf32>
    %cst_408 = arith.constant dense<0.000000e+00> : vector<8x256xf32>
    %1261 = tpu.matmul %1249, %962, %cst_408 {dimension_numbers = #tpu.dot_dimension_numbers<[1], [0], [0], [1], [0, 0, 1, 1], [], []>} : vector<8x64xf32>, vector<64x256xf32>, vector<8x256xf32> -> vector<8x256xf32>
    %1262 = arith.addf %1260, %1261 : vector<8x256xf32>
    %1263 = vector.extract_strided_slice %1262 {offsets = [0, 0], sizes = [8, 192], strides = [1, 1]} : vector<8x256xf32> to vector<8x192xf32>
    %1264 = arith.negf %1263 : vector<8x192xf32>
    %1265 = math.exp %1264 : vector<8x192xf32>
    %cst_409 = arith.constant 1.000000e+00 : f32
    %1266 = vector.broadcast %cst_409 : f32 to vector<8x192xf32>
    %1267 = arith.addf %1266, %1265 : vector<8x192xf32>
    %1268 = arith.divf %1266, %1267 : vector<8x192xf32>
    %1269 = vector.extract_strided_slice %1262 {offsets = [0, 192], sizes = [8, 64], strides = [1, 1]} : vector<8x256xf32> to vector<8x64xf32>
    %1270 = math.tanh %1269 : vector<8x64xf32>
    %1271 = vector.extract_strided_slice %1268 {offsets = [0, 0], sizes = [8, 64], strides = [1, 1]} : vector<8x192xf32> to vector<8x64xf32>
    %1272 = arith.mulf %1271, %1246 : vector<8x64xf32>
    %1273 = vector.extract_strided_slice %1268 {offsets = [0, 64], sizes = [8, 64], strides = [1, 1]} : vector<8x192xf32> to vector<8x64xf32>
    %1274 = arith.mulf %1273, %1270 : vector<8x64xf32>
    %1275 = arith.addf %1272, %1274 : vector<8x64xf32>
    %1276 = vector.extract_strided_slice %1268 {offsets = [0, 128], sizes = [8, 64], strides = [1, 1]} : vector<8x192xf32> to vector<8x64xf32>
    %1277 = math.tanh %1275 : vector<8x64xf32>
    %1278 = arith.mulf %1276, %1277 : vector<8x64xf32>
    %1279 = arith.index_cast %1255 : i32 to index
    %c0_410 = arith.constant 0 : index
    %1280 = vector.load %arg15[%1279, %c0_410] : memref<128x128xf32, #tpu.memory_space<vmem>>, vector<8x64xf32>
    tpu.vector_store %arg15[%1279, %c0_410], %1278 {strides = array<i32>} : memref<128x128xf32, #tpu.memory_space<vmem>>, vector<8x64xf32>,
    %1281 = arith.index_cast %1258 : i32 to index
    %c64_411 = arith.constant 64 : index
    %1282 = vector.load %arg15[%1281, %c64_411] : memref<128x128xf32, #tpu.memory_space<vmem>>, vector<8x64xf32>
    tpu.vector_store %arg15[%1281, %c64_411], %1278 {strides = array<i32>} : memref<128x128xf32, #tpu.memory_space<vmem>>, vector<8x64xf32>,
    %c11_i32_412 = arith.constant 11 : i32
    %c8_i32_413 = arith.constant 8 : i32
    %1283 = arith.muli %c11_i32_412, %c8_i32_413 : i32
    %1284 = tpu.assume_multiple %1283, 8 : i32
    %c15_i32_414 = arith.constant 15 : i32
    %1285 = arith.subi %c15_i32_414, %c11_i32_412 : i32
    %c8_i32_415 = arith.constant 8 : i32
    %1286 = arith.muli %1285, %c8_i32_415 : i32
    %1287 = tpu.assume_multiple %1286, 8 : i32
    %1288 = arith.index_cast %1284 : i32 to index
    %c0_416 = arith.constant 0 : index
    %1289 = vector.load %arg14[%1288, %c0_416] : memref<128x256xf32, #tpu.memory_space<vmem>>, vector<8x256xf32>
    %cst_417 = arith.constant dense<0.000000e+00> : vector<8x256xf32>
    %1290 = tpu.matmul %1278, %962, %cst_417 {dimension_numbers = #tpu.dot_dimension_numbers<[1], [0], [0], [1], [0, 0, 1, 1], [], []>} : vector<8x64xf32>, vector<64x256xf32>, vector<8x256xf32> -> vector<8x256xf32>
    %1291 = arith.addf %1289, %1290 : vector<8x256xf32>
    %1292 = vector.extract_strided_slice %1291 {offsets = [0, 0], sizes = [8, 192], strides = [1, 1]} : vector<8x256xf32> to vector<8x192xf32>
    %1293 = arith.negf %1292 : vector<8x192xf32>
    %1294 = math.exp %1293 : vector<8x192xf32>
    %cst_418 = arith.constant 1.000000e+00 : f32
    %1295 = vector.broadcast %cst_418 : f32 to vector<8x192xf32>
    %1296 = arith.addf %1295, %1294 : vector<8x192xf32>
    %1297 = arith.divf %1295, %1296 : vector<8x192xf32>
    %1298 = vector.extract_strided_slice %1291 {offsets = [0, 192], sizes = [8, 64], strides = [1, 1]} : vector<8x256xf32> to vector<8x64xf32>
    %1299 = math.tanh %1298 : vector<8x64xf32>
    %1300 = vector.extract_strided_slice %1297 {offsets = [0, 0], sizes = [8, 64], strides = [1, 1]} : vector<8x192xf32> to vector<8x64xf32>
    %1301 = arith.mulf %1300, %1275 : vector<8x64xf32>
    %1302 = vector.extract_strided_slice %1297 {offsets = [0, 64], sizes = [8, 64], strides = [1, 1]} : vector<8x192xf32> to vector<8x64xf32>
    %1303 = arith.mulf %1302, %1299 : vector<8x64xf32>
    %1304 = arith.addf %1301, %1303 : vector<8x64xf32>
    %1305 = vector.extract_strided_slice %1297 {offsets = [0, 128], sizes = [8, 64], strides = [1, 1]} : vector<8x192xf32> to vector<8x64xf32>
    %1306 = math.tanh %1304 : vector<8x64xf32>
    %1307 = arith.mulf %1305, %1306 : vector<8x64xf32>
    %1308 = arith.index_cast %1284 : i32 to index
    %c0_419 = arith.constant 0 : index
    %1309 = vector.load %arg15[%1308, %c0_419] : memref<128x128xf32, #tpu.memory_space<vmem>>, vector<8x64xf32>
    tpu.vector_store %arg15[%1308, %c0_419], %1307 {strides = array<i32>} : memref<128x128xf32, #tpu.memory_space<vmem>>, vector<8x64xf32>,
    %1310 = arith.index_cast %1287 : i32 to index
    %c64_420 = arith.constant 64 : index
    %1311 = vector.load %arg15[%1310, %c64_420] : memref<128x128xf32, #tpu.memory_space<vmem>>, vector<8x64xf32>
    tpu.vector_store %arg15[%1310, %c64_420], %1307 {strides = array<i32>} : memref<128x128xf32, #tpu.memory_space<vmem>>, vector<8x64xf32>,
    %c12_i32_421 = arith.constant 12 : i32
    %c8_i32_422 = arith.constant 8 : i32
    %1312 = arith.muli %c12_i32_421, %c8_i32_422 : i32
    %1313 = tpu.assume_multiple %1312, 8 : i32
    %c15_i32_423 = arith.constant 15 : i32
    %1314 = arith.subi %c15_i32_423, %c12_i32_421 : i32
    %c8_i32_424 = arith.constant 8 : i32
    %1315 = arith.muli %1314, %c8_i32_424 : i32
    %1316 = tpu.assume_multiple %1315, 8 : i32
    %1317 = arith.index_cast %1313 : i32 to index
    %c0_425 = arith.constant 0 : index
    %1318 = vector.load %arg14[%1317, %c0_425] : memref<128x256xf32, #tpu.memory_space<vmem>>, vector<8x256xf32>
    %cst_426 = arith.constant dense<0.000000e+00> : vector<8x256xf32>
    %1319 = tpu.matmul %1307, %962, %cst_426 {dimension_numbers = #tpu.dot_dimension_numbers<[1], [0], [0], [1], [0, 0, 1, 1], [], []>} : vector<8x64xf32>, vector<64x256xf32>, vector<8x256xf32> -> vector<8x256xf32>
    %1320 = arith.addf %1318, %1319 : vector<8x256xf32>
    %1321 = vector.extract_strided_slice %1320 {offsets = [0, 0], sizes = [8, 192], strides = [1, 1]} : vector<8x256xf32> to vector<8x192xf32>
    %1322 = arith.negf %1321 : vector<8x192xf32>
    %1323 = math.exp %1322 : vector<8x192xf32>
    %cst_427 = arith.constant 1.000000e+00 : f32
    %1324 = vector.broadcast %cst_427 : f32 to vector<8x192xf32>
    %1325 = arith.addf %1324, %1323 : vector<8x192xf32>
    %1326 = arith.divf %1324, %1325 : vector<8x192xf32>
    %1327 = vector.extract_strided_slice %1320 {offsets = [0, 192], sizes = [8, 64], strides = [1, 1]} : vector<8x256xf32> to vector<8x64xf32>
    %1328 = math.tanh %1327 : vector<8x64xf32>
    %1329 = vector.extract_strided_slice %1326 {offsets = [0, 0], sizes = [8, 64], strides = [1, 1]} : vector<8x192xf32> to vector<8x64xf32>
    %1330 = arith.mulf %1329, %1304 : vector<8x64xf32>
    %1331 = vector.extract_strided_slice %1326 {offsets = [0, 64], sizes = [8, 64], strides = [1, 1]} : vector<8x192xf32> to vector<8x64xf32>
    %1332 = arith.mulf %1331, %1328 : vector<8x64xf32>
    %1333 = arith.addf %1330, %1332 : vector<8x64xf32>
    %1334 = vector.extract_strided_slice %1326 {offsets = [0, 128], sizes = [8, 64], strides = [1, 1]} : vector<8x192xf32> to vector<8x64xf32>
    %1335 = math.tanh %1333 : vector<8x64xf32>
    %1336 = arith.mulf %1334, %1335 : vector<8x64xf32>
    %1337 = arith.index_cast %1313 : i32 to index
    %c0_428 = arith.constant 0 : index
    %1338 = vector.load %arg15[%1337, %c0_428] : memref<128x128xf32, #tpu.memory_space<vmem>>, vector<8x64xf32>
    tpu.vector_store %arg15[%1337, %c0_428], %1336 {strides = array<i32>} : memref<128x128xf32, #tpu.memory_space<vmem>>, vector<8x64xf32>,
    %1339 = arith.index_cast %1316 : i32 to index
    %c64_429 = arith.constant 64 : index
    %1340 = vector.load %arg15[%1339, %c64_429] : memref<128x128xf32, #tpu.memory_space<vmem>>, vector<8x64xf32>
    tpu.vector_store %arg15[%1339, %c64_429], %1336 {strides = array<i32>} : memref<128x128xf32, #tpu.memory_space<vmem>>, vector<8x64xf32>,
    %c13_i32_430 = arith.constant 13 : i32
    %c8_i32_431 = arith.constant 8 : i32
    %1341 = arith.muli %c13_i32_430, %c8_i32_431 : i32
    %1342 = tpu.assume_multiple %1341, 8 : i32
    %c15_i32_432 = arith.constant 15 : i32
    %1343 = arith.subi %c15_i32_432, %c13_i32_430 : i32
    %c8_i32_433 = arith.constant 8 : i32
    %1344 = arith.muli %1343, %c8_i32_433 : i32
    %1345 = tpu.assume_multiple %1344, 8 : i32
    %1346 = arith.index_cast %1342 : i32 to index
    %c0_434 = arith.constant 0 : index
    %1347 = vector.load %arg14[%1346, %c0_434] : memref<128x256xf32, #tpu.memory_space<vmem>>, vector<8x256xf32>
    %cst_435 = arith.constant dense<0.000000e+00> : vector<8x256xf32>
    %1348 = tpu.matmul %1336, %962, %cst_435 {dimension_numbers = #tpu.dot_dimension_numbers<[1], [0], [0], [1], [0, 0, 1, 1], [], []>} : vector<8x64xf32>, vector<64x256xf32>, vector<8x256xf32> -> vector<8x256xf32>
    %1349 = arith.addf %1347, %1348 : vector<8x256xf32>
    %1350 = vector.extract_strided_slice %1349 {offsets = [0, 0], sizes = [8, 192], strides = [1, 1]} : vector<8x256xf32> to vector<8x192xf32>
    %1351 = arith.negf %1350 : vector<8x192xf32>
    %1352 = math.exp %1351 : vector<8x192xf32>
    %cst_436 = arith.constant 1.000000e+00 : f32
    %1353 = vector.broadcast %cst_436 : f32 to vector<8x192xf32>
    %1354 = arith.addf %1353, %1352 : vector<8x192xf32>
    %1355 = arith.divf %1353, %1354 : vector<8x192xf32>
    %1356 = vector.extract_strided_slice %1349 {offsets = [0, 192], sizes = [8, 64], strides = [1, 1]} : vector<8x256xf32> to vector<8x64xf32>
    %1357 = math.tanh %1356 : vector<8x64xf32>
    %1358 = vector.extract_strided_slice %1355 {offsets = [0, 0], sizes = [8, 64], strides = [1, 1]} : vector<8x192xf32> to vector<8x64xf32>
    %1359 = arith.mulf %1358, %1333 : vector<8x64xf32>
    %1360 = vector.extract_strided_slice %1355 {offsets = [0, 64], sizes = [8, 64], strides = [1, 1]} : vector<8x192xf32> to vector<8x64xf32>
    %1361 = arith.mulf %1360, %1357 : vector<8x64xf32>
    %1362 = arith.addf %1359, %1361 : vector<8x64xf32>
    %1363 = vector.extract_strided_slice %1355 {offsets = [0, 128], sizes = [8, 64], strides = [1, 1]} : vector<8x192xf32> to vector<8x64xf32>
    %1364 = math.tanh %1362 : vector<8x64xf32>
    %1365 = arith.mulf %1363, %1364 : vector<8x64xf32>
    %1366 = arith.index_cast %1342 : i32 to index
    %c0_437 = arith.constant 0 : index
    %1367 = vector.load %arg15[%1366, %c0_437] : memref<128x128xf32, #tpu.memory_space<vmem>>, vector<8x64xf32>
    tpu.vector_store %arg15[%1366, %c0_437], %1365 {strides = array<i32>} : memref<128x128xf32, #tpu.memory_space<vmem>>, vector<8x64xf32>,
    %1368 = arith.index_cast %1345 : i32 to index
    %c64_438 = arith.constant 64 : index
    %1369 = vector.load %arg15[%1368, %c64_438] : memref<128x128xf32, #tpu.memory_space<vmem>>, vector<8x64xf32>
    tpu.vector_store %arg15[%1368, %c64_438], %1365 {strides = array<i32>} : memref<128x128xf32, #tpu.memory_space<vmem>>, vector<8x64xf32>,
    %c14_i32_439 = arith.constant 14 : i32
    %c8_i32_440 = arith.constant 8 : i32
    %1370 = arith.muli %c14_i32_439, %c8_i32_440 : i32
    %1371 = tpu.assume_multiple %1370, 8 : i32
    %c15_i32_441 = arith.constant 15 : i32
    %1372 = arith.subi %c15_i32_441, %c14_i32_439 : i32
    %c8_i32_442 = arith.constant 8 : i32
    %1373 = arith.muli %1372, %c8_i32_442 : i32
    %1374 = tpu.assume_multiple %1373, 8 : i32
    %1375 = arith.index_cast %1371 : i32 to index
    %c0_443 = arith.constant 0 : index
    %1376 = vector.load %arg14[%1375, %c0_443] : memref<128x256xf32, #tpu.memory_space<vmem>>, vector<8x256xf32>
    %cst_444 = arith.constant dense<0.000000e+00> : vector<8x256xf32>
    %1377 = tpu.matmul %1365, %962, %cst_444 {dimension_numbers = #tpu.dot_dimension_numbers<[1], [0], [0], [1], [0, 0, 1, 1], [], []>} : vector<8x64xf32>, vector<64x256xf32>, vector<8x256xf32> -> vector<8x256xf32>
    %1378 = arith.addf %1376, %1377 : vector<8x256xf32>
    %1379 = vector.extract_strided_slice %1378 {offsets = [0, 0], sizes = [8, 192], strides = [1, 1]} : vector<8x256xf32> to vector<8x192xf32>
    %1380 = arith.negf %1379 : vector<8x192xf32>
    %1381 = math.exp %1380 : vector<8x192xf32>
    %cst_445 = arith.constant 1.000000e+00 : f32
    %1382 = vector.broadcast %cst_445 : f32 to vector<8x192xf32>
    %1383 = arith.addf %1382, %1381 : vector<8x192xf32>
    %1384 = arith.divf %1382, %1383 : vector<8x192xf32>
    %1385 = vector.extract_strided_slice %1378 {offsets = [0, 192], sizes = [8, 64], strides = [1, 1]} : vector<8x256xf32> to vector<8x64xf32>
    %1386 = math.tanh %1385 : vector<8x64xf32>
    %1387 = vector.extract_strided_slice %1384 {offsets = [0, 0], sizes = [8, 64], strides = [1, 1]} : vector<8x192xf32> to vector<8x64xf32>
    %1388 = arith.mulf %1387, %1362 : vector<8x64xf32>
    %1389 = vector.extract_strided_slice %1384 {offsets = [0, 64], sizes = [8, 64], strides = [1, 1]} : vector<8x192xf32> to vector<8x64xf32>
    %1390 = arith.mulf %1389, %1386 : vector<8x64xf32>
    %1391 = arith.addf %1388, %1390 : vector<8x64xf32>
    %1392 = vector.extract_strided_slice %1384 {offsets = [0, 128], sizes = [8, 64], strides = [1, 1]} : vector<8x192xf32> to vector<8x64xf32>
    %1393 = math.tanh %1391 : vector<8x64xf32>
    %1394 = arith.mulf %1392, %1393 : vector<8x64xf32>
    %1395 = arith.index_cast %1371 : i32 to index
    %c0_446 = arith.constant 0 : index
    %1396 = vector.load %arg15[%1395, %c0_446] : memref<128x128xf32, #tpu.memory_space<vmem>>, vector<8x64xf32>
    tpu.vector_store %arg15[%1395, %c0_446], %1394 {strides = array<i32>} : memref<128x128xf32, #tpu.memory_space<vmem>>, vector<8x64xf32>,
    %1397 = arith.index_cast %1374 : i32 to index
    %c64_447 = arith.constant 64 : index
    %1398 = vector.load %arg15[%1397, %c64_447] : memref<128x128xf32, #tpu.memory_space<vmem>>, vector<8x64xf32>
    tpu.vector_store %arg15[%1397, %c64_447], %1394 {strides = array<i32>} : memref<128x128xf32, #tpu.memory_space<vmem>>, vector<8x64xf32>,
    %c15_i32_448 = arith.constant 15 : i32
    %c8_i32_449 = arith.constant 8 : i32
    %1399 = arith.muli %c15_i32_448, %c8_i32_449 : i32
    %1400 = tpu.assume_multiple %1399, 8 : i32
    %c15_i32_450 = arith.constant 15 : i32
    %1401 = arith.subi %c15_i32_450, %c15_i32_448 : i32
    %c8_i32_451 = arith.constant 8 : i32
    %1402 = arith.muli %1401, %c8_i32_451 : i32
    %1403 = tpu.assume_multiple %1402, 8 : i32
    %1404 = arith.index_cast %1400 : i32 to index
    %c0_452 = arith.constant 0 : index
    %1405 = vector.load %arg14[%1404, %c0_452] : memref<128x256xf32, #tpu.memory_space<vmem>>, vector<8x256xf32>
    %cst_453 = arith.constant dense<0.000000e+00> : vector<8x256xf32>
    %1406 = tpu.matmul %1394, %962, %cst_453 {dimension_numbers = #tpu.dot_dimension_numbers<[1], [0], [0], [1], [0, 0, 1, 1], [], []>} : vector<8x64xf32>, vector<64x256xf32>, vector<8x256xf32> -> vector<8x256xf32>
    %1407 = arith.addf %1405, %1406 : vector<8x256xf32>
    %1408 = vector.extract_strided_slice %1407 {offsets = [0, 0], sizes = [8, 192], strides = [1, 1]} : vector<8x256xf32> to vector<8x192xf32>
    %1409 = arith.negf %1408 : vector<8x192xf32>
    %1410 = math.exp %1409 : vector<8x192xf32>
    %cst_454 = arith.constant 1.000000e+00 : f32
    %1411 = vector.broadcast %cst_454 : f32 to vector<8x192xf32>
    %1412 = arith.addf %1411, %1410 : vector<8x192xf32>
    %1413 = arith.divf %1411, %1412 : vector<8x192xf32>
    %1414 = vector.extract_strided_slice %1407 {offsets = [0, 192], sizes = [8, 64], strides = [1, 1]} : vector<8x256xf32> to vector<8x64xf32>
    %1415 = math.tanh %1414 : vector<8x64xf32>
    %1416 = vector.extract_strided_slice %1413 {offsets = [0, 0], sizes = [8, 64], strides = [1, 1]} : vector<8x192xf32> to vector<8x64xf32>
    %1417 = arith.mulf %1416, %1391 : vector<8x64xf32>
    %1418 = vector.extract_strided_slice %1413 {offsets = [0, 64], sizes = [8, 64], strides = [1, 1]} : vector<8x192xf32> to vector<8x64xf32>
    %1419 = arith.mulf %1418, %1415 : vector<8x64xf32>
    %1420 = arith.addf %1417, %1419 : vector<8x64xf32>
    %1421 = vector.extract_strided_slice %1413 {offsets = [0, 128], sizes = [8, 64], strides = [1, 1]} : vector<8x192xf32> to vector<8x64xf32>
    %1422 = math.tanh %1420 : vector<8x64xf32>
    %1423 = arith.mulf %1421, %1422 : vector<8x64xf32>
    %1424 = arith.index_cast %1400 : i32 to index
    %c0_455 = arith.constant 0 : index
    %1425 = vector.load %arg15[%1424, %c0_455] : memref<128x128xf32, #tpu.memory_space<vmem>>, vector<8x64xf32>
    tpu.vector_store %arg15[%1424, %c0_455], %1423 {strides = array<i32>} : memref<128x128xf32, #tpu.memory_space<vmem>>, vector<8x64xf32>,
    %1426 = arith.index_cast %1403 : i32 to index
    %c64_456 = arith.constant 64 : index
    %1427 = vector.load %arg15[%1426, %c64_456] : memref<128x128xf32, #tpu.memory_space<vmem>>, vector<8x64xf32>
    tpu.vector_store %arg15[%1426, %c64_456], %1423 {strides = array<i32>} : memref<128x128xf32, #tpu.memory_space<vmem>>, vector<8x64xf32>,
    %c16_i32_457 = arith.constant 16 : i32
    %c120 = arith.constant 120 : index
    %c0_458 = arith.constant 0 : index
    %1428 = vector.load %arg15[%c120, %c0_458] : memref<128x128xf32, #tpu.memory_space<vmem>>, vector<2x32xf32>
    %c0_459 = arith.constant 0 : index
    %c0_460 = arith.constant 0 : index
    %1429 = vector.load %arg13[%c0_459, %c0_460] : memref<2x128xf32, #tpu.memory_space<vmem>>, vector<2x32xf32>
    tpu.vector_store %arg13[%c0_459, %c0_460], %1428 {strides = array<i32>} : memref<2x128xf32, #tpu.memory_space<vmem>>, vector<2x32xf32>,
    %c120_461 = arith.constant 120 : index
    %c96 = arith.constant 96 : index
    %1430 = vector.load %arg15[%c120_461, %c96] : memref<128x128xf32, #tpu.memory_space<vmem>>, vector<2x32xf32>
    %c0_462 = arith.constant 0 : index
    %c32 = arith.constant 32 : index
    %1431 = vector.load %arg13[%c0_462, %c32] : memref<2x128xf32, #tpu.memory_space<vmem>>, vector<2x32xf32>
    tpu.vector_store %arg13[%c0_462, %c32], %1430 {strides = array<i32>} : memref<2x128xf32, #tpu.memory_space<vmem>>, vector<2x32xf32>,
    %c0_463 = arith.constant 0 : index
    %c0_464 = arith.constant 0 : index
    %1432 = vector.load %arg1[%c0_463, %c0_464] : memref<32x64xf32, #tpu.memory_space<vmem>>, vector<32x64xf32>
    %cst_465 = arith.constant 0.000000e+00 : f32
    %1433 = vector.broadcast %cst_465 : f32 to vector<18x8xf32>
    %c0_466 = arith.constant 0 : index
    %c0_467 = arith.constant 0 : index
    %1434 = vector.load %arg6[%c0_466, %c0_467] : memref<1x8xf32, #tpu.memory_space<vmem>>, vector<1x8xf32>
    %1435 = vector.broadcast %1434 : vector<1x8xf32> to vector<18x8xf32>
    %1436 = arith.addf %1433, %1435 : vector<18x8xf32>
    %1437 = vector.extract_strided_slice %1432 {offsets = [0, 0], sizes = [18, 64], strides = [1, 1]} : vector<32x64xf32> to vector<18x64xf32>
    %c0_468 = arith.constant 0 : index
    %c0_469 = arith.constant 0 : index
    %c0_470 = arith.constant 0 : index
    %1438 = vector.load %arg5[%c0_468, %c0_469, %c0_470] : memref<8x64x8xf32, #tpu.memory_space<vmem>>, vector<1x64x8xf32>
    %1439 = vector.shape_cast %1438 : vector<1x64x8xf32> to vector<64x8xf32>
    %cst_471 = arith.constant dense<0.000000e+00> : vector<18x8xf32>
    %1440 = tpu.matmul %1437, %1439, %cst_471 {dimension_numbers = #tpu.dot_dimension_numbers<[1], [0], [0], [1], [0, 0, 1, 1], [], []>} : vector<18x64xf32>, vector<64x8xf32>, vector<18x8xf32> -> vector<18x8xf32>
    %1441 = arith.addf %1436, %1440 : vector<18x8xf32>
    %1442 = vector.extract_strided_slice %1432 {offsets = [2, 0], sizes = [18, 64], strides = [1, 1]} : vector<32x64xf32> to vector<18x64xf32>
    %c1_472 = arith.constant 1 : index
    %c0_473 = arith.constant 0 : index
    %c0_474 = arith.constant 0 : index
    %1443 = vector.load %arg5[%c1_472, %c0_473, %c0_474] : memref<8x64x8xf32, #tpu.memory_space<vmem>>, vector<1x64x8xf32>
    %1444 = vector.shape_cast %1443 : vector<1x64x8xf32> to vector<64x8xf32>
    %cst_475 = arith.constant dense<0.000000e+00> : vector<18x8xf32>
    %1445 = tpu.matmul %1442, %1444, %cst_475 {dimension_numbers = #tpu.dot_dimension_numbers<[1], [0], [0], [1], [0, 0, 1, 1], [], []>} : vector<18x64xf32>, vector<64x8xf32>, vector<18x8xf32> -> vector<18x8xf32>
    %1446 = arith.addf %1441, %1445 : vector<18x8xf32>
    %1447 = vector.extract_strided_slice %1432 {offsets = [4, 0], sizes = [18, 64], strides = [1, 1]} : vector<32x64xf32> to vector<18x64xf32>
    %c2_476 = arith.constant 2 : index
    %c0_477 = arith.constant 0 : index
    %c0_478 = arith.constant 0 : index
    %1448 = vector.load %arg5[%c2_476, %c0_477, %c0_478] : memref<8x64x8xf32, #tpu.memory_space<vmem>>, vector<1x64x8xf32>
    %1449 = vector.shape_cast %1448 : vector<1x64x8xf32> to vector<64x8xf32>
    %cst_479 = arith.constant dense<0.000000e+00> : vector<18x8xf32>
    %1450 = tpu.matmul %1447, %1449, %cst_479 {dimension_numbers = #tpu.dot_dimension_numbers<[1], [0], [0], [1], [0, 0, 1, 1], [], []>} : vector<18x64xf32>, vector<64x8xf32>, vector<18x8xf32> -> vector<18x8xf32>
    %1451 = arith.addf %1446, %1450 : vector<18x8xf32>
    %1452 = vector.extract_strided_slice %1432 {offsets = [6, 0], sizes = [18, 64], strides = [1, 1]} : vector<32x64xf32> to vector<18x64xf32>
    %c3 = arith.constant 3 : index
    %c0_480 = arith.constant 0 : index
    %c0_481 = arith.constant 0 : index
    %1453 = vector.load %arg5[%c3, %c0_480, %c0_481] : memref<8x64x8xf32, #tpu.memory_space<vmem>>, vector<1x64x8xf32>
    %1454 = vector.shape_cast %1453 : vector<1x64x8xf32> to vector<64x8xf32>
    %cst_482 = arith.constant dense<0.000000e+00> : vector<18x8xf32>
    %1455 = tpu.matmul %1452, %1454, %cst_482 {dimension_numbers = #tpu.dot_dimension_numbers<[1], [0], [0], [1], [0, 0, 1, 1], [], []>} : vector<18x64xf32>, vector<64x8xf32>, vector<18x8xf32> -> vector<18x8xf32>
    %1456 = arith.addf %1451, %1455 : vector<18x8xf32>
    %1457 = vector.extract_strided_slice %1432 {offsets = [8, 0], sizes = [18, 64], strides = [1, 1]} : vector<32x64xf32> to vector<18x64xf32>
    %c4 = arith.constant 4 : index
    %c0_483 = arith.constant 0 : index
    %c0_484 = arith.constant 0 : index
    %1458 = vector.load %arg5[%c4, %c0_483, %c0_484] : memref<8x64x8xf32, #tpu.memory_space<vmem>>, vector<1x64x8xf32>
    %1459 = vector.shape_cast %1458 : vector<1x64x8xf32> to vector<64x8xf32>
    %cst_485 = arith.constant dense<0.000000e+00> : vector<18x8xf32>
    %1460 = tpu.matmul %1457, %1459, %cst_485 {dimension_numbers = #tpu.dot_dimension_numbers<[1], [0], [0], [1], [0, 0, 1, 1], [], []>} : vector<18x64xf32>, vector<64x8xf32>, vector<18x8xf32> -> vector<18x8xf32>
    %1461 = arith.addf %1456, %1460 : vector<18x8xf32>
    %1462 = vector.extract_strided_slice %1432 {offsets = [10, 0], sizes = [18, 64], strides = [1, 1]} : vector<32x64xf32> to vector<18x64xf32>
    %c5 = arith.constant 5 : index
    %c0_486 = arith.constant 0 : index
    %c0_487 = arith.constant 0 : index
    %1463 = vector.load %arg5[%c5, %c0_486, %c0_487] : memref<8x64x8xf32, #tpu.memory_space<vmem>>, vector<1x64x8xf32>
    %1464 = vector.shape_cast %1463 : vector<1x64x8xf32> to vector<64x8xf32>
    %cst_488 = arith.constant dense<0.000000e+00> : vector<18x8xf32>
    %1465 = tpu.matmul %1462, %1464, %cst_488 {dimension_numbers = #tpu.dot_dimension_numbers<[1], [0], [0], [1], [0, 0, 1, 1], [], []>} : vector<18x64xf32>, vector<64x8xf32>, vector<18x8xf32> -> vector<18x8xf32>
    %1466 = arith.addf %1461, %1465 : vector<18x8xf32>
    %1467 = vector.extract_strided_slice %1432 {offsets = [12, 0], sizes = [18, 64], strides = [1, 1]} : vector<32x64xf32> to vector<18x64xf32>
    %c6 = arith.constant 6 : index
    %c0_489 = arith.constant 0 : index
    %c0_490 = arith.constant 0 : index
    %1468 = vector.load %arg5[%c6, %c0_489, %c0_490] : memref<8x64x8xf32, #tpu.memory_space<vmem>>, vector<1x64x8xf32>
    %1469 = vector.shape_cast %1468 : vector<1x64x8xf32> to vector<64x8xf32>
    %cst_491 = arith.constant dense<0.000000e+00> : vector<18x8xf32>
    %1470 = tpu.matmul %1467, %1469, %cst_491 {dimension_numbers = #tpu.dot_dimension_numbers<[1], [0], [0], [1], [0, 0, 1, 1], [], []>} : vector<18x64xf32>, vector<64x8xf32>, vector<18x8xf32> -> vector<18x8xf32>
    %1471 = arith.addf %1466, %1470 : vector<18x8xf32>
    %1472 = vector.extract_strided_slice %1432 {offsets = [14, 0], sizes = [18, 64], strides = [1, 1]} : vector<32x64xf32> to vector<18x64xf32>
    %c7 = arith.constant 7 : index
    %c0_492 = arith.constant 0 : index
    %c0_493 = arith.constant 0 : index
    %1473 = vector.load %arg5[%c7, %c0_492, %c0_493] : memref<8x64x8xf32, #tpu.memory_space<vmem>>, vector<1x64x8xf32>
    %1474 = vector.shape_cast %1473 : vector<1x64x8xf32> to vector<64x8xf32>
    %cst_494 = arith.constant dense<0.000000e+00> : vector<18x8xf32>
    %1475 = tpu.matmul %1472, %1474, %cst_494 {dimension_numbers = #tpu.dot_dimension_numbers<[1], [0], [0], [1], [0, 0, 1, 1], [], []>} : vector<18x64xf32>, vector<64x8xf32>, vector<18x8xf32> -> vector<18x8xf32>
    %1476 = arith.addf %1471, %1475 : vector<18x8xf32>
    %cst_495 = arith.constant dense<0.000000e+00> : vector<8xf32>
    %1477 = vector.multi_reduction <add>, %1476, %cst_495 [0] : vector<18x8xf32> to vector<8xf32>
    %1478 = vector.shape_cast %1477 : vector<8xf32> to vector<1x8xf32>
    %cst_496 = arith.constant 1.800000e+01 : f32
    %1479 = vector.broadcast %cst_496 : f32 to vector<1x8xf32>
    %1480 = arith.divf %1478, %1479 : vector<1x8xf32>
    %1481 = vector.broadcast %1480 : vector<1x8xf32> to vector<18x8xf32>
    %1482 = arith.subf %1476, %1481 : vector<18x8xf32>
    %1483 = arith.mulf %1482, %1482 : vector<18x8xf32>
    %cst_497 = arith.constant dense<0.000000e+00> : vector<8xf32>
    %1484 = vector.multi_reduction <add>, %1483, %cst_497 [0] : vector<18x8xf32> to vector<8xf32>
    %1485 = vector.shape_cast %1484 : vector<8xf32> to vector<1x8xf32>
    %cst_498 = arith.constant 1.800000e+01 : f32
    %1486 = vector.broadcast %cst_498 : f32 to vector<1x8xf32>
    %1487 = arith.divf %1485, %1486 : vector<1x8xf32>
    %1488 = vector.broadcast %1480 : vector<1x8xf32> to vector<18x8xf32>
    %1489 = arith.subf %1476, %1488 : vector<18x8xf32>
    %cst_499 = arith.constant 9.99999974E-6 : f32
    %1490 = vector.broadcast %cst_499 : f32 to vector<1x8xf32>
    %1491 = arith.addf %1487, %1490 : vector<1x8xf32>
    %1492 = math.rsqrt %1491 : vector<1x8xf32>
    %1493 = vector.broadcast %1492 : vector<1x8xf32> to vector<18x8xf32>
    %1494 = arith.mulf %1489, %1493 : vector<18x8xf32>
    %c0_500 = arith.constant 0 : index
    %c0_501 = arith.constant 0 : index
    %1495 = vector.load %arg7[%c0_500, %c0_501] : memref<1x8xf32, #tpu.memory_space<vmem>>, vector<1x8xf32>
    %1496 = vector.broadcast %1495 : vector<1x8xf32> to vector<18x8xf32>
    %1497 = arith.mulf %1494, %1496 : vector<18x8xf32>
    %c0_502 = arith.constant 0 : index
    %c0_503 = arith.constant 0 : index
    %1498 = vector.load %arg8[%c0_502, %c0_503] : memref<1x8xf32, #tpu.memory_space<vmem>>, vector<1x8xf32>
    %1499 = vector.broadcast %1498 : vector<1x8xf32> to vector<18x8xf32>
    %1500 = arith.addf %1497, %1499 : vector<18x8xf32>
    %cst_504 = arith.constant 0.000000e+00 : f32
    %1501 = vector.broadcast %cst_504 : f32 to vector<18x8xf32>
    %1502 = arith.maximumf %1500, %1501 : vector<18x8xf32>
    %cst_505 = arith.constant 0.000000e+00 : f32
    %1503 = vector.broadcast %cst_505 : f32 to vector<4x64xf32>
    %c0_506 = arith.constant 0 : index
    %c0_507 = arith.constant 0 : index
    %1504 = vector.load %arg10[%c0_506, %c0_507] : memref<1x64xf32, #tpu.memory_space<vmem>>, vector<1x64xf32>
    %1505 = vector.broadcast %1504 : vector<1x64xf32> to vector<4x64xf32>
    %1506 = arith.addf %1503, %1505 : vector<4x64xf32>
    %1507 = vector.extract_strided_slice %1502 {offsets = [0, 0], sizes = [4, 8], strides = [1, 1]} : vector<18x8xf32> to vector<4x8xf32>
    %c0_508 = arith.constant 0 : index
    %c0_509 = arith.constant 0 : index
    %c0_510 = arith.constant 0 : index
    %1508 = vector.load %arg9[%c0_508, %c0_509, %c0_510] : memref<8x8x64xf32, #tpu.memory_space<vmem>>, vector<1x8x64xf32>
    %1509 = vector.shape_cast %1508 : vector<1x8x64xf32> to vector<8x64xf32>
    %cst_511 = arith.constant dense<0.000000e+00> : vector<4x64xf32>
    %1510 = tpu.matmul %1507, %1509, %cst_511 {dimension_numbers = #tpu.dot_dimension_numbers<[1], [0], [0], [1], [0, 0, 1, 1], [], []>} : vector<4x8xf32>, vector<8x64xf32>, vector<4x64xf32> -> vector<4x64xf32>
    %1511 = arith.addf %1506, %1510 : vector<4x64xf32>
    %1512 = vector.extract_strided_slice %1502 {offsets = [2, 0], sizes = [4, 8], strides = [1, 1]} : vector<18x8xf32> to vector<4x8xf32>
    %c1_512 = arith.constant 1 : index
    %c0_513 = arith.constant 0 : index
    %c0_514 = arith.constant 0 : index
    %1513 = vector.load %arg9[%c1_512, %c0_513, %c0_514] : memref<8x8x64xf32, #tpu.memory_space<vmem>>, vector<1x8x64xf32>
    %1514 = vector.shape_cast %1513 : vector<1x8x64xf32> to vector<8x64xf32>
    %cst_515 = arith.constant dense<0.000000e+00> : vector<4x64xf32>
    %1515 = tpu.matmul %1512, %1514, %cst_515 {dimension_numbers = #tpu.dot_dimension_numbers<[1], [0], [0], [1], [0, 0, 1, 1], [], []>} : vector<4x8xf32>, vector<8x64xf32>, vector<4x64xf32> -> vector<4x64xf32>
    %1516 = arith.addf %1511, %1515 : vector<4x64xf32>
    %1517 = vector.extract_strided_slice %1502 {offsets = [4, 0], sizes = [4, 8], strides = [1, 1]} : vector<18x8xf32> to vector<4x8xf32>
    %c2_516 = arith.constant 2 : index
    %c0_517 = arith.constant 0 : index
    %c0_518 = arith.constant 0 : index
    %1518 = vector.load %arg9[%c2_516, %c0_517, %c0_518] : memref<8x8x64xf32, #tpu.memory_space<vmem>>, vector<1x8x64xf32>
    %1519 = vector.shape_cast %1518 : vector<1x8x64xf32> to vector<8x64xf32>
    %cst_519 = arith.constant dense<0.000000e+00> : vector<4x64xf32>
    %1520 = tpu.matmul %1517, %1519, %cst_519 {dimension_numbers = #tpu.dot_dimension_numbers<[1], [0], [0], [1], [0, 0, 1, 1], [], []>} : vector<4x8xf32>, vector<8x64xf32>, vector<4x64xf32> -> vector<4x64xf32>
    %1521 = arith.addf %1516, %1520 : vector<4x64xf32>
    %1522 = vector.extract_strided_slice %1502 {offsets = [6, 0], sizes = [4, 8], strides = [1, 1]} : vector<18x8xf32> to vector<4x8xf32>
    %c3_520 = arith.constant 3 : index
    %c0_521 = arith.constant 0 : index
    %c0_522 = arith.constant 0 : index
    %1523 = vector.load %arg9[%c3_520, %c0_521, %c0_522] : memref<8x8x64xf32, #tpu.memory_space<vmem>>, vector<1x8x64xf32>
    %1524 = vector.shape_cast %1523 : vector<1x8x64xf32> to vector<8x64xf32>
    %cst_523 = arith.constant dense<0.000000e+00> : vector<4x64xf32>
    %1525 = tpu.matmul %1522, %1524, %cst_523 {dimension_numbers = #tpu.dot_dimension_numbers<[1], [0], [0], [1], [0, 0, 1, 1], [], []>} : vector<4x8xf32>, vector<8x64xf32>, vector<4x64xf32> -> vector<4x64xf32>
    %1526 = arith.addf %1521, %1525 : vector<4x64xf32>
    %1527 = vector.extract_strided_slice %1502 {offsets = [8, 0], sizes = [4, 8], strides = [1, 1]} : vector<18x8xf32> to vector<4x8xf32>
    %c4_524 = arith.constant 4 : index
    %c0_525 = arith.constant 0 : index
    %c0_526 = arith.constant 0 : index
    %1528 = vector.load %arg9[%c4_524, %c0_525, %c0_526] : memref<8x8x64xf32, #tpu.memory_space<vmem>>, vector<1x8x64xf32>
    %1529 = vector.shape_cast %1528 : vector<1x8x64xf32> to vector<8x64xf32>
    %cst_527 = arith.constant dense<0.000000e+00> : vector<4x64xf32>
    %1530 = tpu.matmul %1527, %1529, %cst_527 {dimension_numbers = #tpu.dot_dimension_numbers<[1], [0], [0], [1], [0, 0, 1, 1], [], []>} : vector<4x8xf32>, vector<8x64xf32>, vector<4x64xf32> -> vector<4x64xf32>
    %1531 = arith.addf %1526, %1530 : vector<4x64xf32>
    %1532 = vector.extract_strided_slice %1502 {offsets = [10, 0], sizes = [4, 8], strides = [1, 1]} : vector<18x8xf32> to vector<4x8xf32>
    %c5_528 = arith.constant 5 : index
    %c0_529 = arith.constant 0 : index
    %c0_530 = arith.constant 0 : index
    %1533 = vector.load %arg9[%c5_528, %c0_529, %c0_530] : memref<8x8x64xf32, #tpu.memory_space<vmem>>, vector<1x8x64xf32>
    %1534 = vector.shape_cast %1533 : vector<1x8x64xf32> to vector<8x64xf32>
    %cst_531 = arith.constant dense<0.000000e+00> : vector<4x64xf32>
    %1535 = tpu.matmul %1532, %1534, %cst_531 {dimension_numbers = #tpu.dot_dimension_numbers<[1], [0], [0], [1], [0, 0, 1, 1], [], []>} : vector<4x8xf32>, vector<8x64xf32>, vector<4x64xf32> -> vector<4x64xf32>
    %1536 = arith.addf %1531, %1535 : vector<4x64xf32>
    %1537 = vector.extract_strided_slice %1502 {offsets = [12, 0], sizes = [4, 8], strides = [1, 1]} : vector<18x8xf32> to vector<4x8xf32>
    %c6_532 = arith.constant 6 : index
    %c0_533 = arith.constant 0 : index
    %c0_534 = arith.constant 0 : index
    %1538 = vector.load %arg9[%c6_532, %c0_533, %c0_534] : memref<8x8x64xf32, #tpu.memory_space<vmem>>, vector<1x8x64xf32>
    %1539 = vector.shape_cast %1538 : vector<1x8x64xf32> to vector<8x64xf32>
    %cst_535 = arith.constant dense<0.000000e+00> : vector<4x64xf32>
    %1540 = tpu.matmul %1537, %1539, %cst_535 {dimension_numbers = #tpu.dot_dimension_numbers<[1], [0], [0], [1], [0, 0, 1, 1], [], []>} : vector<4x8xf32>, vector<8x64xf32>, vector<4x64xf32> -> vector<4x64xf32>
    %1541 = arith.addf %1536, %1540 : vector<4x64xf32>
    %1542 = vector.extract_strided_slice %1502 {offsets = [14, 0], sizes = [4, 8], strides = [1, 1]} : vector<18x8xf32> to vector<4x8xf32>
    %c7_536 = arith.constant 7 : index
    %c0_537 = arith.constant 0 : index
    %c0_538 = arith.constant 0 : index
    %1543 = vector.load %arg9[%c7_536, %c0_537, %c0_538] : memref<8x8x64xf32, #tpu.memory_space<vmem>>, vector<1x8x64xf32>
    %1544 = vector.shape_cast %1543 : vector<1x8x64xf32> to vector<8x64xf32>
    %cst_539 = arith.constant dense<0.000000e+00> : vector<4x64xf32>
    %1545 = tpu.matmul %1542, %1544, %cst_539 {dimension_numbers = #tpu.dot_dimension_numbers<[1], [0], [0], [1], [0, 0, 1, 1], [], []>} : vector<4x8xf32>, vector<8x64xf32>, vector<4x64xf32> -> vector<4x64xf32>
    %1546 = arith.addf %1541, %1545 : vector<4x64xf32>
    %cst_540 = arith.constant dense<0.000000e+00> : vector<64xf32>
    %1547 = vector.multi_reduction <add>, %1546, %cst_540 [0] : vector<4x64xf32> to vector<64xf32>
    %1548 = vector.shape_cast %1547 : vector<64xf32> to vector<1x64xf32>
    %cst_541 = arith.constant 4.000000e+00 : f32
    %1549 = vector.broadcast %cst_541 : f32 to vector<1x64xf32>
    %1550 = arith.divf %1548, %1549 : vector<1x64xf32>
    %1551 = vector.broadcast %1550 : vector<1x64xf32> to vector<4x64xf32>
    %1552 = arith.subf %1546, %1551 : vector<4x64xf32>
    %1553 = arith.mulf %1552, %1552 : vector<4x64xf32>
    %cst_542 = arith.constant dense<0.000000e+00> : vector<64xf32>
    %1554 = vector.multi_reduction <add>, %1553, %cst_542 [0] : vector<4x64xf32> to vector<64xf32>
    %1555 = vector.shape_cast %1554 : vector<64xf32> to vector<1x64xf32>
    %cst_543 = arith.constant 4.000000e+00 : f32
    %1556 = vector.broadcast %cst_543 : f32 to vector<1x64xf32>
    %1557 = arith.divf %1555, %1556 : vector<1x64xf32>
    %1558 = vector.broadcast %1550 : vector<1x64xf32> to vector<4x64xf32>
    %1559 = arith.subf %1546, %1558 : vector<4x64xf32>
    %cst_544 = arith.constant 9.99999974E-6 : f32
    %1560 = vector.broadcast %cst_544 : f32 to vector<1x64xf32>
    %1561 = arith.addf %1557, %1560 : vector<1x64xf32>
    %1562 = math.rsqrt %1561 : vector<1x64xf32>
    %1563 = vector.broadcast %1562 : vector<1x64xf32> to vector<4x64xf32>
    %1564 = arith.mulf %1559, %1563 : vector<4x64xf32>
    %c0_545 = arith.constant 0 : index
    %c0_546 = arith.constant 0 : index
    %1565 = vector.load %arg11[%c0_545, %c0_546] : memref<1x64xf32, #tpu.memory_space<vmem>>, vector<1x64xf32>
    %1566 = vector.broadcast %1565 : vector<1x64xf32> to vector<4x64xf32>
    %1567 = arith.mulf %1564, %1566 : vector<4x64xf32>
    %c0_547 = arith.constant 0 : index
    %c0_548 = arith.constant 0 : index
    %1568 = vector.load %arg12[%c0_547, %c0_548] : memref<1x64xf32, #tpu.memory_space<vmem>>, vector<1x64xf32>
    %1569 = vector.broadcast %1568 : vector<1x64xf32> to vector<4x64xf32>
    %1570 = arith.addf %1567, %1569 : vector<4x64xf32>
    %cst_549 = arith.constant 0.000000e+00 : f32
    %1571 = vector.broadcast %cst_549 : f32 to vector<4x64xf32>
    %1572 = arith.maximumf %1570, %1571 : vector<4x64xf32>
    %cst_550 = arith.constant 0.000000e+00 : f32
    %1573 = vector.broadcast %cst_550 : f32 to vector<2x64xf32>
    %1574 = vector.extract_strided_slice %1572 {offsets = [0, 0], sizes = [2, 64], strides = [1, 1]} : vector<4x64xf32> to vector<2x64xf32>
    %1575 = arith.addf %1573, %1574 : vector<2x64xf32>
    %1576 = vector.extract_strided_slice %1572 {offsets = [2, 0], sizes = [2, 64], strides = [1, 1]} : vector<4x64xf32> to vector<2x64xf32>
    %1577 = arith.addf %1575, %1576 : vector<2x64xf32>
    %cst_551 = arith.constant 5.000000e-01 : f32
    %1578 = vector.broadcast %cst_551 : f32 to vector<2x64xf32>
    %1579 = arith.mulf %1577, %1578 : vector<2x64xf32>
    %c0_552 = arith.constant 0 : index
    %c64_553 = arith.constant 64 : index
    %1580 = vector.load %arg13[%c0_552, %c64_553] : memref<2x128xf32, #tpu.memory_space<vmem>>, vector<2x64xf32>
    tpu.vector_store %arg13[%c0_552, %c64_553], %1579 {strides = array<i32>} : memref<2x128xf32, #tpu.memory_space<vmem>>, vector<2x64xf32>,
    return
  }
}

</mosaic_0001>

<bundles_post_ra>
// kernel: fcn_model_forward.1
= control target key start
LH: loop header
LB: loop body
LE: loop exit
PB: predicated region body
PF: predicated region fallthrough
CT: control target
= control target key end

     0   :  { %v10048_v7 = vmov 0.0   ;;  %s12244_s0 = inlined_call_operand.vmem [shape: f32[128,128], index: 0, kind: input, shape index: {}]   ;;  %s12245_s1 = inlined_call_operand.vmem [shape: f32[32,64], index: 1, kind: input, shape index: {}]   ;;  %s12246_s2 = inlined_call_operand.vmem [shape: f32[3,128,256], index: 2, kind: input, shape index: {}]   ;;  %s12247_s3 = inlined_call_operand.vmem [shape: f32[3,64,256], index: 3, kind: input, shape index: {}]   ;;  %s12248_s4 = inlined_call_operand.vmem [shape: f32[3,1,256], index: 4, kind: input, shape index: {}]   ;;  %s12249_s5 = inlined_call_operand.vmem [shape: f32[8,64,8], index: 5, kind: input, shape index: {}]   ;;  %s12250_s6 = inlined_call_operand.vmem [shape: f32[1,8], index: 6, kind: input, shape index: {}]   ;;  %s12251_s7 = inlined_call_operand.vmem [shape: f32[1,8], index: 7, kind: input, shape index: {}]   ;;  %s12252_s8 = inlined_call_operand.vmem [shape: f32[1,8], index: 8, kind: input, shape index: {}]   ;;  %s12253_s9 = inlined_call_operand.vmem [shape: f32[8,8,64], index: 9, kind: input, shape index: {}]   ;;  %s12254_s10 = inlined_call_operand.vmem [shape: f32[1,64], index: 10, kind: input, shape index: {}]   ;;  %s12255_s11 = inlined_call_operand.vmem [shape: f32[1,64], index: 11, kind: input, shape index: {}]   ;;  %s12256_s12 = inlined_call_operand.vmem [shape: f32[1,64], index: 12, kind: input, shape index: {}]   ;;  %s12257_s13 = inlined_call_operand.hbm [shape: f32[2,128], index: 13, kind: output, shape index: {}]  }
   0x1   :  { %v62_v0 = vld [vmem:[%s12246_s2 + $0x8] sm:$0xff]  ;;  %v64_v1 = vld [vmem:[%s12246_s2 + $0x18] sm:$0xff]  ;;  %v61_v2 = vld [vmem:[%s12246_s2] sm:$0xff]  ;;  %169 = vmatprep.mubr.f32.mxu1 %v10048_v7  ;;  %387 = vmatprep.mubr.f32.mxu0 %v10048_v7 }
   0x2   :  { %v8228_v3 = vpack.c.bf16 %v64_v1, %v62_v0  ;;  %v63_v4 = vld [vmem:[%s12246_s2 + $0x10] sm:$0xff]  ;;  %v66_v5 = vld [vmem:[%s12246_s2 + $0x28] sm:$0xff]  ;;  %v68_v6 = vld [vmem:[%s12246_s2 + $0x38] sm:$0xff] }
   0x3   :  { %v8230_v8 = vpack.c.bf16 %v63_v4, %v61_v2  ;;  %v8232_v9 = vpack.c.bf16 %v68_v6, %v66_v5  ;;  %v65_v10 = vld [vmem:[%s12246_s2 + $0x20] sm:$0xff]  ;;  %v67_v11 = vld [vmem:[%s12246_s2 + $0x30] sm:$0xff]  ;;  %v70_v12 = vld [vmem:[%s12246_s2 + $0x48] sm:$0xff] }
   0x4   :  { %8229 = vmatprep.subr.bf16.mxu1 %v8228_v3  ;;  %v72_v13 = vld [vmem:[%s12246_s2 + $0x58] sm:$0xff]  ;;  %v8234_v14 = vpack.c.bf16 %v67_v11, %v65_v10  ;;  %v69_v16 = vld [vmem:[%s12246_s2 + $0x40] sm:$0xff]  ;;  %v71_v17 = vld [vmem:[%s12246_s2 + $0x50] sm:$0xff] }
   0x5   :  { %8231 = vmatpush1.bf16.msra.mxu1 %v8230_v8  ;;  %v8236_v15 = vpack.c.bf16 %v72_v13, %v70_v12  ;;  %v74_v18 = vld [vmem:[%s12246_s2 + $0x68] sm:$0xff]  ;;  %v76_v19 = vld [vmem:[%s12246_s2 + $0x78] sm:$0xff]  ;;  %v298_v22 = vld [vmem:[%s12247_s3] sm:$0xff]  ;;  %v8238_v24 = vpack.c.bf16 %v71_v17, %v69_v16 }
   0x6   :  { %8233 = vmatprep.subr.bf16.mxu1 %v8232_v9  ;;  %v299_v20 = vld [vmem:[%s12247_s3 + $0x8] sm:$0xff]  ;;  %v301_v21 = vld [vmem:[%s12247_s3 + $0x18] sm:$0xff]  ;;  %v300_v23 = vld [vmem:[%s12247_s3 + $0x10] sm:$0xff]  ;;  %v8240_v29 = vpack.c.bf16 %v76_v19, %v74_v18 }
   0x7   :  { %v73_v25 = vld [vmem:[%s12246_s2 + $0x60] sm:$0xff]  ;;  %v75_v26 = vld [vmem:[%s12246_s2 + $0x70] sm:$0xff]  ;;  %v10185_v27 = vpack.c.bf16 %v301_v21, %v299_v20  ;;  %v10187_v28 = vpack.c.bf16 %v300_v23, %v298_v22  ;;  %v78_v30 = vld [vmem:[%s12246_s2 + $0x88] sm:$0xff] }
   0x8   :  { %v303_v31 = vld [vmem:[%s12247_s3 + $0x28] sm:$0xff]  ;;  %v305_v32 = vld [vmem:[%s12247_s3 + $0x38] sm:$0xff]  ;;  %v302_v35 = vld [vmem:[%s12247_s3 + $0x20] sm:$0xff]  ;;  %v8242_v38 = vpack.c.bf16 %v75_v26, %v73_v25 }
   0x9   :  { %8235 = vmatpush1.bf16.msra.mxu1 %v8234_v14  ;;  %v80_v33 = vld [vmem:[%s12246_s2 + $0x98] sm:$0xff]  ;;  %8261 = vmatprep.subr.bf16.mxu0 %v10185_v27  ;;  %v10202_v34 = vpack.c.bf16 %v305_v32, %v303_v31  ;;  %v304_v36 = vld [vmem:[%s12247_s3 + $0x30] sm:$0xff]  ;;  %v307_v39 = vld [vmem:[%s12247_s3 + $0x48] sm:$0xff] }
   0xa   :  { %8237 = vmatprep.subr.bf16.mxu1 %v8236_v15  ;;  %8263 = vmatpush1.bf16.msra.mxu0 %v10187_v28  ;;  %v10211_v37 = vpack.c.bf16 %v304_v36, %v302_v35  ;;  %v309_v40 = vld [vmem:[%s12247_s3 + $0x58] sm:$0xff]  ;;  %v306_v41 = vld [vmem:[%s12247_s3 + $0x40] sm:$0xff]  ;;  %v8244_v42 = vpack.c.bf16 %v80_v33, %v78_v30  ;;  %v79_v44 = vld [vmem:[%s12246_s2 + $0x90] sm:$0xff] }
   0xb   :  { %8265 = vmatprep.subr.bf16.mxu0 %v10202_v34  ;;  %v77_v43 = vld [vmem:[%s12246_s2 + $0x80] sm:$0xff]  ;;  %v10229_v45 = vpack.c.bf16 %v309_v40, %v307_v39  ;;  %v308_v46 = vld [vmem:[%s12247_s3 + $0x50] sm:$0xff]  ;;  %v82_v47 = vld [vmem:[%s12246_s2 + $0xa8] sm:$0xff] }
   0xc   :  { %v84_v48 = vld [vmem:[%s12246_s2 + $0xb8] sm:$0xff]  ;;  %v311_v49 = vld [vmem:[%s12247_s3 + $0x68] sm:$0xff]  ;;  %v10244_v50 = vpack.c.bf16 %v308_v46, %v306_v41  ;;  %v8246_v52 = vpack.c.bf16 %v79_v44, %v77_v43  ;;  %v310_v54 = vld [vmem:[%s12247_s3 + $0x60] sm:$0xff] }
   0xd   :  { %8239 = vmatpush1.bf16.msra.mxu1 %v8238_v24  ;;  %v313_v51 = vld [vmem:[%s12247_s3 + $0x78] sm:$0xff]  ;;  %v312_v55 = vld [vmem:[%s12247_s3 + $0x70] sm:$0xff] }
   0xe   :  { %8241 = vmatprep.subr.bf16.mxu1 %v8240_v29  ;;  %8267 = vmatpush1.bf16.msra.mxu0 %v10211_v37  ;;  %v10250_v53 = vpack.c.bf16 %v313_v51, %v311_v49 }
   0xf   :  { %8269 = vmatprep.subr.bf16.mxu0 %v10229_v45 }
  0x11   :  { %8243 = vmatpush1.bf16.msra.mxu1 %v8242_v38 }
  0x12   :  { %18 = vsyncpa [#allocation5], 0  ;;  %8245 = vmatprep.subr.bf16.mxu1 %v8244_v42  ;;  %v8248_v56 = vpack.c.bf16 %v84_v48, %v82_v47  ;;  %v81_v57 = vld [vmem:[%s12246_s2 + $0xa0] sm:$0xff]  ;;  %v83_v58 = vld [vmem:[%s12246_s2 + $0xb0] sm:$0xff]  ;;  %8271 = vmatpush1.bf16.msra.mxu0 %v10244_v50  ;;  %v10271_v61 = vpack.c.bf16 %v312_v55, %v310_v54  ;;  %v95_v11 = vlaneseq  ;;  %s10049_s25 = smov 64   ;;  %vm319_vm0 = vcmask 523264  }
  0x13   :  { %v86_v59 = vld [vmem:[%s12246_s2 + $0xc8] sm:$0xff]  ;;  %v88_v60 = vld [vmem:[%s12246_s2 + $0xd8] sm:$0xff]  ;;  %v8250_v62 = vpack.c.bf16 %v83_v58, %v81_v57  ;;  %8273 = vmatprep.subr.bf16.mxu0 %v10250_v53  ;;  %v85_v0 = vld [vmem:[%s12246_s2 + $0xc0] sm:$0xff]  ;;  %vm424_vm1 = vcmask 1048064   ;;  %vm10051_vm2 = vmmov 0   ;;  %vm6091_vm3 = vcmask 1045504  }
  0x14   :  { %v8252_v63 = vpack.c.bf16 %v88_v60, %v86_v59  ;;  %v87_v1 = vld [vmem:[%s12246_s2 + $0xd0] sm:$0xff]  ;;  %v90_v2 = vld [vmem:[%s12246_s2 + $0xe8] sm:$0xff]  ;;  %v92_v3 = vld [vmem:[%s12246_s2 + $0xf8] sm:$0xff]  ;;  %v96_v12 = vshrl.u32 %v95_v11, 7  ;;  %vm6195_vm4 = vcmask 1043456   ;;  %vm6299_vm5 = vcmask 1041408  }
  0x15   :  { %8247 = vmatpush1.bf16.msra.mxu1 %v8246_v52  ;;  %v8254_v4 = vpack.c.bf16 %v87_v1, %v85_v0  ;;  %v8256_v5 = vpack.c.bf16 %v92_v3, %v90_v2  ;;  %v89_v6 = vld [vmem:[%s12246_s2 + $0xe0] sm:$0xff]  ;;  %v91_v8 = vld [vmem:[%s12246_s2 + $0xf0] sm:$0xff]  ;;  %v46_v31 = vld [vmem:[%s12244_s0 + $0x8] sm:$0xff]  ;;  %vm6783_vm6 = vcmask 64512   ;;  %vm6787_vm7 = vcmask 58368  }
  0x16   :  { %8249 = vmatprep.subr.bf16.mxu1 %v8248_v56  ;;  %8275 = vmatpush1.bf16.msra.mxu0 %v10271_v61  ;;  %v8258_v9 = vpack.c.bf16 %v91_v8, %v89_v6  ;;  %v45_v10 = vld [vmem:[%s12244_s0] sm:$0xff]  ;;  %v10308_v15 = vsub.s32 0, %v96_v12  ;;  %v10313_v17 = vsub.s32 1, %v96_v12  ;;  %v47_v60 = vld [vmem:[%s12244_s0 + $0x10] sm:$0xff]  ;;  %vm7463_vm8 = vcmask 519168  }
  0x17   :  { %8277 = vmatprep.subr.bf16.mxu0 %v10185_v27  ;;  %v93_v16 = vld [vmem:[%s12248_s4] sm:$0x3]  ;;  %vm5961_vm9 = vcmask 254976   ;;  %vm5968_vm10 = vcmask 517376   ;;  %vm7513_vm11 = vcmask 1041920  }
  0x18   :  { %v10316_v18 = vrot.slane %v93_v16, %v10308_v15  ;;  %v10319_v19 = vrot.slane %v93_v16, %v10313_v17 }
  0x19   :  { %8251 = vmatpush1.bf16.msra.mxu1 %v8250_v62  ;;  %388 = vmatmul.mubr.f32.vlgmr.msra.gmra.mrb[0].mxu0 %v10048_v7 }
  0x1a   :  { %8253 = vmatprep.subr.bf16.mxu1 %v8252_v63  ;;  %8279 = vmatpush1.bf16.msra.mxu0 %v10187_v28 }
  0x1b   :  { %497 = vmatprep.mubr.f32.mxu0 %v10048_v7  ;;  %8281 = vmatprep.subr.bf16.mxu0 %v10202_v34 }
  0x1d   :  { %8255 = vmatpush1.bf16.msra.mxu1 %v8254_v4 }
  0x1e   :  { %8257 = vmatprep.subr.bf16.mxu1 %v8256_v5  ;;  %8283 = vmatpush1.bf16.msra.mxu0 %v10211_v37 }
  0x1f   :  { %8285 = vmatprep.subr.bf16.mxu0 %v10229_v45 }
  0x21   :  { %8259 = vmatpush1.bf16.msra.mxu1 %v8258_v9 }
  0x22   :  { %8287 = vmatpush1.bf16.msra.mxu0 %v10244_v50 }
  0x23   :  { %8289 = vmatprep.subr.bf16.mxu0 %v10250_v53 }
  0x24   :  { %170 = vmatmul.mubr.f32.vlgmr.msra.gmra.mrb[0].mxu1 %v45_v10 }
  0x25   :  { %175 = vmatprep.mubr.f32.mxu1 %v10048_v7 }
  0x26   :  { %8291 = vmatpush1.bf16.msra.mxu0 %v10271_v61 }
  0x27   :  { %8293 = vmatprep.subr.bf16.mxu0 %v10185_v27 }
  0x28   :  { %176 = vmatmul.mubr.f32.gmra.mrb[2].mxu1 %v46_v31 }
  0x29   :  { %181 = vmatprep.mubr.f32.mxu1 %v10048_v7 }
  0x2c   :  { %182 = vmatmul.mubr.f32.gmra.mrb[4].mxu1 %v47_v60 }
  0x2d   :  { %187 = vmatprep.mubr.f32.mxu1 %v10048_v7 }
  0xec   :  { %v389_v13 = vpop.f32.mrb[0].mxu0 }
  0xed   :  { %v391_v14 = vpop.f32.mrb[1].mxu0 }
  0xf7   :  { %v171_v20 = vpop.f32.mrb[0].mxu1 }
  0xf8   :  { %v172_v21 = vadd.f32 %v171_v20, %v10316_v18  ;;  %v173_v22 = vpop.f32.mrb[1].mxu1 }
  0xf9   :  { %v174_v23 = vadd.f32 %v173_v22, %v10319_v19 }
  0xfa   :  { %v394_v24 = vadd.f32 %v389_v13, %v172_v21 }
  0xfb   :  { %v395_v25 = vadd.f32 %v391_v14, %v174_v23  ;;  %v177_v47 = vpop.f32.mrb[2].mxu1 }
  0xfc   :  { %v7544_v26 = vmul.f32 -1.442695, %v394_v24  ;;  %v179_v48 = vpop.f32.mrb[3].mxu1  ;;  %v178_v49 = vadd.f32 %v177_v47, %v10316_v18 }
  0xfd   :  { %v7545_v36 = vmul.f32 -1.442695, %v395_v25  ;;  %v180_v51 = vadd.f32 %v179_v48, %v10319_v19 }
  0xfe   :  { %9444 = vpow2.f32 %v7544_v26  ;;  %v48_v26 = vld [vmem:[%s12244_s0 + $0x18] sm:$0xff] }
  0xff   :  { %9446 = vtanh.f32 %v395_v25  ;;  %v183_v11 = vpop.f32.mrb[4].mxu1  ;;  %188 = vmatmul.mubr.f32.gmra.mrb[6].mxu1 %v48_v26 }
 0x100   :  { %v185_v12 = vpop.f32.mrb[5].mxu1  ;;  %v184_v13 = vadd.f32 %v183_v11, %v10316_v18  ;;  %193 = vmatprep.mubr.f32.mxu1 %v10048_v7 }
 0x101   :  { %v186_v14 = vadd.f32 %v185_v12, %v10319_v19 }
 0x108   :  { %v9445_v29 = vpop.eup %9444 }
 0x109   :  { %v402_v30 = vadd.f32 1.0, %v9445_v29  ;;  %v9447_v32 = vpop.eup %9446 }
 0x10b   :  { %9448 = vrcp.f32 %v402_v30 }
 0x10c   :  { %9450 = vpow2.f32 %v7545_v36 }
 0x115   :  { %v9449_v33 = vpop.eup %9448 }
 0x116   :  { %v410_v35 = vmul.f32 %v9449_v33, %v9447_v32  ;;  %v9451_v38 = vpop.eup %9450  ;;  %v409_v40 = vmul.f32 0.0, %v9449_v33 }
 0x117   :  { %v403_v39 = vadd.f32 1.0, %v9451_v38 }
 0x118   :  { %412 = vrot.lane.b32.xlu0 %v410_v35, %s10049_s25 }
 0x119   :  { %9452 = vrcp.f32 %v403_v39 }
 0x123   :  { %v9453_v43 = vpop.eup %9452 }
 0x18a   :  { %v413_v41 = vpop.permute.xlu0 %412 }
 0x18b   :  { %v415_v42 = vadd.f32 %v413_v41, %v409_v40 }
 0x18d   :  { %9454 = vtanh.f32 %v415_v42 }
 0x197   :  { %v9455_v44 = vpop.eup %9454 }
 0x198   :  { %v10328_v46 = vmul.f32 %v9455_v44, %v9453_v43 }
 0x19a   :  { %7546 = vmatmul.mubr.msk.f32.vlgmr.msra.gmra.mrb[2].mxu0 %vm319_vm0, %v10328_v46  ;;  %418 = vst.msk [vmem:[#allocation3] sm:$0xff] %vm319_vm0, %v10328_v46 }
 0x19b   :  { %8295 = vmatpush1.bf16.msra.mxu0 %v10187_v28  ;;  %607 = vmatprep.mubr.f32.mxu0 %v10048_v7 }
 0x19c   :  { %8297 = vmatprep.subr.bf16.mxu0 %v10202_v34 }
 0x19f   :  { %8299 = vmatpush1.bf16.msra.mxu0 %v10211_v37 }
 0x1a0   :  { %8301 = vmatprep.subr.bf16.mxu0 %v10229_v45 }
 0x1a3   :  { %8303 = vmatpush1.bf16.msra.mxu0 %v10244_v50 }
 0x1a4   :  { %8305 = vmatprep.subr.bf16.mxu0 %v10250_v53 }
 0x1a7   :  { %8307 = vmatpush1.bf16.msra.mxu0 %v10271_v61 }
 0x1a8   :  { %8309 = vmatprep.subr.bf16.mxu0 %v10185_v27 }
 0x1d2   :  { %v189_v43 = vpop.f32.mrb[6].mxu1 }
 0x1d3   :  { %v191_v44 = vpop.f32.mrb[7].mxu1  ;;  %v190_v47 = vadd.f32 %v189_v43, %v10316_v18 }
 0x1d4   :  { %v192_v48 = vadd.f32 %v191_v44, %v10319_v19 }
 0x26d   :  { %v499_v52 = vpop.f32.mrb[2].mxu0 }
 0x26e   :  { %v504_v54 = vadd.f32 %v499_v52, %v178_v49  ;;  %v501_v55 = vpop.f32.mrb[3].mxu0 }
 0x26f   :  { %v505_v56 = vadd.f32 %v501_v55, %v180_v51 }
 0x270   :  { %v7547_v57 = vmul.f32 -1.442695, %v504_v54 }
 0x271   :  { %v7548_v1 = vmul.f32 -1.442695, %v505_v56 }
 0x272   :  { %9456 = vpow2.f32 %v7547_v57 }
 0x273   :  { %9458 = vtanh.f32 %v505_v56 }
 0x27c   :  { %v9457_v58 = vpop.eup %9456 }
 0x27d   :  { %v512_v59 = vadd.f32 1.0, %v9457_v58  ;;  %v9459_v62 = vpop.eup %9458  ;;  %v49_v58 = vld [vmem:[%s12244_s0 + $0x20] sm:$0xff] }
 0x27e   :  { %194 = vmatmul.mubr.f32.gmra.mrb[8].mxu1 %v49_v58  ;;  %v51_v58 = vld [vmem:[%s12244_s0 + $0x30] sm:$0xff] }
 0x27f   :  { %9460 = vrcp.f32 %v512_v59  ;;  %199 = vmatprep.mubr.f32.mxu1 %v10048_v7 }
 0x280   :  { %9462 = vpow2.f32 %v7548_v1 }
 0x289   :  { %v9461_v63 = vpop.eup %9460 }
 0x28a   :  { %v520_v0 = vmul.f32 %v9461_v63, %v9459_v62  ;;  %v9463_v2 = vpop.eup %9462  ;;  %v519_v4 = vmul.f32 %v9461_v63, %v415_v42 }
 0x28b   :  { %v513_v3 = vadd.f32 1.0, %v9463_v2 }
 0x28c   :  { %522 = vrot.lane.b32.xlu0 %v520_v0, %s10049_s25 }
 0x28d   :  { %9464 = vrcp.f32 %v513_v3 }
 0x297   :  { %v9465_v8 = vpop.eup %9464 }
 0x2fe   :  { %v523_v5 = vpop.permute.xlu0 %522 }
 0x2ff   :  { %v525_v6 = vadd.f32 %v523_v5, %v519_v4 }
 0x301   :  { %9466 = vtanh.f32 %v525_v6 }
 0x30b   :  { %v9467_v9 = vpop.eup %9466 }
 0x30c   :  { %v10350_v10 = vmul.f32 %v9467_v9, %v9465_v8 }
 0x30e   :  { %7549 = vmatmul.mubr.msk.f32.vlgmr.msra.gmra.mrb[4].mxu0 %vm319_vm0, %v10350_v10  ;;  %529 = vst.msk [vmem:[#allocation3 + $0x8] sm:$0xff] %vm319_vm0, %v10350_v10 }
 0x30f   :  { %8311 = vmatpush1.bf16.msra.mxu0 %v10187_v28  ;;  %717 = vmatprep.mubr.f32.mxu0 %v10048_v7 }
 0x310   :  { %8313 = vmatprep.subr.bf16.mxu0 %v10202_v34 }
 0x313   :  { %8315 = vmatpush1.bf16.msra.mxu0 %v10211_v37 }
 0x314   :  { %8317 = vmatprep.subr.bf16.mxu0 %v10229_v45 }
 0x317   :  { %8319 = vmatpush1.bf16.msra.mxu0 %v10244_v50 }
 0x318   :  { %8321 = vmatprep.subr.bf16.mxu0 %v10250_v53 }
 0x31b   :  { %8323 = vmatpush1.bf16.msra.mxu0 %v10271_v61 }
 0x31c   :  { %8325 = vmatprep.subr.bf16.mxu0 %v10185_v27 }
 0x351   :  { %v195_v9 = vpop.f32.mrb[8].mxu1 }
 0x352   :  { %v197_v11 = vpop.f32.mrb[9].mxu1  ;;  %v196_v12 = vadd.f32 %v195_v9, %v10316_v18 }
 0x3e1   :  { %v609_v16 = vpop.f32.mrb[4].mxu0 }
 0x3e2   :  { %v614_v20 = vadd.f32 %v609_v16, %v184_v13  ;;  %v611_v21 = vpop.f32.mrb[5].mxu0  ;;  %v198_v13 = vadd.f32 %v197_v11, %v10319_v19 }
 0x3e3   :  { %v615_v22 = vadd.f32 %v611_v21, %v186_v14 }
 0x3e4   :  { %v7550_v23 = vmul.f32 -1.442695, %v614_v20 }
 0x3e5   :  { %v7551_v32 = vmul.f32 -1.442695, %v615_v22 }
 0x3e6   :  { %9468 = vpow2.f32 %v7550_v23 }
 0x3e7   :  { %9470 = vtanh.f32 %v615_v22 }
 0x3f0   :  { %v9469_v24 = vpop.eup %9468 }
 0x3f1   :  { %v622_v25 = vadd.f32 1.0, %v9469_v24  ;;  %v9471_v29 = vpop.eup %9470 }
 0x3f3   :  { %9472 = vrcp.f32 %v622_v25  ;;  %v50_v25 = vld [vmem:[%s12244_s0 + $0x28] sm:$0xff] }
 0x3f4   :  { %9474 = vpow2.f32 %v7551_v32  ;;  %200 = vmatmul.mubr.f32.gmra.mrb[10].mxu1 %v50_v25 }
 0x3f5   :  { %205 = vmatprep.mubr.f32.mxu1 %v10048_v7 }
 0x3f8   :  { %206 = vmatmul.mubr.f32.gmra.mrb[12].mxu1 %v51_v58 }
 0x3f9   :  { %211 = vmatprep.mubr.f32.mxu1 %v10048_v7 }
 0x3fd   :  { %v9473_v30 = vpop.eup %9472 }
 0x3fe   :  { %v630_v31 = vmul.f32 %v9473_v30, %v9471_v29  ;;  %v9475_v33 = vpop.eup %9474  ;;  %v629_v36 = vmul.f32 %v9473_v30, %v525_v6 }
 0x3ff   :  { %v623_v35 = vadd.f32 1.0, %v9475_v33 }
 0x400   :  { %632 = vrot.lane.b32.xlu1 %v630_v31, %s10049_s25 }
 0x401   :  { %9476 = vrcp.f32 %v623_v35 }
 0x40b   :  { %v9477_v40 = vpop.eup %9476 }
 0x472   :  { %v633_v38 = vpop.permute.xlu1 %632 }
 0x473   :  { %v635_v39 = vadd.f32 %v633_v38, %v629_v36 }
 0x475   :  { %9478 = vtanh.f32 %v635_v39 }
 0x47f   :  { %v9479_v41 = vpop.eup %9478 }
 0x480   :  { %v10372_v42 = vmul.f32 %v9479_v41, %v9477_v40 }
 0x482   :  { %7552 = vmatmul.mubr.msk.f32.vlgmr.msra.gmra.mrb[6].mxu0 %vm319_vm0, %v10372_v42  ;;  %639 = vst.msk [vmem:[#allocation3 + $0x10] sm:$0xff] %vm319_vm0, %v10372_v42 }
 0x483   :  { %8327 = vmatpush1.bf16.msra.mxu0 %v10187_v28  ;;  %827 = vmatprep.mubr.f32.mxu0 %v10048_v7 }
 0x484   :  { %8329 = vmatprep.subr.bf16.mxu0 %v10202_v34 }
 0x487   :  { %8331 = vmatpush1.bf16.msra.mxu0 %v10211_v37 }
 0x488   :  { %8333 = vmatprep.subr.bf16.mxu0 %v10229_v45 }
 0x48b   :  { %8335 = vmatpush1.bf16.msra.mxu0 %v10244_v50 }
 0x48c   :  { %8337 = vmatprep.subr.bf16.mxu0 %v10250_v53 }
 0x48f   :  { %8339 = vmatpush1.bf16.msra.mxu0 %v10271_v61 }
 0x490   :  { %8341 = vmatprep.subr.bf16.mxu0 %v10185_v27 }
 0x4c7   :  { %v201_v43 = vpop.f32.mrb[10].mxu1 }
 0x4c8   :  { %v203_v44 = vpop.f32.mrb[11].mxu1 }
 0x4cb   :  { %v207_v11 = vpop.f32.mrb[12].mxu1 }
 0x555   :  { %v719_v49 = vpop.f32.mrb[6].mxu0 }
 0x556   :  { %v724_v51 = vadd.f32 %v719_v49, %v190_v47  ;;  %v721_v52 = vpop.f32.mrb[7].mxu0  ;;  %v202_v47 = vadd.f32 %v201_v43, %v10316_v18 }
 0x557   :  { %v725_v54 = vadd.f32 %v721_v52, %v192_v48  ;;  %v204_v48 = vadd.f32 %v203_v44, %v10319_v19 }
 0x558   :  { %v7553_v55 = vmul.f32 -1.442695, %v724_v51 }
 0x559   :  { %v7554_v63 = vmul.f32 -1.442695, %v725_v54 }
 0x55a   :  { %9480 = vpow2.f32 %v7553_v55 }
 0x55b   :  { %9482 = vtanh.f32 %v725_v54 }
 0x564   :  { %v9481_v56 = vpop.eup %9480 }
 0x565   :  { %v732_v57 = vadd.f32 1.0, %v9481_v56  ;;  %v9483_v59 = vpop.eup %9482 }
 0x567   :  { %9484 = vrcp.f32 %v732_v57 }
 0x568   :  { %9486 = vpow2.f32 %v7554_v63 }
 0x571   :  { %v9485_v60 = vpop.eup %9484 }
 0x572   :  { %v740_v62 = vmul.f32 %v9485_v60, %v9483_v59  ;;  %v9487_v0 = vpop.eup %9486  ;;  %v739_v2 = vmul.f32 %v9485_v60, %v635_v39 }
 0x573   :  { %v733_v1 = vadd.f32 1.0, %v9487_v0 }
 0x574   :  { %742 = vrot.lane.b32.xlu1 %v740_v62, %s10049_s25 }
 0x575   :  { %9488 = vrcp.f32 %v733_v1 }
 0x57f   :  { %v9489_v5 = vpop.eup %9488 }
 0x5e6   :  { %v743_v3 = vpop.permute.xlu1 %742 }
 0x5e7   :  { %v745_v4 = vadd.f32 %v743_v3, %v739_v2 }
 0x5e9   :  { %9490 = vtanh.f32 %v745_v4 }
 0x5f3   :  { %v9491_v6 = vpop.eup %9490 }
 0x5f4   :  { %v10394_v8 = vmul.f32 %v9491_v6, %v9489_v5 }
 0x5f6   :  { %7555 = vmatmul.mubr.msk.f32.vlgmr.msra.gmra.mrb[8].mxu0 %vm319_vm0, %v10394_v8  ;;  %749 = vst.msk [vmem:[#allocation3 + $0x18] sm:$0xff] %vm319_vm0, %v10394_v8 }
 0x5f7   :  { %8343 = vmatpush1.bf16.msra.mxu0 %v10187_v28  ;;  %937 = vmatprep.mubr.f32.mxu0 %v10048_v7 }
 0x5f8   :  { %8345 = vmatprep.subr.bf16.mxu0 %v10202_v34 }
 0x5fb   :  { %8347 = vmatpush1.bf16.msra.mxu0 %v10211_v37 }
 0x5fc   :  { %8349 = vmatprep.subr.bf16.mxu0 %v10229_v45 }
 0x5ff   :  { %8351 = vmatpush1.bf16.msra.mxu0 %v10244_v50 }
 0x600   :  { %8353 = vmatprep.subr.bf16.mxu0 %v10250_v53 }
 0x603   :  { %8355 = vmatpush1.bf16.msra.mxu0 %v10271_v61 }
 0x604   :  { %8357 = vmatprep.subr.bf16.mxu0 %v10185_v27 }
 0x6c9   :  { %v829_v14 = vpop.f32.mrb[8].mxu0 }
 0x6ca   :  { %v834_v16 = vadd.f32 %v829_v14, %v196_v12  ;;  %v831_v20 = vpop.f32.mrb[9].mxu0  ;;  %v209_v12 = vpop.f32.mrb[13].mxu1 }
 0x6cb   :  { %v835_v21 = vadd.f32 %v831_v20, %v198_v13  ;;  %v208_v13 = vadd.f32 %v207_v11, %v10316_v18  ;;  %v210_v14 = vadd.f32 %v209_v12, %v10319_v19 }
 0x6cc   :  { %v7556_v22 = vmul.f32 -1.442695, %v834_v16 }
 0x6cd   :  { %v7557_v31 = vmul.f32 -1.442695, %v835_v21 }
 0x6ce   :  { %9492 = vpow2.f32 %v7556_v22 }
 0x6cf   :  { %9494 = vtanh.f32 %v835_v21 }
 0x6d8   :  { %v9493_v23 = vpop.eup %9492 }
 0x6d9   :  { %v842_v24 = vadd.f32 1.0, %v9493_v23  ;;  %v9495_v26 = vpop.eup %9494 }
 0x6db   :  { %9496 = vrcp.f32 %v842_v24 }
 0x6dc   :  { %9498 = vpow2.f32 %v7557_v31 }
 0x6e5   :  { %v9497_v29 = vpop.eup %9496 }
 0x6e6   :  { %v850_v30 = vmul.f32 %v9497_v29, %v9495_v26  ;;  %v9499_v32 = vpop.eup %9498  ;;  %v849_v35 = vmul.f32 %v9497_v29, %v745_v4  ;;  %v52_v26 = vld [vmem:[%s12244_s0 + $0x38] sm:$0xff] }
 0x6e7   :  { %v843_v33 = vadd.f32 1.0, %v9499_v32  ;;  %212 = vmatmul.mubr.f32.gmra.mrb[14].mxu1 %v52_v26 }
 0x6e8   :  { %852 = vrot.lane.b32.xlu0 %v850_v30, %s10049_s25  ;;  %217 = vmatprep.mubr.f32.mxu1 %v10048_v7 }
 0x6e9   :  { %9500 = vrcp.f32 %v843_v33 }
 0x6f3   :  { %v9501_v39 = vpop.eup %9500 }
 0x75a   :  { %v853_v36 = vpop.permute.xlu0 %852 }
 0x75b   :  { %v855_v38 = vadd.f32 %v853_v36, %v849_v35 }
 0x75d   :  { %9502 = vtanh.f32 %v855_v38 }
 0x767   :  { %v9503_v40 = vpop.eup %9502 }
 0x768   :  { %v10416_v41 = vmul.f32 %v9503_v40, %v9501_v39 }
 0x76a   :  { %7558 = vmatmul.mubr.msk.f32.vlgmr.msra.gmra.mrb[10].mxu0 %vm319_vm0, %v10416_v41  ;;  %859 = vst.msk [vmem:[#allocation3 + $0x20] sm:$0xff] %vm319_vm0, %v10416_v41 }
 0x76b   :  { %8359 = vmatpush1.bf16.msra.mxu0 %v10187_v28  ;;  %1047 = vmatprep.mubr.f32.mxu0 %v10048_v7 }
 0x76c   :  { %8361 = vmatprep.subr.bf16.mxu0 %v10202_v34 }
 0x76f   :  { %8363 = vmatpush1.bf16.msra.mxu0 %v10211_v37 }
 0x770   :  { %8365 = vmatprep.subr.bf16.mxu0 %v10229_v45 }
 0x773   :  { %8367 = vmatpush1.bf16.msra.mxu0 %v10244_v50 }
 0x774   :  { %8369 = vmatprep.subr.bf16.mxu0 %v10250_v53 }
 0x777   :  { %8371 = vmatpush1.bf16.msra.mxu0 %v10271_v61 }
 0x778   :  { %8373 = vmatprep.subr.bf16.mxu0 %v10185_v27 }
 0x83d   :  { %v939_v49 = vpop.f32.mrb[10].mxu0 }
 0x83e   :  { %v944_v51 = vadd.f32 %v939_v49, %v202_v47  ;;  %v941_v52 = vpop.f32.mrb[11].mxu0  ;;  %v213_v47 = vpop.f32.mrb[14].mxu1 }
 0x83f   :  { %v945_v54 = vadd.f32 %v941_v52, %v204_v48  ;;  %v215_v48 = vpop.f32.mrb[15].mxu1  ;;  %v214_v49 = vadd.f32 %v213_v47, %v10316_v18 }
 0x840   :  { %v7559_v55 = vmul.f32 -1.442695, %v944_v51  ;;  %v216_v51 = vadd.f32 %v215_v48, %v10319_v19 }
 0x841   :  { %v7560_v63 = vmul.f32 -1.442695, %v945_v54 }
 0x842   :  { %9504 = vpow2.f32 %v7559_v55 }
 0x843   :  { %9506 = vtanh.f32 %v945_v54 }
 0x84c   :  { %v9505_v56 = vpop.eup %9504 }
 0x84d   :  { %v952_v57 = vadd.f32 1.0, %v9505_v56  ;;  %v9507_v59 = vpop.eup %9506 }
 0x84f   :  { %9508 = vrcp.f32 %v952_v57 }
 0x850   :  { %9510 = vpow2.f32 %v7560_v63 }
 0x859   :  { %v9509_v60 = vpop.eup %9508 }
 0x85a   :  { %v960_v62 = vmul.f32 %v9509_v60, %v9507_v59  ;;  %v9511_v0 = vpop.eup %9510  ;;  %v959_v2 = vmul.f32 %v9509_v60, %v855_v38  ;;  %v53_v60 = vld [vmem:[%s12244_s0 + $0x40] sm:$0xff] }
 0x85b   :  { %v953_v1 = vadd.f32 1.0, %v9511_v0  ;;  %218 = vmatmul.mubr.f32.gmra.mrb[16].mxu1 %v53_v60 }
 0x85c   :  { %962 = vrot.lane.b32.xlu1 %v960_v62, %s10049_s25  ;;  %223 = vmatprep.mubr.f32.mxu1 %v10048_v7 }
 0x85d   :  { %9512 = vrcp.f32 %v953_v1 }
 0x867   :  { %v9513_v5 = vpop.eup %9512 }
 0x8ce   :  { %v963_v3 = vpop.permute.xlu1 %962 }
 0x8cf   :  { %v965_v4 = vadd.f32 %v963_v3, %v959_v2 }
 0x8d1   :  { %9514 = vtanh.f32 %v965_v4 }
 0x8db   :  { %v9515_v6 = vpop.eup %9514 }
 0x8dc   :  { %v10438_v9 = vmul.f32 %v9515_v6, %v9513_v5 }
 0x8de   :  { %7561 = vmatmul.mubr.msk.f32.vlgmr.msra.gmra.mrb[12].mxu0 %vm319_vm0, %v10438_v9  ;;  %969 = vst.msk [vmem:[#allocation3 + $0x28] sm:$0xff] %vm319_vm0, %v10438_v9 }
 0x8df   :  { %8375 = vmatpush1.bf16.msra.mxu0 %v10187_v28  ;;  %1157 = vmatprep.mubr.f32.mxu0 %v10048_v7 }
 0x8e0   :  { %8377 = vmatprep.subr.bf16.mxu0 %v10202_v34 }
 0x8e3   :  { %8379 = vmatpush1.bf16.msra.mxu0 %v10211_v37 }
 0x8e4   :  { %8381 = vmatprep.subr.bf16.mxu0 %v10229_v45 }
 0x8e7   :  { %8383 = vmatpush1.bf16.msra.mxu0 %v10244_v50 }
 0x8e8   :  { %8385 = vmatprep.subr.bf16.mxu0 %v10250_v53 }
 0x8eb   :  { %8387 = vmatpush1.bf16.msra.mxu0 %v10271_v61 }
 0x8ec   :  { %8389 = vmatprep.subr.bf16.mxu0 %v10185_v27 }
 0x9b1   :  { %v1049_v16 = vpop.f32.mrb[12].mxu0 }
 0x9b2   :  { %v1054_v20 = vadd.f32 %v1049_v16, %v208_v13  ;;  %v1051_v21 = vpop.f32.mrb[13].mxu0 }
 0x9b3   :  { %v1055_v22 = vadd.f32 %v1051_v21, %v210_v14  ;;  %v219_v14 = vpop.f32.mrb[16].mxu1 }
 0x9b4   :  { %v7562_v23 = vmul.f32 -1.442695, %v1054_v20  ;;  %v221_v16 = vpop.f32.mrb[17].mxu1  ;;  %v220_v20 = vadd.f32 %v219_v14, %v10316_v18 }
 0x9b5   :  { %v7563_v32 = vmul.f32 -1.442695, %v1055_v22  ;;  %v222_v21 = vadd.f32 %v221_v16, %v10319_v19 }
 0x9b6   :  { %9516 = vpow2.f32 %v7562_v23 }
 0x9b7   :  { %9518 = vtanh.f32 %v1055_v22 }
 0x9c0   :  { %v9517_v24 = vpop.eup %9516 }
 0x9c1   :  { %v1062_v25 = vadd.f32 1.0, %v9517_v24  ;;  %v9519_v29 = vpop.eup %9518 }
 0x9c3   :  { %9520 = vrcp.f32 %v1062_v25 }
 0x9c4   :  { %9522 = vpow2.f32 %v7563_v32 }
 0x9cd   :  { %v9521_v30 = vpop.eup %9520 }
 0x9ce   :  { %v1070_v31 = vmul.f32 %v9521_v30, %v9519_v29  ;;  %v9523_v33 = vpop.eup %9522  ;;  %v1069_v36 = vmul.f32 %v9521_v30, %v965_v4 }
 0x9cf   :  { %v1063_v35 = vadd.f32 1.0, %v9523_v33 }
 0x9d0   :  { %1072 = vrot.lane.b32.xlu0 %v1070_v31, %s10049_s25  ;;  %v54_v31 = vld [vmem:[%s12244_s0 + $0x48] sm:$0xff] }
 0x9d1   :  { %9524 = vrcp.f32 %v1063_v35  ;;  %224 = vmatmul.mubr.f32.gmra.mrb[18].mxu1 %v54_v31 }
 0x9d2   :  { %229 = vmatprep.mubr.f32.mxu1 %v10048_v7 }
 0x9db   :  { %v9525_v40 = vpop.eup %9524 }
 0xa42   :  { %v1073_v38 = vpop.permute.xlu0 %1072 }
 0xa43   :  { %v1075_v39 = vadd.f32 %v1073_v38, %v1069_v36 }
 0xa45   :  { %9526 = vtanh.f32 %v1075_v39 }
 0xa4f   :  { %v9527_v43 = vpop.eup %9526 }
 0xa50   :  { %v10460_v44 = vmul.f32 %v9527_v43, %v9525_v40 }
 0xa52   :  { %7564 = vmatmul.mubr.msk.f32.vlgmr.msra.gmra.mrb[14].mxu0 %vm319_vm0, %v10460_v44  ;;  %1079 = vst.msk [vmem:[#allocation3 + $0x30] sm:$0xff] %vm319_vm0, %v10460_v44 }
 0xa53   :  { %8391 = vmatpush1.bf16.msra.mxu0 %v10187_v28  ;;  %1267 = vmatprep.mubr.f32.mxu0 %v10048_v7 }
 0xa54   :  { %8393 = vmatprep.subr.bf16.mxu0 %v10202_v34 }
 0xa57   :  { %8395 = vmatpush1.bf16.msra.mxu0 %v10211_v37 }
 0xa58   :  { %8397 = vmatprep.subr.bf16.mxu0 %v10229_v45 }
 0xa5b   :  { %8399 = vmatpush1.bf16.msra.mxu0 %v10244_v50 }
 0xa5c   :  { %8401 = vmatprep.subr.bf16.mxu0 %v10250_v53 }
 0xa5f   :  { %8403 = vmatpush1.bf16.msra.mxu0 %v10271_v61 }
 0xa60   :  { %8405 = vmatprep.subr.bf16.mxu0 %v10185_v27 }
 0xb25   :  { %v1159_v52 = vpop.f32.mrb[14].mxu0 }
 0xb26   :  { %v1164_v54 = vadd.f32 %v1159_v52, %v214_v49  ;;  %v1161_v55 = vpop.f32.mrb[15].mxu0  ;;  %v225_v52 = vpop.f32.mrb[18].mxu1 }
 0xb27   :  { %v1165_v56 = vadd.f32 %v1161_v55, %v216_v51  ;;  %v226_v55 = vadd.f32 %v225_v52, %v10316_v18 }
 0xb28   :  { %v7565_v57 = vmul.f32 -1.442695, %v1164_v54  ;;  %v227_v54 = vpop.f32.mrb[19].mxu1 }
 0xb29   :  { %v7566_v1 = vmul.f32 -1.442695, %v1165_v56 }
 0xb2a   :  { %9528 = vpow2.f32 %v7565_v57 }
 0xb2b   :  { %9530 = vtanh.f32 %v1165_v56  ;;  %v228_v56 = vadd.f32 %v227_v54, %v10319_v19 }
 0xb34   :  { %v9529_v58 = vpop.eup %9528 }
 0xb35   :  { %v1172_v59 = vadd.f32 1.0, %v9529_v58  ;;  %v9531_v62 = vpop.eup %9530 }
 0xb37   :  { %9532 = vrcp.f32 %v1172_v59 }
 0xb38   :  { %9534 = vpow2.f32 %v7566_v1  ;;  %v55_v1 = vld [vmem:[%s12244_s0 + $0x50] sm:$0xff] }
 0xb39   :  { %230 = vmatmul.mubr.f32.gmra.mrb[20].mxu1 %v55_v1 }
 0xb3a   :  { %235 = vmatprep.mubr.f32.mxu1 %v10048_v7 }
 0xb41   :  { %v9533_v63 = vpop.eup %9532 }
 0xb42   :  { %v1180_v0 = vmul.f32 %v9533_v63, %v9531_v62  ;;  %v9535_v2 = vpop.eup %9534  ;;  %v1179_v4 = vmul.f32 %v9533_v63, %v1075_v39 }
 0xb43   :  { %v1173_v3 = vadd.f32 1.0, %v9535_v2 }
 0xb44   :  { %1182 = vrot.lane.b32.xlu1 %v1180_v0, %s10049_s25 }
 0xb45   :  { %9536 = vrcp.f32 %v1173_v3 }
 0xb4f   :  { %v9537_v11 = vpop.eup %9536 }
 0xbb6   :  { %v1183_v5 = vpop.permute.xlu1 %1182 }
 0xbb7   :  { %v1185_v6 = vadd.f32 %v1183_v5, %v1179_v4 }
 0xbb9   :  { %9538 = vtanh.f32 %v1185_v6 }
 0xbc3   :  { %v9539_v12 = vpop.eup %9538 }
 0xbc4   :  { %v10482_v13 = vmul.f32 %v9539_v12, %v9537_v11 }
 0xbc6   :  { %7567 = vmatmul.mubr.msk.f32.vlgmr.msra.gmra.mrb[16].mxu0 %vm319_vm0, %v10482_v13  ;;  %1189 = vst.msk [vmem:[#allocation3 + $0x38] sm:$0xff] %vm319_vm0, %v10482_v13 }
 0xbc7   :  { %8407 = vmatpush1.bf16.msra.mxu0 %v10187_v28  ;;  %1375 = vmatprep.mubr.f32.mxu0 %v10048_v7 }
 0xbc8   :  { %8409 = vmatprep.subr.bf16.mxu0 %v10202_v34 }
 0xbcb   :  { %8411 = vmatpush1.bf16.msra.mxu0 %v10211_v37 }
 0xbcc   :  { %8413 = vmatprep.subr.bf16.mxu0 %v10229_v45 }
 0xbcf   :  { %8415 = vmatpush1.bf16.msra.mxu0 %v10244_v50 }
 0xbd0   :  { %8417 = vmatprep.subr.bf16.mxu0 %v10250_v53 }
 0xbd3   :  { %8419 = vmatpush1.bf16.msra.mxu0 %v10271_v61 }
 0xbd4   :  { %8421 = vmatprep.subr.bf16.mxu0 %v10185_v27 }
 0xc99   :  { %v1269_v22 = vpop.f32.mrb[16].mxu0 }
 0xc9a   :  { %v1274_v23 = vadd.f32 %v1269_v22, %v220_v20  ;;  %v1271_v24 = vpop.f32.mrb[17].mxu0 }
 0xc9b   :  { %v1275_v25 = vadd.f32 %v1271_v24, %v222_v21 }
 0xc9c   :  { %v7568_v26 = vmul.f32 -1.442695, %v1274_v23  ;;  %v231_v23 = vpop.f32.mrb[20].mxu1 }
 0xc9d   :  { %v7569_v36 = vmul.f32 -1.442695, %v1275_v25  ;;  %v233_v24 = vpop.f32.mrb[21].mxu1 }
 0xc9e   :  { %9540 = vpow2.f32 %v7568_v26  ;;  %v234_v26 = vadd.f32 %v233_v24, %v10319_v19 }
 0xc9f   :  { %9542 = vtanh.f32 %v1275_v25  ;;  %v232_v25 = vadd.f32 %v231_v23, %v10316_v18 }
 0xca8   :  { %v9541_v29 = vpop.eup %9540 }
 0xca9   :  { %v1282_v30 = vadd.f32 1.0, %v9541_v29  ;;  %v9543_v32 = vpop.eup %9542 }
 0xcab   :  { %9544 = vrcp.f32 %v1282_v30 }
 0xcac   :  { %9546 = vpow2.f32 %v7569_v36 }
 0xcb5   :  { %v9545_v33 = vpop.eup %9544 }
 0xcb6   :  { %v1290_v35 = vmul.f32 %v9545_v33, %v9543_v32  ;;  %v9547_v38 = vpop.eup %9546  ;;  %v1289_v40 = vmul.f32 %v9545_v33, %v1185_v6 }
 0xcb7   :  { %v1283_v39 = vadd.f32 1.0, %v9547_v38  ;;  %v56_v38 = vld [vmem:[%s12244_s0 + $0x58] sm:$0xff] }
 0xcb8   :  { %1292 = vrot.lane.b32.xlu0 %v1290_v35, %s10049_s25  ;;  %236 = vmatmul.mubr.f32.gmra.mrb[22].mxu1 %v56_v38 }
 0xcb9   :  { %9548 = vrcp.f32 %v1283_v39  ;;  %241 = vmatprep.mubr.f32.mxu1 %v10048_v7 }
 0xcc3   :  { %v9549_v48 = vpop.eup %9548 }
 0xd2a   :  { %v1293_v43 = vpop.permute.xlu0 %1292 }
 0xd2b   :  { %v1295_v47 = vadd.f32 %v1293_v43, %v1289_v40 }
 0xd2d   :  { %9550 = vtanh.f32 %v1295_v47 }
 0xd37   :  { %v9551_v49 = vpop.eup %9550 }
 0xd38   :  { %v10504_v51 = vmul.f32 %v9551_v49, %v9549_v48 }
 0xd3a   :  { %7570 = vmatmul.mubr.msk.f32.vlgmr.msra.gmra.mrb[18].mxu0 %vm319_vm0, %v10504_v51 }
 0xd3b   :  { %8423 = vmatpush1.bf16.msra.mxu0 %v10187_v28  ;;  %1483 = vmatprep.mubr.f32.mxu0 %v10048_v7 }
 0xd3c   :  { %8425 = vmatprep.subr.bf16.mxu0 %v10202_v34 }
 0xd3f   :  { %8427 = vmatpush1.bf16.msra.mxu0 %v10211_v37 }
 0xd40   :  { %8429 = vmatprep.subr.bf16.mxu0 %v10229_v45 }
 0xd43   :  { %8431 = vmatpush1.bf16.msra.mxu0 %v10244_v50 }
 0xd44   :  { %8433 = vmatprep.subr.bf16.mxu0 %v10250_v53 }
 0xd47   :  { %8435 = vmatpush1.bf16.msra.mxu0 %v10271_v61 }
 0xd48   :  { %8437 = vmatprep.subr.bf16.mxu0 %v10185_v27 }
 0xe0d   :  { %v1377_v57 = vpop.f32.mrb[18].mxu0 }
 0xe0e   :  { %v1382_v58 = vadd.f32 %v1377_v57, %v226_v55  ;;  %v1379_v59 = vpop.f32.mrb[19].mxu0 }
 0xe0f   :  { %v1383_v60 = vadd.f32 %v1379_v59, %v228_v56  ;;  %v237_v59 = vpop.f32.mrb[22].mxu1 }
 0xe10   :  { %v7571_v62 = vmul.f32 -1.442695, %v1382_v58 }
 0xe11   :  { %v7572_v5 = vmul.f32 -1.442695, %v1383_v60 }
 0xe12   :  { %9552 = vpow2.f32 %v7571_v62  ;;  %v238_v62 = vadd.f32 %v237_v59, %v10316_v18 }
 0xe13   :  { %9554 = vtanh.f32 %v1383_v60  ;;  %v239_v60 = vpop.f32.mrb[23].mxu1 }
 0xe1c   :  { %v9553_v63 = vpop.eup %9552 }
 0xe1d   :  { %v1390_v0 = vadd.f32 1.0, %v9553_v63  ;;  %v9555_v2 = vpop.eup %9554  ;;  %v240_v63 = vadd.f32 %v239_v60, %v10319_v19 }
 0xe1f   :  { %9556 = vrcp.f32 %v1390_v0 }
 0xe20   :  { %9558 = vpow2.f32 %v7572_v5 }
 0xe29   :  { %v9557_v3 = vpop.eup %9556 }
 0xe2a   :  { %v1398_v4 = vmul.f32 %v9557_v3, %v9555_v2  ;;  %v9559_v6 = vpop.eup %9558  ;;  %v1397_v12 = vmul.f32 %v9557_v3, %v1295_v47 }
 0xe2b   :  { %v1391_v11 = vadd.f32 1.0, %v9559_v6 }
 0xe2c   :  { %1400 = vrot.lane.b32.xlu1 %v1398_v4, %s10049_s25 }
 0xe2d   :  { %9560 = vrcp.f32 %v1391_v11  ;;  %v57_v11 = vld [vmem:[%s12244_s0 + $0x60] sm:$0xff] }
 0xe2e   :  { %242 = vmatmul.mubr.f32.gmra.mrb[24].mxu1 %v57_v11 }
 0xe2f   :  { %247 = vmatprep.mubr.f32.mxu1 %v10048_v7 }
 0xe37   :  { %v9561_v20 = vpop.eup %9560 }
 0xe9e   :  { %v1401_v14 = vpop.permute.xlu1 %1400 }
 0xe9f   :  { %v1403_v16 = vadd.f32 %v1401_v14, %v1397_v12 }
 0xea1   :  { %9562 = vtanh.f32 %v1403_v16 }
 0xeab   :  { %v9563_v21 = vpop.eup %9562 }
 0xeac   :  { %v10524_v22 = vmul.f32 %v9563_v21, %v9561_v20 }
 0xeae   :  { %7573 = vmatmul.mubr.msk.f32.vlgmr.msra.gmra.mrb[20].mxu0 %vm319_vm0, %v10524_v22 }
 0xeaf   :  { %8439 = vmatpush1.bf16.msra.mxu0 %v10187_v28  ;;  %1591 = vmatprep.mubr.f32.mxu0 %v10048_v7 }
 0xeb0   :  { %8441 = vmatprep.subr.bf16.mxu0 %v10202_v34 }
 0xeb3   :  { %8443 = vmatpush1.bf16.msra.mxu0 %v10211_v37 }
 0xeb4   :  { %8445 = vmatprep.subr.bf16.mxu0 %v10229_v45 }
 0xeb7   :  { %8447 = vmatpush1.bf16.msra.mxu0 %v10244_v50 }
 0xeb8   :  { %8449 = vmatprep.subr.bf16.mxu0 %v10250_v53 }
 0xebb   :  { %8451 = vmatpush1.bf16.msra.mxu0 %v10271_v61 }
 0xebc   :  { %8453 = vmatprep.subr.bf16.mxu0 %v10185_v27 }
 0xf81   :  { %v1485_v29 = vpop.f32.mrb[20].mxu0 }
 0xf82   :  { %v1490_v30 = vadd.f32 %v1485_v29, %v232_v25  ;;  %v1487_v31 = vpop.f32.mrb[21].mxu0 }
 0xf83   :  { %v1491_v32 = vadd.f32 %v1487_v31, %v234_v26 }
 0xf84   :  { %v7574_v33 = vmul.f32 -1.442695, %v1490_v30 }
 0xf85   :  { %v7575_v47 = vmul.f32 -1.442695, %v1491_v32 }
 0xf86   :  { %9564 = vpow2.f32 %v7574_v33 }
 0xf87   :  { %9566 = vtanh.f32 %v1491_v32  ;;  %v243_v32 = vpop.f32.mrb[24].mxu1 }
 0xf88   :  { %v245_v33 = vpop.f32.mrb[25].mxu1 }
 0xf90   :  { %v9565_v35 = vpop.eup %9564 }
 0xf91   :  { %v1498_v36 = vadd.f32 1.0, %v9565_v35  ;;  %v9567_v39 = vpop.eup %9566  ;;  %v244_v35 = vadd.f32 %v243_v32, %v10316_v18 }
 0xf93   :  { %9568 = vrcp.f32 %v1498_v36  ;;  %v246_v36 = vadd.f32 %v245_v33, %v10319_v19 }
 0xf94   :  { %9570 = vpow2.f32 %v7575_v47 }
 0xf9d   :  { %v9569_v40 = vpop.eup %9568 }
 0xf9e   :  { %v1506_v43 = vmul.f32 %v9569_v40, %v9567_v39  ;;  %v9571_v48 = vpop.eup %9570  ;;  %v1505_v52 = vmul.f32 %v9569_v40, %v1403_v16 }
 0xf9f   :  { %v1499_v49 = vadd.f32 1.0, %v9571_v48 }
 0xfa0   :  { %1508 = vrot.lane.b32.xlu0 %v1506_v43, %s10049_s25 }
 0xfa1   :  { %9572 = vrcp.f32 %v1499_v49 }
 0xfab   :  { %v9573_v56 = vpop.eup %9572 }
0x1012   :  { %v1509_v54 = vpop.permute.xlu0 %1508 }
0x1013   :  { %v1511_v55 = vadd.f32 %v1509_v54, %v1505_v52  ;;  %v58_v52 = vld [vmem:[%s12244_s0 + $0x68] sm:$0xff] }
0x1014   :  { %248 = vmatmul.mubr.f32.gmra.mrb[26].mxu1 %v58_v52 }
0x1015   :  { %9574 = vtanh.f32 %v1511_v55  ;;  %253 = vmatprep.mubr.f32.mxu1 %v10048_v7 }
0x101f   :  { %v9575_v57 = vpop.eup %9574 }
0x1020   :  { %v10544_v58 = vmul.f32 %v9575_v57, %v9573_v56 }
0x1022   :  { %7576 = vmatmul.mubr.msk.f32.vlgmr.msra.gmra.mrb[22].mxu0 %vm319_vm0, %v10544_v58 }
0x1023   :  { %8455 = vmatpush1.bf16.msra.mxu0 %v10187_v28  ;;  %1699 = vmatprep.mubr.f32.mxu0 %v10048_v7 }
0x1024   :  { %8457 = vmatprep.subr.bf16.mxu0 %v10202_v34 }
0x1027   :  { %8459 = vmatpush1.bf16.msra.mxu0 %v10211_v37 }
0x1028   :  { %8461 = vmatprep.subr.bf16.mxu0 %v10229_v45 }
0x102b   :  { %8463 = vmatpush1.bf16.msra.mxu0 %v10244_v50 }
0x102c   :  { %8465 = vmatprep.subr.bf16.mxu0 %v10250_v53 }
0x102f   :  { %8467 = vmatpush1.bf16.msra.mxu0 %v10271_v61 }
0x1030   :  { %8469 = vmatprep.subr.bf16.mxu0 %v10185_v27 }
0x10f5   :  { %v1593_v0 = vpop.f32.mrb[22].mxu0 }
0x10f6   :  { %v1598_v1 = vadd.f32 %v1593_v0, %v238_v62  ;;  %v1595_v2 = vpop.f32.mrb[23].mxu0 }
0x10f7   :  { %v1599_v3 = vadd.f32 %v1595_v2, %v240_v63 }
0x10f8   :  { %v7577_v4 = vmul.f32 -1.442695, %v1598_v1 }
0x10f9   :  { %v7578_v20 = vmul.f32 -1.442695, %v1599_v3 }
0x10fa   :  { %9576 = vpow2.f32 %v7577_v4  ;;  %v249_v4 = vpop.f32.mrb[26].mxu1 }
0x10fb   :  { %9578 = vtanh.f32 %v1599_v3 }
0x1104   :  { %v9577_v5 = vpop.eup %9576 }
0x1105   :  { %v1606_v6 = vadd.f32 1.0, %v9577_v5  ;;  %v9579_v12 = vpop.eup %9578  ;;  %v251_v5 = vpop.f32.mrb[27].mxu1 }
0x1106   :  { %v252_v11 = vadd.f32 %v251_v5, %v10319_v19 }
0x1107   :  { %9580 = vrcp.f32 %v1606_v6  ;;  %v250_v6 = vadd.f32 %v249_v4, %v10316_v18 }
0x1108   :  { %9582 = vpow2.f32 %v7578_v20 }
0x1111   :  { %v9581_v14 = vpop.eup %9580 }
0x1112   :  { %v1614_v16 = vmul.f32 %v9581_v14, %v9579_v12  ;;  %v9583_v21 = vpop.eup %9582  ;;  %v1613_v24 = vmul.f32 %v9581_v14, %v1511_v55 }
0x1113   :  { %v1607_v23 = vadd.f32 1.0, %v9583_v21 }
0x1114   :  { %1616 = vrot.lane.b32.xlu1 %v1614_v16, %s10049_s25 }
0x1115   :  { %9584 = vrcp.f32 %v1607_v23 }
0x111f   :  { %v9585_v29 = vpop.eup %9584 }
0x1186   :  { %v1617_v25 = vpop.permute.xlu1 %1616 }
0x1187   :  { %v1619_v26 = vadd.f32 %v1617_v25, %v1613_v24 }
0x1189   :  { %9586 = vtanh.f32 %v1619_v26 }
0x1193   :  { %v9587_v30 = vpop.eup %9586 }
0x1194   :  { %v10564_v31 = vmul.f32 %v9587_v30, %v9585_v29 }
0x1196   :  { %7579 = vmatmul.mubr.msk.f32.vlgmr.msra.gmra.mrb[24].mxu0 %vm319_vm0, %v10564_v31 }
0x1197   :  { %8471 = vmatpush1.bf16.msra.mxu0 %v10187_v28  ;;  %1807 = vmatprep.mubr.f32.mxu0 %v10048_v7 }
0x1198   :  { %8473 = vmatprep.subr.bf16.mxu0 %v10202_v34 }
0x119b   :  { %8475 = vmatpush1.bf16.msra.mxu0 %v10211_v37 }
0x119c   :  { %8477 = vmatprep.subr.bf16.mxu0 %v10229_v45 }
0x119f   :  { %8479 = vmatpush1.bf16.msra.mxu0 %v10244_v50 }
0x11a0   :  { %8481 = vmatprep.subr.bf16.mxu0 %v10250_v53 }
0x11a3   :  { %8483 = vmatpush1.bf16.msra.mxu0 %v10271_v61 }
0x11a4   :  { %8485 = vmatprep.subr.bf16.mxu0 %v10185_v27 }
0x1269   :  { %v1701_v38 = vpop.f32.mrb[24].mxu0 }
0x126a   :  { %v1706_v39 = vadd.f32 %v1701_v38, %v244_v35  ;;  %v1703_v40 = vpop.f32.mrb[25].mxu0 }
0x126b   :  { %v1707_v43 = vadd.f32 %v1703_v40, %v246_v36 }
0x126c   :  { %v7580_v47 = vmul.f32 -1.442695, %v1706_v39 }
0x126d   :  { %v7581_v57 = vmul.f32 -1.442695, %v1707_v43 }
0x126e   :  { %9588 = vpow2.f32 %v7580_v47 }
0x126f   :  { %9590 = vtanh.f32 %v1707_v43 }
0x1278   :  { %v9589_v48 = vpop.eup %9588 }
0x1279   :  { %v1714_v49 = vadd.f32 1.0, %v9589_v48  ;;  %v9591_v54 = vpop.eup %9590 }
0x127b   :  { %9592 = vrcp.f32 %v1714_v49 }
0x127c   :  { %9594 = vpow2.f32 %v7581_v57 }
0x1285   :  { %v9593_v55 = vpop.eup %9592 }
0x1286   :  { %v1722_v56 = vmul.f32 %v9593_v55, %v9591_v54  ;;  %v9595_v59 = vpop.eup %9594  ;;  %v1721_v62 = vmul.f32 %v9593_v55, %v1619_v26 }
0x1287   :  { %v1715_v60 = vadd.f32 1.0, %v9595_v59 }
0x1288   :  { %1724 = vrot.lane.b32.xlu0 %v1722_v56, %s10049_s25 }
0x1289   :  { %9596 = vrcp.f32 %v1715_v60 }
0x1293   :  { %v9597_v1 = vpop.eup %9596 }
0x12fa   :  { %v1725_v63 = vpop.permute.xlu0 %1724 }
0x12fb   :  { %v1727_v0 = vadd.f32 %v1725_v63, %v1721_v62 }
0x12fd   :  { %9598 = vtanh.f32 %v1727_v0 }
0x1307   :  { %v9599_v2 = vpop.eup %9598 }
0x1308   :  { %v10584_v3 = vmul.f32 %v9599_v2, %v9597_v1 }
0x130a   :  { %7582 = vmatmul.mubr.msk.f32.vlgmr.msra.gmra.mrb[26].mxu0 %vm319_vm0, %v10584_v3 }
0x130b   :  { %8487 = vmatpush1.bf16.msra.mxu0 %v10187_v28  ;;  %1915 = vmatprep.mubr.f32.mxu0 %v10048_v7 }
0x130c   :  { %8489 = vmatprep.subr.bf16.mxu0 %v10202_v34 }
0x130f   :  { %8491 = vmatpush1.bf16.msra.mxu0 %v10211_v37 }
0x1310   :  { %8493 = vmatprep.subr.bf16.mxu0 %v10229_v45 }
0x1313   :  { %8495 = vmatpush1.bf16.msra.mxu0 %v10244_v50 }
0x1314   :  { %8497 = vmatprep.subr.bf16.mxu0 %v10250_v53 }
0x1317   :  { %8499 = vmatpush1.bf16.msra.mxu0 %v10271_v61 }
0x1318   :  { %8501 = vmatprep.subr.bf16.mxu0 %v10185_v27  ;;  %v59_v27 = vld [vmem:[%s12244_s0 + $0x70] sm:$0xff] }
0x1319   :  { %254 = vmatmul.mubr.f32.gmra.mrb[28].mxu1 %v59_v27 }
0x131a   :  { %259 = vmatprep.mubr.f32.mxu1 %v10048_v7 }
0x13dd   :  { %v1809_v12 = vpop.f32.mrb[26].mxu0 }
0x13de   :  { %v1814_v14 = vadd.f32 %v1809_v12, %v250_v6  ;;  %v1811_v16 = vpop.f32.mrb[27].mxu0 }
0x13df   :  { %v1815_v20 = vadd.f32 %v1811_v16, %v252_v11 }
0x13e0   :  { %v7583_v21 = vmul.f32 -1.442695, %v1814_v14 }
0x13e1   :  { %v7584_v30 = vmul.f32 -1.442695, %v1815_v20 }
0x13e2   :  { %9600 = vpow2.f32 %v7583_v21 }
0x13e3   :  { %9602 = vtanh.f32 %v1815_v20 }
0x13ec   :  { %v9601_v23 = vpop.eup %9600  ;;  %v255_v47 = vpop.f32.mrb[28].mxu1 }
0x13ed   :  { %v1822_v24 = vadd.f32 1.0, %v9601_v23  ;;  %v9603_v25 = vpop.eup %9602  ;;  %v257_v48 = vpop.f32.mrb[29].mxu1  ;;  %v256_v49 = vadd.f32 %v255_v47, %v10316_v18  ;;  %v7602_v47 = vld [vmem:[%s12246_s2 + $0x158] sm:$0xff] }
0x13ef   :  { %9604 = vrcp.f32 %v1822_v24 }
0x13f0   :  { %9606 = vpow2.f32 %v7584_v30 }
0x13f9   :  { %v9605_v26 = vpop.eup %9604 }
0x13fa   :  { %v1830_v29 = vmul.f32 %v9605_v26, %v9603_v25  ;;  %v9607_v32 = vpop.eup %9606  ;;  %v1829_v35 = vmul.f32 %v9605_v26, %v1727_v0 }
0x13fb   :  { %v1823_v33 = vadd.f32 1.0, %v9607_v32  ;;  %v7591_v32 = vld [vmem:[%s12246_s2 + $0x100] sm:$0xff] }
0x13fc   :  { %1832 = vrot.lane.b32.xlu1 %v1830_v29, %s10049_s25 }
0x13fd   :  { %9608 = vrcp.f32 %v1823_v33 }
0x1407   :  { %v9609_v39 = vpop.eup %9608 }
0x146e   :  { %v1833_v36 = vpop.permute.xlu1 %1832 }
0x146f   :  { %v1835_v38 = vadd.f32 %v1833_v36, %v1829_v35 }
0x1471   :  { %9610 = vtanh.f32 %v1835_v38 }
0x147b   :  { %v9611_v40 = vpop.eup %9610 }
0x147c   :  { %v10604_v43 = vmul.f32 %v9611_v40, %v9609_v39  ;;  %v7597_v39 = vld [vmem:[%s12246_s2 + $0x130] sm:$0xff]  ;;  %v7600_v40 = vld [vmem:[%s12246_s2 + $0x148] sm:$0xff] }
0x147e   :  { %7585 = vmatmul.mubr.msk.f32.vlgmr.msra.gmra.mrb[28].mxu0 %vm319_vm0, %v10604_v43 }
0x147f   :  { %8503 = vmatpush1.bf16.msra.mxu0 %v10187_v28  ;;  %2023 = vmatprep.mubr.f32.mxu0 %v10048_v7  ;;  %v258_v28 = vadd.f32 %v257_v48, %v10319_v19  ;;  %v8524_v48 = vpack.c.bf16 %v7602_v47, %v7600_v40 }
0x1480   :  { %8505 = vmatprep.subr.bf16.mxu0 %v10202_v34 }
0x1483   :  { %8507 = vmatpush1.bf16.msra.mxu0 %v10211_v37 }
0x1484   :  { %8509 = vmatprep.subr.bf16.mxu0 %v10229_v45 }
0x1487   :  { %8511 = vmatpush1.bf16.msra.mxu0 %v10244_v50  ;;  %v60_v50 = vld [vmem:[%s12244_s0 + $0x78] sm:$0xff] }
0x1488   :  { %8513 = vmatprep.subr.bf16.mxu0 %v10250_v53  ;;  %260 = vmatmul.mubr.f32.gmra.mrb[30].mxu1 %v60_v50  ;;  %v7610_v50 = vld [vmem:[%s12246_s2 + $0x198] sm:$0xff] }
0x1489   :  { %2186 = vmatprep.mubr.f32.mxu1 %v10048_v7 }
0x148b   :  { %8515 = vmatpush1.bf16.msra.mxu0 %v10271_v61 }
0x1551   :  { %v1917_v52 = vpop.f32.mrb[28].mxu0 }
0x1552   :  { %v1922_v54 = vadd.f32 %v1917_v52, %v256_v49  ;;  %v1919_v55 = vpop.f32.mrb[29].mxu0  ;;  %v7599_v49 = vld [vmem:[%s12246_s2 + $0x140] sm:$0xff]  ;;  %v7604_v52 = vld [vmem:[%s12246_s2 + $0x168] sm:$0xff] }
0x1553   :  { %v1923_v34 = vadd.f32 %v1919_v55, %v258_v28  ;;  %v7601_v28 = vld [vmem:[%s12246_s2 + $0x150] sm:$0xff] }
0x1554   :  { %v7586_v56 = vmul.f32 -1.442695, %v1922_v54  ;;  %v7606_v54 = vld [vmem:[%s12246_s2 + $0x178] sm:$0xff]  ;;  %v8526_v55 = vpack.c.bf16 %v7601_v28, %v7599_v49 }
0x1555   :  { %v7587_v59 = vmul.f32 -1.442695, %v1923_v34 }
0x1556   :  { %9612 = vpow2.f32 %v7586_v56  ;;  %v7603_v56 = vld [vmem:[%s12246_s2 + $0x160] sm:$0xff] }
0x1557   :  { %9614 = vtanh.f32 %v1923_v34  ;;  %v8528_v34 = vpack.c.bf16 %v7606_v54, %v7604_v52 }
0x155b   :  { %v261_v6 = vpop.f32.mrb[30].mxu1 }
0x155c   :  { %v263_v11 = vpop.f32.mrb[31].mxu1  ;;  %v262_v12 = vadd.f32 %v261_v6, %v10316_v18  ;;  %v7592_v18 = vld [vmem:[%s12246_s2 + $0x108] sm:$0xff] }
0x155d   :  { %v264_v14 = vadd.f32 %v263_v11, %v10319_v19  ;;  %v7594_v19 = vld [vmem:[%s12246_s2 + $0x118] sm:$0xff]  ;;  %v7616_v6 = vld [vmem:[%s12246_s2 + $0x1c8] sm:$0xff] }
0x155e   :  { %v8516_v33 = vpack.c.bf16 %v7594_v19, %v7592_v18  ;;  %v7618_v11 = vld [vmem:[%s12246_s2 + $0x1d8] sm:$0xff] }
0x1560   :  { %v9613_v37 = vpop.eup %9612  ;;  %8517 = vmatprep.subr.bf16.mxu1 %v8516_v33 }
0x1561   :  { %v1930_v45 = vadd.f32 1.0, %v9613_v37  ;;  %v9615_v53 = vpop.eup %9614  ;;  %v7605_v37 = vld [vmem:[%s12246_s2 + $0x170] sm:$0xff] }
0x1563   :  { %9616 = vrcp.f32 %v1930_v45  ;;  %v7608_v45 = vld [vmem:[%s12246_s2 + $0x188] sm:$0xff] }
0x1564   :  { %9618 = vpow2.f32 %v7587_v59  ;;  %v7609_v59 = vld [vmem:[%s12246_s2 + $0x190] sm:$0xff] }
0x156d   :  { %v9617_v61 = vpop.eup %9616 }
0x156e   :  { %v1938_v57 = vmul.f32 %v9617_v61, %v9615_v53  ;;  %v9619_v60 = vpop.eup %9618  ;;  %v1937_v63 = vmul.f32 %v9617_v61, %v1835_v38  ;;  %v7595_v38 = vld [vmem:[%s12246_s2 + $0x120] sm:$0xff]  ;;  %v8530_v53 = vpack.c.bf16 %v7605_v37, %v7603_v56  ;;  %v8532_v61 = vpack.c.bf16 %v7610_v50, %v7608_v45  ;;  %v7633_v45 = vld [vmem:[%s12247_s3 + $0xc8] sm:$0xff]  ;;  %v7635_v50 = vld [vmem:[%s12247_s3 + $0xd8] sm:$0xff] }
0x156f   :  { %v1931_v62 = vadd.f32 1.0, %v9619_v60  ;;  %v7612_v60 = vld [vmem:[%s12246_s2 + $0x1a8] sm:$0xff] }
0x1570   :  { %1940 = vrot.lane.b32.xlu0 %v1938_v57, %s10049_s25  ;;  %v7607_v57 = vld [vmem:[%s12246_s2 + $0x180] sm:$0xff] }
0x1571   :  { %9620 = vrcp.f32 %v1931_v62  ;;  %v7614_v62 = vld [vmem:[%s12246_s2 + $0x1b8] sm:$0xff] }
0x157b   :  { %v9621_v2 = vpop.eup %9620 }
0x15e2   :  { %v1941_v0 = vpop.permute.xlu0 %1940 }
0x15e3   :  { %v10623_v1 = vadd.f32 %v1941_v0, %v1937_v63  ;;  %v8534_v63 = vpack.c.bf16 %v7609_v59, %v7607_v57  ;;  %v8536_v0 = vpack.c.bf16 %v7614_v62, %v7612_v60  ;;  %v7632_v57 = vld [vmem:[%s12247_s3 + $0xc0] sm:$0xff]  ;;  %v7634_v59 = vld [vmem:[%s12247_s3 + $0xd0] sm:$0xff] }
0x15e5   :  { %9622 = vtanh.f32 %v10623_v1 }
0x15ef   :  { %v9623_v4 = vpop.eup %9622 }
0x15f0   :  { %v10626_v5 = vmul.f32 %v9623_v4, %v9621_v2  ;;  %v7611_v2 = vld [vmem:[%s12246_s2 + $0x1a0] sm:$0xff]  ;;  %v7613_v4 = vld [vmem:[%s12246_s2 + $0x1b0] sm:$0xff] }
0x15f2   :  { %7588 = vmatmul.mubr.msk.f32.vlgmr.msra.gmra.mrb[30].mxu0 %vm319_vm0, %v10626_v5 }
0x15f3   :  { %4136 = vmatprep.mubr.f32.mxu0 %v10048_v7 }
0x16c5   :  { %v2025_v16 = vpop.f32.mrb[30].mxu0 }
0x16c6   :  { %v2030_v20 = vadd.f32 %v2025_v16, %v262_v12  ;;  %v2027_v21 = vpop.f32.mrb[31].mxu0  ;;  %v8538_v12 = vpack.c.bf16 %v7613_v4, %v7611_v2  ;;  %v7615_v16 = vld [vmem:[%s12246_s2 + $0x1c0] sm:$0xff]  ;;  %v10847_v2 = vpack.c.bf16 %v7634_v59, %v7632_v57 }
0x16c7   :  { %v10633_v23 = vadd.f32 %v2027_v21, %v264_v14  ;;  %v8540_v14 = vpack.c.bf16 %v7618_v11, %v7616_v6  ;;  %v7620_v21 = vld [vmem:[%s12246_s2 + $0x1e8] sm:$0xff]  ;;  %v7636_v6 = vld [vmem:[%s12247_s3 + $0xe0] sm:$0xff]  ;;  %v7638_v11 = vld [vmem:[%s12247_s3 + $0xf0] sm:$0xff] }
0x16c8   :  { %v7589_v24 = vmul.f32 -1.442695, %v2030_v20  ;;  %v7617_v20 = vld [vmem:[%s12246_s2 + $0x1d0] sm:$0xff] }
0x16ca   :  { %9624 = vpow2.f32 %v7589_v24  ;;  %v7622_v24 = vld [vmem:[%s12246_s2 + $0x1f8] sm:$0xff] }
0x16cb   :  { %9626 = vtanh.f32 %v10633_v23 }
0x16d4   :  { %v9625_v27 = vpop.eup %9624 }
0x16d5   :  { %v2038_v25 = vadd.f32 1.0, %v9625_v27  ;;  %v9627_v26 = vpop.eup %9626  ;;  %v8542_v27 = vpack.c.bf16 %v7617_v20, %v7615_v16  ;;  %v10863_v16 = vpack.c.bf16 %v7638_v11, %v7636_v6 }
0x16d7   :  { %9628 = vrcp.f32 %v2038_v25  ;;  %v8544_v25 = vpack.c.bf16 %v7622_v24, %v7620_v21 }
0x16e1   :  { %v10636_v29 = vpop.eup %9628 }
0x16e2   :  { %v2046_v30 = vmul.f32 %v10636_v29, %v9627_v26  ;;  %v7590_v26 = vmul.f32 -1.442695, %v10633_v23  ;;  %v2045_v19 = vmul.f32 %v10636_v29, %v10623_v1  ;;  %v7625_v1 = vld [vmem:[%s12247_s3 + $0x88] sm:$0xff]  ;;  %v7627_v29 = vld [vmem:[%s12247_s3 + $0x98] sm:$0xff] }
0x16e4   :  { %2048 = vrot.lane.b32.xlu1 %v2046_v30, %s10049_s25  ;;  %9630 = vpow2.f32 %v7590_v26 }
0x16e8   :  { %1948 = vrot.lane.b32.xlu1 %v10626_v5, %s10049_s25 }
0x16ec   :  { %1732 = vrot.lane.b32.xlu1 %v10584_v3, %s10049_s25 }
0x16ee   :  { %v9631_v30 = vpop.eup %9630 }
0x16ef   :  { %v2039_v18 = vadd.f32 1.0, %v9631_v30 }
0x16f0   :  { %1516 = vrot.lane.b32.xlu1 %v10544_v58, %s10049_s25 }
0x16f1   :  { %9632 = vrcp.f32 %v2039_v18 }
0x16f4   :  { %1300 = vrot.lane.b32.xlu1 %v10504_v51, %s10049_s25 }
0x16f8   :  { %1081 = vrot.lane.b32.xlu1 %v10460_v44, %s10049_s25  ;;  %v7598_v44 = vld [vmem:[%s12246_s2 + $0x138] sm:$0xff] }
0x16fc   :  { %861 = vrot.lane.b32.xlu1 %v10416_v41, %s10049_s25  ;;  %v7593_v41 = vld [vmem:[%s12246_s2 + $0x110] sm:$0xff] }
0x16fd   :  { %v8518_v35 = vpack.c.bf16 %v7593_v41, %v7591_v32  ;;  %v7619_v41 = vld [vmem:[%s12246_s2 + $0x1e0] sm:$0xff] }
0x16ff   :  { %8519 = vmatpush1.bf16.msra.mxu1 %v8518_v35 }
0x1700   :  { %641 = vrot.lane.b32.xlu1 %v10372_v42, %s10049_s25  ;;  %v7596_v42 = vld [vmem:[%s12246_s2 + $0x128] sm:$0xff] }
0x1701   :  { %v8520_v36 = vpack.c.bf16 %v7598_v44, %v7596_v42  ;;  %v7621_v42 = vld [vmem:[%s12246_s2 + $0x1f0] sm:$0xff] }
0x1702   :  { %v8546_v44 = vpack.c.bf16 %v7621_v42, %v7619_v41  ;;  %v7623_v42 = vld [vmem:[%s12248_s4 + $0x2] sm:$0x3] }
0x1703   :  { %8521 = vmatprep.subr.bf16.mxu1 %v8520_v36  ;;  %v10762_v36 = vpack.c.bf16 %v7627_v29, %v7625_v1 }
0x1704   :  { %420 = vrot.lane.b32.xlu1 %v10328_v46, %s10049_s25  ;;  %v8522_v46 = vpack.c.bf16 %v7597_v39, %v7595_v38  ;;  %v9633_v38 = vpop.eup %9632 }
0x1706   :  { %8523 = vmatpush1.bf16.msra.mxu1 %v8522_v46 }
0x1707   :  { %8525 = vmatprep.subr.bf16.mxu1 %v8524_v48 }
0x170a   :  { %8527 = vmatpush1.bf16.msra.mxu1 %v8526_v55  ;;  %v7628_v55 = vld [vmem:[%s12247_s3 + $0xa0] sm:$0xff] }
0x170b   :  { %8529 = vmatprep.subr.bf16.mxu1 %v8528_v34  ;;  %v7630_v34 = vld [vmem:[%s12247_s3 + $0xb0] sm:$0xff] }
0x170e   :  { %8531 = vmatpush1.bf16.msra.mxu1 %v8530_v53  ;;  %v10827_v53 = vpack.c.bf16 %v7630_v34, %v7628_v55 }
0x170f   :  { %8533 = vmatprep.subr.bf16.mxu1 %v8532_v61  ;;  %v10830_v61 = vpack.c.bf16 %v7635_v50, %v7633_v45 }
0x1712   :  { %8535 = vmatpush1.bf16.msra.mxu1 %v8534_v63  ;;  %v7637_v63 = vld [vmem:[%s12247_s3 + $0xe8] sm:$0xff] }
0x1713   :  { %8537 = vmatprep.subr.bf16.mxu1 %v8536_v0  ;;  %v7639_v0 = vld [vmem:[%s12247_s3 + $0xf8] sm:$0xff] }
0x1714   :  { %v10850_v4 = vpack.c.bf16 %v7639_v0, %v7637_v63 }
0x1716   :  { %8539 = vmatpush1.bf16.msra.mxu1 %v8538_v12 }
0x1717   :  { %8541 = vmatprep.subr.bf16.mxu1 %v8540_v14 }
0x171a   :  { %8543 = vmatpush1.bf16.msra.mxu1 %v8542_v27 }
0x171b   :  { %8545 = vmatprep.subr.bf16.mxu1 %v8544_v25 }
0x171e   :  { %8547 = vmatpush1.bf16.msra.mxu1 %v8546_v44 }
0x171f   :  { %8549 = vmatprep.subr.bf16.mxu1 %v10762_v36 }
0x1756   :  { %v2049_v32 = vpop.permute.xlu1 %2048 }
0x1757   :  { %v2051_v33 = vadd.f32 %v2049_v32, %v2045_v19 }
0x1759   :  { %9634 = vtanh.f32 %v2051_v33 }
0x175a   :  { %v1949_v23 = vpop.permute.xlu1 %1948 }
0x175b   :  { %1951 = vst.msk [vmem:[#allocation3 + $0x8] sm:$0xff] %vm424_vm1, %v1949_v23  ;;  %v10904_v23 = vrot.slane %v7623_v42, %v10308_v15 }
0x175e   :  { %v1733_v35 = vpop.permute.xlu1 %1732 }
0x175f   :  { %1735 = vst.msk [vmem:[#allocation3 + $0x18] sm:$0xff] %vm424_vm1, %v1733_v35 }
0x1762   :  { %v1517_v39 = vpop.permute.xlu1 %1516  ;;  %v2061_v62 = vld [vmem:[#allocation3 + $0x8] sm:$0xff] }
0x1763   :  { %v9635_v40 = vpop.eup %9634  ;;  %1519 = vst.msk [vmem:[#allocation3 + $0x28] sm:$0xff] %vm424_vm1, %v1517_v39 }
0x1764   :  { %v2053_v47 = vmul.f32 %v9635_v40, %v9633_v38  ;;  %v10908_v38 = vrot.slane %v7623_v42, %v10313_v17 }
0x1766   :  { %v1301_v46 = vpop.permute.xlu1 %1300  ;;  %2056 = vrot.lane.b32.xlu0 %v2053_v47, %s10049_s25  ;;  %v2063_v21 = vld [vmem:[#allocation3 + $0x18] sm:$0xff] }
0x1767   :  { %1303 = vst.msk [vmem:[#allocation3 + $0x38] sm:$0xff] %vm424_vm1, %v1301_v46 }
0x176a   :  { %v1082_v48 = vpop.permute.xlu1 %1081  ;;  %1840 = vrot.lane.b32.xlu0 %v10604_v43, %s10049_s25  ;;  %v2065_v25 = vld [vmem:[#allocation3 + $0x28] sm:$0xff] }
0x176b   :  { %1085 = vst.msk [vmem:[#allocation3 + $0x48] sm:$0xff] %vm424_vm1, %v1082_v48 }
0x176c   :  { %1406 = vst.msk [vmem:[#allocation3 + $0x48] sm:$0xff] %vm319_vm0, %v10524_v22 }
0x176e   :  { %v862_v49 = vpop.permute.xlu1 %861  ;;  %1624 = vrot.lane.b32.xlu0 %v10564_v31, %s10049_s25  ;;  %v2067_v26 = vld [vmem:[#allocation3 + $0x38] sm:$0xff] }
0x176f   :  { %865 = vst.msk [vmem:[#allocation3 + $0x58] sm:$0xff] %vm424_vm1, %v862_v49 }
0x1770   :  { %1622 = vst.msk [vmem:[#allocation3 + $0x58] sm:$0xff] %vm319_vm0, %v10564_v31  ;;  %v7626_v31 = vld [vmem:[%s12247_s3 + $0x90] sm:$0xff] }
0x1772   :  { %v642_v28 = vpop.permute.xlu1 %641  ;;  %1408 = vrot.lane.b32.xlu0 %v10524_v22, %s10049_s25 }
0x1773   :  { %645 = vst.msk [vmem:[#allocation3 + $0x68] sm:$0xff] %vm424_vm1, %v642_v28  ;;  %v2069_v30 = vld [vmem:[#allocation3 + $0x48] sm:$0xff] }
0x1774   :  { %1838 = vst.msk [vmem:[#allocation3 + $0x68] sm:$0xff] %vm319_vm0, %v10604_v43 }
0x1776   :  { %v421_v52 = vpop.permute.xlu1 %420  ;;  %1191 = vrot.lane.b32.xlu0 %v10482_v13, %s10049_s25  ;;  %v7624_v13 = vld [vmem:[%s12247_s3 + $0x80] sm:$0xff] }
0x1777   :  { %425 = vst.msk [vmem:[#allocation3 + $0x78] sm:$0xff] %vm424_vm1, %v421_v52 }
0x1778   :  { %2054 = vst.msk [vmem:[#allocation3 + $0x78] sm:$0xff] %vm319_vm0, %v2053_v47 }
0x177a   :  { %971 = vrot.lane.b32.xlu0 %v10438_v9, %s10049_s25  ;;  %v7629_v9 = vld [vmem:[%s12247_s3 + $0xa8] sm:$0xff] }
0x177b   :  { %v2073_v32 = vld [vmem:[#allocation3 + $0x68] sm:$0xff] }
0x177e   :  { %751 = vrot.lane.b32.xlu0 %v10394_v8, %s10049_s25  ;;  %v10808_v8 = vpack.c.bf16 %v7626_v31, %v7624_v13 }
0x177f   :  { %v2075_v41 = vld [vmem:[#allocation3 + $0x78] sm:$0xff] }
0x1782   :  { %531 = vrot.lane.b32.xlu0 %v10350_v10, %s10049_s25  ;;  %v7631_v10 = vld [vmem:[%s12247_s3 + $0xb8] sm:$0xff] }
0x1783   :  { %v10810_v54 = vpack.c.bf16 %v7631_v10, %v7629_v9 }
0x17d8   :  { %v2057_v22 = vpop.permute.xlu0 %2056 }
0x17d9   :  { %2059 = vst.msk [vmem:[#allocation3] sm:$0xff] %vm424_vm1, %v2057_v22 }
0x17dc   :  { %v1841_v43 = vpop.permute.xlu0 %1840 }
0x17dd   :  { %1843 = vst.msk [vmem:[#allocation3 + $0x10] sm:$0xff] %vm424_vm1, %v1841_v43 }
0x17e0   :  { %v1625_v56 = vpop.permute.xlu0 %1624  ;;  %v2060_v37 = vld [vmem:[#allocation3] sm:$0xff] }
0x17e1   :  { %1627 = vst.msk [vmem:[#allocation3 + $0x20] sm:$0xff] %vm424_vm1, %v1625_v56  ;;  %2187 = vmatmul.mubr.f32.vlgmr.msra.gmra.mrb[32].mxu1 %v2060_v37 }
0x17e2   :  { %8551 = vmatpush1.bf16.msra.mxu1 %v10808_v8  ;;  %2192 = vmatprep.mubr.f32.mxu1 %v10048_v7 }
0x17e3   :  { %8553 = vmatprep.subr.bf16.mxu1 %v10810_v54 }
0x17e4   :  { %v1409_v60 = vpop.permute.xlu0 %1408  ;;  %v2062_v14 = vld [vmem:[#allocation3 + $0x10] sm:$0xff] }
0x17e5   :  { %1411 = vst.msk [vmem:[#allocation3 + $0x30] sm:$0xff] %vm424_vm1, %v1409_v60  ;;  %2193 = vmatmul.mubr.f32.gmra.mrb[34].mxu1 %v2061_v62 }
0x17e6   :  { %2198 = vmatprep.mubr.f32.mxu1 %v10048_v7  ;;  %8555 = vmatpush1.bf16.msra.mxu1 %v10827_v53 }
0x17e7   :  { %8557 = vmatprep.subr.bf16.mxu1 %v10830_v61 }
0x17e8   :  { %v1192_v12 = vpop.permute.xlu0 %1191  ;;  %v2064_v24 = vld [vmem:[#allocation3 + $0x20] sm:$0xff] }
0x17e9   :  { %1195 = vst.msk [vmem:[#allocation3 + $0x40] sm:$0xff] %vm424_vm1, %v1192_v12  ;;  %2199 = vmatmul.mubr.f32.gmra.mrb[36].mxu1 %v2062_v14 }
0x17ea   :  { %1298 = vst.msk [vmem:[#allocation3 + $0x40] sm:$0xff] %vm319_vm0, %v10504_v51  ;;  %2204 = vmatprep.mubr.f32.mxu1 %v10048_v7  ;;  %8559 = vmatpush1.bf16.msra.mxu1 %v10847_v2 }
0x17eb   :  { %8561 = vmatprep.subr.bf16.mxu1 %v10850_v4 }
0x17ec   :  { %v972_v20 = vpop.permute.xlu0 %971 }
0x17ed   :  { %975 = vst.msk [vmem:[#allocation3 + $0x50] sm:$0xff] %vm424_vm1, %v972_v20  ;;  %2205 = vmatmul.mubr.f32.gmra.mrb[38].mxu1 %v2063_v21 }
0x17ee   :  { %1514 = vst.msk [vmem:[#allocation3 + $0x50] sm:$0xff] %vm319_vm0, %v10544_v58  ;;  %2210 = vmatprep.mubr.f32.mxu1 %v10048_v7  ;;  %8563 = vmatpush1.bf16.msra.mxu1 %v10863_v16  ;;  %v2066_v58 = vld [vmem:[#allocation3 + $0x30] sm:$0xff] }
0x17ef   :  { %8565 = vmatprep.subr.bf16.mxu1 %v10762_v36 }
0x17f0   :  { %v752_v51 = vpop.permute.xlu0 %751 }
0x17f1   :  { %755 = vst.msk [vmem:[#allocation3 + $0x60] sm:$0xff] %vm424_vm1, %v752_v51  ;;  %2211 = vmatmul.mubr.f32.gmra.mrb[40].mxu1 %v2064_v24 }
0x17f2   :  { %1730 = vst.msk [vmem:[#allocation3 + $0x60] sm:$0xff] %vm319_vm0, %v10584_v3  ;;  %2216 = vmatprep.mubr.f32.mxu1 %v10048_v7  ;;  %v2068_v3 = vld [vmem:[#allocation3 + $0x40] sm:$0xff] }
0x17f4   :  { %v532_v27 = vpop.permute.xlu0 %531 }
0x17f5   :  { %535 = vst.msk [vmem:[#allocation3 + $0x70] sm:$0xff] %vm424_vm1, %v532_v27  ;;  %2217 = vmatmul.mubr.f32.gmra.mrb[42].mxu1 %v2065_v25  ;;  %v2070_v18 = vld [vmem:[#allocation3 + $0x50] sm:$0xff] }
0x17f6   :  { %1946 = vst.msk [vmem:[#allocation3 + $0x70] sm:$0xff] %vm319_vm0, %v10626_v5  ;;  %2222 = vmatprep.mubr.f32.mxu1 %v10048_v7  ;;  %v2071_v5 = vld [vmem:[#allocation3 + $0x58] sm:$0xff] }
0x17f9   :  { %2223 = vmatmul.mubr.f32.gmra.mrb[44].mxu1 %v2066_v58  ;;  %v2072_v19 = vld [vmem:[#allocation3 + $0x60] sm:$0xff] }
0x17fa   :  { %2228 = vmatprep.mubr.f32.mxu1 %v10048_v7 }
0x17fd   :  { %2229 = vmatmul.mubr.f32.gmra.mrb[46].mxu1 %v2067_v26  ;;  %v2074_v33 = vld [vmem:[#allocation3 + $0x70] sm:$0xff] }
0x17fe   :  { %2234 = vmatprep.mubr.f32.mxu1 %v10048_v7 }
0x1801   :  { %2235 = vmatmul.mubr.f32.gmra.mrb[48].mxu1 %v2068_v3 }
0x1802   :  { %2240 = vmatprep.mubr.f32.mxu1 %v10048_v7 }
0x1805   :  { %2241 = vmatmul.mubr.f32.gmra.mrb[50].mxu1 %v2069_v30 }
0x1806   :  { %2246 = vmatprep.mubr.f32.mxu1 %v10048_v7 }
0x1809   :  { %2247 = vmatmul.mubr.f32.gmra.mrb[52].mxu1 %v2070_v18 }
0x180a   :  { %2252 = vmatprep.mubr.f32.mxu1 %v10048_v7 }
0x180d   :  { %2253 = vmatmul.mubr.f32.gmra.mrb[54].mxu1 %v2071_v5 }
0x180e   :  { %2258 = vmatprep.mubr.f32.mxu1 %v10048_v7 }
0x1811   :  { %2259 = vmatmul.mubr.f32.gmra.mrb[56].mxu1 %v2072_v19 }
0x1812   :  { %2264 = vmatprep.mubr.f32.mxu1 %v10048_v7 }
0x1815   :  { %2265 = vmatmul.mubr.f32.gmra.mrb[58].mxu1 %v2073_v32 }
0x1816   :  { %2270 = vmatprep.mubr.f32.mxu1 %v10048_v7 }
0x1819   :  { %2271 = vmatmul.mubr.f32.gmra.mrb[60].mxu1 %v2074_v33 }
0x181a   :  { %2276 = vmatprep.mubr.f32.mxu1 %v10048_v7 }
0x181d   :  { %2277 = vmatmul.mubr.f32.gmra.mrb[62].mxu1 %v2075_v41 }
0x181e   :  { %2398 = vmatprep.mubr.f32.mxu1 %v10048_v7 }
0x1821   :  { %2399 = vmatmul.mubr.f32.vlgmr.msra.gmra.mrb[32].mxu1 %v10048_v7 }
0x1822   :  { %8567 = vmatpush1.bf16.msra.mxu1 %v10808_v8  ;;  %2503 = vmatprep.mubr.f32.mxu1 %v10048_v7 }
0x1823   :  { %8569 = vmatprep.subr.bf16.mxu1 %v10810_v54 }
0x1826   :  { %8571 = vmatpush1.bf16.msra.mxu1 %v10827_v53 }
0x1827   :  { %8573 = vmatprep.subr.bf16.mxu1 %v10830_v61 }
0x182a   :  { %8575 = vmatpush1.bf16.msra.mxu1 %v10847_v2 }
0x182b   :  { %8577 = vmatprep.subr.bf16.mxu1 %v10850_v4 }
0x182e   :  { %8579 = vmatpush1.bf16.msra.mxu1 %v10863_v16 }
0x182f   :  { %8581 = vmatprep.subr.bf16.mxu1 %v10762_v36 }
0x18f4   :  { %v2400_v44 = vpop.f32.mrb[32].mxu1 }
0x18f5   :  { %v9252_v1 = vadd.f32 %v2400_v44, %v10904_v23  ;;  %v2402_v29 = vpop.f32.mrb[33].mxu1 }
0x18f6   :  { %v9253_v39 = vadd.f32 %v2402_v29, %v10908_v38 }
0x18f7   :  { %v7640_v35 = vmul.f32 -1.442695, %v9252_v1 }
0x18f8   :  { %v7641_v28 = vmul.f32 -1.442695, %v9253_v39 }
0x18f9   :  { %9636 = vpow2.f32 %v7640_v35 }
0x18fa   :  { %9638 = vtanh.f32 %v9253_v39 }
0x1903   :  { %v9637_v40 = vpop.eup %9636 }
0x1904   :  { %v2413_v47 = vadd.f32 1.0, %v9637_v40  ;;  %v9639_v46 = vpop.eup %9638 }
0x1906   :  { %9640 = vrcp.f32 %v2413_v47 }
0x1907   :  { %9642 = vpow2.f32 %v7641_v28 }
0x1910   :  { %v9641_v48 = vpop.eup %9640 }
0x1911   :  { %v2421_v49 = vmul.f32 %v9641_v48, %v9639_v46  ;;  %v9643_v52 = vpop.eup %9642  ;;  %v2420_v13 = vmul.f32 0.0, %v9641_v48 }
0x1912   :  { %v2414_v22 = vadd.f32 1.0, %v9643_v52 }
0x1913   :  { %2423 = vrot.lane.b32.xlu0 %v2421_v49, %s10049_s25 }
0x1914   :  { %9644 = vrcp.f32 %v2414_v22 }
0x191e   :  { %v9645_v9 = vpop.eup %9644 }
0x1985   :  { %v2424_v31 = vpop.permute.xlu0 %2423 }
0x1986   :  { %v2426_v43 = vadd.f32 %v2424_v31, %v2420_v13 }
0x1988   :  { %9646 = vtanh.f32 %v2426_v43 }
0x1992   :  { %v9647_v10 = vpop.eup %9646 }
0x1993   :  { %v10912_v55 = vmul.f32 %v9647_v10, %v9645_v9 }
0x1995   :  { %7642 = vmatmul.mubr.msk.f32.vlgmr.msra.gmra.mrb[34].mxu1 %vm319_vm0, %v10912_v55  ;;  %2429 = vst.msk [vmem:[#allocation3] sm:$0xff] %vm319_vm0, %v10912_v55 }
0x1996   :  { %8583 = vmatpush1.bf16.msra.mxu1 %v10808_v8  ;;  %2608 = vmatprep.mubr.f32.mxu1 %v10048_v7 }
0x1997   :  { %8585 = vmatprep.subr.bf16.mxu1 %v10810_v54 }
0x199a   :  { %8587 = vmatpush1.bf16.msra.mxu1 %v10827_v53 }
0x199b   :  { %8589 = vmatprep.subr.bf16.mxu1 %v10830_v61 }
0x199e   :  { %8591 = vmatpush1.bf16.msra.mxu1 %v10847_v2 }
0x199f   :  { %8593 = vmatprep.subr.bf16.mxu1 %v10850_v4 }
0x19a2   :  { %8595 = vmatpush1.bf16.msra.mxu1 %v10863_v16 }
0x19a3   :  { %8597 = vmatprep.subr.bf16.mxu1 %v10762_v36 }
0x1a68   :  { %v2505_v34 = vpop.f32.mrb[34].mxu1 }
0x1a69   :  { %v9254_v56 = vadd.f32 %v2505_v34, %v10904_v23  ;;  %v2507_v37 = vpop.f32.mrb[35].mxu1 }
0x1a6a   :  { %v9255_v50 = vadd.f32 %v2507_v37, %v10908_v38 }
0x1a6b   :  { %v7643_v45 = vmul.f32 -1.442695, %v9254_v56 }
0x1a6c   :  { %v7644_v0 = vmul.f32 -1.442695, %v9255_v50 }
0x1a6d   :  { %9648 = vpow2.f32 %v7643_v45 }
0x1a6e   :  { %9650 = vtanh.f32 %v9255_v50 }
0x1a77   :  { %v9649_v57 = vpop.eup %9648 }
0x1a78   :  { %v2518_v59 = vadd.f32 1.0, %v9649_v57  ;;  %v9651_v60 = vpop.eup %9650 }
0x1a7a   :  { %9652 = vrcp.f32 %v2518_v59 }
0x1a7b   :  { %9654 = vpow2.f32 %v7644_v0 }
0x1a84   :  { %v9653_v62 = vpop.eup %9652 }
0x1a85   :  { %v2526_v63 = vmul.f32 %v9653_v62, %v9651_v60  ;;  %v9655_v6 = vpop.eup %9654  ;;  %v2525_v12 = vmul.f32 %v9653_v62, %v2426_v43 }
0x1a86   :  { %v2519_v11 = vadd.f32 1.0, %v9655_v6 }
0x1a87   :  { %2528 = vrot.lane.b32.xlu1 %v2526_v63, %s10049_s25 }
0x1a88   :  { %9656 = vrcp.f32 %v2519_v11 }
0x1a92   :  { %v9657_v21 = vpop.eup %9656 }
0x1af9   :  { %v2529_v14 = vpop.permute.xlu1 %2528 }
0x1afa   :  { %v2531_v20 = vadd.f32 %v2529_v14, %v2525_v12 }
0x1afc   :  { %9658 = vtanh.f32 %v2531_v20 }
0x1b06   :  { %v9659_v51 = vpop.eup %9658 }
0x1b07   :  { %v10930_v24 = vmul.f32 %v9659_v51, %v9657_v21 }
0x1b09   :  { %7645 = vmatmul.mubr.msk.f32.vlgmr.msra.gmra.mrb[36].mxu1 %vm319_vm0, %v10930_v24  ;;  %2534 = vst.msk [vmem:[#allocation3 + $0x8] sm:$0xff] %vm319_vm0, %v10930_v24 }
0x1b0a   :  { %8599 = vmatpush1.bf16.msra.mxu1 %v10808_v8  ;;  %2713 = vmatprep.mubr.f32.mxu1 %v10048_v7 }
0x1b0b   :  { %8601 = vmatprep.subr.bf16.mxu1 %v10810_v54 }
0x1b0e   :  { %8603 = vmatpush1.bf16.msra.mxu1 %v10827_v53 }
0x1b0f   :  { %8605 = vmatprep.subr.bf16.mxu1 %v10830_v61 }
0x1b12   :  { %8607 = vmatpush1.bf16.msra.mxu1 %v10847_v2 }
0x1b13   :  { %8609 = vmatprep.subr.bf16.mxu1 %v10850_v4 }
0x1b16   :  { %8611 = vmatpush1.bf16.msra.mxu1 %v10863_v16 }
0x1b17   :  { %8613 = vmatprep.subr.bf16.mxu1 %v10762_v36 }
0x1bdc   :  { %v2610_v27 = vpop.f32.mrb[36].mxu1 }
0x1bdd   :  { %v9256_v25 = vadd.f32 %v2610_v27, %v10904_v23  ;;  %v2612_v58 = vpop.f32.mrb[37].mxu1 }
0x1bde   :  { %v9257_v3 = vadd.f32 %v2612_v58, %v10908_v38 }
0x1bdf   :  { %v7646_v26 = vmul.f32 -1.442695, %v9256_v25 }
0x1be0   :  { %v7647_v33 = vmul.f32 -1.442695, %v9257_v3 }
0x1be1   :  { %9660 = vpow2.f32 %v7646_v26 }
0x1be2   :  { %9662 = vtanh.f32 %v9257_v3 }
0x1beb   :  { %v9661_v30 = vpop.eup %9660 }
0x1bec   :  { %v2623_v18 = vadd.f32 1.0, %v9661_v30  ;;  %v9663_v5 = vpop.eup %9662 }
0x1bee   :  { %9664 = vrcp.f32 %v2623_v18 }
0x1bef   :  { %9666 = vpow2.f32 %v7647_v33 }
0x1bf8   :  { %v9665_v19 = vpop.eup %9664 }
0x1bf9   :  { %v2631_v32 = vmul.f32 %v9665_v19, %v9663_v5  ;;  %v9667_v41 = vpop.eup %9666  ;;  %v2630_v44 = vmul.f32 %v9665_v19, %v2531_v20 }
0x1bfa   :  { %v2624_v42 = vadd.f32 1.0, %v9667_v41 }
0x1bfb   :  { %2633 = vrot.lane.b32.xlu0 %v2631_v32, %s10049_s25 }
0x1bfc   :  { %9668 = vrcp.f32 %v2624_v42 }
0x1c06   :  { %v9669_v35 = vpop.eup %9668 }
0x1c6d   :  { %v2634_v1 = vpop.permute.xlu0 %2633 }
0x1c6e   :  { %v2636_v29 = vadd.f32 %v2634_v1, %v2630_v44 }
0x1c70   :  { %9670 = vtanh.f32 %v2636_v29 }
0x1c7a   :  { %v9671_v39 = vpop.eup %9670 }
0x1c7b   :  { %v10948_v40 = vmul.f32 %v9671_v39, %v9669_v35 }
0x1c7d   :  { %7648 = vmatmul.mubr.msk.f32.vlgmr.msra.gmra.mrb[38].mxu1 %vm319_vm0, %v10948_v40  ;;  %2639 = vst.msk [vmem:[#allocation3 + $0x10] sm:$0xff] %vm319_vm0, %v10948_v40 }
0x1c7e   :  { %8615 = vmatpush1.bf16.msra.mxu1 %v10808_v8  ;;  %2818 = vmatprep.mubr.f32.mxu1 %v10048_v7 }
0x1c7f   :  { %8617 = vmatprep.subr.bf16.mxu1 %v10810_v54 }
0x1c82   :  { %8619 = vmatpush1.bf16.msra.mxu1 %v10827_v53 }
0x1c83   :  { %8621 = vmatprep.subr.bf16.mxu1 %v10830_v61 }
0x1c86   :  { %8623 = vmatpush1.bf16.msra.mxu1 %v10847_v2 }
0x1c87   :  { %8625 = vmatprep.subr.bf16.mxu1 %v10850_v4 }
0x1c8a   :  { %8627 = vmatpush1.bf16.msra.mxu1 %v10863_v16 }
0x1c8b   :  { %8629 = vmatprep.subr.bf16.mxu1 %v10762_v36 }
0x1d50   :  { %v2715_v47 = vpop.f32.mrb[38].mxu1 }
0x1d51   :  { %v9258_v46 = vadd.f32 %v2715_v47, %v10904_v23  ;;  %v2717_v48 = vpop.f32.mrb[39].mxu1 }
0x1d52   :  { %v9259_v28 = vadd.f32 %v2717_v48, %v10908_v38 }
0x1d53   :  { %v7649_v49 = vmul.f32 -1.442695, %v9258_v46 }
0x1d54   :  { %v7650_v9 = vmul.f32 -1.442695, %v9259_v28 }
0x1d55   :  { %9672 = vpow2.f32 %v7649_v49 }
0x1d56   :  { %9674 = vtanh.f32 %v9259_v28 }
0x1d5f   :  { %v9673_v52 = vpop.eup %9672 }
0x1d60   :  { %v2728_v22 = vadd.f32 1.0, %v9673_v52  ;;  %v9675_v13 = vpop.eup %9674 }
0x1d62   :  { %9676 = vrcp.f32 %v2728_v22 }
0x1d63   :  { %9678 = vpow2.f32 %v7650_v9 }
0x1d6c   :  { %v9677_v31 = vpop.eup %9676 }
0x1d6d   :  { %v2736_v43 = vmul.f32 %v9677_v31, %v9675_v13  ;;  %v9679_v10 = vpop.eup %9678  ;;  %v2735_v56 = vmul.f32 %v9677_v31, %v2636_v29 }
0x1d6e   :  { %v2729_v34 = vadd.f32 1.0, %v9679_v10 }
0x1d6f   :  { %2738 = vrot.lane.b32.xlu1 %v2736_v43, %s10049_s25 }
0x1d70   :  { %9680 = vrcp.f32 %v2729_v34 }
0x1d7a   :  { %v9681_v50 = vpop.eup %9680 }
0x1de1   :  { %v2739_v37 = vpop.permute.xlu1 %2738 }
0x1de2   :  { %v2741_v45 = vadd.f32 %v2739_v37, %v2735_v56 }
0x1de4   :  { %9682 = vtanh.f32 %v2741_v45 }
0x1dee   :  { %v9683_v57 = vpop.eup %9682 }
0x1def   :  { %v10966_v59 = vmul.f32 %v9683_v57, %v9681_v50 }
0x1df1   :  { %7651 = vmatmul.mubr.msk.f32.vlgmr.msra.gmra.mrb[40].mxu1 %vm319_vm0, %v10966_v59  ;;  %2744 = vst.msk [vmem:[#allocation3 + $0x18] sm:$0xff] %vm319_vm0, %v10966_v59 }
0x1df2   :  { %8631 = vmatpush1.bf16.msra.mxu1 %v10808_v8  ;;  %2923 = vmatprep.mubr.f32.mxu1 %v10048_v7 }
0x1df3   :  { %8633 = vmatprep.subr.bf16.mxu1 %v10810_v54 }
0x1df6   :  { %8635 = vmatpush1.bf16.msra.mxu1 %v10827_v53 }
0x1df7   :  { %8637 = vmatprep.subr.bf16.mxu1 %v10830_v61 }
0x1dfa   :  { %8639 = vmatpush1.bf16.msra.mxu1 %v10847_v2 }
0x1dfb   :  { %8641 = vmatprep.subr.bf16.mxu1 %v10850_v4 }
0x1dfe   :  { %8643 = vmatpush1.bf16.msra.mxu1 %v10863_v16 }
0x1dff   :  { %8645 = vmatprep.subr.bf16.mxu1 %v10762_v36 }
0x1ec4   :  { %v2820_v60 = vpop.f32.mrb[40].mxu1 }
0x1ec5   :  { %v9260_v62 = vadd.f32 %v2820_v60, %v10904_v23  ;;  %v2822_v63 = vpop.f32.mrb[41].mxu1 }
0x1ec6   :  { %v9261_v6 = vadd.f32 %v2822_v63, %v10908_v38 }
0x1ec7   :  { %v7652_v0 = vmul.f32 -1.442695, %v9260_v62 }
0x1ec8   :  { %v7653_v51 = vmul.f32 -1.442695, %v9261_v6 }
0x1ec9   :  { %9684 = vpow2.f32 %v7652_v0 }
0x1eca   :  { %9686 = vtanh.f32 %v9261_v6 }
0x1ed3   :  { %v9685_v11 = vpop.eup %9684 }
0x1ed4   :  { %v2833_v12 = vadd.f32 1.0, %v9685_v11  ;;  %v9687_v14 = vpop.eup %9686 }
0x1ed6   :  { %9688 = vrcp.f32 %v2833_v12 }
0x1ed7   :  { %9690 = vpow2.f32 %v7653_v51 }
0x1ee0   :  { %v9689_v20 = vpop.eup %9688 }
0x1ee1   :  { %v2841_v21 = vmul.f32 %v9689_v20, %v9687_v14  ;;  %v9691_v27 = vpop.eup %9690  ;;  %v2840_v58 = vmul.f32 %v9689_v20, %v2741_v45 }
0x1ee2   :  { %v2834_v25 = vadd.f32 1.0, %v9691_v27 }
0x1ee3   :  { %2843 = vrot.lane.b32.xlu0 %v2841_v21, %s10049_s25 }
0x1ee4   :  { %9692 = vrcp.f32 %v2834_v25 }
0x1eee   :  { %v9693_v30 = vpop.eup %9692 }
0x1f55   :  { %v2844_v26 = vpop.permute.xlu0 %2843 }
0x1f56   :  { %v2846_v3 = vadd.f32 %v2844_v26, %v2840_v58 }
0x1f58   :  { %9694 = vtanh.f32 %v2846_v3 }
0x1f62   :  { %v9695_v18 = vpop.eup %9694 }
0x1f63   :  { %v10984_v5 = vmul.f32 %v9695_v18, %v9693_v30 }
0x1f65   :  { %7654 = vmatmul.mubr.msk.f32.vlgmr.msra.gmra.mrb[42].mxu1 %vm319_vm0, %v10984_v5  ;;  %2849 = vst.msk [vmem:[#allocation3 + $0x20] sm:$0xff] %vm319_vm0, %v10984_v5 }
0x1f66   :  { %8647 = vmatpush1.bf16.msra.mxu1 %v10808_v8  ;;  %3028 = vmatprep.mubr.f32.mxu1 %v10048_v7 }
0x1f67   :  { %8649 = vmatprep.subr.bf16.mxu1 %v10810_v54 }
0x1f6a   :  { %8651 = vmatpush1.bf16.msra.mxu1 %v10827_v53 }
0x1f6b   :  { %8653 = vmatprep.subr.bf16.mxu1 %v10830_v61 }
0x1f6e   :  { %8655 = vmatpush1.bf16.msra.mxu1 %v10847_v2 }
0x1f6f   :  { %8657 = vmatprep.subr.bf16.mxu1 %v10850_v4 }
0x1f72   :  { %8659 = vmatpush1.bf16.msra.mxu1 %v10863_v16 }
0x1f73   :  { %8661 = vmatprep.subr.bf16.mxu1 %v10762_v36 }
0x2038   :  { %v2925_v19 = vpop.f32.mrb[42].mxu1 }
0x2039   :  { %v9262_v32 = vadd.f32 %v2925_v19, %v10904_v23  ;;  %v2927_v33 = vpop.f32.mrb[43].mxu1 }
0x203a   :  { %v9263_v42 = vadd.f32 %v2927_v33, %v10908_v38 }
0x203b   :  { %v7655_v41 = vmul.f32 -1.442695, %v9262_v32 }
0x203c   :  { %v7656_v47 = vmul.f32 -1.442695, %v9263_v42 }
0x203d   :  { %9696 = vpow2.f32 %v7655_v41 }
0x203e   :  { %9698 = vtanh.f32 %v9263_v42 }
0x2047   :  { %v9697_v44 = vpop.eup %9696 }
0x2048   :  { %v2938_v1 = vadd.f32 1.0, %v9697_v44  ;;  %v9699_v29 = vpop.eup %9698 }
0x204a   :  { %9700 = vrcp.f32 %v2938_v1 }
0x204b   :  { %9702 = vpow2.f32 %v7656_v47 }
0x2054   :  { %v9701_v35 = vpop.eup %9700 }
0x2055   :  { %v2946_v39 = vmul.f32 %v9701_v35, %v9699_v29  ;;  %v9703_v46 = vpop.eup %9702  ;;  %v2945_v49 = vmul.f32 %v9701_v35, %v2846_v3 }
0x2056   :  { %v2939_v48 = vadd.f32 1.0, %v9703_v46 }
0x2057   :  { %2948 = vrot.lane.b32.xlu1 %v2946_v39, %s10049_s25 }
0x2058   :  { %9704 = vrcp.f32 %v2939_v48 }
0x2062   :  { %v9705_v22 = vpop.eup %9704 }
0x20c9   :  { %v2949_v28 = vpop.permute.xlu1 %2948 }
0x20ca   :  { %v2951_v52 = vadd.f32 %v2949_v28, %v2945_v49 }
0x20cc   :  { %9706 = vtanh.f32 %v2951_v52 }
0x20d6   :  { %v9707_v13 = vpop.eup %9706 }
0x20d7   :  { %v11002_v31 = vmul.f32 %v9707_v13, %v9705_v22 }
0x20d9   :  { %7657 = vmatmul.mubr.msk.f32.vlgmr.msra.gmra.mrb[44].mxu1 %vm319_vm0, %v11002_v31  ;;  %2954 = vst.msk [vmem:[#allocation3 + $0x28] sm:$0xff] %vm319_vm0, %v11002_v31 }
0x20da   :  { %8663 = vmatpush1.bf16.msra.mxu1 %v10808_v8  ;;  %3133 = vmatprep.mubr.f32.mxu1 %v10048_v7 }
0x20db   :  { %8665 = vmatprep.subr.bf16.mxu1 %v10810_v54 }
0x20de   :  { %8667 = vmatpush1.bf16.msra.mxu1 %v10827_v53 }
0x20df   :  { %8669 = vmatprep.subr.bf16.mxu1 %v10830_v61 }
0x20e2   :  { %8671 = vmatpush1.bf16.msra.mxu1 %v10847_v2 }
0x20e3   :  { %8673 = vmatprep.subr.bf16.mxu1 %v10850_v4 }
0x20e6   :  { %8675 = vmatpush1.bf16.msra.mxu1 %v10863_v16 }
0x20e7   :  { %8677 = vmatprep.subr.bf16.mxu1 %v10762_v36 }
0x21ac   :  { %v3030_v43 = vpop.f32.mrb[44].mxu1 }
0x21ad   :  { %v9264_v9 = vadd.f32 %v3030_v43, %v10904_v23  ;;  %v3032_v10 = vpop.f32.mrb[45].mxu1 }
0x21ae   :  { %v9265_v56 = vadd.f32 %v3032_v10, %v10908_v38 }
0x21af   :  { %v7658_v34 = vmul.f32 -1.442695, %v9264_v9 }
0x21b0   :  { %v7659_v62 = vmul.f32 -1.442695, %v9265_v56 }
0x21b1   :  { %9708 = vpow2.f32 %v7658_v34 }
0x21b2   :  { %9710 = vtanh.f32 %v9265_v56 }
0x21bb   :  { %v9709_v37 = vpop.eup %9708 }
0x21bc   :  { %v3043_v45 = vadd.f32 1.0, %v9709_v37  ;;  %v9711_v50 = vpop.eup %9710 }
0x21be   :  { %9712 = vrcp.f32 %v3043_v45 }
0x21bf   :  { %9714 = vpow2.f32 %v7659_v62 }
0x21c8   :  { %v9713_v57 = vpop.eup %9712 }
0x21c9   :  { %v3051_v60 = vmul.f32 %v9713_v57, %v9711_v50  ;;  %v9715_v63 = vpop.eup %9714  ;;  %v3050_v6 = vmul.f32 %v9713_v57, %v2951_v52 }
0x21ca   :  { %v3044_v0 = vadd.f32 1.0, %v9715_v63 }
0x21cb   :  { %3053 = vrot.lane.b32.xlu0 %v3051_v60, %s10049_s25 }
0x21cc   :  { %9716 = vrcp.f32 %v3044_v0 }
0x21d6   :  { %v9717_v14 = vpop.eup %9716 }
0x223d   :  { %v3054_v11 = vpop.permute.xlu0 %3053 }
0x223e   :  { %v3056_v12 = vadd.f32 %v3054_v11, %v3050_v6 }
0x2240   :  { %9718 = vtanh.f32 %v3056_v12 }
0x224a   :  { %v9719_v20 = vpop.eup %9718 }
0x224b   :  { %v11020_v21 = vmul.f32 %v9719_v20, %v9717_v14 }
0x224d   :  { %7660 = vmatmul.mubr.msk.f32.vlgmr.msra.gmra.mrb[46].mxu1 %vm319_vm0, %v11020_v21  ;;  %3059 = vst.msk [vmem:[#allocation3 + $0x30] sm:$0xff] %vm319_vm0, %v11020_v21 }
0x224e   :  { %8679 = vmatpush1.bf16.msra.mxu1 %v10808_v8  ;;  %3238 = vmatprep.mubr.f32.mxu1 %v10048_v7 }
0x224f   :  { %8681 = vmatprep.subr.bf16.mxu1 %v10810_v54 }
0x2252   :  { %8683 = vmatpush1.bf16.msra.mxu1 %v10827_v53 }
0x2253   :  { %8685 = vmatprep.subr.bf16.mxu1 %v10830_v61 }
0x2256   :  { %8687 = vmatpush1.bf16.msra.mxu1 %v10847_v2 }
0x2257   :  { %8689 = vmatprep.subr.bf16.mxu1 %v10850_v4 }
0x225a   :  { %8691 = vmatpush1.bf16.msra.mxu1 %v10863_v16 }
0x225b   :  { %8693 = vmatprep.subr.bf16.mxu1 %v10762_v36 }
0x2320   :  { %v3135_v51 = vpop.f32.mrb[46].mxu1 }
0x2321   :  { %v9266_v27 = vadd.f32 %v3135_v51, %v10904_v23  ;;  %v3137_v25 = vpop.f32.mrb[47].mxu1 }
0x2322   :  { %v9267_v26 = vadd.f32 %v3137_v25, %v10908_v38 }
0x2323   :  { %v7661_v58 = vmul.f32 -1.442695, %v9266_v27 }
0x2324   :  { %v7662_v33 = vmul.f32 -1.442695, %v9267_v26 }
0x2325   :  { %9720 = vpow2.f32 %v7661_v58 }
0x2326   :  { %9722 = vtanh.f32 %v9267_v26 }
0x232f   :  { %v9721_v3 = vpop.eup %9720 }
0x2330   :  { %v3148_v30 = vadd.f32 1.0, %v9721_v3  ;;  %v9723_v18 = vpop.eup %9722 }
0x2332   :  { %9724 = vrcp.f32 %v3148_v30 }
0x2333   :  { %9726 = vpow2.f32 %v7662_v33 }
0x233c   :  { %v9725_v19 = vpop.eup %9724 }
0x233d   :  { %v3156_v32 = vmul.f32 %v9725_v19, %v9723_v18  ;;  %v9727_v41 = vpop.eup %9726  ;;  %v3155_v44 = vmul.f32 %v9725_v19, %v3056_v12 }
0x233e   :  { %v3149_v42 = vadd.f32 1.0, %v9727_v41 }
0x233f   :  { %3158 = vrot.lane.b32.xlu1 %v3156_v32, %s10049_s25 }
0x2340   :  { %9728 = vrcp.f32 %v3149_v42 }
0x234a   :  { %v9729_v35 = vpop.eup %9728 }
0x23b1   :  { %v3159_v1 = vpop.permute.xlu1 %3158 }
0x23b2   :  { %v3161_v29 = vadd.f32 %v3159_v1, %v3155_v44 }
0x23b4   :  { %9730 = vtanh.f32 %v3161_v29 }
0x23be   :  { %v9731_v39 = vpop.eup %9730 }
0x23bf   :  { %v11038_v47 = vmul.f32 %v9731_v39, %v9729_v35 }
0x23c1   :  { %7663 = vmatmul.mubr.msk.f32.vlgmr.msra.gmra.mrb[48].mxu1 %vm319_vm0, %v11038_v47  ;;  %3164 = vst.msk [vmem:[#allocation3 + $0x38] sm:$0xff] %vm319_vm0, %v11038_v47 }
0x23c2   :  { %8695 = vmatpush1.bf16.msra.mxu1 %v10808_v8  ;;  %3343 = vmatprep.mubr.f32.mxu1 %v10048_v7 }
0x23c3   :  { %8697 = vmatprep.subr.bf16.mxu1 %v10810_v54 }
0x23c6   :  { %8699 = vmatpush1.bf16.msra.mxu1 %v10827_v53 }
0x23c7   :  { %8701 = vmatprep.subr.bf16.mxu1 %v10830_v61 }
0x23ca   :  { %8703 = vmatpush1.bf16.msra.mxu1 %v10847_v2 }
0x23cb   :  { %8705 = vmatprep.subr.bf16.mxu1 %v10850_v4 }
0x23ce   :  { %8707 = vmatpush1.bf16.msra.mxu1 %v10863_v16 }
0x23cf   :  { %8709 = vmatprep.subr.bf16.mxu1 %v10762_v36 }
0x2494   :  { %v3240_v46 = vpop.f32.mrb[48].mxu1 }
0x2495   :  { %v9268_v48 = vadd.f32 %v3240_v46, %v10904_v23  ;;  %v3242_v49 = vpop.f32.mrb[49].mxu1 }
0x2496   :  { %v9269_v52 = vadd.f32 %v3242_v49, %v10908_v38 }
0x2497   :  { %v7664_v28 = vmul.f32 -1.442695, %v9268_v48 }
0x2498   :  { %v7665_v34 = vmul.f32 -1.442695, %v9269_v52 }
0x2499   :  { %9732 = vpow2.f32 %v7664_v28 }
0x249a   :  { %9734 = vtanh.f32 %v9269_v52 }
0x24a3   :  { %v9733_v22 = vpop.eup %9732 }
0x24a4   :  { %v3253_v13 = vadd.f32 1.0, %v9733_v22  ;;  %v9735_v43 = vpop.eup %9734 }
0x24a6   :  { %9736 = vrcp.f32 %v3253_v13 }
0x24a7   :  { %9738 = vpow2.f32 %v7665_v34 }
0x24b0   :  { %v9737_v9 = vpop.eup %9736 }
0x24b1   :  { %v3261_v10 = vmul.f32 %v9737_v9, %v9735_v43  ;;  %v9739_v56 = vpop.eup %9738  ;;  %v3260_v45 = vmul.f32 %v9737_v9, %v3161_v29 }
0x24b2   :  { %v3254_v37 = vadd.f32 1.0, %v9739_v56 }
0x24b3   :  { %3263 = vrot.lane.b32.xlu0 %v3261_v10, %s10049_s25 }
0x24b4   :  { %9740 = vrcp.f32 %v3254_v37 }
0x24be   :  { %v9741_v60 = vpop.eup %9740 }
0x2525   :  { %v3264_v50 = vpop.permute.xlu0 %3263 }
0x2526   :  { %v3266_v57 = vadd.f32 %v3264_v50, %v3260_v45 }
0x2528   :  { %9742 = vtanh.f32 %v3266_v57 }
0x2532   :  { %v9743_v62 = vpop.eup %9742 }
0x2533   :  { %v11056_v63 = vmul.f32 %v9743_v62, %v9741_v60 }
0x2535   :  { %7666 = vmatmul.mubr.msk.f32.vlgmr.msra.gmra.mrb[50].mxu1 %vm319_vm0, %v11056_v63 }
0x2536   :  { %8711 = vmatpush1.bf16.msra.mxu1 %v10808_v8  ;;  %3448 = vmatprep.mubr.f32.mxu1 %v10048_v7 }
0x2537   :  { %8713 = vmatprep.subr.bf16.mxu1 %v10810_v54 }
0x253a   :  { %8715 = vmatpush1.bf16.msra.mxu1 %v10827_v53 }
0x253b   :  { %8717 = vmatprep.subr.bf16.mxu1 %v10830_v61 }
0x253e   :  { %8719 = vmatpush1.bf16.msra.mxu1 %v10847_v2 }
0x253f   :  { %8721 = vmatprep.subr.bf16.mxu1 %v10850_v4 }
0x2542   :  { %8723 = vmatpush1.bf16.msra.mxu1 %v10863_v16 }
0x2543   :  { %8725 = vmatprep.subr.bf16.mxu1 %v10762_v36 }
0x2608   :  { %v3345_v0 = vpop.f32.mrb[50].mxu1 }
0x2609   :  { %v9270_v6 = vadd.f32 %v3345_v0, %v10904_v23  ;;  %v3347_v11 = vpop.f32.mrb[51].mxu1 }
0x260a   :  { %v9271_v14 = vadd.f32 %v3347_v11, %v10908_v38 }
0x260b   :  { %v7667_v12 = vmul.f32 -1.442695, %v9270_v6 }
0x260c   :  { %v7668_v26 = vmul.f32 -1.442695, %v9271_v14 }
0x260d   :  { %9744 = vpow2.f32 %v7667_v12 }
0x260e   :  { %9746 = vtanh.f32 %v9271_v14 }
0x2617   :  { %v9745_v20 = vpop.eup %9744 }
0x2618   :  { %v3358_v51 = vadd.f32 1.0, %v9745_v20  ;;  %v9747_v27 = vpop.eup %9746 }
0x261a   :  { %9748 = vrcp.f32 %v3358_v51 }
0x261b   :  { %9750 = vpow2.f32 %v7668_v26 }
0x2624   :  { %v9749_v25 = vpop.eup %9748 }
0x2625   :  { %v3366_v58 = vmul.f32 %v9749_v25, %v9747_v27  ;;  %v9751_v3 = vpop.eup %9750  ;;  %v3365_v18 = vmul.f32 %v9749_v25, %v3266_v57 }
0x2626   :  { %v3359_v30 = vadd.f32 1.0, %v9751_v3 }
0x2627   :  { %3368 = vrot.lane.b32.xlu1 %v3366_v58, %s10049_s25 }
0x2628   :  { %9752 = vrcp.f32 %v3359_v30 }
0x2632   :  { %v9753_v33 = vpop.eup %9752 }
0x2699   :  { %v3369_v19 = vpop.permute.xlu1 %3368 }
0x269a   :  { %v3371_v32 = vadd.f32 %v3369_v19, %v3365_v18 }
0x269c   :  { %9754 = vtanh.f32 %v3371_v32 }
0x26a6   :  { %v9755_v41 = vpop.eup %9754 }
0x26a7   :  { %v11072_v42 = vmul.f32 %v9755_v41, %v9753_v33 }
0x26a9   :  { %7669 = vmatmul.mubr.msk.f32.vlgmr.msra.gmra.mrb[52].mxu1 %vm319_vm0, %v11072_v42 }
0x26aa   :  { %8727 = vmatpush1.bf16.msra.mxu1 %v10808_v8  ;;  %3553 = vmatprep.mubr.f32.mxu1 %v10048_v7 }
0x26ab   :  { %8729 = vmatprep.subr.bf16.mxu1 %v10810_v54 }
0x26ae   :  { %8731 = vmatpush1.bf16.msra.mxu1 %v10827_v53 }
0x26af   :  { %8733 = vmatprep.subr.bf16.mxu1 %v10830_v61 }
0x26b2   :  { %8735 = vmatpush1.bf16.msra.mxu1 %v10847_v2 }
0x26b3   :  { %8737 = vmatprep.subr.bf16.mxu1 %v10850_v4 }
0x26b6   :  { %8739 = vmatpush1.bf16.msra.mxu1 %v10863_v16 }
0x26b7   :  { %8741 = vmatprep.subr.bf16.mxu1 %v10762_v36 }
0x277c   :  { %v3450_v44 = vpop.f32.mrb[52].mxu1 }
0x277d   :  { %v9272_v1 = vadd.f32 %v3450_v44, %v10904_v23  ;;  %v3452_v29 = vpop.f32.mrb[53].mxu1 }
0x277e   :  { %v9273_v39 = vadd.f32 %v3452_v29, %v10908_v38 }
0x277f   :  { %v7670_v35 = vmul.f32 -1.442695, %v9272_v1 }
0x2780   :  { %v7671_v22 = vmul.f32 -1.442695, %v9273_v39 }
0x2781   :  { %9756 = vpow2.f32 %v7670_v35 }
0x2782   :  { %9758 = vtanh.f32 %v9273_v39 }
0x278b   :  { %v9757_v46 = vpop.eup %9756 }
0x278c   :  { %v3463_v48 = vadd.f32 1.0, %v9757_v46  ;;  %v9759_v49 = vpop.eup %9758 }
0x278e   :  { %9760 = vrcp.f32 %v3463_v48 }
0x278f   :  { %9762 = vpow2.f32 %v7671_v22 }
0x2798   :  { %v9761_v28 = vpop.eup %9760 }
0x2799   :  { %v3471_v52 = vmul.f32 %v9761_v28, %v9759_v49  ;;  %v9763_v13 = vpop.eup %9762  ;;  %v3470_v9 = vmul.f32 %v9761_v28, %v3371_v32 }
0x279a   :  { %v3464_v43 = vadd.f32 1.0, %v9763_v13 }
0x279b   :  { %3473 = vrot.lane.b32.xlu0 %v3471_v52, %s10049_s25 }
0x279c   :  { %9764 = vrcp.f32 %v3464_v43 }
0x27a6   :  { %v9765_v56 = vpop.eup %9764 }
0x280d   :  { %v3474_v10 = vpop.permute.xlu0 %3473 }
0x280e   :  { %v3476_v34 = vadd.f32 %v3474_v10, %v3470_v9 }
0x2810   :  { %9766 = vtanh.f32 %v3476_v34 }
0x281a   :  { %v9767_v37 = vpop.eup %9766 }
0x281b   :  { %v11088_v45 = vmul.f32 %v9767_v37, %v9765_v56 }
0x281d   :  { %7672 = vmatmul.mubr.msk.f32.vlgmr.msra.gmra.mrb[54].mxu1 %vm319_vm0, %v11088_v45 }
0x281e   :  { %8743 = vmatpush1.bf16.msra.mxu1 %v10808_v8  ;;  %3658 = vmatprep.mubr.f32.mxu1 %v10048_v7 }
0x281f   :  { %8745 = vmatprep.subr.bf16.mxu1 %v10810_v54 }
0x2822   :  { %8747 = vmatpush1.bf16.msra.mxu1 %v10827_v53 }
0x2823   :  { %8749 = vmatprep.subr.bf16.mxu1 %v10830_v61 }
0x2826   :  { %8751 = vmatpush1.bf16.msra.mxu1 %v10847_v2 }
0x2827   :  { %8753 = vmatprep.subr.bf16.mxu1 %v10850_v4 }
0x282a   :  { %8755 = vmatpush1.bf16.msra.mxu1 %v10863_v16 }
0x282b   :  { %8757 = vmatprep.subr.bf16.mxu1 %v10762_v36 }
0x28f0   :  { %v3555_v50 = vpop.f32.mrb[54].mxu1 }
0x28f1   :  { %v9274_v57 = vadd.f32 %v3555_v50, %v10904_v23  ;;  %v3557_v60 = vpop.f32.mrb[55].mxu1 }
0x28f2   :  { %v9275_v0 = vadd.f32 %v3557_v60, %v10908_v38 }
0x28f3   :  { %v7673_v62 = vmul.f32 -1.442695, %v9274_v57 }
0x28f4   :  { %v7674_v51 = vmul.f32 -1.442695, %v9275_v0 }
0x28f5   :  { %9768 = vpow2.f32 %v7673_v62 }
0x28f6   :  { %9770 = vtanh.f32 %v9275_v0 }
0x28ff   :  { %v9769_v6 = vpop.eup %9768 }
0x2900   :  { %v3568_v11 = vadd.f32 1.0, %v9769_v6  ;;  %v9771_v12 = vpop.eup %9770 }
0x2902   :  { %9772 = vrcp.f32 %v3568_v11 }
0x2903   :  { %9774 = vpow2.f32 %v7674_v51 }
0x290c   :  { %v9773_v14 = vpop.eup %9772 }
0x290d   :  { %v3576_v20 = vmul.f32 %v9773_v14, %v9771_v12  ;;  %v9775_v27 = vpop.eup %9774  ;;  %v3575_v58 = vmul.f32 %v9773_v14, %v3476_v34 }
0x290e   :  { %v3569_v25 = vadd.f32 1.0, %v9775_v27 }
0x290f   :  { %3578 = vrot.lane.b32.xlu1 %v3576_v20, %s10049_s25 }
0x2910   :  { %9776 = vrcp.f32 %v3569_v25 }
0x291a   :  { %v9777_v30 = vpop.eup %9776 }
0x2981   :  { %v3579_v26 = vpop.permute.xlu1 %3578 }
0x2982   :  { %v3581_v3 = vadd.f32 %v3579_v26, %v3575_v58 }
0x2984   :  { %9778 = vtanh.f32 %v3581_v3 }
0x298e   :  { %v9779_v18 = vpop.eup %9778 }
0x298f   :  { %v11104_v19 = vmul.f32 %v9779_v18, %v9777_v30 }
0x2991   :  { %7675 = vmatmul.mubr.msk.f32.vlgmr.msra.gmra.mrb[56].mxu1 %vm319_vm0, %v11104_v19 }
0x2992   :  { %8759 = vmatpush1.bf16.msra.mxu1 %v10808_v8  ;;  %3763 = vmatprep.mubr.f32.mxu1 %v10048_v7 }
0x2993   :  { %8761 = vmatprep.subr.bf16.mxu1 %v10810_v54 }
0x2996   :  { %8763 = vmatpush1.bf16.msra.mxu1 %v10827_v53 }
0x2997   :  { %8765 = vmatprep.subr.bf16.mxu1 %v10830_v61 }
0x299a   :  { %8767 = vmatpush1.bf16.msra.mxu1 %v10847_v2 }
0x299b   :  { %8769 = vmatprep.subr.bf16.mxu1 %v10850_v4 }
0x299e   :  { %8771 = vmatpush1.bf16.msra.mxu1 %v10863_v16 }
0x299f   :  { %8773 = vmatprep.subr.bf16.mxu1 %v10762_v36 }
0x2a64   :  { %v3660_v32 = vpop.f32.mrb[56].mxu1 }
0x2a65   :  { %v9276_v33 = vadd.f32 %v3660_v32, %v10904_v23  ;;  %v3662_v41 = vpop.f32.mrb[57].mxu1 }
0x2a66   :  { %v9277_v1 = vadd.f32 %v3662_v41, %v10908_v38 }
0x2a67   :  { %v7676_v44 = vmul.f32 -1.442695, %v9276_v33 }
0x2a68   :  { %v7677_v49 = vmul.f32 -1.442695, %v9277_v1 }
0x2a69   :  { %9780 = vpow2.f32 %v7676_v44 }
0x2a6a   :  { %9782 = vtanh.f32 %v9277_v1 }
0x2a73   :  { %v9781_v29 = vpop.eup %9780 }
0x2a74   :  { %v3673_v35 = vadd.f32 1.0, %v9781_v29  ;;  %v9783_v39 = vpop.eup %9782 }
0x2a76   :  { %9784 = vrcp.f32 %v3673_v35 }
0x2a77   :  { %9786 = vpow2.f32 %v7677_v49 }
0x2a80   :  { %v9785_v46 = vpop.eup %9784 }
0x2a81   :  { %v3681_v48 = vmul.f32 %v9785_v46, %v9783_v39  ;;  %v9787_v28 = vpop.eup %9786  ;;  %v3680_v22 = vmul.f32 %v9785_v46, %v3581_v3 }
0x2a82   :  { %v3674_v52 = vadd.f32 1.0, %v9787_v28 }
0x2a83   :  { %3683 = vrot.lane.b32.xlu0 %v3681_v48, %s10049_s25 }
0x2a84   :  { %9788 = vrcp.f32 %v3674_v52 }
0x2a8e   :  { %v9789_v9 = vpop.eup %9788 }
0x2af5   :  { %v3684_v13 = vpop.permute.xlu0 %3683 }
0x2af6   :  { %v3686_v43 = vadd.f32 %v3684_v13, %v3680_v22 }
0x2af8   :  { %9790 = vtanh.f32 %v3686_v43 }
0x2b02   :  { %v9791_v10 = vpop.eup %9790 }
0x2b03   :  { %v11120_v34 = vmul.f32 %v9791_v10, %v9789_v9 }
0x2b05   :  { %7678 = vmatmul.mubr.msk.f32.vlgmr.msra.gmra.mrb[58].mxu1 %vm319_vm0, %v11120_v34 }
0x2b06   :  { %8775 = vmatpush1.bf16.msra.mxu1 %v10808_v8  ;;  %3868 = vmatprep.mubr.f32.mxu1 %v10048_v7 }
0x2b07   :  { %8777 = vmatprep.subr.bf16.mxu1 %v10810_v54 }
0x2b0a   :  { %8779 = vmatpush1.bf16.msra.mxu1 %v10827_v53 }
0x2b0b   :  { %8781 = vmatprep.subr.bf16.mxu1 %v10830_v61 }
0x2b0e   :  { %8783 = vmatpush1.bf16.msra.mxu1 %v10847_v2 }
0x2b0f   :  { %8785 = vmatprep.subr.bf16.mxu1 %v10850_v4 }
0x2b12   :  { %8787 = vmatpush1.bf16.msra.mxu1 %v10863_v16 }
0x2b13   :  { %8789 = vmatprep.subr.bf16.mxu1 %v10762_v36 }
0x2bd8   :  { %v3765_v56 = vpop.f32.mrb[58].mxu1 }
0x2bd9   :  { %v9278_v37 = vadd.f32 %v3765_v56, %v10904_v23  ;;  %v3767_v50 = vpop.f32.mrb[59].mxu1 }
0x2bda   :  { %v9279_v60 = vadd.f32 %v3767_v50, %v10908_v38  ;;  %v7687_v50 = vld [vmem:[%s12246_s2 + $0x200] sm:$0xff] }
0x2bdb   :  { %v7679_v57 = vmul.f32 -1.442695, %v9278_v37 }
0x2bdc   :  { %v7680_v14 = vmul.f32 -1.442695, %v9279_v60 }
0x2bdd   :  { %9792 = vpow2.f32 %v7679_v57 }
0x2bde   :  { %9794 = vtanh.f32 %v9279_v60 }
0x2be7   :  { %v9793_v62 = vpop.eup %9792 }
0x2be8   :  { %v3778_v0 = vadd.f32 1.0, %v9793_v62  ;;  %v9795_v6 = vpop.eup %9794 }
0x2bea   :  { %9796 = vrcp.f32 %v3778_v0  ;;  %v7691_v0 = vld [vmem:[%s12246_s2 + $0x220] sm:$0xff] }
0x2beb   :  { %9798 = vpow2.f32 %v7680_v14 }
0x2bf4   :  { %v9797_v11 = vpop.eup %9796 }
0x2bf5   :  { %v3786_v12 = vmul.f32 %v9797_v11, %v9795_v6  ;;  %v9799_v36 = vpop.eup %9798  ;;  %v3785_v51 = vmul.f32 %v9797_v11, %v3686_v43  ;;  %v7693_v6 = vld [vmem:[%s12246_s2 + $0x230] sm:$0xff]  ;;  %v7696_v11 = vld [vmem:[%s12246_s2 + $0x248] sm:$0xff] }
0x2bf6   :  { %v3779_v20 = vadd.f32 1.0, %v9799_v36  ;;  %v8810_v14 = vpack.c.bf16 %v7693_v6, %v7691_v0 }
0x2bf7   :  { %3788 = vrot.lane.b32.xlu1 %v3786_v12, %s10049_s25  ;;  %v7698_v12 = vld [vmem:[%s12246_s2 + $0x258] sm:$0xff] }
0x2bf8   :  { %9800 = vrcp.f32 %v3779_v20  ;;  %v8812_v36 = vpack.c.bf16 %v7698_v12, %v7696_v11  ;;  %v7695_v20 = vld [vmem:[%s12246_s2 + $0x240] sm:$0xff]  ;;  %v7713_v11 = vld [vmem:[%s12246_s2 + $0x2d0] sm:$0xff]  ;;  %v7731_v12 = vld [vmem:[%s12247_s3 + $0x158] sm:$0xff] }
0x2c02   :  { %v9801_v58 = vpop.eup %9800 }
0x2c69   :  { %v3789_v27 = vpop.permute.xlu1 %3788 }
0x2c6a   :  { %v3791_v25 = vadd.f32 %v3789_v27, %v3785_v51  ;;  %v7697_v51 = vld [vmem:[%s12246_s2 + $0x250] sm:$0xff]  ;;  %v7700_v27 = vld [vmem:[%s12246_s2 + $0x268] sm:$0xff] }
0x2c6c   :  { %9802 = vtanh.f32 %v3791_v25 }
0x2c76   :  { %v9803_v26 = vpop.eup %9802 }
0x2c77   :  { %v11136_v3 = vmul.f32 %v9803_v26, %v9801_v58  ;;  %v7721_v58 = vld [vmem:[%s12247_s3 + $0x108] sm:$0xff]  ;;  %v7723_v26 = vld [vmem:[%s12247_s3 + $0x118] sm:$0xff] }
0x2c79   :  { %7681 = vmatmul.mubr.msk.f32.vlgmr.msra.gmra.mrb[60].mxu1 %vm319_vm0, %v11136_v3 }
0x2c7a   :  { %8791 = vmatpush1.bf16.msra.mxu1 %v10808_v8  ;;  %3973 = vmatprep.mubr.f32.mxu1 %v10048_v7 }
0x2c7b   :  { %8793 = vmatprep.subr.bf16.mxu1 %v10810_v54 }
0x2c7e   :  { %8795 = vmatpush1.bf16.msra.mxu1 %v10827_v53 }
0x2c7f   :  { %8797 = vmatprep.subr.bf16.mxu1 %v10830_v61 }
0x2c82   :  { %8799 = vmatpush1.bf16.msra.mxu1 %v10847_v2 }
0x2c83   :  { %8801 = vmatprep.subr.bf16.mxu1 %v10850_v4 }
0x2c86   :  { %8803 = vmatpush1.bf16.msra.mxu1 %v10863_v16 }
0x2d4c   :  { %v3870_v30 = vpop.f32.mrb[60].mxu1 }
0x2d4d   :  { %v9280_v18 = vadd.f32 %v3870_v30, %v10904_v23  ;;  %v3872_v32 = vpop.f32.mrb[61].mxu1  ;;  %v7720_v30 = vld [vmem:[%s12247_s3 + $0x100] sm:$0xff] }
0x2d4e   :  { %v9281_v8 = vadd.f32 %v3872_v32, %v10908_v38  ;;  %v8814_v32 = vpack.c.bf16 %v7697_v51, %v7695_v20 }
0x2d4f   :  { %v7682_v33 = vmul.f32 -1.442695, %v9280_v18  ;;  %v7722_v18 = vld [vmem:[%s12247_s3 + $0x110] sm:$0xff] }
0x2d50   :  { %v7683_v2 = vmul.f32 -1.442695, %v9281_v8 }
0x2d51   :  { %9804 = vpow2.f32 %v7682_v33  ;;  %v7699_v33 = vld [vmem:[%s12246_s2 + $0x260] sm:$0xff] }
0x2d52   :  { %9806 = vtanh.f32 %v9281_v8  ;;  %v7701_v8 = vld [vmem:[%s12246_s2 + $0x270] sm:$0xff] }
0x2d5b   :  { %v9805_v41 = vpop.eup %9804 }
0x2d5c   :  { %v3883_v54 = vadd.f32 1.0, %v9805_v41  ;;  %v9807_v53 = vpop.eup %9806  ;;  %v11242_v41 = vpack.c.bf16 %v7723_v26, %v7721_v58  ;;  %v7718_v58 = vld [vmem:[%s12246_s2 + $0x2f8] sm:$0xff] }
0x2d5e   :  { %9808 = vrcp.f32 %v3883_v54  ;;  %v11244_v54 = vpack.c.bf16 %v7722_v18, %v7720_v30  ;;  %8837 = vmatprep.subr.bf16.mxu1 %v11242_v41  ;;  %v7715_v30 = vld [vmem:[%s12246_s2 + $0x2e0] sm:$0xff]  ;;  %v7717_v18 = vld [vmem:[%s12246_s2 + $0x2f0] sm:$0xff] }
0x2d5f   :  { %9810 = vpow2.f32 %v7683_v2  ;;  %v7727_v2 = vld [vmem:[%s12247_s3 + $0x138] sm:$0xff] }
0x2d68   :  { %v9809_v61 = vpop.eup %9808 }
0x2d69   :  { %v3891_v44 = vmul.f32 %v9809_v61, %v9807_v53  ;;  %v9811_v4 = vpop.eup %9810  ;;  %v3890_v1 = vmul.f32 %v9809_v61, %v3791_v25  ;;  %v7702_v25 = vld [vmem:[%s12246_s2 + $0x278] sm:$0xff]  ;;  %v7704_v61 = vld [vmem:[%s12246_s2 + $0x288] sm:$0xff] }
0x2d6a   :  { %v3884_v16 = vadd.f32 1.0, %v9811_v4  ;;  %v8816_v53 = vpack.c.bf16 %v7702_v25, %v7700_v27  ;;  %v7706_v4 = vld [vmem:[%s12246_s2 + $0x298] sm:$0xff]  ;;  %v7716_v25 = vld [vmem:[%s12246_s2 + $0x2e8] sm:$0xff] }
0x2d6b   :  { %3893 = vrot.lane.b32.xlu0 %v3891_v44, %s10049_s25  ;;  %v7725_v44 = vld [vmem:[%s12247_s3 + $0x128] sm:$0xff]  ;;  %v8832_v26 = vpack.c.bf16 %v7718_v58, %v7716_v25 }
0x2d6c   :  { %9812 = vrcp.f32 %v3884_v16  ;;  %v11259_v16 = vpack.c.bf16 %v7727_v2, %v7725_v44 }
0x2d76   :  { %v9813_v39 = vpop.eup %9812 }
0x2ddd   :  { %v3894_v29 = vpop.permute.xlu0 %3893 }
0x2dde   :  { %v11151_v35 = vadd.f32 %v3894_v29, %v3890_v1  ;;  %v7724_v1 = vld [vmem:[%s12247_s3 + $0x120] sm:$0xff]  ;;  %v7726_v29 = vld [vmem:[%s12247_s3 + $0x130] sm:$0xff] }
0x2de0   :  { %9814 = vtanh.f32 %v11151_v35 }
0x2dea   :  { %v9815_v46 = vpop.eup %9814 }
0x2deb   :  { %v11154_v48 = vmul.f32 %v9815_v46, %v9813_v39  ;;  %v11268_v39 = vpack.c.bf16 %v7726_v29, %v7724_v1  ;;  %v8818_v46 = vpack.c.bf16 %v7701_v8, %v7699_v33  ;;  %v8834_v33 = vpack.c.bf16 %v7717_v18, %v7715_v30  ;;  %v7735_v8 = vld [vmem:[%s12247_s3 + $0x178] sm:$0xff] }
0x2ded   :  { %7684 = vmatmul.mubr.msk.f32.vlgmr.msra.gmra.mrb[62].mxu1 %vm319_vm0, %v11154_v48 }
0x2dee   :  { %4348 = vmatprep.mubr.f32.mxu1 %v10048_v7  ;;  %8839 = vmatpush1.bf16.msra.mxu1 %v11244_v54 }
0x2def   :  { %8841 = vmatprep.subr.bf16.mxu1 %v11259_v16 }
0x2df2   :  { %8843 = vmatpush1.bf16.msra.mxu1 %v11268_v39 }
0x2ec0   :  { %v3975_v49 = vpop.f32.mrb[62].mxu1 }
0x2ec1   :  { %v9282_v28 = vadd.f32 %v3975_v49, %v10904_v23  ;;  %v3977_v52 = vpop.f32.mrb[63].mxu1  ;;  %v7688_v23 = vld [vmem:[%s12246_s2 + $0x208] sm:$0xff]  ;;  %v8820_v49 = vpack.c.bf16 %v7706_v4, %v7704_v61  ;;  %v7734_v61 = vld [vmem:[%s12247_s3 + $0x170] sm:$0xff] }
0x2ec2   :  { %v11161_v13 = vadd.f32 %v3977_v52, %v10908_v38  ;;  %v7690_v38 = vld [vmem:[%s12246_s2 + $0x218] sm:$0xff]  ;;  %v7705_v52 = vld [vmem:[%s12246_s2 + $0x290] sm:$0xff] }
0x2ec3   :  { %v7685_v22 = vmul.f32 -1.442695, %v9282_v28  ;;  %v8804_v57 = vpack.c.bf16 %v7690_v38, %v7688_v23  ;;  %v7703_v28 = vld [vmem:[%s12246_s2 + $0x280] sm:$0xff]  ;;  %v7709_v23 = vld [vmem:[%s12246_s2 + $0x2b0] sm:$0xff] }
0x2ec5   :  { %9816 = vpow2.f32 %v7685_v22  ;;  %8805 = vmatprep.subr.bf16.mxu0 %v8804_v57  ;;  %v7708_v22 = vld [vmem:[%s12246_s2 + $0x2a8] sm:$0xff] }
0x2ec6   :  { %9818 = vtanh.f32 %v11161_v13 }
0x2ecf   :  { %v9817_v43 = vpop.eup %9816 }
0x2ed0   :  { %v3988_v9 = vadd.f32 1.0, %v9817_v43  ;;  %v9819_v10 = vpop.eup %9818  ;;  %v7710_v43 = vld [vmem:[%s12246_s2 + $0x2b8] sm:$0xff] }
0x2ed2   :  { %9820 = vrcp.f32 %v3988_v9  ;;  %v8822_v9 = vpack.c.bf16 %v7705_v52, %v7703_v28 }
0x2edc   :  { %v11164_v56 = vpop.eup %9820 }
0x2edd   :  { %v3996_v37 = vmul.f32 %v11164_v56, %v9819_v10  ;;  %v8824_v10 = vpack.c.bf16 %v7710_v43, %v7708_v22 }
0x2edf   :  { %3998 = vrot.lane.b32.xlu1 %v3996_v37, %s10049_s25  ;;  %v7707_v37 = vld [vmem:[%s12246_s2 + $0x2a0] sm:$0xff] }
0x2ee0   :  { %v8826_v38 = vpack.c.bf16 %v7709_v23, %v7707_v37 }
0x2ee3   :  { %3901 = vrot.lane.b32.xlu1 %v11154_v48, %s10049_s25 }
0x2ee7   :  { %3691 = vrot.lane.b32.xlu1 %v11120_v34, %s10049_s25 }
0x2eeb   :  { %3481 = vrot.lane.b32.xlu1 %v11088_v45, %s10049_s25 }
0x2eef   :  { %3271 = vrot.lane.b32.xlu1 %v11056_v63, %s10049_s25 }
0x2ef3   :  { %3061 = vrot.lane.b32.xlu1 %v11020_v21, %s10049_s25  ;;  %v7694_v21 = vld [vmem:[%s12246_s2 + $0x238] sm:$0xff] }
0x2ef7   :  { %2851 = vrot.lane.b32.xlu1 %v10984_v5, %s10049_s25  ;;  %v7689_v5 = vld [vmem:[%s12246_s2 + $0x210] sm:$0xff] }
0x2ef8   :  { %v8806_v60 = vpack.c.bf16 %v7689_v5, %v7687_v50  ;;  %v7686_v50 = vmul.f32 -1.442695, %v11161_v13  ;;  %v7711_v13 = vld [vmem:[%s12246_s2 + $0x2c0] sm:$0xff] }
0x2efa   :  { %8807 = vmatpush1.bf16.msra.mxu0 %v8806_v60  ;;  %9822 = vpow2.f32 %v7686_v50  ;;  %v7712_v60 = vld [vmem:[%s12246_s2 + $0x2c8] sm:$0xff] }
0x2efb   :  { %2641 = vrot.lane.b32.xlu1 %v10948_v40, %s10049_s25  ;;  %v7692_v40 = vld [vmem:[%s12246_s2 + $0x228] sm:$0xff] }
0x2efc   :  { %v8808_v62 = vpack.c.bf16 %v7694_v21, %v7692_v40  ;;  %v3995_v40 = vmul.f32 %v11164_v56, %v11151_v35  ;;  %v7729_v35 = vld [vmem:[%s12247_s3 + $0x148] sm:$0xff]  ;;  %v8830_v56 = vpack.c.bf16 %v7713_v11, %v7711_v13  ;;  %v7719_v11 = vld [vmem:[%s12248_s4 + $0x4] sm:$0x3] }
0x2efd   :  { %v11317_v20 = vpack.c.bf16 %v7731_v12, %v7729_v35  ;;  %v11435_v35 = vrot.slane %v7719_v11, %v10308_v15 }
0x2efe   :  { %8809 = vmatprep.subr.bf16.mxu0 %v8808_v62  ;;  %v7714_v62 = vld [vmem:[%s12246_s2 + $0x2d8] sm:$0xff] }
0x2eff   :  { %8811 = vmatpush1.bf16.msra.mxu0 %v8810_v14  ;;  %v8828_v6 = vpack.c.bf16 %v7714_v62, %v7712_v60  ;;  %v7728_v14 = vld [vmem:[%s12247_s3 + $0x140] sm:$0xff]  ;;  %8845 = vmatprep.subr.bf16.mxu1 %v11317_v20 }
0x2f00   :  { %8813 = vmatprep.subr.bf16.mxu0 %v8812_v36  ;;  %v7730_v36 = vld [vmem:[%s12247_s3 + $0x150] sm:$0xff] }
0x2f01   :  { %v11319_v51 = vpack.c.bf16 %v7730_v36, %v7728_v14 }
0x2f03   :  { %8815 = vmatpush1.bf16.msra.mxu0 %v8814_v32  ;;  %v7733_v32 = vld [vmem:[%s12247_s3 + $0x168] sm:$0xff]  ;;  %8847 = vmatpush1.bf16.msra.mxu1 %v11319_v51 }
0x2f04   :  { %8817 = vmatprep.subr.bf16.mxu0 %v8816_v53  ;;  %v9823_v57 = vpop.eup %9822  ;;  %v7732_v53 = vld [vmem:[%s12247_s3 + $0x160] sm:$0xff]  ;;  %v11348_v44 = vpack.c.bf16 %v7735_v8, %v7733_v32 }
0x2f05   :  { %v3989_v5 = vadd.f32 1.0, %v9823_v57  ;;  %v11350_v2 = vpack.c.bf16 %v7734_v61, %v7732_v53 }
0x2f06   :  { %8849 = vmatprep.subr.bf16.mxu1 %v11348_v44 }
0x2f07   :  { %8819 = vmatpush1.bf16.msra.mxu0 %v8818_v46  ;;  %9824 = vrcp.f32 %v3989_v5  ;;  %8851 = vmatpush1.bf16.msra.mxu1 %v11350_v2 }
0x2f08   :  { %8821 = vmatprep.subr.bf16.mxu0 %v8820_v49 }
0x2f0a   :  { %4349 = vmatmul.mubr.f32.vlgmr.msra.gmra.mrb[64].mxu1 %v10048_v7 }
0x2f0b   :  { %8823 = vmatpush1.bf16.msra.mxu0 %v8822_v9  ;;  %8004 = vmatprep.mubr.msk.f32.mxu1 %vm10051_vm2, %v10048_v7 }
0x2f0c   :  { %8825 = vmatprep.subr.bf16.mxu0 %v8824_v10 }
0x2f0f   :  { %8827 = vmatpush1.bf16.msra.mxu0 %v8826_v38 }
0x2f10   :  { %8829 = vmatprep.subr.bf16.mxu0 %v8828_v6 }
0x2f11   :  { %v9825_v1 = vpop.eup %9824 }
0x2f13   :  { %8831 = vmatpush1.bf16.msra.mxu0 %v8830_v56  ;;  %v11438_v56 = vrot.slane %v7719_v11, %v10313_v17 }
0x2f14   :  { %8833 = vmatprep.subr.bf16.mxu0 %v8832_v26 }
0x2f17   :  { %8835 = vmatpush1.bf16.msra.mxu0 %v8834_v33 }
0x2f18   :  { %8853 = vmatprep.subr.bf16.mxu0 %v11242_v41 }
0x2f51   :  { %v3999_v21 = vpop.permute.xlu1 %3998 }
0x2f52   :  { %v4001_v0 = vadd.f32 %v3999_v21, %v3995_v40 }
0x2f54   :  { %9826 = vtanh.f32 %v4001_v0 }
0x2f55   :  { %v3902_v27 = vpop.permute.xlu1 %3901 }
0x2f56   :  { %3904 = vst.msk [vmem:[#allocation3 + $0x8] sm:$0xff] %vm424_vm1, %v3902_v27 }
0x2f59   :  { %v3692_v4 = vpop.permute.xlu1 %3691 }
0x2f5a   :  { %3694 = vst.msk [vmem:[#allocation3 + $0x18] sm:$0xff] %vm424_vm1, %v3692_v4 }
0x2f5d   :  { %v3482_v29 = vpop.permute.xlu1 %3481 }
0x2f5e   :  { %v9827_v46 = vpop.eup %9826  ;;  %3484 = vst.msk [vmem:[#allocation3 + $0x28] sm:$0xff] %vm424_vm1, %v3482_v29 }
0x2f5f   :  { %v11358_v49 = vmul.f32 %v9827_v46, %v9825_v1 }
0x2f61   :  { %v3272_v28 = vpop.permute.xlu1 %3271  ;;  %4006 = vrot.lane.b32.xlu0 %v11358_v49, %s10049_s25  ;;  %v4013_v10 = vld [vmem:[#allocation3 + $0x18] sm:$0xff] }
0x2f62   :  { %3274 = vst.msk [vmem:[#allocation3 + $0x38] sm:$0xff] %vm424_vm1, %v3272_v28 }
0x2f65   :  { %v3062_v52 = vpop.permute.xlu1 %3061  ;;  %3796 = vrot.lane.b32.xlu0 %v11136_v3, %s10049_s25  ;;  %v4015_v38 = vld [vmem:[#allocation3 + $0x28] sm:$0xff] }
0x2f66   :  { %3064 = vst.msk [vmem:[#allocation3 + $0x48] sm:$0xff] %vm424_vm1, %v3062_v52 }
0x2f67   :  { %3374 = vst.msk [vmem:[#allocation3 + $0x48] sm:$0xff] %vm319_vm0, %v11072_v42 }
0x2f69   :  { %v2852_v22 = vpop.permute.xlu1 %2851  ;;  %3586 = vrot.lane.b32.xlu0 %v11104_v19, %s10049_s25 }
0x2f6a   :  { %2854 = vst.msk [vmem:[#allocation3 + $0x58] sm:$0xff] %vm424_vm1, %v2852_v22 }
0x2f6b   :  { %3584 = vst.msk [vmem:[#allocation3 + $0x58] sm:$0xff] %vm319_vm0, %v11104_v19 }
0x2f6d   :  { %v2642_v43 = vpop.permute.xlu1 %2641  ;;  %3376 = vrot.lane.b32.xlu0 %v11072_v42, %s10049_s25 }
0x2f6e   :  { %2644 = vst.msk [vmem:[#allocation3 + $0x68] sm:$0xff] %vm424_vm1, %v2642_v43 }
0x2f6f   :  { %3794 = vst.msk [vmem:[#allocation3 + $0x68] sm:$0xff] %vm319_vm0, %v11136_v3 }
0x2f71   :  { %3166 = vrot.lane.b32.xlu0 %v11038_v47, %s10049_s25 }
0x2f72   :  { %v4021_v40 = vld [vmem:[#allocation3 + $0x58] sm:$0xff] }
0x2f75   :  { %2956 = vrot.lane.b32.xlu0 %v11002_v31, %s10049_s25 }
0x2f76   :  { %v4023_v60 = vld [vmem:[#allocation3 + $0x68] sm:$0xff] }
0x2f79   :  { %2746 = vrot.lane.b32.xlu0 %v10966_v59, %s10049_s25  ;;  %v4011_v59 = vld [vmem:[#allocation3 + $0x8] sm:$0xff] }
0x2f7d   :  { %2536 = vrot.lane.b32.xlu0 %v10930_v24, %s10049_s25 }
0x2f81   :  { %2431 = vrot.lane.b32.xlu0 %v10912_v55, %s10049_s25 }
0x2fd3   :  { %v4007_v42 = vpop.permute.xlu0 %4006 }
0x2fd4   :  { %4009 = vst.msk [vmem:[#allocation3] sm:$0xff] %vm424_vm1, %v4007_v42 }
0x2fd7   :  { %v3797_v19 = vpop.permute.xlu0 %3796 }
0x2fd8   :  { %3799 = vst.msk [vmem:[#allocation3 + $0x10] sm:$0xff] %vm424_vm1, %v3797_v19 }
0x2fdb   :  { %v3587_v3 = vpop.permute.xlu0 %3586  ;;  %v4010_v47 = vld [vmem:[#allocation3] sm:$0xff] }
0x2fdc   :  { %3589 = vst.msk [vmem:[#allocation3 + $0x20] sm:$0xff] %vm424_vm1, %v3587_v3  ;;  %4137 = vmatmul.mubr.f32.vlgmr.msra.gmra.mrb[32].mxu0 %v4010_v47 }
0x2fdd   :  { %4142 = vmatprep.mubr.f32.mxu0 %v10048_v7  ;;  %8855 = vmatpush1.bf16.msra.mxu0 %v11244_v54  ;;  %v4350_v6 = vpop.f32.mrb[64].mxu1 }
0x2fde   :  { %8857 = vmatprep.subr.bf16.mxu0 %v11259_v16  ;;  %v4352_v13 = vpop.f32.mrb[65].mxu1 }
0x2fdf   :  { %v3377_v24 = vpop.permute.xlu0 %3376  ;;  %v4012_v31 = vld [vmem:[#allocation3 + $0x10] sm:$0xff] }
0x2fe0   :  { %3379 = vst.msk [vmem:[#allocation3 + $0x30] sm:$0xff] %vm424_vm1, %v3377_v24  ;;  %4143 = vmatmul.mubr.f32.gmra.mrb[34].mxu0 %v4011_v59 }
0x2fe1   :  { %4148 = vmatprep.mubr.f32.mxu0 %v10048_v7  ;;  %8859 = vmatpush1.bf16.msra.mxu0 %v11268_v39 }
0x2fe2   :  { %8861 = vmatprep.subr.bf16.mxu0 %v11317_v20 }
0x2fe3   :  { %v3167_v55 = vpop.permute.xlu0 %3166  ;;  %v4014_v37 = vld [vmem:[#allocation3 + $0x20] sm:$0xff] }
0x2fe4   :  { %3169 = vst.msk [vmem:[#allocation3 + $0x40] sm:$0xff] %vm424_vm1, %v3167_v55  ;;  %4149 = vmatmul.mubr.f32.gmra.mrb[36].mxu0 %v4012_v31 }
0x2fe5   :  { %3269 = vst.msk [vmem:[#allocation3 + $0x40] sm:$0xff] %vm319_vm0, %v11056_v63  ;;  %4154 = vmatprep.mubr.f32.mxu0 %v10048_v7  ;;  %8863 = vmatpush1.bf16.msra.mxu0 %v11319_v51 }
0x2fe6   :  { %8865 = vmatprep.subr.bf16.mxu0 %v11348_v44 }
0x2fe7   :  { %v2957_v9 = vpop.permute.xlu0 %2956  ;;  %v4016_v50 = vld [vmem:[#allocation3 + $0x30] sm:$0xff] }
0x2fe8   :  { %2959 = vst.msk [vmem:[#allocation3 + $0x50] sm:$0xff] %vm424_vm1, %v2957_v9  ;;  %4155 = vmatmul.mubr.f32.gmra.mrb[38].mxu0 %v4013_v10 }
0x2fe9   :  { %3479 = vst.msk [vmem:[#allocation3 + $0x50] sm:$0xff] %vm319_vm0, %v11088_v45  ;;  %4160 = vmatprep.mubr.f32.mxu0 %v10048_v7  ;;  %8867 = vmatpush1.bf16.msra.mxu0 %v11350_v2 }
0x2fea   :  { %8869 = vmatprep.subr.bf16.mxu0 %v11242_v41 }
0x2feb   :  { %v2747_v63 = vpop.permute.xlu0 %2746 }
0x2fec   :  { %2749 = vst.msk [vmem:[#allocation3 + $0x60] sm:$0xff] %vm424_vm1, %v2747_v63  ;;  %4161 = vmatmul.mubr.f32.gmra.mrb[40].mxu0 %v4014_v37  ;;  %v4018_v57 = vld [vmem:[#allocation3 + $0x40] sm:$0xff] }
0x2fed   :  { %3689 = vst.msk [vmem:[#allocation3 + $0x60] sm:$0xff] %vm319_vm0, %v11120_v34  ;;  %4166 = vmatprep.mubr.f32.mxu0 %v10048_v7  ;;  %v4017_v34 = vld [vmem:[#allocation3 + $0x38] sm:$0xff] }
0x2fef   :  { %v2537_v23 = vpop.permute.xlu0 %2536 }
0x2ff0   :  { %2539 = vst.msk [vmem:[#allocation3 + $0x70] sm:$0xff] %vm424_vm1, %v2537_v23  ;;  %4167 = vmatmul.mubr.f32.gmra.mrb[42].mxu0 %v4015_v38  ;;  %v4020_v5 = vld [vmem:[#allocation3 + $0x50] sm:$0xff] }
0x2ff1   :  { %3899 = vst.msk [vmem:[#allocation3 + $0x70] sm:$0xff] %vm319_vm0, %v11154_v48  ;;  %4172 = vmatprep.mubr.f32.mxu0 %v10048_v7  ;;  %v4019_v48 = vld [vmem:[#allocation3 + $0x48] sm:$0xff] }
0x2ff3   :  { %v2432_v45 = vpop.permute.xlu0 %2431 }
0x2ff4   :  { %2434 = vst.msk [vmem:[#allocation3 + $0x78] sm:$0xff] %vm424_vm1, %v2432_v45  ;;  %4173 = vmatmul.mubr.f32.gmra.mrb[44].mxu0 %v4016_v50  ;;  %v4022_v21 = vld [vmem:[#allocation3 + $0x60] sm:$0xff] }
0x2ff5   :  { %4004 = vst.msk [vmem:[#allocation3 + $0x78] sm:$0xff] %vm319_vm0, %v11358_v49  ;;  %4178 = vmatprep.mubr.f32.mxu0 %v10048_v7 }
0x2ff8   :  { %4179 = vmatmul.mubr.f32.gmra.mrb[46].mxu0 %v4017_v34  ;;  %v4024_v62 = vld [vmem:[#allocation3 + $0x70] sm:$0xff] }
0x2ff9   :  { %4184 = vmatprep.mubr.f32.mxu0 %v10048_v7 }
0x2ffc   :  { %4185 = vmatmul.mubr.f32.gmra.mrb[48].mxu0 %v4018_v57  ;;  %v4025_v0 = vld [vmem:[#allocation3 + $0x78] sm:$0xff] }
0x2ffd   :  { %4190 = vmatprep.mubr.f32.mxu0 %v10048_v7 }
0x3000   :  { %4191 = vmatmul.mubr.f32.gmra.mrb[50].mxu0 %v4019_v48 }
0x3001   :  { %4196 = vmatprep.mubr.f32.mxu0 %v10048_v7 }
0x3004   :  { %4197 = vmatmul.mubr.f32.gmra.mrb[52].mxu0 %v4020_v5 }
0x3005   :  { %4202 = vmatprep.mubr.f32.mxu0 %v10048_v7 }
0x3008   :  { %4203 = vmatmul.mubr.f32.gmra.mrb[54].mxu0 %v4021_v40 }
0x3009   :  { %4208 = vmatprep.mubr.f32.mxu0 %v10048_v7 }
0x300c   :  { %4209 = vmatmul.mubr.f32.gmra.mrb[56].mxu0 %v4022_v21 }
0x300d   :  { %4214 = vmatprep.mubr.f32.mxu0 %v10048_v7 }
0x3010   :  { %4215 = vmatmul.mubr.f32.gmra.mrb[58].mxu0 %v4023_v60 }
0x3011   :  { %4220 = vmatprep.mubr.f32.mxu0 %v10048_v7 }
0x3014   :  { %4221 = vmatmul.mubr.f32.gmra.mrb[60].mxu0 %v4024_v62 }
0x3015   :  { %4226 = vmatprep.mubr.f32.mxu0 %v10048_v7 }
0x3018   :  { %4227 = vmatmul.mubr.f32.gmra.mrb[62].mxu0 %v4025_v0 }
0x3019   :  { %4453 = vmatprep.mubr.f32.mxu0 %v10048_v7 }
0x30af   :  { %v4138_v12 = vpop.f32.mrb[32].mxu0 }
0x30b0   :  { %v4139_v14 = vadd.f32 %v4138_v12, %v11435_v35  ;;  %v4140_v36 = vpop.f32.mrb[33].mxu0 }
0x30b1   :  { %v4141_v27 = vadd.f32 %v4140_v36, %v11438_v56 }
0x30b2   :  { %v4355_v25 = vadd.f32 %v4350_v6, %v4139_v14 }
0x30b3   :  { %v4356_v58 = vadd.f32 %v4352_v13, %v4141_v27 }
0x30b4   :  { %v7736_v26 = vmul.f32 -1.442695, %v4355_v25 }
0x30b5   :  { %v7737_v17 = vmul.f32 -1.442695, %v4356_v58 }
0x30b6   :  { %9828 = vpow2.f32 %v7736_v26 }
0x30b7   :  { %9830 = vtanh.f32 %v4356_v58 }
0x30c0   :  { %v9829_v30 = vpop.eup %9828 }
0x30c1   :  { %v4363_v18 = vadd.f32 1.0, %v9829_v30  ;;  %v9831_v32 = vpop.eup %9830 }
0x30c3   :  { %9832 = vrcp.f32 %v4363_v18 }
0x30c4   :  { %9834 = vpow2.f32 %v7737_v17 }
0x30cd   :  { %v9833_v15 = vpop.eup %9832 }
0x30ce   :  { %v4371_v33 = vmul.f32 %v9833_v15, %v9831_v32  ;;  %v9835_v8 = vpop.eup %9834  ;;  %v4370_v61 = vmul.f32 0.0, %v9833_v15 }
0x30cf   :  { %v4364_v53 = vadd.f32 1.0, %v9835_v8 }
0x30d0   :  { %4373 = vrot.lane.b32.xlu1 %v4371_v33, %s10049_s25 }
0x30d1   :  { %9836 = vrcp.f32 %v4364_v53 }
0x30db   :  { %v9837_v29 = vpop.eup %9836 }
0x3142   :  { %v4374_v4 = vpop.permute.xlu1 %4373 }
0x3143   :  { %v4376_v1 = vadd.f32 %v4374_v4, %v4370_v61 }
0x3145   :  { %9838 = vtanh.f32 %v4376_v1 }
0x314f   :  { %v9839_v46 = vpop.eup %9838 }
0x3150   :  { %v11443_v49 = vmul.f32 %v9839_v46, %v9837_v29 }
0x3152   :  { %4379 = vst.msk [vmem:[#allocation3] sm:$0xff] %vm319_vm0, %v11443_v49  ;;  %7738 = vmatmul.mubr.msk.f32.vlgmr.msra.gmra.mrb[34].mxu0 %vm319_vm0, %v11443_v49 }
0x3153   :  { %8871 = vmatpush1.bf16.msra.mxu0 %v11244_v54  ;;  %4558 = vmatprep.mubr.f32.mxu0 %v10048_v7 }
0x3154   :  { %8873 = vmatprep.subr.bf16.mxu0 %v11259_v16 }
0x3157   :  { %8875 = vmatpush1.bf16.msra.mxu0 %v11268_v39 }
0x3158   :  { %8877 = vmatprep.subr.bf16.mxu0 %v11317_v20 }
0x315b   :  { %8879 = vmatpush1.bf16.msra.mxu0 %v11319_v51 }
0x315c   :  { %8881 = vmatprep.subr.bf16.mxu0 %v11348_v44 }
0x315f   :  { %8883 = vmatpush1.bf16.msra.mxu0 %v11350_v2 }
0x3160   :  { %8885 = vmatprep.subr.bf16.mxu0 %v11242_v41 }
0x3225   :  { %v4455_v28 = vpop.f32.mrb[34].mxu0 }
0x3226   :  { %v9288_v52 = vadd.f32 %v4455_v28, %v11435_v35  ;;  %v4457_v22 = vpop.f32.mrb[35].mxu0 }
0x3227   :  { %v9289_v42 = vadd.f32 %v4457_v22, %v11438_v56 }
0x3228   :  { %v7739_v43 = vmul.f32 -1.442695, %v9288_v52 }
0x3229   :  { %v7740_v55 = vmul.f32 -1.442695, %v9289_v42 }
0x322a   :  { %9840 = vpow2.f32 %v7739_v43 }
0x322b   :  { %9842 = vtanh.f32 %v9289_v42 }
0x3234   :  { %v9841_v19 = vpop.eup %9840 }
0x3235   :  { %v4468_v3 = vadd.f32 1.0, %v9841_v19  ;;  %v9843_v47 = vpop.eup %9842 }
0x3237   :  { %9844 = vrcp.f32 %v4468_v3 }
0x3238   :  { %9846 = vpow2.f32 %v7740_v55 }
0x3241   :  { %v9845_v24 = vpop.eup %9844 }
0x3242   :  { %v4476_v59 = vmul.f32 %v9845_v24, %v9843_v47  ;;  %v9847_v31 = vpop.eup %9846  ;;  %v4475_v10 = vmul.f32 %v9845_v24, %v4376_v1 }
0x3243   :  { %v4469_v9 = vadd.f32 1.0, %v9847_v31 }
0x3244   :  { %4478 = vrot.lane.b32.xlu1 %v4476_v59, %s10049_s25 }
0x3245   :  { %9848 = vrcp.f32 %v4469_v9 }
0x324f   :  { %v9849_v23 = vpop.eup %9848 }
0x32b6   :  { %v4479_v63 = vpop.permute.xlu1 %4478 }
0x32b7   :  { %v4481_v37 = vadd.f32 %v4479_v63, %v4475_v10 }
0x32b9   :  { %9850 = vtanh.f32 %v4481_v37 }
0x32c3   :  { %v9851_v38 = vpop.eup %9850 }
0x32c4   :  { %v11461_v45 = vmul.f32 %v9851_v38, %v9849_v23 }
0x32c6   :  { %7741 = vmatmul.mubr.msk.f32.vlgmr.msra.gmra.mrb[36].mxu0 %vm319_vm0, %v11461_v45  ;;  %4484 = vst.msk [vmem:[#allocation3 + $0x8] sm:$0xff] %vm319_vm0, %v11461_v45 }
0x32c7   :  { %8887 = vmatpush1.bf16.msra.mxu0 %v11244_v54  ;;  %4663 = vmatprep.mubr.f32.mxu0 %v10048_v7 }
0x32c8   :  { %8889 = vmatprep.subr.bf16.mxu0 %v11259_v16 }
0x32cb   :  { %8891 = vmatpush1.bf16.msra.mxu0 %v11268_v39 }
0x32cc   :  { %8893 = vmatprep.subr.bf16.mxu0 %v11317_v20 }
0x32cf   :  { %8895 = vmatpush1.bf16.msra.mxu0 %v11319_v51 }
0x32d0   :  { %8897 = vmatprep.subr.bf16.mxu0 %v11348_v44 }
0x32d3   :  { %8899 = vmatpush1.bf16.msra.mxu0 %v11350_v2 }
0x32d4   :  { %8901 = vmatprep.subr.bf16.mxu0 %v11242_v41 }
0x3399   :  { %v4560_v50 = vpop.f32.mrb[36].mxu0 }
0x339a   :  { %v9290_v34 = vadd.f32 %v4560_v50, %v11435_v35  ;;  %v4562_v57 = vpop.f32.mrb[37].mxu0 }
0x339b   :  { %v9291_v5 = vadd.f32 %v4562_v57, %v11438_v56 }
0x339c   :  { %v7742_v48 = vmul.f32 -1.442695, %v9290_v34 }
0x339d   :  { %v7743_v6 = vmul.f32 -1.442695, %v9291_v5 }
0x339e   :  { %9852 = vpow2.f32 %v7742_v48 }
0x339f   :  { %9854 = vtanh.f32 %v9291_v5 }
0x33a8   :  { %v9853_v40 = vpop.eup %9852 }
0x33a9   :  { %v4573_v21 = vadd.f32 1.0, %v9853_v40  ;;  %v9855_v60 = vpop.eup %9854 }
0x33ab   :  { %9856 = vrcp.f32 %v4573_v21 }
0x33ac   :  { %9858 = vpow2.f32 %v7743_v6 }
0x33b5   :  { %v9857_v62 = vpop.eup %9856 }
0x33b6   :  { %v4581_v0 = vmul.f32 %v9857_v62, %v9855_v60  ;;  %v9859_v13 = vpop.eup %9858  ;;  %v4580_v12 = vmul.f32 %v9857_v62, %v4481_v37 }
0x33b7   :  { %v4574_v11 = vadd.f32 1.0, %v9859_v13 }
0x33b8   :  { %4583 = vrot.lane.b32.xlu0 %v4581_v0, %s10049_s25 }
0x33b9   :  { %9860 = vrcp.f32 %v4574_v11 }
0x33c3   :  { %v9861_v27 = vpop.eup %9860 }
0x342a   :  { %v4584_v14 = vpop.permute.xlu0 %4583 }
0x342b   :  { %v4586_v36 = vadd.f32 %v4584_v14, %v4580_v12 }
0x342d   :  { %9862 = vtanh.f32 %v4586_v36 }
0x3437   :  { %v9863_v25 = vpop.eup %9862 }
0x3438   :  { %v11479_v58 = vmul.f32 %v9863_v25, %v9861_v27 }
0x343a   :  { %7744 = vmatmul.mubr.msk.f32.vlgmr.msra.gmra.mrb[38].mxu0 %vm319_vm0, %v11479_v58  ;;  %4589 = vst.msk [vmem:[#allocation3 + $0x10] sm:$0xff] %vm319_vm0, %v11479_v58 }
0x343b   :  { %8903 = vmatpush1.bf16.msra.mxu0 %v11244_v54  ;;  %4768 = vmatprep.mubr.f32.mxu0 %v10048_v7 }
0x343c   :  { %8905 = vmatprep.subr.bf16.mxu0 %v11259_v16 }
0x343f   :  { %8907 = vmatpush1.bf16.msra.mxu0 %v11268_v39 }
0x3440   :  { %8909 = vmatprep.subr.bf16.mxu0 %v11317_v20 }
0x3443   :  { %8911 = vmatpush1.bf16.msra.mxu0 %v11319_v51 }
0x3444   :  { %8913 = vmatprep.subr.bf16.mxu0 %v11348_v44 }
0x3447   :  { %8915 = vmatpush1.bf16.msra.mxu0 %v11350_v2 }
0x3448   :  { %8917 = vmatprep.subr.bf16.mxu0 %v11242_v41 }
0x350d   :  { %v4665_v26 = vpop.f32.mrb[38].mxu0 }
0x350e   :  { %v9292_v30 = vadd.f32 %v4665_v26, %v11435_v35  ;;  %v4667_v18 = vpop.f32.mrb[39].mxu0 }
0x350f   :  { %v9293_v15 = vadd.f32 %v4667_v18, %v11438_v56 }
0x3510   :  { %v7745_v32 = vmul.f32 -1.442695, %v9292_v30 }
0x3511   :  { %v7746_v4 = vmul.f32 -1.442695, %v9293_v15 }
0x3512   :  { %9864 = vpow2.f32 %v7745_v32 }
0x3513   :  { %9866 = vtanh.f32 %v9293_v15 }
0x351c   :  { %v9865_v33 = vpop.eup %9864 }
0x351d   :  { %v4678_v17 = vadd.f32 1.0, %v9865_v33  ;;  %v9867_v8 = vpop.eup %9866 }
0x351f   :  { %9868 = vrcp.f32 %v4678_v17 }
0x3520   :  { %9870 = vpow2.f32 %v7746_v4 }
0x3529   :  { %v9869_v53 = vpop.eup %9868 }
0x352a   :  { %v4686_v61 = vmul.f32 %v9869_v53, %v9867_v8  ;;  %v9871_v1 = vpop.eup %9870  ;;  %v4685_v46 = vmul.f32 %v9869_v53, %v4586_v36 }
0x352b   :  { %v4679_v29 = vadd.f32 1.0, %v9871_v1 }
0x352c   :  { %4688 = vrot.lane.b32.xlu1 %v4686_v61, %s10049_s25 }
0x352d   :  { %9872 = vrcp.f32 %v4679_v29 }
0x3537   :  { %v9873_v22 = vpop.eup %9872 }
0x359e   :  { %v4689_v28 = vpop.permute.xlu1 %4688 }
0x359f   :  { %v4691_v52 = vadd.f32 %v4689_v28, %v4685_v46 }
0x35a1   :  { %9874 = vtanh.f32 %v4691_v52 }
0x35ab   :  { %v9875_v43 = vpop.eup %9874 }
0x35ac   :  { %v11497_v42 = vmul.f32 %v9875_v43, %v9873_v22 }
0x35ae   :  { %7747 = vmatmul.mubr.msk.f32.vlgmr.msra.gmra.mrb[40].mxu0 %vm319_vm0, %v11497_v42  ;;  %4694 = vst.msk [vmem:[#allocation3 + $0x18] sm:$0xff] %vm319_vm0, %v11497_v42 }
0x35af   :  { %8919 = vmatpush1.bf16.msra.mxu0 %v11244_v54  ;;  %4873 = vmatprep.mubr.f32.mxu0 %v10048_v7 }
0x35b0   :  { %8921 = vmatprep.subr.bf16.mxu0 %v11259_v16 }
0x35b3   :  { %8923 = vmatpush1.bf16.msra.mxu0 %v11268_v39 }
0x35b4   :  { %8925 = vmatprep.subr.bf16.mxu0 %v11317_v20 }
0x35b7   :  { %8927 = vmatpush1.bf16.msra.mxu0 %v11319_v51 }
0x35b8   :  { %8929 = vmatprep.subr.bf16.mxu0 %v11348_v44 }
0x35bb   :  { %8931 = vmatpush1.bf16.msra.mxu0 %v11350_v2 }
0x35bc   :  { %8933 = vmatprep.subr.bf16.mxu0 %v11242_v41 }
0x3681   :  { %v4770_v19 = vpop.f32.mrb[40].mxu0 }
0x3682   :  { %v9294_v3 = vadd.f32 %v4770_v19, %v11435_v35  ;;  %v4772_v47 = vpop.f32.mrb[41].mxu0 }
0x3683   :  { %v9295_v59 = vadd.f32 %v4772_v47, %v11438_v56 }
0x3684   :  { %v7748_v24 = vmul.f32 -1.442695, %v9294_v3 }
0x3685   :  { %v7749_v37 = vmul.f32 -1.442695, %v9295_v59 }
0x3686   :  { %9876 = vpow2.f32 %v7748_v24 }
0x3687   :  { %9878 = vtanh.f32 %v9295_v59 }
0x3690   :  { %v9877_v55 = vpop.eup %9876 }
0x3691   :  { %v4783_v31 = vadd.f32 1.0, %v9877_v55  ;;  %v9879_v9 = vpop.eup %9878 }
0x3693   :  { %9880 = vrcp.f32 %v4783_v31 }
0x3694   :  { %9882 = vpow2.f32 %v7749_v37 }
0x369d   :  { %v9881_v10 = vpop.eup %9880 }
0x369e   :  { %v4791_v63 = vmul.f32 %v9881_v10, %v9879_v9  ;;  %v9883_v23 = vpop.eup %9882  ;;  %v4790_v50 = vmul.f32 %v9881_v10, %v4691_v52 }
0x369f   :  { %v4784_v38 = vadd.f32 1.0, %v9883_v23 }
0x36a0   :  { %4793 = vrot.lane.b32.xlu0 %v4791_v63, %s10049_s25 }
0x36a1   :  { %9884 = vrcp.f32 %v4784_v38 }
0x36ab   :  { %v9885_v48 = vpop.eup %9884 }
0x3712   :  { %v4794_v34 = vpop.permute.xlu0 %4793 }
0x3713   :  { %v4796_v57 = vadd.f32 %v4794_v34, %v4790_v50 }
0x3715   :  { %9886 = vtanh.f32 %v4796_v57 }
0x371f   :  { %v9887_v5 = vpop.eup %9886 }
0x3720   :  { %v11515_v40 = vmul.f32 %v9887_v5, %v9885_v48 }
0x3722   :  { %7750 = vmatmul.mubr.msk.f32.vlgmr.msra.gmra.mrb[42].mxu0 %vm319_vm0, %v11515_v40  ;;  %4799 = vst.msk [vmem:[#allocation3 + $0x20] sm:$0xff] %vm319_vm0, %v11515_v40 }
0x3723   :  { %8935 = vmatpush1.bf16.msra.mxu0 %v11244_v54  ;;  %4978 = vmatprep.mubr.f32.mxu0 %v10048_v7 }
0x3724   :  { %8937 = vmatprep.subr.bf16.mxu0 %v11259_v16 }
0x3727   :  { %8939 = vmatpush1.bf16.msra.mxu0 %v11268_v39 }
0x3728   :  { %8941 = vmatprep.subr.bf16.mxu0 %v11317_v20 }
0x372b   :  { %8943 = vmatpush1.bf16.msra.mxu0 %v11319_v51 }
0x372c   :  { %8945 = vmatprep.subr.bf16.mxu0 %v11348_v44 }
0x372f   :  { %8947 = vmatpush1.bf16.msra.mxu0 %v11350_v2 }
0x3730   :  { %8949 = vmatprep.subr.bf16.mxu0 %v11242_v41 }
0x37f5   :  { %v4875_v21 = vpop.f32.mrb[42].mxu0 }
0x37f6   :  { %v9296_v60 = vadd.f32 %v4875_v21, %v11435_v35  ;;  %v4877_v62 = vpop.f32.mrb[43].mxu0 }
0x37f7   :  { %v9297_v6 = vadd.f32 %v4877_v62, %v11438_v56 }
0x37f8   :  { %v7751_v0 = vmul.f32 -1.442695, %v9296_v60 }
0x37f9   :  { %v7752_v27 = vmul.f32 -1.442695, %v9297_v6 }
0x37fa   :  { %9888 = vpow2.f32 %v7751_v0 }
0x37fb   :  { %9890 = vtanh.f32 %v9297_v6 }
0x3804   :  { %v9889_v13 = vpop.eup %9888 }
0x3805   :  { %v4888_v11 = vadd.f32 1.0, %v9889_v13  ;;  %v9891_v12 = vpop.eup %9890 }
0x3807   :  { %9892 = vrcp.f32 %v4888_v11 }
0x3808   :  { %9894 = vpow2.f32 %v7752_v27 }
0x3811   :  { %v9893_v14 = vpop.eup %9892 }
0x3812   :  { %v4896_v36 = vmul.f32 %v9893_v14, %v9891_v12  ;;  %v9895_v25 = vpop.eup %9894  ;;  %v4895_v30 = vmul.f32 %v9893_v14, %v4796_v57 }
0x3813   :  { %v4889_v26 = vadd.f32 1.0, %v9895_v25 }
0x3814   :  { %4898 = vrot.lane.b32.xlu1 %v4896_v36, %s10049_s25 }
0x3815   :  { %9896 = vrcp.f32 %v4889_v26 }
0x381f   :  { %v9897_v15 = vpop.eup %9896 }
0x3886   :  { %v4899_v18 = vpop.permute.xlu1 %4898 }
0x3887   :  { %v4901_v32 = vadd.f32 %v4899_v18, %v4895_v30 }
0x3889   :  { %9898 = vtanh.f32 %v4901_v32 }
0x3893   :  { %v9899_v33 = vpop.eup %9898 }
0x3894   :  { %v11533_v17 = vmul.f32 %v9899_v33, %v9897_v15 }
0x3896   :  { %7753 = vmatmul.mubr.msk.f32.vlgmr.msra.gmra.mrb[44].mxu0 %vm319_vm0, %v11533_v17  ;;  %4904 = vst.msk [vmem:[#allocation3 + $0x28] sm:$0xff] %vm319_vm0, %v11533_v17 }
0x3897   :  { %8951 = vmatpush1.bf16.msra.mxu0 %v11244_v54  ;;  %5083 = vmatprep.mubr.f32.mxu0 %v10048_v7 }
0x3898   :  { %8953 = vmatprep.subr.bf16.mxu0 %v11259_v16 }
0x389b   :  { %8955 = vmatpush1.bf16.msra.mxu0 %v11268_v39 }
0x389c   :  { %8957 = vmatprep.subr.bf16.mxu0 %v11317_v20 }
0x389f   :  { %8959 = vmatpush1.bf16.msra.mxu0 %v11319_v51 }
0x38a0   :  { %8961 = vmatprep.subr.bf16.mxu0 %v11348_v44 }
0x38a3   :  { %8963 = vmatpush1.bf16.msra.mxu0 %v11350_v2 }
0x38a4   :  { %8965 = vmatprep.subr.bf16.mxu0 %v11242_v41 }
0x3969   :  { %v4980_v8 = vpop.f32.mrb[44].mxu0 }
0x396a   :  { %v9298_v53 = vadd.f32 %v4980_v8, %v11435_v35  ;;  %v4982_v61 = vpop.f32.mrb[45].mxu0 }
0x396b   :  { %v9299_v1 = vadd.f32 %v4982_v61, %v11438_v56 }
0x396c   :  { %v7754_v4 = vmul.f32 -1.442695, %v9298_v53 }
0x396d   :  { %v7755_v43 = vmul.f32 -1.442695, %v9299_v1 }
0x396e   :  { %9900 = vpow2.f32 %v7754_v4 }
0x396f   :  { %9902 = vtanh.f32 %v9299_v1 }
0x3978   :  { %v9901_v29 = vpop.eup %9900 }
0x3979   :  { %v4993_v46 = vadd.f32 1.0, %v9901_v29  ;;  %v9903_v28 = vpop.eup %9902 }
0x397b   :  { %9904 = vrcp.f32 %v4993_v46 }
0x397c   :  { %9906 = vpow2.f32 %v7755_v43 }
0x3985   :  { %v9905_v52 = vpop.eup %9904 }
0x3986   :  { %v5001_v22 = vmul.f32 %v9905_v52, %v9903_v28  ;;  %v9907_v19 = vpop.eup %9906  ;;  %v5000_v47 = vmul.f32 %v9905_v52, %v4901_v32 }
0x3987   :  { %v4994_v3 = vadd.f32 1.0, %v9907_v19 }
0x3988   :  { %5003 = vrot.lane.b32.xlu0 %v5001_v22, %s10049_s25 }
0x3989   :  { %9908 = vrcp.f32 %v4994_v3 }
0x3993   :  { %v9909_v55 = vpop.eup %9908 }
0x39fa   :  { %v5004_v24 = vpop.permute.xlu0 %5003 }
0x39fb   :  { %v5006_v59 = vadd.f32 %v5004_v24, %v5000_v47 }
0x39fd   :  { %9910 = vtanh.f32 %v5006_v59 }
0x3a07   :  { %v9911_v31 = vpop.eup %9910 }
0x3a08   :  { %v11551_v9 = vmul.f32 %v9911_v31, %v9909_v55 }
0x3a0a   :  { %7756 = vmatmul.mubr.msk.f32.vlgmr.msra.gmra.mrb[46].mxu0 %vm319_vm0, %v11551_v9  ;;  %5009 = vst.msk [vmem:[#allocation3 + $0x30] sm:$0xff] %vm319_vm0, %v11551_v9 }
0x3a0b   :  { %8967 = vmatpush1.bf16.msra.mxu0 %v11244_v54  ;;  %5188 = vmatprep.mubr.f32.mxu0 %v10048_v7 }
0x3a0c   :  { %8969 = vmatprep.subr.bf16.mxu0 %v11259_v16 }
0x3a0f   :  { %8971 = vmatpush1.bf16.msra.mxu0 %v11268_v39 }
0x3a10   :  { %8973 = vmatprep.subr.bf16.mxu0 %v11317_v20 }
0x3a13   :  { %8975 = vmatpush1.bf16.msra.mxu0 %v11319_v51 }
0x3a14   :  { %8977 = vmatprep.subr.bf16.mxu0 %v11348_v44 }
0x3a17   :  { %8979 = vmatpush1.bf16.msra.mxu0 %v11350_v2 }
0x3a18   :  { %8981 = vmatprep.subr.bf16.mxu0 %v11242_v41 }
0x3add   :  { %v5085_v10 = vpop.f32.mrb[46].mxu0 }
0x3ade   :  { %v9300_v63 = vadd.f32 %v5085_v10, %v11435_v35  ;;  %v5087_v37 = vpop.f32.mrb[47].mxu0 }
0x3adf   :  { %v9301_v38 = vadd.f32 %v5087_v37, %v11438_v56 }
0x3ae0   :  { %v7757_v23 = vmul.f32 -1.442695, %v9300_v63 }
0x3ae1   :  { %v7758_v21 = vmul.f32 -1.442695, %v9301_v38 }
0x3ae2   :  { %9912 = vpow2.f32 %v7757_v23 }
0x3ae3   :  { %9914 = vtanh.f32 %v9301_v38 }
0x3aec   :  { %v9913_v50 = vpop.eup %9912 }
0x3aed   :  { %v5098_v34 = vadd.f32 1.0, %v9913_v50  ;;  %v9915_v57 = vpop.eup %9914 }
0x3aef   :  { %9916 = vrcp.f32 %v5098_v34 }
0x3af0   :  { %9918 = vpow2.f32 %v7758_v21 }
0x3af9   :  { %v9917_v48 = vpop.eup %9916 }
0x3afa   :  { %v5106_v5 = vmul.f32 %v9917_v48, %v9915_v57  ;;  %v9919_v60 = vpop.eup %9918  ;;  %v5105_v0 = vmul.f32 %v9917_v48, %v5006_v59 }
0x3afb   :  { %v5099_v62 = vadd.f32 1.0, %v9919_v60 }
0x3afc   :  { %5108 = vrot.lane.b32.xlu1 %v5106_v5, %s10049_s25 }
0x3afd   :  { %9920 = vrcp.f32 %v5099_v62 }
0x3b07   :  { %v9921_v11 = vpop.eup %9920 }
0x3b6e   :  { %v5109_v6 = vpop.permute.xlu1 %5108 }
0x3b6f   :  { %v5111_v13 = vadd.f32 %v5109_v6, %v5105_v0 }
0x3b71   :  { %9922 = vtanh.f32 %v5111_v13 }
0x3b7b   :  { %v9923_v12 = vpop.eup %9922 }
0x3b7c   :  { %v11569_v14 = vmul.f32 %v9923_v12, %v9921_v11 }
0x3b7e   :  { %7759 = vmatmul.mubr.msk.f32.vlgmr.msra.gmra.mrb[48].mxu0 %vm319_vm0, %v11569_v14  ;;  %5114 = vst.msk [vmem:[#allocation3 + $0x38] sm:$0xff] %vm319_vm0, %v11569_v14 }
0x3b7f   :  { %8983 = vmatpush1.bf16.msra.mxu0 %v11244_v54  ;;  %5293 = vmatprep.mubr.f32.mxu0 %v10048_v7 }
0x3b80   :  { %8985 = vmatprep.subr.bf16.mxu0 %v11259_v16 }
0x3b83   :  { %8987 = vmatpush1.bf16.msra.mxu0 %v11268_v39 }
0x3b84   :  { %8989 = vmatprep.subr.bf16.mxu0 %v11317_v20 }
0x3b87   :  { %8991 = vmatpush1.bf16.msra.mxu0 %v11319_v51 }
0x3b88   :  { %8993 = vmatprep.subr.bf16.mxu0 %v11348_v44 }
0x3b8b   :  { %8995 = vmatpush1.bf16.msra.mxu0 %v11350_v2 }
0x3b8c   :  { %8997 = vmatprep.subr.bf16.mxu0 %v11242_v41 }
0x3c51   :  { %v5190_v36 = vpop.f32.mrb[48].mxu0 }
0x3c52   :  { %v9302_v27 = vadd.f32 %v5190_v36, %v11435_v35  ;;  %v5192_v25 = vpop.f32.mrb[49].mxu0 }
0x3c53   :  { %v9303_v30 = vadd.f32 %v5192_v25, %v11438_v56 }
0x3c54   :  { %v7760_v26 = vmul.f32 -1.442695, %v9302_v27 }
0x3c55   :  { %v7761_v53 = vmul.f32 -1.442695, %v9303_v30 }
0x3c56   :  { %9924 = vpow2.f32 %v7760_v26 }
0x3c57   :  { %9926 = vtanh.f32 %v9303_v30 }
0x3c60   :  { %v9925_v18 = vpop.eup %9924 }
0x3c61   :  { %v5203_v32 = vadd.f32 1.0, %v9925_v18  ;;  %v9927_v15 = vpop.eup %9926 }
0x3c63   :  { %9928 = vrcp.f32 %v5203_v32 }
0x3c64   :  { %9930 = vpow2.f32 %v7761_v53 }
0x3c6d   :  { %v9929_v33 = vpop.eup %9928 }
0x3c6e   :  { %v5211_v8 = vmul.f32 %v9929_v33, %v9927_v15  ;;  %v9931_v61 = vpop.eup %9930  ;;  %v5210_v1 = vmul.f32 %v9929_v33, %v5111_v13 }
0x3c6f   :  { %v5204_v4 = vadd.f32 1.0, %v9931_v61 }
0x3c70   :  { %5213 = vrot.lane.b32.xlu0 %v5211_v8, %s10049_s25 }
0x3c71   :  { %9932 = vrcp.f32 %v5204_v4 }
0x3c7b   :  { %v9933_v28 = vpop.eup %9932 }
0x3ce2   :  { %v5214_v29 = vpop.permute.xlu0 %5213 }
0x3ce3   :  { %v5216_v46 = vadd.f32 %v5214_v29, %v5210_v1 }
0x3ce5   :  { %9934 = vtanh.f32 %v5216_v46 }
0x3cef   :  { %v9935_v52 = vpop.eup %9934 }
0x3cf0   :  { %v11587_v22 = vmul.f32 %v9935_v52, %v9933_v28 }
0x3cf2   :  { %7762 = vmatmul.mubr.msk.f32.vlgmr.msra.gmra.mrb[50].mxu0 %vm319_vm0, %v11587_v22 }
0x3cf3   :  { %8999 = vmatpush1.bf16.msra.mxu0 %v11244_v54  ;;  %5398 = vmatprep.mubr.f32.mxu0 %v10048_v7 }
0x3cf4   :  { %9001 = vmatprep.subr.bf16.mxu0 %v11259_v16 }
0x3cf7   :  { %9003 = vmatpush1.bf16.msra.mxu0 %v11268_v39 }
0x3cf8   :  { %9005 = vmatprep.subr.bf16.mxu0 %v11317_v20 }
0x3cfb   :  { %9007 = vmatpush1.bf16.msra.mxu0 %v11319_v51 }
0x3cfc   :  { %9009 = vmatprep.subr.bf16.mxu0 %v11348_v44 }
0x3cff   :  { %9011 = vmatpush1.bf16.msra.mxu0 %v11350_v2 }
0x3d00   :  { %9013 = vmatprep.subr.bf16.mxu0 %v11242_v41 }
0x3dc5   :  { %v5295_v43 = vpop.f32.mrb[50].mxu0 }
0x3dc6   :  { %v9304_v19 = vadd.f32 %v5295_v43, %v11435_v35  ;;  %v5297_v3 = vpop.f32.mrb[51].mxu0 }
0x3dc7   :  { %v9305_v24 = vadd.f32 %v5297_v3, %v11438_v56 }
0x3dc8   :  { %v7763_v47 = vmul.f32 -1.442695, %v9304_v19 }
0x3dc9   :  { %v7764_v37 = vmul.f32 -1.442695, %v9305_v24 }
0x3dca   :  { %9936 = vpow2.f32 %v7763_v47 }
0x3dcb   :  { %9938 = vtanh.f32 %v9305_v24 }
0x3dd4   :  { %v9937_v59 = vpop.eup %9936 }
0x3dd5   :  { %v5308_v55 = vadd.f32 1.0, %v9937_v59  ;;  %v9939_v31 = vpop.eup %9938 }
0x3dd7   :  { %9940 = vrcp.f32 %v5308_v55 }
0x3dd8   :  { %9942 = vpow2.f32 %v7764_v37 }
0x3de1   :  { %v9941_v10 = vpop.eup %9940 }
0x3de2   :  { %v5316_v63 = vmul.f32 %v9941_v10, %v9939_v31  ;;  %v9943_v23 = vpop.eup %9942  ;;  %v5315_v50 = vmul.f32 %v9941_v10, %v5216_v46 }
0x3de3   :  { %v5309_v38 = vadd.f32 1.0, %v9943_v23 }
0x3de4   :  { %5318 = vrot.lane.b32.xlu1 %v5316_v63, %s10049_s25 }
0x3de5   :  { %9944 = vrcp.f32 %v5309_v38 }
0x3def   :  { %v9945_v48 = vpop.eup %9944 }
0x3e56   :  { %v5319_v34 = vpop.permute.xlu1 %5318 }
0x3e57   :  { %v5321_v57 = vadd.f32 %v5319_v34, %v5315_v50 }
0x3e59   :  { %9946 = vtanh.f32 %v5321_v57 }
0x3e63   :  { %v9947_v5 = vpop.eup %9946 }
0x3e64   :  { %v11603_v21 = vmul.f32 %v9947_v5, %v9945_v48 }
0x3e66   :  { %7765 = vmatmul.mubr.msk.f32.vlgmr.msra.gmra.mrb[52].mxu0 %vm319_vm0, %v11603_v21 }
0x3e67   :  { %9015 = vmatpush1.bf16.msra.mxu0 %v11244_v54  ;;  %5503 = vmatprep.mubr.f32.mxu0 %v10048_v7 }
0x3e68   :  { %9017 = vmatprep.subr.bf16.mxu0 %v11259_v16 }
0x3e6b   :  { %9019 = vmatpush1.bf16.msra.mxu0 %v11268_v39 }
0x3e6c   :  { %9021 = vmatprep.subr.bf16.mxu0 %v11317_v20 }
0x3e6f   :  { %9023 = vmatpush1.bf16.msra.mxu0 %v11319_v51 }
0x3e70   :  { %9025 = vmatprep.subr.bf16.mxu0 %v11348_v44 }
0x3e73   :  { %9027 = vmatpush1.bf16.msra.mxu0 %v11350_v2 }
0x3e74   :  { %9029 = vmatprep.subr.bf16.mxu0 %v11242_v41 }
0x3f39   :  { %v5400_v60 = vpop.f32.mrb[52].mxu0 }
0x3f3a   :  { %v9306_v62 = vadd.f32 %v5400_v60, %v11435_v35  ;;  %v5402_v0 = vpop.f32.mrb[53].mxu0 }
0x3f3b   :  { %v9307_v13 = vadd.f32 %v5402_v0, %v11438_v56 }
0x3f3c   :  { %v7766_v6 = vmul.f32 -1.442695, %v9306_v62 }
0x3f3d   :  { %v7767_v26 = vmul.f32 -1.442695, %v9307_v13 }
0x3f3e   :  { %9948 = vpow2.f32 %v7766_v6 }
0x3f3f   :  { %9950 = vtanh.f32 %v9307_v13 }
0x3f48   :  { %v9949_v11 = vpop.eup %9948 }
0x3f49   :  { %v5413_v12 = vadd.f32 1.0, %v9949_v11  ;;  %v9951_v36 = vpop.eup %9950  ;;  %v5982_v11 = vld [vmem:[%s12249_s5] sm:$0xff] }
0x3f4b   :  { %9952 = vrcp.f32 %v5413_v12  ;;  %v5983_v12 = vld [vmem:[%s12249_s5 + $0x8] sm:$0xff] }
0x3f4c   :  { %9954 = vpow2.f32 %v7767_v26  ;;  %v5985_v26 = vld [vmem:[%s12249_s5 + $0x18] sm:$0xff] }
0x3f55   :  { %v9953_v27 = vpop.eup %9952 }
0x3f56   :  { %v5421_v25 = vmul.f32 %v9953_v27, %v9951_v36  ;;  %v9955_v30 = vpop.eup %9954  ;;  %v5420_v32 = vmul.f32 %v9953_v27, %v5321_v57  ;;  %v5984_v36 = vld [vmem:[%s12249_s5 + $0x10] sm:$0xff]  ;;  %v10050_v27 = vmov 0.0|0.0  }
0x3f57   :  { %v5414_v18 = vadd.f32 1.0, %v9955_v30  ;;  %9092 = vmatprep.subr.bf16.mxu1 %v10050_v27  ;;  %v9096_v30 = vpack.c.bf16 %v5985_v26, %v5984_v36  ;;  %v7803_v36 = vld [vmem:[%s12249_s5 + $0xa8] sm:$0xff]  ;;  %v7804_v26 = vld [vmem:[%s12249_s5 + $0xb0] sm:$0xff] }
0x3f58   :  { %5423 = vrot.lane.b32.xlu0 %v5421_v25, %s10049_s25  ;;  %v9093_v25 = vpack.c.bf16 %v5983_v12, %v5982_v11  ;;  %v7802_v12 = vld [vmem:[%s12249_s5 + $0xa0] sm:$0xff] }
0x3f59   :  { %9956 = vrcp.f32 %v5414_v18  ;;  %v5986_v18 = vld [vmem:[%s12249_s5 + $0x20] sm:$0xff] }
0x3f5a   :  { %9094 = vmatpush3.bf16.msra.mxu1 %v9093_v25  ;;  %v9123_v25 = vpack.c.bf16 %v7803_v36, %v7802_v12  ;;  %v7822_v36 = vld [vmem:[%s12249_s5 + $0x110] sm:$0xff] }
0x3f5b   :  { %9095 = vmatprep.subr.bf16.mxu1 %v10050_v27 }
0x3f5e   :  { %9097 = vmatpush3.bf16.msra.mxu1 %v9096_v30  ;;  %v7805_v30 = vld [vmem:[%s12249_s5 + $0xb8] sm:$0xff] }
0x3f5f   :  { %9098 = vmatprep.subr.bf16.mxu1 %v10050_v27 }
0x3f63   :  { %v9957_v8 = vpop.eup %9956 }
0x3fca   :  { %v5424_v15 = vpop.permute.xlu0 %5423 }
0x3fcb   :  { %v5426_v33 = vadd.f32 %v5424_v15, %v5420_v32  ;;  %v5987_v32 = vld [vmem:[%s12249_s5 + $0x28] sm:$0xff] }
0x3fcc   :  { %v9099_v15 = vpack.c.bf16 %v5987_v32, %v5986_v18  ;;  %v9126_v18 = vpack.c.bf16 %v7805_v30, %v7804_v26 }
0x3fcd   :  { %9958 = vtanh.f32 %v5426_v33 }
0x3fce   :  { %9100 = vmatpush3.bf16.msra.mxu1 %v9099_v15 }
0x3fcf   :  { %9101 = vmatprep.subr.bf16.mxu1 %v10050_v27 }
0x3fd7   :  { %v9959_v53 = vpop.eup %9958 }
0x3fd8   :  { %v11619_v61 = vmul.f32 %v9959_v53, %v9957_v8  ;;  %v5989_v8 = vld [vmem:[%s12249_s5 + $0x38] sm:$0xff] }
0x3fda   :  { %7768 = vmatmul.mubr.msk.f32.vlgmr.msra.gmra.mrb[54].mxu0 %vm319_vm0, %v11619_v61 }
0x3fdb   :  { %9031 = vmatpush1.bf16.msra.mxu0 %v11244_v54  ;;  %5608 = vmatprep.mubr.f32.mxu0 %v10048_v7 }
0x3fdc   :  { %9033 = vmatprep.subr.bf16.mxu0 %v11259_v16 }
0x3fdf   :  { %9035 = vmatpush1.bf16.msra.mxu0 %v11268_v39 }
0x3fe0   :  { %9037 = vmatprep.subr.bf16.mxu0 %v11317_v20 }
0x3fe3   :  { %9039 = vmatpush1.bf16.msra.mxu0 %v11319_v51 }
0x3fe4   :  { %9041 = vmatprep.subr.bf16.mxu0 %v11348_v44 }
0x3fe7   :  { %9043 = vmatpush1.bf16.msra.mxu0 %v11350_v2 }
0x3fe8   :  { %9045 = vmatprep.subr.bf16.mxu0 %v11242_v41 }
0x40ad   :  { %v5505_v4 = vpop.f32.mrb[54].mxu0 }
0x40ae   :  { %v9308_v1 = vadd.f32 %v5505_v4, %v11435_v35  ;;  %v5507_v29 = vpop.f32.mrb[55].mxu0  ;;  %v7787_v4 = vld [vmem:[%s12249_s5 + $0x40] sm:$0xff] }
0x40af   :  { %v9309_v28 = vadd.f32 %v5507_v29, %v11438_v56  ;;  %v11699_v29 = vld [vmem:[%s12245_s1] sm:$0xff] }
0x40b0   :  { %v7769_v46 = vmul.f32 -1.442695, %v9308_v1  ;;  %v7788_v1 = vld [vmem:[%s12249_s5 + $0x48] sm:$0xff] }
0x40b1   :  { %v7770_v24 = vmul.f32 -1.442695, %v9309_v28 }
0x40b2   :  { %9960 = vpow2.f32 %v7769_v46  ;;  %v9105_v46 = vpack.c.bf16 %v7788_v1, %v7787_v4 }
0x40b3   :  { %9962 = vtanh.f32 %v9309_v28  ;;  %v7789_v28 = vld [vmem:[%s12249_s5 + $0x50] sm:$0xff] }
0x40bc   :  { %v9961_v52 = vpop.eup %9960 }
0x40bd   :  { %v5518_v43 = vadd.f32 1.0, %v9961_v52  ;;  %v9963_v19 = vpop.eup %9962  ;;  %v7790_v52 = vld [vmem:[%s12249_s5 + $0x58] sm:$0xff] }
0x40bf   :  { %9964 = vrcp.f32 %v5518_v43  ;;  %v9108_v43 = vpack.c.bf16 %v7790_v52, %v7789_v28  ;;  %v7810_v52 = vld [vmem:[%s12249_s5 + $0xc8] sm:$0xff] }
0x40c0   :  { %9966 = vpow2.f32 %v7770_v24 }
0x40c9   :  { %v9965_v3 = vpop.eup %9964 }
0x40ca   :  { %v5526_v47 = vmul.f32 %v9965_v3, %v9963_v19  ;;  %v9967_v59 = vpop.eup %9966  ;;  %v5525_v31 = vmul.f32 %v9965_v3, %v5426_v33  ;;  %v5988_v33 = vld [vmem:[%s12249_s5 + $0x30] sm:$0xff]  ;;  %v11715_v19 = vld [vmem:[%s12245_s1 + $0x8] sm:$0xff]  ;;  %v7791_v3 = vld [vmem:[%s12249_s5 + $0x60] sm:$0xff] }
0x40cb   :  { %v5519_v55 = vadd.f32 1.0, %v9967_v59  ;;  %v9102_v53 = vpack.c.bf16 %v5989_v8, %v5988_v33  ;;  %v11731_v59 = vld [vmem:[%s12245_s1 + $0x10] sm:$0xff] }
0x40cc   :  { %5528 = vrot.lane.b32.xlu1 %v5526_v47, %s10049_s25  ;;  %v7792_v47 = vld [vmem:[%s12249_s5 + $0x68] sm:$0xff]  ;;  %v11880_v26 = vrot.slane %v11731_v59, 6 }
0x40cd   :  { %9968 = vrcp.f32 %v5519_v55  ;;  %9103 = vmatpush3.bf16.msra.mxu1 %v9102_v53  ;;  %v9111_v24 = vpack.c.bf16 %v7792_v47, %v7791_v3  ;;  %v7793_v55 = vld [vmem:[%s12249_s5 + $0x70] sm:$0xff]  ;;  %v7812_v47 = vld [vmem:[%s12249_s5 + $0xd8] sm:$0xff] }
0x40ce   :  { %9104 = vmatprep.subr.bf16.mxu1 %v10050_v27 }
0x40d0   :  { %8005 = vmatmul.mubr.msk.f32.vlgmr.msra.gmra.mrb[66].mxu1 %vm319_vm0, %v11699_v29 }
0x40d1   :  { %9106 = vmatpush3.bf16.msra.mxu1 %v9105_v46  ;;  %8007 = vmatprep.mubr.msk.f32.mxu1 %vm10051_vm2, %v10048_v7 }
0x40d2   :  { %9107 = vmatprep.subr.bf16.mxu1 %v10050_v27 }
0x40d4   :  { %8008 = vmatmul.mubr.msk.f32.gmra.mrb[68].mxu1 %vm319_vm0, %v11715_v19 }
0x40d5   :  { %9109 = vmatpush3.bf16.msra.mxu1 %v9108_v43  ;;  %8010 = vmatprep.mubr.msk.f32.mxu1 %vm10051_vm2, %v10048_v7 }
0x40d6   :  { %9110 = vmatprep.subr.bf16.mxu1 %v10050_v27 }
0x40d7   :  { %v9969_v37 = vpop.eup %9968 }
0x40d8   :  { %8011 = vmatmul.mubr.msk.f32.gmra.mrb[70].mxu1 %vm319_vm0, %v11731_v59 }
0x40d9   :  { %9112 = vmatpush3.bf16.msra.mxu1 %v9111_v24  ;;  %8029 = vmatprep.mubr.msk.f32.mxu1 %vm10051_vm2, %v10048_v7 }
0x40da   :  { %9113 = vmatprep.subr.bf16.mxu1 %v10050_v27 }
0x413e   :  { %v5529_v10 = vpop.permute.xlu1 %5528 }
0x413f   :  { %v11635_v63 = vadd.f32 %v5529_v10, %v5525_v31  ;;  %v7794_v31 = vld [vmem:[%s12249_s5 + $0x78] sm:$0xff]  ;;  %v6092_v10 = vrot.slane %v11699_v29, 2 }
0x4141   :  { %9970 = vtanh.f32 %v11635_v63 }
0x414b   :  { %v9971_v23 = vpop.eup %9970 }
0x414c   :  { %v11638_v38 = vmul.f32 %v9971_v23, %v9969_v37  ;;  %v6093_v37 = vrot.slane %v11715_v19, 2  ;;  %v9114_v23 = vpack.c.bf16 %v7794_v31, %v7793_v55  ;;  %v11834_v55 = vrot.slane %v11731_v59, 4  ;;  %v7813_v31 = vld [vmem:[%s12249_s5 + $0xe0] sm:$0xff] }
0x414e   :  { %7771 = vmatmul.mubr.msk.f32.vlgmr.msra.gmra.mrb[56].mxu0 %vm319_vm0, %v11638_v38  ;;  %9115 = vmatpush3.bf16.msra.mxu1 %v9114_v23 }
0x414f   :  { %9047 = vmatpush1.bf16.msra.mxu0 %v11244_v54  ;;  %5713 = vmatprep.mubr.f32.mxu0 %v10048_v7 }
0x4150   :  { %9049 = vmatprep.subr.bf16.mxu0 %v11259_v16  ;;  %9116 = vmatprep.subr.bf16.mxu1 %v10050_v27 }
0x4153   :  { %9051 = vmatpush1.bf16.msra.mxu0 %v11268_v39 }
0x4154   :  { %9053 = vmatprep.subr.bf16.mxu0 %v11317_v20 }
0x4157   :  { %9055 = vmatpush1.bf16.msra.mxu0 %v11319_v51 }
0x4158   :  { %9057 = vmatprep.subr.bf16.mxu0 %v11348_v44 }
0x415b   :  { %9059 = vmatpush1.bf16.msra.mxu0 %v11350_v2 }
0x415c   :  { %9061 = vmatprep.subr.bf16.mxu0 %v11242_v41 }
0x4221   :  { %v5610_v50 = vpop.f32.mrb[56].mxu0 }
0x4222   :  { %v9310_v34 = vadd.f32 %v5610_v50, %v11435_v35  ;;  %v5612_v57 = vpop.f32.mrb[57].mxu0  ;;  %v7798_v50 = vld [vmem:[%s12249_s5 + $0x80] sm:$0xff] }
0x4223   :  { %v11653_v5 = vadd.f32 %v5612_v57, %v11438_v56  ;;  %v6094_v57 = vsel %vm6091_vm3, %v6092_v10, %v6093_v37  ;;  %v7814_v10 = vld [vmem:[%s12249_s5 + $0xe8] sm:$0xff] }
0x4224   :  { %v7772_v48 = vmul.f32 -1.442695, %v9310_v34  ;;  %v7799_v34 = vld [vmem:[%s12249_s5 + $0x88] sm:$0xff]  ;;  %8030 = vmatmul.mubr.msk.f32.vlgmr.msra.gmra.mrb[66].mxu1 %vm319_vm0, %v6094_v57 }
0x4225   :  { %8032 = vmatprep.mubr.msk.f32.mxu1 %vm10051_vm2, %v10048_v7  ;;  %v7773_v32 = vmul.f32 -1.442695, %v11653_v5 }
0x4226   :  { %9972 = vpow2.f32 %v7772_v48  ;;  %v9117_v48 = vpack.c.bf16 %v7799_v34, %v7798_v50  ;;  %v7815_v50 = vld [vmem:[%s12249_s5 + $0xf0] sm:$0xff]  ;;  %v7816_v34 = vld [vmem:[%s12249_s5 + $0xf8] sm:$0xff] }
0x4227   :  { %9974 = vtanh.f32 %v11653_v5  ;;  %v6197_v5 = vrot.slane %v11715_v19, 4  ;;  %v9138_v57 = vpack.c.bf16 %v7816_v34, %v7815_v50 }
0x4228   :  { %9118 = vmatpush3.bf16.msra.mxu1 %v9117_v48  ;;  %v6300_v48 = vrot.slane %v11699_v29, 6 }
0x4229   :  { %9119 = vmatprep.subr.bf16.mxu1 %v10050_v27  ;;  %v11845_v23 = vsel %vm6195_vm4, %v6197_v5, %v11834_v55 }
0x4230   :  { %v9973_v60 = vpop.eup %9972 }
0x4231   :  { %v5623_v62 = vadd.f32 1.0, %v9973_v60  ;;  %v9975_v0 = vpop.eup %9974  ;;  %v11755_v60 = vrot.slane %v11731_v59, 2 }
0x4233   :  { %9976 = vrcp.f32 %v5623_v62  ;;  %v7800_v62 = vld [vmem:[%s12249_s5 + $0x90] sm:$0xff]  ;;  %v11769_v11 = vsel %vm6091_vm3, %v6093_v37, %v11755_v60  ;;  %v9135_v37 = vpack.c.bf16 %v7814_v10, %v7813_v31  ;;  %v7842_v10 = vld [vmem:[%s12249_s5 + $0x180] sm:$0xff] }
0x4234   :  { %8033 = vmatmul.mubr.msk.f32.gmra.mrb[68].mxu1 %vm319_vm0, %v11769_v11  ;;  %9978 = vpow2.f32 %v7773_v32  ;;  %v7824_v32 = vld [vmem:[%s12249_s5 + $0x120] sm:$0xff] }
0x4235   :  { %8035 = vmatprep.mubr.msk.f32.mxu1 %vm10051_vm2, %v10048_v7 }
0x4238   :  { %8036 = vmatmul.mubr.msk.f32.gmra.mrb[70].mxu1 %vm319_vm0, %v11755_v60 }
0x4239   :  { %8054 = vmatprep.mubr.msk.f32.mxu1 %vm10051_vm2, %v10048_v7 }
0x423d   :  { %v11656_v6 = vpop.eup %9976 }
0x423e   :  { %v5631_v13 = vmul.f32 %v11656_v6, %v9975_v0  ;;  %v7801_v0 = vld [vmem:[%s12249_s5 + $0x98] sm:$0xff]  ;;  %v9979_v15 = vpop.eup %9978  ;;  %v5630_v8 = vmul.f32 %v11656_v6, %v11635_v63  ;;  %v6196_v63 = vrot.slane %v11699_v29, 4  ;;  %v7809_v6 = vld [vmem:[%s12249_s5 + $0xc0] sm:$0xff] }
0x423f   :  { %v5624_v33 = vadd.f32 1.0, %v9979_v15  ;;  %v9129_v43 = vpack.c.bf16 %v7810_v52, %v7809_v6  ;;  %v7825_v15 = vld [vmem:[%s12249_s5 + $0x128] sm:$0xff]  ;;  %v7833_v6 = vld [vmem:[%s12249_s5 + $0x150] sm:$0xff]  ;;  %v7834_v52 = vld [vmem:[%s12249_s5 + $0x158] sm:$0xff] }
0x4240   :  { %5633 = vrot.lane.b32.xlu0 %v5631_v13, %s10049_s25  ;;  %v9120_v13 = vpack.c.bf16 %v7801_v0, %v7800_v62  ;;  %v6198_v3 = vsel %vm6195_vm4, %v6196_v63, %v6197_v5  ;;  %v6301_v62 = vrot.slane %v11715_v19, 6  ;;  %v7820_v0 = vld [vmem:[%s12249_s5 + $0x100] sm:$0xff]  ;;  %v7832_v63 = vld [vmem:[%s12249_s5 + $0x148] sm:$0xff] }
0x4241   :  { %9980 = vrcp.f32 %v5624_v33  ;;  %v9147_v33 = vpack.c.bf16 %v7825_v15, %v7824_v32 }
0x4242   :  { %9121 = vmatpush3.bf16.msra.mxu1 %v9120_v13  ;;  %v7821_v13 = vld [vmem:[%s12249_s5 + $0x108] sm:$0xff]  ;;  %v6302_v12 = vsel %vm6299_vm5, %v6300_v48, %v6301_v62  ;;  %v7845_v48 = vld [vmem:[%s12249_s5 + $0x198] sm:$0xff] }
0x4243   :  { %9122 = vmatprep.subr.bf16.mxu1 %v10050_v27  ;;  %v9141_v29 = vpack.c.bf16 %v7821_v13, %v7820_v0  ;;  %v7846_v13 = vld [vmem:[%s12249_s5 + $0x1a0] sm:$0xff] }
0x4246   :  { %9124 = vmatpush3.bf16.msra.mxu1 %v9123_v25  ;;  %v7823_v25 = vld [vmem:[%s12249_s5 + $0x118] sm:$0xff] }
0x4247   :  { %9125 = vmatprep.subr.bf16.mxu1 %v10050_v27  ;;  %v9144_v30 = vpack.c.bf16 %v7823_v25, %v7822_v36  ;;  %v7853_v25 = vld [vmem:[%s12249_s5 + $0x1c0] sm:$0xff] }
0x424a   :  { %9127 = vmatpush3.bf16.msra.mxu1 %v9126_v18  ;;  %v11887_v18 = vsel %vm6299_vm5, %v6301_v62, %v11880_v26 }
0x424b   :  { %9128 = vmatprep.subr.bf16.mxu1 %v10050_v27  ;;  %v9981_v1 = vpop.eup %9980 }
0x424d   :  { %8055 = vmatmul.mubr.msk.f32.vlgmr.msra.gmra.mrb[66].mxu1 %vm319_vm0, %v6198_v3  ;;  %v7835_v3 = vld [vmem:[%s12249_s5 + $0x160] sm:$0xff] }
0x424e   :  { %9130 = vmatpush3.bf16.msra.mxu1 %v9129_v43  ;;  %8057 = vmatprep.mubr.msk.f32.mxu1 %vm10051_vm2, %v10048_v7  ;;  %v9156_v43 = vpack.c.bf16 %v7834_v52, %v7833_v6 }
0x424f   :  { %9131 = vmatprep.subr.bf16.mxu1 %v10050_v27 }
0x4251   :  { %8058 = vmatmul.mubr.msk.f32.gmra.mrb[68].mxu1 %vm319_vm0, %v11845_v23 }
0x4252   :  { %8060 = vmatprep.mubr.msk.f32.mxu1 %vm10051_vm2, %v10048_v7 }
0x4255   :  { %8061 = vmatmul.mubr.msk.f32.gmra.mrb[70].mxu1 %vm319_vm0, %v11834_v55 }
0x4256   :  { %8079 = vmatprep.mubr.msk.f32.mxu1 %vm10051_vm2, %v10048_v7 }
0x42b2   :  { %v5634_v53 = vpop.permute.xlu0 %5633 }
0x42b3   :  { %v11798_v4 = vadd.f32 %v5634_v53, %v5630_v8  ;;  %v7826_v8 = vld [vmem:[%s12249_s5 + $0x130] sm:$0xff]  ;;  %v7827_v53 = vld [vmem:[%s12249_s5 + $0x138] sm:$0xff] }
0x42b5   :  { %9982 = vtanh.f32 %v11798_v4 }
0x42bf   :  { %v9983_v46 = vpop.eup %9982 }
0x42c0   :  { %v11801_v28 = vmul.f32 %v9983_v46, %v9981_v1  ;;  %v9150_v1 = vpack.c.bf16 %v7827_v53, %v7826_v8  ;;  %v7831_v46 = vld [vmem:[%s12249_s5 + $0x140] sm:$0xff]  ;;  %v7856_v8 = vld [vmem:[%s12249_s5 + $0x1d8] sm:$0xff] }
0x42c1   :  { %v9153_v5 = vpack.c.bf16 %v7832_v63, %v7831_v46  ;;  %v7857_v46 = vld [vmem:[%s12249_s5 + $0x1e0] sm:$0xff]  ;;  %v7858_v63 = vld [vmem:[%s12249_s5 + $0x1e8] sm:$0xff] }
0x42c2   :  { %7774 = vmatmul.mubr.msk.f32.vlgmr.msra.gmra.mrb[58].mxu0 %vm319_vm0, %v11801_v28 }
0x42c3   :  { %9063 = vmatpush1.bf16.msra.mxu0 %v11244_v54  ;;  %5818 = vmatprep.mubr.f32.mxu0 %v10048_v7 }
0x42c4   :  { %9065 = vmatprep.subr.bf16.mxu0 %v11259_v16 }
0x42c7   :  { %9067 = vmatpush1.bf16.msra.mxu0 %v11268_v39 }
0x42c8   :  { %9069 = vmatprep.subr.bf16.mxu0 %v11317_v20 }
0x42cb   :  { %9071 = vmatpush1.bf16.msra.mxu0 %v11319_v51 }
0x42cc   :  { %9073 = vmatprep.subr.bf16.mxu0 %v11348_v44 }
0x42cf   :  { %9075 = vmatpush1.bf16.msra.mxu0 %v11350_v2 }
0x42d0   :  { %9077 = vmatprep.subr.bf16.mxu0 %v11242_v41  ;;  %v7811_v41 = vld [vmem:[%s12249_s5 + $0xd0] sm:$0xff] }
0x42d1   :  { %v9132_v24 = vpack.c.bf16 %v7812_v47, %v7811_v41  ;;  %v7836_v41 = vld [vmem:[%s12249_s5 + $0x168] sm:$0xff]  ;;  %v11942_v47 = vld [vmem:[%s12245_s1 + $0x18] sm:$0xff] }
0x42d2   :  { %v6498_v50 = vrot.slane %v11942_v47, 2  ;;  %v6596_v32 = vrot.slane %v11942_v47, 4  ;;  %v6694_v52 = vrot.slane %v11942_v47, 6 }
0x42d3   :  { %9133 = vmatpush3.bf16.msra.mxu1 %v9132_v24  ;;  %v7837_v24 = vld [vmem:[%s12249_s5 + $0x170] sm:$0xff] }
0x42d4   :  { %9134 = vmatprep.subr.bf16.mxu1 %v10050_v27  ;;  %v6499_v0 = vsel %vm6091_vm3, %v11755_v60, %v6498_v50  ;;  %v7848_v60 = vld [vmem:[%s12249_s5 + $0x1b0] sm:$0xff] }
0x42d7   :  { %9136 = vmatpush3.bf16.msra.mxu1 %v9135_v37  ;;  %v7843_v37 = vld [vmem:[%s12249_s5 + $0x188] sm:$0xff] }
0x42d8   :  { %9137 = vmatprep.subr.bf16.mxu1 %v10050_v27  ;;  %v9165_v34 = vpack.c.bf16 %v7843_v37, %v7842_v10  ;;  %v7868_v10 = vld [vmem:[%s12253_s9 + $0x8] sm:$0xff] }
0x42db   :  { %9139 = vmatpush3.bf16.msra.mxu1 %v9138_v57  ;;  %v7844_v57 = vld [vmem:[%s12249_s5 + $0x190] sm:$0xff] }
0x42dc   :  { %9140 = vmatprep.subr.bf16.mxu1 %v10050_v27  ;;  %v9168_v62 = vpack.c.bf16 %v7845_v48, %v7844_v57 }
0x42de   :  { %8080 = vmatmul.mubr.msk.f32.vlgmr.msra.gmra.mrb[66].mxu1 %vm319_vm0, %v6302_v12  ;;  %v7849_v12 = vld [vmem:[%s12249_s5 + $0x1b8] sm:$0xff] }
0x42df   :  { %9142 = vmatpush3.bf16.msra.mxu1 %v9141_v29  ;;  %8082 = vmatprep.mubr.msk.f32.mxu1 %vm10051_vm2, %v10048_v7  ;;  %v7847_v29 = vld [vmem:[%s12249_s5 + $0x1a8] sm:$0xff]  ;;  %v9174_v36 = vpack.c.bf16 %v7849_v12, %v7848_v60 }
0x42e0   :  { %9143 = vmatprep.subr.bf16.mxu1 %v10050_v27 }
0x42e2   :  { %8083 = vmatmul.mubr.msk.f32.gmra.mrb[68].mxu1 %vm319_vm0, %v11887_v18 }
0x42e3   :  { %9145 = vmatpush3.bf16.msra.mxu1 %v9144_v30  ;;  %8085 = vmatprep.mubr.msk.f32.mxu1 %vm10051_vm2, %v10048_v7  ;;  %v7854_v30 = vld [vmem:[%s12249_s5 + $0x1c8] sm:$0xff] }
0x42e4   :  { %9146 = vmatprep.subr.bf16.mxu1 %v10050_v27  ;;  %v9177_v15 = vpack.c.bf16 %v7854_v30, %v7853_v25 }
0x42e6   :  { %8086 = vmatmul.mubr.msk.f32.gmra.mrb[70].mxu1 %vm319_vm0, %v11880_v26 }
0x42e7   :  { %9148 = vmatpush3.bf16.msra.mxu1 %v9147_v33  ;;  %8104 = vmatprep.mubr.msk.f32.mxu1 %vm10051_vm2, %v10048_v7  ;;  %v7855_v33 = vld [vmem:[%s12249_s5 + $0x1d0] sm:$0xff] }
0x42e8   :  { %9149 = vmatprep.subr.bf16.mxu1 %v10050_v27  ;;  %v9180_v53 = vpack.c.bf16 %v7856_v8, %v7855_v33 }
0x42eb   :  { %9151 = vmatpush3.bf16.msra.mxu1 %v9150_v1  ;;  %v6597_v1 = vsel %vm6195_vm4, %v11834_v55, %v6596_v32  ;;  %v7859_v55 = vld [vmem:[%s12249_s5 + $0x1f0] sm:$0xff] }
0x42ec   :  { %9152 = vmatprep.subr.bf16.mxu1 %v10050_v27 }
0x42ee   :  { %8105 = vmatmul.mubr.msk.f32.vlgmr.msra.gmra.mrb[66].mxu1 %vm319_vm0, %v11715_v19  ;;  %v9159_v19 = vpack.c.bf16 %v7836_v41, %v7835_v3 }
0x42ef   :  { %9154 = vmatpush3.bf16.msra.mxu1 %v9153_v5  ;;  %8107 = vmatprep.mubr.msk.f32.mxu1 %vm10051_vm2, %v10048_v7  ;;  %v7860_v5 = vld [vmem:[%s12249_s5 + $0x1f8] sm:$0xff] }
0x42f0   :  { %9155 = vmatprep.subr.bf16.mxu1 %v10050_v27  ;;  %v9186_v6 = vpack.c.bf16 %v7860_v5, %v7859_v55 }
0x42f2   :  { %8108 = vmatmul.mubr.msk.f32.gmra.mrb[68].mxu1 %vm319_vm0, %v11731_v59  ;;  %v7838_v59 = vld [vmem:[%s12249_s5 + $0x178] sm:$0xff] }
0x42f3   :  { %9157 = vmatpush3.bf16.msra.mxu1 %v9156_v43  ;;  %8110 = vmatprep.mubr.msk.f32.mxu1 %vm10051_vm2, %v10048_v7  ;;  %v9162_v31 = vpack.c.bf16 %v7838_v59, %v7837_v24  ;;  %v6695_v43 = vsel %vm6299_vm5, %v11880_v26, %v6694_v52 }
0x42f4   :  { %9158 = vmatprep.subr.bf16.mxu1 %v10050_v27 }
0x42f6   :  { %8111 = vmatmul.mubr.msk.f32.gmra.mrb[70].mxu1 %vm319_vm0, %v11942_v47 }
0x42f7   :  { %9160 = vmatpush3.bf16.msra.mxu1 %v9159_v19  ;;  %8129 = vmatprep.mubr.msk.f32.mxu1 %vm10051_vm2, %v10048_v7 }
0x42f8   :  { %9161 = vmatprep.subr.bf16.mxu1 %v10050_v27 }
0x42fb   :  { %9163 = vmatpush3.bf16.msra.mxu1 %v9162_v31 }
0x42fc   :  { %9164 = vmatprep.subr.bf16.mxu1 %v10050_v27 }
0x42fe   :  { %8130 = vmatmul.mubr.msk.f32.vlgmr.msra.gmra.mrb[66].mxu1 %vm319_vm0, %v11769_v11  ;;  %v9171_v11 = vpack.c.bf16 %v7847_v29, %v7846_v13 }
0x42ff   :  { %9166 = vmatpush3.bf16.msra.mxu1 %v9165_v34  ;;  %8132 = vmatprep.mubr.msk.f32.mxu1 %vm10051_vm2, %v10048_v7 }
0x4300   :  { %9167 = vmatprep.subr.bf16.mxu1 %v10050_v27 }
0x4302   :  { %8133 = vmatmul.mubr.msk.f32.gmra.mrb[68].mxu1 %vm319_vm0, %v6499_v0 }
0x4303   :  { %9169 = vmatpush3.bf16.msra.mxu1 %v9168_v62  ;;  %8135 = vmatprep.mubr.msk.f32.mxu1 %vm10051_vm2, %v10048_v7 }
0x4304   :  { %9170 = vmatprep.subr.bf16.mxu1 %v10050_v27 }
0x4306   :  { %8136 = vmatmul.mubr.msk.f32.gmra.mrb[70].mxu1 %vm319_vm0, %v6498_v50 }
0x4307   :  { %9172 = vmatpush3.bf16.msra.mxu1 %v9171_v11  ;;  %8154 = vmatprep.mubr.msk.f32.mxu1 %vm10051_vm2, %v10048_v7 }
0x4308   :  { %9173 = vmatprep.subr.bf16.mxu1 %v10050_v27 }
0x430b   :  { %9175 = vmatpush3.bf16.msra.mxu1 %v9174_v36 }
0x430c   :  { %9176 = vmatprep.subr.bf16.mxu1 %v10050_v27 }
0x430e   :  { %8155 = vmatmul.mubr.msk.f32.vlgmr.msra.gmra.mrb[66].mxu1 %vm319_vm0, %v11845_v23  ;;  %v9183_v23 = vpack.c.bf16 %v7858_v63, %v7857_v46 }
0x430f   :  { %9178 = vmatpush3.bf16.msra.mxu1 %v9177_v15  ;;  %8157 = vmatprep.mubr.msk.f32.mxu1 %vm10051_vm2, %v10048_v7 }
0x4310   :  { %9179 = vmatprep.subr.bf16.mxu1 %v10050_v27 }
0x4312   :  { %8158 = vmatmul.mubr.msk.f32.gmra.mrb[68].mxu1 %vm319_vm0, %v6597_v1 }
0x4313   :  { %9181 = vmatpush3.bf16.msra.mxu1 %v9180_v53  ;;  %8160 = vmatprep.mubr.msk.f32.mxu1 %vm10051_vm2, %v10048_v7 }
0x4314   :  { %9182 = vmatprep.subr.bf16.mxu1 %v10050_v27 }
0x4316   :  { %8161 = vmatmul.mubr.msk.f32.gmra.mrb[70].mxu1 %vm319_vm0, %v6596_v32 }
0x4317   :  { %9184 = vmatpush3.bf16.msra.mxu1 %v9183_v23  ;;  %8179 = vmatprep.mubr.msk.f32.mxu1 %vm10051_vm2, %v10048_v7 }
0x4318   :  { %9185 = vmatprep.subr.bf16.mxu1 %v10050_v27 }
0x431b   :  { %9187 = vmatpush3.bf16.msra.mxu1 %v9186_v6 }
0x431c   :  { %8193 = vmatprep.subr.mxu1 %v10048_v7 }
0x431e   :  { %8180 = vmatmul.mubr.msk.f32.vlgmr.msra.gmra.mrb[66].mxu1 %vm319_vm0, %v11887_v18 }
0x431f   :  { %8182 = vmatprep.mubr.msk.f32.mxu1 %vm10051_vm2, %v10048_v7  ;;  %8194 = vmatpush3.msra.mxu1 %v7868_v10 }
0x4320   :  { %8198 = vmatprep.subr.mxu1 %v10048_v7 }
0x4322   :  { %8183 = vmatmul.mubr.msk.f32.gmra.mrb[68].mxu1 %vm319_vm0, %v6695_v43 }
0x4323   :  { %8185 = vmatprep.mubr.msk.f32.mxu1 %vm10051_vm2, %v10048_v7 }
0x4326   :  { %8186 = vmatmul.mubr.msk.f32.gmra.mrb[70].mxu1 %vm319_vm0, %v6694_v52 }
0x4327   :  { %8195 = vmatprep.mubr.msk.f32.mxu1 %vm10051_vm2, %v10048_v7 }
0x4395   :  { %v5715_v27 = vpop.f32.mrb[58].mxu0 }
0x4396   :  { %v9312_v3 = vadd.f32 %v5715_v27, %v11435_v35  ;;  %v5717_v18 = vpop.f32.mrb[59].mxu0 }
0x4397   :  { %v9313_v19 = vadd.f32 %v5717_v18, %v11438_v56 }
0x4398   :  { %v7775_v41 = vmul.f32 -1.442695, %v9312_v3 }
0x4399   :  { %v7776_v37 = vmul.f32 -1.442695, %v9313_v19 }
0x439a   :  { %9984 = vpow2.f32 %v7775_v41 }
0x439b   :  { %9986 = vtanh.f32 %v9313_v19 }
0x43a4   :  { %v9985_v47 = vpop.eup %9984 }
0x43a5   :  { %v5728_v26 = vadd.f32 1.0, %v9985_v47  ;;  %v9987_v24 = vpop.eup %9986 }
0x43a7   :  { %9988 = vrcp.f32 %v5728_v26 }
0x43a8   :  { %9990 = vpow2.f32 %v7776_v37 }
0x43b1   :  { %v9989_v59 = vpop.eup %9988 }
0x43b2   :  { %v5736_v31 = vmul.f32 %v9989_v59, %v9987_v24  ;;  %v9991_v50 = vpop.eup %9990  ;;  %v5735_v57 = vmul.f32 %v9989_v59, %v11798_v4  ;;  %v7783_v4 = vld [vmem:[%s12250_s6] ss:$0 sm:$0xff] }
0x43b3   :  { %v5729_v34 = vadd.f32 1.0, %v9991_v50 }
0x43b4   :  { %5738 = vrot.lane.b32.xlu1 %v5736_v31, %s10049_s25 }
0x43b5   :  { %9992 = vrcp.f32 %v5729_v34 }
0x43bf   :  { %v9993_v0 = vpop.eup %9992 }
0x43f1   :  { %v6766_v11 = vpop.f32.mrb[66].mxu1 }
0x43f2   :  { %v9318_v60 = vadd.f32 %v7783_v4, %v6766_v11  ;;  %v8181_v12 = vpop.f32.mrb[67].mxu1 }
0x43f5   :  { %v6771_v36 = vpop.f32.mrb[68].mxu1 }
0x43f6   :  { %v9319_v25 = vadd.f32 %v7783_v4, %v6771_v36  ;;  %v8184_v30 = vpop.f32.mrb[69].mxu1 }
0x43f7   :  { %v7870_v30 = vld [vmem:[%s12253_s9 + $0x10] sm:$0xff] }
0x43f9   :  { %v6776_v15 = vpop.f32.mrb[70].mxu1 }
0x43fa   :  { %v8187_v33 = vpop.f32.mrb[71].mxu1 }
0x43fb   :  { %v7872_v33 = vld [vmem:[%s12253_s9 + $0x18] sm:$0xff] }
0x4426   :  { %v5739_v48 = vpop.permute.xlu1 %5738 }
0x4427   :  { %v12060_v62 = vadd.f32 %v5739_v48, %v5735_v57  ;;  %v7864_v57 = vld [vmem:[%s12251_s7] ss:$0 sm:$0xff] }
0x4429   :  { %9994 = vtanh.f32 %v12060_v62 }
0x4433   :  { %v9995_v13 = vpop.eup %9994 }
0x4434   :  { %v12063_v29 = vmul.f32 %v9995_v13, %v9993_v0 }
0x4436   :  { %7777 = vmatmul.mubr.msk.f32.vlgmr.msra.gmra.mrb[60].mxu0 %vm319_vm0, %v12063_v29 }
0x4437   :  { %9079 = vmatpush1.bf16.msra.mxu0 %v11244_v54  ;;  %5923 = vmatprep.mubr.f32.mxu0 %v10048_v7  ;;  %v6784_v54 = vsel %vm6783_vm6, %v9318_v60, 0.0 }
0x4438   :  { %9081 = vmatprep.subr.bf16.mxu0 %v11259_v16  ;;  %v6785_v16 = vsel %vm6783_vm6, %v9319_v25, 0.0 }
0x4439   :  { %v6786_v32 = vadd.f32 %v6785_v16, %v6784_v54 }
0x443b   :  { %9083 = vmatpush1.bf16.msra.mxu0 %v11268_v39  ;;  %v9320_v39 = vadd.f32 %v7783_v4, %v6776_v15  ;;  %v7865_v4 = vld [vmem:[%s12252_s8] ss:$0 sm:$0xff] }
0x443c   :  { %9085 = vmatprep.subr.bf16.mxu0 %v11317_v20 }
0x443d   :  { %v6788_v20 = vsel %vm6787_vm7, %v9320_v39, 0.0 }
0x443f   :  { %9087 = vmatpush1.bf16.msra.mxu0 %v11319_v51  ;;  %v6789_v51 = vadd.f32 %v6788_v20, %v6786_v32 }
0x4440   :  { %9089 = vmatprep.subr.bf16.mxu0 %v11348_v44 }
0x4441   :  { %v6790_v8 = vrot.slane %v6789_v51, 4 }
0x4443   :  { %9091 = vmatpush1.bf16.msra.mxu0 %v11350_v2  ;;  %v6791_v53 = vadd.f32 %v6790_v8, %v6789_v51  ;;  %v7874_v51 = vld [vmem:[%s12253_s9 + $0x20] sm:$0xff]  ;;  %v7876_v8 = vld [vmem:[%s12253_s9 + $0x28] sm:$0xff] }
0x4444   :  { %8188 = vmatprep.subr.mxu0 %v10048_v7 }
0x4445   :  { %v6792_v1 = vrot.slane %v6791_v53, 2 }
0x4447   :  { %v6793_v46 = vadd.f32 %v6792_v1, %v6791_v53 }
0x4449   :  { %v6794_v63 = vrot.slane %v6793_v46, 1 }
0x444b   :  { %v6795_v44 = vadd.f32 %v6794_v63, %v6793_v46 }
0x444d   :  { %v6797_v23 = vmul.f32 0.055555556, %v6795_v44  ;;  %v7878_v44 = vld [vmem:[%s12253_s9 + $0x30] sm:$0xff] }
0x444f   :  { %v6798_v55 = vsub.f32 %v9318_v60, %v6797_v23  ;;  %v6799_v5 = vsub.f32 %v9319_v25, %v6797_v23  ;;  %v6800_v6 = vsub.f32 %v9320_v39, %v6797_v23 }
0x4451   :  { %v6801_v52 = vmul.f32 %v6798_v55, %v6798_v55  ;;  %v6802_v43 = vmul.f32 %v6799_v5, %v6799_v5  ;;  %v6803_v2 = vmul.f32 %v6800_v6, %v6800_v6 }
0x4453   :  { %v6804_v27 = vsel %vm6783_vm6, %v6801_v52, 0.0  ;;  %v6805_v3 = vsel %vm6783_vm6, %v6802_v43, 0.0  ;;  %v6807_v18 = vsel %vm6787_vm7, %v6803_v2, 0.0 }
0x4454   :  { %v6806_v41 = vadd.f32 %v6805_v3, %v6804_v27 }
0x4456   :  { %v6808_v19 = vadd.f32 %v6807_v18, %v6806_v41 }
0x4458   :  { %v6809_v47 = vrot.slane %v6808_v19, 4 }
0x445a   :  { %v6810_v26 = vadd.f32 %v6809_v47, %v6808_v19 }
0x445c   :  { %v6811_v24 = vrot.slane %v6810_v26, 2 }
0x445e   :  { %v6812_v59 = vadd.f32 %v6811_v24, %v6810_v26 }
0x4460   :  { %v6813_v31 = vrot.slane %v6812_v59, 1 }
0x4462   :  { %v6814_v10 = vadd.f32 %v6813_v31, %v6812_v59 }
0x4464   :  { %v6815_v37 = vmul.f32 0.055555556, %v6814_v10 }
0x4466   :  { %v6816_v50 = vadd.f32 1e-05, %v6815_v37 }
0x4468   :  { %9996 = vrsqrt.f32 %v6816_v50 }
0x4472   :  { %v9997_v34 = vpop.eup %9996 }
0x4473   :  { %v6818_v48 = vmul.f32 %v9997_v34, %v6798_v55  ;;  %v6819_v0 = vmul.f32 %v9997_v34, %v6799_v5  ;;  %v6820_v13 = vmul.f32 %v9997_v34, %v6800_v6  ;;  %v7880_v5 = vld [vmem:[%s12253_s9 + $0x38] sm:$0xff] }
0x4475   :  { %v6828_v11 = vmul.f32 %v7864_v57, %v6818_v48  ;;  %v6829_v54 = vmul.f32 %v7864_v57, %v6819_v0  ;;  %v6830_v53 = vmul.f32 %v7864_v57, %v6820_v13  ;;  %v6852_v48 = vld [vmem:[%s12253_s9] sm:$0xff] }
0x4477   :  { %v6838_v60 = vadd.f32 %v7865_v4, %v6828_v11  ;;  %v6839_v25 = vadd.f32 %v7865_v4, %v6829_v54  ;;  %v6840_v46 = vadd.f32 %v7865_v4, %v6830_v53 }
0x4479   :  { %v12091_v12 = vmax.f32 %v6838_v60, 0.0  ;;  %v6842_v32 = vmax.f32 %v6839_v25, 0.0  ;;  %v6843_v63 = vmax.f32 %v6840_v46, 0.0 }
0x447b   :  { %v6929_v36 = vrot.slane %v12091_v12, 2  ;;  %v7005_v16 = vrot.slane %v12091_v12, 4  ;;  %v7082_v15 = vrot.slane %v12091_v12, 6  ;;  %v7083_v39 = vrot.slane %v6842_v32, 6 }
0x447c   :  { %v7235_v1 = vrot.slane %v6842_v32, 2  ;;  %v7311_v23 = vrot.slane %v6842_v32, 4  ;;  %v7388_v55 = vrot.slane %v6843_v63, 6 }
0x447d   :  { %8196 = vmatmul.mubr.msk.f32.vlgmr.msra.gmra.mrb[72].mxu1 %vm6783_vm6, %v6929_v36  ;;  %v7084_v20 = vsel %vm6299_vm5, %v7082_v15, %v7083_v39 }
0x447e   :  { %8200 = vmatprep.mubr.msk.f32.mxu1 %vm10051_vm2, %v10048_v7  ;;  %8199 = vmatpush3.msra.mxu1 %v7870_v30  ;;  %v7389_v6 = vsel %vm6299_vm5, %v7083_v39, %v7388_v55 }
0x447f   :  { %8203 = vmatprep.subr.mxu1 %v10048_v7 }
0x4485   :  { %8201 = vmatmul.mubr.msk.f32.vlgmr.msra.gmra.mrb[72].mxu1 %vm6783_vm6, %v7005_v16 }
0x4486   :  { %8205 = vmatprep.mubr.msk.f32.mxu1 %vm10051_vm2, %v10048_v7  ;;  %8204 = vmatpush3.msra.mxu1 %v7872_v33 }
0x4487   :  { %8208 = vmatprep.subr.mxu1 %v10048_v7 }
0x448d   :  { %8206 = vmatmul.mubr.msk.f32.vlgmr.msra.gmra.mrb[72].mxu1 %vm6783_vm6, %v7084_v20 }
0x448e   :  { %8210 = vmatprep.mubr.msk.f32.mxu1 %vm10051_vm2, %v10048_v7  ;;  %8209 = vmatpush3.msra.mxu1 %v7874_v51 }
0x448f   :  { %8213 = vmatprep.subr.mxu1 %v10048_v7 }
0x4495   :  { %8211 = vmatmul.mubr.msk.f32.vlgmr.msra.gmra.mrb[72].mxu1 %vm6783_vm6, %v6842_v32 }
0x4496   :  { %8214 = vmatpush3.msra.mxu1 %v7876_v8  ;;  %8215 = vmatprep.mubr.msk.f32.mxu1 %vm10051_vm2, %v10048_v7 }
0x4497   :  { %8218 = vmatprep.subr.mxu1 %v10048_v7 }
0x449d   :  { %8216 = vmatmul.mubr.msk.f32.vlgmr.msra.gmra.mrb[72].mxu1 %vm6783_vm6, %v7235_v1 }
0x449e   :  { %8220 = vmatprep.mubr.msk.f32.mxu1 %vm10051_vm2, %v10048_v7  ;;  %8219 = vmatpush3.msra.mxu1 %v7878_v44 }
0x449f   :  { %8223 = vmatprep.subr.mxu1 %v10048_v7 }
0x44a5   :  { %8221 = vmatmul.mubr.msk.f32.vlgmr.msra.gmra.mrb[72].mxu1 %vm6783_vm6, %v7311_v23 }
0x44a6   :  { %8225 = vmatprep.mubr.msk.f32.mxu1 %vm10051_vm2, %v10048_v7  ;;  %8224 = vmatpush3.msra.mxu1 %v7880_v5 }
0x44ad   :  { %8226 = vmatmul.mubr.msk.f32.vlgmr.msra.gmra.mrb[72].mxu1 %vm6783_vm6, %v7389_v6 }
0x4509   :  { %v5820_v52 = vpop.f32.mrb[60].mxu0 }
0x450a   :  { %v9314_v43 = vadd.f32 %v5820_v52, %v11435_v35  ;;  %v5822_v2 = vpop.f32.mrb[61].mxu0 }
0x450b   :  { %v9315_v3 = vadd.f32 %v5822_v2, %v11438_v56 }
0x450c   :  { %v7778_v27 = vmul.f32 -1.442695, %v9314_v43 }
0x450e   :  { %9998 = vpow2.f32 %v7778_v27 }
0x450f   :  { %10000 = vtanh.f32 %v9315_v3 }
0x4518   :  { %v9999_v18 = vpop.eup %9998 }
0x4519   :  { %v5833_v41 = vadd.f32 1.0, %v9999_v18  ;;  %v10001_v19 = vpop.eup %10000 }
0x451b   :  { %10002 = vrcp.f32 %v5833_v41 }
0x4525   :  { %v10003_v47 = vpop.eup %10002 }
0x4526   :  { %v5841_v26 = vmul.f32 %v10003_v47, %v10001_v19 }
0x4528   :  { %5843 = vrot.lane.b32.xlu0 %v5841_v26, %s10049_s25 }
0x452c   :  { %4381 = vrot.lane.b32.xlu0 %v11443_v49, %s10049_s25  ;;  %v7779_v49 = vmul.f32 -1.442695, %v9315_v3 }
0x452e   :  { %10004 = vpow2.f32 %v7779_v49 }
0x4530   :  { %4486 = vrot.lane.b32.xlu0 %v11461_v45, %s10049_s25 }
0x4534   :  { %4696 = vrot.lane.b32.xlu0 %v11497_v42, %s10049_s25 }
0x4538   :  { %4906 = vrot.lane.b32.xlu0 %v11533_v17, %s10049_s25  ;;  %v10005_v42 = vpop.eup %10004  ;;  %v5840_v17 = vmul.f32 %v10003_v47, %v12060_v62 }
0x4539   :  { %v5834_v59 = vadd.f32 1.0, %v10005_v42 }
0x453b   :  { %10006 = vrcp.f32 %v5834_v59 }
0x453c   :  { %5116 = vrot.lane.b32.xlu0 %v11569_v14, %s10049_s25 }
0x4540   :  { %5221 = vrot.lane.b32.xlu0 %v11587_v22, %s10049_s25 }
0x4544   :  { %5431 = vrot.lane.b32.xlu0 %v11619_v61, %s10049_s25 }
0x4545   :  { %v10007_v50 = vpop.eup %10006 }
0x4548   :  { %5641 = vrot.lane.b32.xlu0 %v11801_v28, %s10049_s25 }
0x4580   :  { %v7458_v45 = vpop.f32.mrb[72].mxu1 }
0x4581   :  { %v8227_v24 = vpop.f32.mrb[73].mxu1 }
0x459a   :  { %v5844_v31 = vpop.permute.xlu0 %5843 }
0x459b   :  { %v12160_v10 = vadd.f32 %v5844_v31, %v5840_v17 }
0x459d   :  { %10008 = vtanh.f32 %v12160_v10 }
0x459e   :  { %v4382_v14 = vpop.permute.xlu0 %4381 }
0x459f   :  { %4384 = vst.msk [vmem:[#allocation3 + $0x78] sm:$0xff] %vm424_vm1, %v4382_v14 }
0x45a2   :  { %v4487_v37 = vpop.permute.xlu0 %4486 }
0x45a3   :  { %4489 = vst.msk [vmem:[#allocation3 + $0x70] sm:$0xff] %vm424_vm1, %v4487_v37 }
0x45a6   :  { %v4697_v34 = vpop.permute.xlu0 %4696 }
0x45a7   :  { %v10009_v57 = vpop.eup %10008  ;;  %4699 = vst.msk [vmem:[#allocation3 + $0x60] sm:$0xff] %vm424_vm1, %v4697_v34 }
0x45a8   :  { %5639 = vst.msk [vmem:[#allocation3 + $0x60] sm:$0xff] %vm319_vm0, %v11801_v28  ;;  %v5848_v62 = vmul.f32 %v10009_v57, %v10007_v50 }
0x45aa   :  { %v4907_v0 = vpop.permute.xlu0 %4906  ;;  %5851 = vrot.lane.b32.xlu0 %v5848_v62, %s10049_s25  ;;  %5849 = vst.msk [vmem:[#allocation3 + $0x70] sm:$0xff] %vm319_vm0, %v5848_v62  ;;  %7780 = vmatmul.mubr.msk.f32.vlgmr.msra.gmra.mrb[62].mxu0 %vm319_vm0, %v5848_v62 }
0x45ab   :  { %4909 = vst.msk [vmem:[#allocation3 + $0x50] sm:$0xff] %vm424_vm1, %v4907_v0  ;;  %8189 = vmatpush3.msra.mxu0 %v6852_v48  ;;  %8190 = vmatprep.mubr.msk.f32.mxu0 %vm10051_vm2, %v10048_v7 }
0x45ac   :  { %5429 = vst.msk [vmem:[#allocation3 + $0x50] sm:$0xff] %vm319_vm0, %v11619_v61 }
0x45ae   :  { %v5117_v28 = vpop.permute.xlu0 %5116  ;;  %8191 = vmatmul.mubr.msk.f32.vlgmr.msra.gmra.mrb[64].mxu0 %vm6783_vm6, %v12091_v12 }
0x45af   :  { %5119 = vst.msk [vmem:[#allocation3 + $0x40] sm:$0xff] %vm424_vm1, %v5117_v28 }
0x45b0   :  { %5219 = vst.msk [vmem:[#allocation3 + $0x40] sm:$0xff] %vm319_vm0, %v11587_v22  ;;  %v7866_v22 = vld [vmem:[%s12254_s10] ss:$0 sm:$0xff] }
0x45b2   :  { %v5222_v13 = vpop.permute.xlu0 %5221 }
0x45b3   :  { %5224 = vst.msk [vmem:[#allocation3 + $0x38] sm:$0xff] %vm424_vm1, %v5222_v13 }
0x45b6   :  { %v5432_v4 = vpop.permute.xlu0 %5431 }
0x45b7   :  { %5434 = vst.msk [vmem:[#allocation3 + $0x28] sm:$0xff] %vm424_vm1, %v5432_v4 }
0x45ba   :  { %v5642_v11 = vpop.permute.xlu0 %5641 }
0x45bb   :  { %5644 = vst.msk [vmem:[#allocation3 + $0x18] sm:$0xff] %vm424_vm1, %v5642_v11 }
0x461c   :  { %v5852_v7 = vpop.permute.xlu0 %5851 }
0x461d   :  { %5854 = vst.msk [vmem:[#allocation3 + $0x8] sm:$0xff] %vm424_vm1, %v5852_v7 }
0x467d   :  { %v5925_v61 = vpop.f32.mrb[62].mxu0 }
0x467e   :  { %v9316_v60 = vadd.f32 %v5925_v61, %v11435_v35  ;;  %v5927_v12 = vpop.f32.mrb[63].mxu0 }
0x467f   :  { %v9317_v33 = vadd.f32 %v5927_v12, %v11438_v56 }
0x4680   :  { %v7781_v36 = vmul.f32 -1.442695, %v9316_v60 }
0x4681   :  { %v6922_v54 = vpop.f32.mrb[64].mxu0  ;;  %v7782_v59 = vmul.f32 -1.442695, %v9317_v33 }
0x4682   :  { %10010 = vpow2.f32 %v7781_v36  ;;  %v6926_v25 = vadd.f32 %v7866_v22, %v6922_v54  ;;  %v8192_v30 = vpop.f32.mrb[65].mxu0 }
0x4683   :  { %10012 = vtanh.f32 %v9317_v33 }
0x4684   :  { %v9322_v16 = vadd.f32 %v7458_v45, %v6926_v25 }
0x4686   :  { %v7464_v32 = vsel %vm7463_vm8, %v9322_v16, 0.0 }
0x4687   :  { %v7465_v15 = vrot.slane %v7464_v32, 4 }
0x4689   :  { %v7466_v39 = vadd.f32 %v7465_v15, %v7464_v32 }
0x468b   :  { %v7467_v20 = vrot.slane %v7466_v39, 2 }
0x468c   :  { %v10011_v35 = vpop.eup %10010 }
0x468d   :  { %v5938_v51 = vadd.f32 1.0, %v10011_v35  ;;  %v7468_v8 = vadd.f32 %v7467_v20, %v7466_v39  ;;  %v10013_v23 = vpop.eup %10012 }
0x468f   :  { %10014 = vrcp.f32 %v5938_v51  ;;  %v7469_v53 = vrot.slane %v7468_v8, 1 }
0x4691   :  { %v7470_v1 = vadd.f32 %v7469_v53, %v7468_v8 }
0x4693   :  { %v7472_v46 = vmul.f32 0.25, %v7470_v1 }
0x4695   :  { %v7473_v63 = vsub.f32 %v9322_v16, %v7472_v46 }
0x4697   :  { %v7474_v44 = vmul.f32 %v7473_v63, %v7473_v63 }
0x4699   :  { %v10015_v55 = vpop.eup %10014  ;;  %v7475_v5 = vsel %vm7463_vm8, %v7474_v44, 0.0 }
0x469a   :  { %v7476_v6 = vrot.slane %v7475_v5, 4  ;;  %v5946_v52 = vmul.f32 %v10015_v55, %v10013_v23  ;;  %v5945_v14 = vmul.f32 %v10015_v55, %v12160_v10 }
0x469c   :  { %v7477_v43 = vadd.f32 %v7476_v6, %v7475_v5  ;;  %5948 = vrot.lane.b32.xlu1 %v5946_v52, %s10049_s25 }
0x469e   :  { %v7478_v56 = vrot.slane %v7477_v43, 2 }
0x46a0   :  { %v7479_v2 = vadd.f32 %v7478_v56, %v7477_v43  ;;  %4591 = vrot.lane.b32.xlu1 %v11479_v58, %s10049_s25  ;;  %v7882_v58 = vld [vmem:[%s12255_s11] ss:$0 sm:$0xff]  ;;  %s10052_s11 = smov [#allocation4]  }
0x46a2   :  { %v7480_v27 = vrot.slane %v7479_v2, 1 }
0x46a4   :  { %v7481_v3 = vadd.f32 %v7480_v27, %v7479_v2  ;;  %4801 = vrot.lane.b32.xlu1 %v11515_v40, %s10049_s25 }
0x46a6   :  { %v7482_v18 = vmul.f32 0.25, %v7481_v3 }
0x46a8   :  { %v7483_v41 = vadd.f32 1e-05, %v7482_v18  ;;  %5011 = vrot.lane.b32.xlu1 %v11551_v9, %s10049_s25  ;;  %v7883_v9 = vld [vmem:[%s12256_s12] ss:$0 sm:$0xff]  ;;  %s7521_s12 = sshll.u32 %s10052_s11, 4  ;;  %s7522_s12 = int_to_ptr.vmem [resolvable:$true] %s7521_s12 }
0x46a9   :  { %s10024_s23 = scalar_lea.vmem %s7522_s12, 32  ;;  %p10029_p1 = scmp.lt.s32.totalorder %s7522_s12, %s7522_s12 }
0x46aa   :  { %10016 = vrsqrt.f32 %v7483_v41  ;;  %p10025_p0 = scmp.ne.s32.totalorder %s7522_s12, %s10024_s23  ;;  %p10030_p2 = scmp.lt.s32.totalorder %s10024_s23, %s10024_s23 }
0x46ab   :  { %10018 = vpow2.f32 %v7782_v59 }
0x46ac   :  { %5326 = vrot.lane.b32.xlu1 %v11603_v21, %s10049_s25  ;;  %p10031_p3 = por %p10030_p2, %p10029_p1 }
0x46ae   :  { %p10032_p4 = pnand %p10031_p3, %p10025_p0 }
0x46b0   :  { %5536 = vrot.lane.b32.xlu1 %v11638_v38, %s10049_s25 }
0x46b4   :  { %v10017_v19 = vpop.eup %10016  ;;  %5746 = vrot.lane.b32.xlu1 %v12063_v29, %s10049_s25 }
0x46b5   :  { %v7485_v40 = vmul.f32 %v10017_v19, %v7473_v63  ;;  %v10019_v17 = vpop.eup %10018 }
0x46b6   :  { %v5939_v31 = vadd.f32 1.0, %v10019_v17 }
0x46b7   :  { %v7493_v47 = vmul.f32 %v7882_v58, %v7485_v40 }
0x46b8   :  { %10020 = vrcp.f32 %v5939_v31 }
0x46b9   :  { %v7501_v26 = vadd.f32 %v7883_v9, %v7493_v47 }
0x46bb   :  { %v7502_v49 = vmax.f32 %v7501_v26, 0.0 }
0x46bd   :  { %v7505_v45 = vrot.slane %v7502_v49, 2 }
0x46bf   :  { %v7507_v24 = vadd.f32 %v7505_v45, %v7502_v49 }
0x46c1   :  { %v7508_v42 = vmul.f32 0.5, %v7507_v24 }
0x46c2   :  { %v10021_v62 = vpop.eup %10020 }
0x46c3   :  { %7510 = vrot.lane.b32.xlu1 %v7508_v42, %s10049_s25 }
0x470e   :  { %v5949_v37 = vpop.permute.xlu1 %5948 }
0x470f   :  { %v5951_v50 = vadd.f32 %v5949_v37, %v5945_v14 }
0x4711   :  { %10022 = vtanh.f32 %v5951_v50 }
0x4712   :  { %v4592_v34 = vpop.permute.xlu1 %4591 }
0x4713   :  { %4594 = vst.msk [vmem:[#allocation3 + $0x68] sm:$0xff] %vm424_vm1, %v4592_v34 }
0x4714   :  { %5744 = vst.msk [vmem:[#allocation3 + $0x68] sm:$0xff] %vm319_vm0, %v12063_v29 }
0x4716   :  { %v4802_v57 = vpop.permute.xlu1 %4801 }
0x4717   :  { %4804 = vst.msk [vmem:[#allocation3 + $0x58] sm:$0xff] %vm424_vm1, %v4802_v57 }
0x4718   :  { %5534 = vst.msk [vmem:[#allocation3 + $0x58] sm:$0xff] %vm319_vm0, %v11638_v38 }
0x471a   :  { %v5012_v48 = vpop.permute.xlu1 %5011 }
0x471b   :  { %v10023_v0 = vpop.eup %10022  ;;  %5014 = vst.msk [vmem:[#allocation3 + $0x48] sm:$0xff] %vm424_vm1, %v5012_v48 }
0x471c   :  { %v5953_v10 = vmul.f32 %v10023_v0, %v10021_v62  ;;  %5324 = vst.msk [vmem:[#allocation3 + $0x48] sm:$0xff] %vm319_vm0, %v11603_v21 }
0x471e   :  { %5954 = vst.msk [vmem:[#allocation3 + $0x78] sm:$0xff] %vm319_vm0, %v5953_v10  ;;  %v5327_v28 = vpop.permute.xlu1 %5326 }
0x471f   :  { %5329 = vst.msk [vmem:[#allocation3 + $0x30] sm:$0xff] %vm424_vm1, %v5327_v28 }
0x4722   :  { %v5537_v29 = vpop.permute.xlu1 %5536 }
0x4723   :  { %5539 = vst.msk [vmem:[#allocation3 + $0x20] sm:$0xff] %vm424_vm1, %v5537_v29 }
0x4725   :  { %v5963_v13 = vld [vmem:[#allocation3 + $0x78] sm:$0x3] }
0x4726   :  { %v5960_v38 = vld [vmem:[#allocation3 + $0x78] sm:$0x3]  ;;  %v5747_v4 = vpop.permute.xlu1 %5746  ;;  %5965 = vrot.lane.b32.xlu1 %v5963_v13, %s10049_s25 }
0x4727   :  { %5962 = vst.msk [vmem:[#allocation4] sm:$0x3] %vm5961_vm9, %v5960_v38 }
0x4728   :  { %5749 = vst.msk [vmem:[#allocation3 + $0x10] sm:$0xff] %vm424_vm1, %v5747_v4 }
0x472a   :  { %5956 = vrot.lane.b32.xlu1 %v5953_v10, %s10049_s25 }
0x4735   :  { %v7511_v21 = vpop.permute.xlu1 %7510 }
0x4798   :  { %v5966_v11 = vpop.permute.xlu1 %5965 }
0x4799   :  { %5969 = vst.msk [vmem:[#allocation4] sm:$0x3] %vm5968_vm10, %v5966_v11 }
0x479a   :  { %7514 = vst.msk [vmem:[#allocation4] sm:$0x3] %vm7513_vm11, %v7511_v21 }
0x479b   :  { %10035 = shalt.err (!%p10032_p4)
}
0x479c   :  { %s10036_s25 = scalar_lea.hbm %s12257_s13, 32 }
0x479d   :  { %p10037_p5 = scmp.ne.s32.totalorder %s12257_s13, %s10036_s25  ;;  %p10040_p6 = scmp.lt.u32.totalorder %s10036_s25, %s12257_s13 }
0x479f   :  { %p10042_p7 = pnand %p10040_p6, %p10037_p5 }
0x47a1   :  { %10045 = shalt.err (!%p10042_p7)
}
0x47a2   :  { %7524 = dma.vmem_to_hbm [thread:$0]  %s7522_s12, 32, %s12257_s13, [#allocation5]   ;;  %v5957_v7 = vpop.permute.xlu1 %5956 }
0x47a3   :  { %5959 = vst.msk [vmem:[#allocation3] sm:$0xff] %vm424_vm1, %v5957_v7 }
0x47a4   :  { %10046 = dma.done.wait [#allocation5], 32  }
0x47a5   :  { %10047 = vsyncadd [#allocation5], 4294967264 }
0x47a6   :  { %7528 = vsyncpa [#allocation5], 1 }

</bundles_post_ra>
